<compile_context>
chip_gen: v6e
topology: v6e:2x2x1
jax: 0.10.0
libtpu: 0.0.40
codegen_flags: <defaults>
</compile_context>

<pallas_src>
import functools

import jax
import jax.numpy as jnp
from jax.experimental import pallas as pl
from jax.experimental.pallas import tpu as pltpu

NUM_KERNELS = 6
_BF16_SUBLANE = 16   # bf16 sublane packing -> tile-aligned slab writes
_LANE = 128


def _round_up(a, b):
    return (a + b - 1) // b * b


def _fused_conv_kernel(x_ref, w_ref, b_ref, o_ref, slab_ref, *, K, Cin_p, Wp, Q):
    """One batch element.
      x_ref   : (Cin_p, L)        bf16  zero-padded image, spatially flattened (lanes)
      w_ref   : (K, Cout, K*Cin_p) bf16 merged/averaged weights, indexed by row kh
      b_ref   : (Cout, 1)         f32   averaged bias
      o_ref   : (Cout, Q)         f32   flattened output rows (q = h*Wp + w), lane-dense
      slab_ref: (K*Cin_p, Q)      bf16  per-kh im2col slab (VMEM scratch)
    """
    Cout = o_ref.shape[0]
    # Initialize the resident output block with the pre-averaged bias.
    o_ref[...] = jnp.broadcast_to(b_ref[...], (Cout, Q))
    for kh in range(K):
        # Build the im2col sub-slab for kernel row kh.  Row (kw*Cin_p + ci)
        # holds the input shifted by d = kh*Wp + kw: a contiguous lane slice,
        # stored at a sublane-tile-aligned offset (Cin_p multiple of 16).
        for kw in range(K):
            d = kh * Wp + kw
            slab_ref[kw * Cin_p:(kw + 1) * Cin_p, :] = x_ref[:, d:d + Q]
        # (Cout, K*Cin_p) x (K*Cin_p, Q) -> f32, accumulate into the output block.
        o_ref[...] += jnp.dot(w_ref[kh], slab_ref[...],
                              preferred_element_type=jnp.float32)


def inception_block_v1(x_nchw, weights, biases):
    """x_nchw: (N, Cin, H, W).  weights[i]: (2i+1, 2i+1, Cin, Cout) HWIO.
    Returns (N, Cout, H, W), matching the PyTorch module's forward."""
    N, Cin, H, W = x_nchw.shape
    num_kernels = len(weights)
    Cout = weights[0].shape[-1]
    P = num_kernels - 1             # max padding (5)
    K = 2 * num_kernels - 1         # merged kernel size (11)
    Hp, Wp = H + 2 * P, W + 2 * P

    Cin_p = _round_up(Cin, _BF16_SUBLANE)             # aligned slab writes
    Q = _round_up(H * Wp, _LANE)                      # lane-dense output width
    L = _round_up(Q + (K - 1) * Wp + (K - 1), _LANE)  # extended flat input

    # ---- Fuse the branches: mean of convs == one conv with averaged,
    # ---- center-padded kernels and averaged bias (exact; convs are linear).
    w_merged = jnp.zeros((K, K, Cin, Cout), jnp.float32)
    for i, w in enumerate(weights):
        k = 2 * i + 1
        off = P - i
        w_merged = w_merged.at[off:off + k, off:off + k, :, :].add(
            w.astype(jnp.float32))
    w_merged = w_merged * (1.0 / num_kernels)
    w_merged = jnp.pad(w_merged, ((0, 0), (0, 0), (0, Cin_p - Cin), (0, 0)))
    # (K, Cout, K*Cin_p); column index kw*Cin_p + ci matches the slab rows.
    w_fused = jnp.transpose(
        w_merged.reshape(K, K * Cin_p, Cout), (0, 2, 1)).astype(jnp.bfloat16)
    b_fused = jnp.mean(jnp.stack(biases, 0).astype(jnp.float32),
                       axis=0).reshape(Cout, 1)

    # ---- Input glue: zero-pad spatially once, pad channels to Cin_p,
    # ---- flatten (h, w) into the lane dim, pad the tail, cast to bf16.
    x_pad = jnp.pad(x_nchw, ((0, 0), (0, Cin_p - Cin), (P, P), (P, P)))
    x_flat = x_pad.reshape(N, Cin_p, Hp * Wp)
    x_ext = jnp.pad(x_flat, ((0, 0), (0, 0),
                             (0, L - Hp * Wp))).astype(jnp.bfloat16)

    kernel = functools.partial(_fused_conv_kernel, K=K, Cin_p=Cin_p, Wp=Wp, Q=Q)

    out_blk = pl.pallas_call(
        kernel,
        out_shape=jax.ShapeDtypeStruct((N, Cout, Q), jnp.float32),
        grid=(N,),
        in_specs=[
            pl.BlockSpec((None, Cin_p, L), lambda n: (n, 0, 0)),
            pl.BlockSpec((K, Cout, K * Cin_p), lambda n: (0, 0, 0)),
            pl.BlockSpec((Cout, 1), lambda n: (0, 0)),
        ],
        out_specs=pl.BlockSpec((None, Cout, Q), lambda n: (n, 0, 0)),
        scratch_shapes=[pltpu.VMEM((K * Cin_p, Q), jnp.bfloat16)],
        compiler_params=pltpu.CompilerParams(
            dimension_semantics=("parallel",),
            vmem_limit_bytes=32 * 1024 * 1024,
        ),
    )(x_ext, w_fused, b_fused)

    # Valid outputs: q = h*Wp + w with h in [0,H), w in [0,W)  (already NCHW).
    out = out_blk[:, :, :H * Wp].reshape(N, Cout, H, Wp)[:, :, :, :W]
    return out.astype(x_nchw.dtype)


def _init_params(key, in_channels, out_channels, num_kernels):
    """kaiming_normal_(mode='fan_out', nonlinearity='relu') init, zero biases,
    weights stored HWIO (matches the PyTorch module's init)."""
    weights, biases = [], []
    for i in range(num_kernels):
        k = 2 * i + 1
        key, sub = jax.random.split(key)
        fan_out = out_channels * k * k
        std = (2.0 / fan_out) ** 0.5
        weights.append(
            std * jax.random.normal(sub, (k, k, in_channels, out_channels),
                                    jnp.float32))
        biases.append(jnp.zeros((out_channels,), jnp.float32))
    return weights, biases


def _reference_forward(x_nchw, weights, biases):
    """Pure-JAX reference (lax conv) of the PyTorch forward, full f32."""
    outs = []
    for i, (w, b) in enumerate(zip(weights, biases)):
        o = jax.lax.conv_general_dilated(
            x_nchw, w, window_strides=(1, 1), padding=[(i, i), (i, i)],
            dimension_numbers=("NCHW", "HWIO", "NCHW"))
        outs.append(o + b[None, :, None, None])
    return jnp.mean(jnp.stack(outs, axis=-1), axis=-1)


if __name__ == "__main__":
    key = jax.random.PRNGKey(0)
    k_param, k_x = jax.random.split(key)

    N, Cin, Cout, H, W = 2, 4, 8, 16, 16
    weights, biases = _init_params(k_param, Cin, Cout, NUM_KERNELS)
    x = jax.random.normal(k_x, (N, Cin, H, W), jnp.float32)

    out = inception_block_v1(x, weights, biases)
    out = jax.block_until_ready(out)

    ref = _reference_forward(x, weights, biases)
    assert out.shape == (N, Cout, H, W)
    # bf16 MXU inputs with f32 accumulation -> tolerance loosened vs pure f32.
    assert jnp.allclose(out, ref, rtol=2e-2, atol=2e-2), \
        float(jnp.max(jnp.abs(out - ref)))

    print("KERNEL_OK")
</pallas_src>

<mosaic_0001>
module attributes {stable_mosaic.version = 11 : i64} {
  func.func @_fused_conv_kernel(%arg0: i32, %arg1: memref<1x16x896xbf16, #tpu.memory_space<vmem>>, %arg2: memref<11x8x176xbf16, #tpu.memory_space<vmem>>, %arg3: memref<8x1xf32, #tpu.memory_space<vmem>>, %arg4: memref<1x8x512xf32, #tpu.memory_space<vmem>>, %arg5: memref<176x512xbf16, #tpu.memory_space<vmem>>) attributes {dimension_semantics = [#tpu.dimension_semantics<parallel>], iteration_bounds = array<i64: 2>, scalar_prefetch = 0 : i64, scratch_operands = 1 : i64, tpu.core_type = #tpu.core_type<tc>, window_params = [{transform_indices = @transform_0, window_bounds = array<i64: 1, 16, 896>}, {pipeline_mode = #tpu.pipeline_mode<synchronous>, transform_indices = @transform_1, window_bounds = array<i64: 11, 8, 176>}, {pipeline_mode = #tpu.pipeline_mode<synchronous>, transform_indices = @transform_2, window_bounds = array<i64: 8, 1>}, {transform_indices = @transform_3, window_bounds = array<i64: 1, 8, 512>}]} {
    %c0 = arith.constant 0 : index
    %c0_0 = arith.constant 0 : index
    %0 = vector.load %arg3[%c0, %c0_0] : memref<8x1xf32, #tpu.memory_space<vmem>>, vector<8x1xf32>
    %1 = vector.shape_cast %0 : vector<8x1xf32> to vector<8x1xf32>
    %2 = vector.broadcast %1 : vector<8x1xf32> to vector<8x512xf32>
    %c0_1 = arith.constant 0 : index
    %c0_2 = arith.constant 0 : index
    %c0_3 = arith.constant 0 : index
    %3 = vector.load %arg4[%c0_1, %c0_2, %c0_3] : memref<1x8x512xf32, #tpu.memory_space<vmem>>, vector<1x8x512xf32>
    %4 = vector.shape_cast %3 : vector<1x8x512xf32> to vector<8x512xf32>
    %5 = vector.shape_cast %2 : vector<8x512xf32> to vector<1x8x512xf32>
    tpu.vector_store %arg4[%c0_1, %c0_2, %c0_3], %5 {strides = array<i32>} : memref<1x8x512xf32, #tpu.memory_space<vmem>>, vector<1x8x512xf32>,
    %c0_4 = arith.constant 0 : index
    %c0_5 = arith.constant 0 : index
    %c0_6 = arith.constant 0 : index
    %6 = vector.load %arg1[%c0_4, %c0_5, %c0_6] : memref<1x16x896xbf16, #tpu.memory_space<vmem>>, vector<1x16x512xbf16>
    %7 = vector.shape_cast %6 : vector<1x16x512xbf16> to vector<16x512xbf16>
    %c0_7 = arith.constant 0 : index
    %c0_8 = arith.constant 0 : index
    %8 = vector.load %arg5[%c0_7, %c0_8] : memref<176x512xbf16, #tpu.memory_space<vmem>>, vector<16x512xbf16>
    tpu.vector_store %arg5[%c0_7, %c0_8], %7 {strides = array<i32>} : memref<176x512xbf16, #tpu.memory_space<vmem>>, vector<16x512xbf16>,
    %c0_9 = arith.constant 0 : index
    %c0_10 = arith.constant 0 : index
    %c1 = arith.constant 1 : index
    %9 = vector.load %arg1[%c0_9, %c0_10, %c1] : memref<1x16x896xbf16, #tpu.memory_space<vmem>>, vector<1x16x512xbf16>
    %10 = vector.shape_cast %9 : vector<1x16x512xbf16> to vector<16x512xbf16>
    %c16 = arith.constant 16 : index
    %c0_11 = arith.constant 0 : index
    %11 = vector.load %arg5[%c16, %c0_11] : memref<176x512xbf16, #tpu.memory_space<vmem>>, vector<16x512xbf16>
    tpu.vector_store %arg5[%c16, %c0_11], %10 {strides = array<i32>} : memref<176x512xbf16, #tpu.memory_space<vmem>>, vector<16x512xbf16>,
    %c0_12 = arith.constant 0 : index
    %c0_13 = arith.constant 0 : index
    %c2 = arith.constant 2 : index
    %12 = vector.load %arg1[%c0_12, %c0_13, %c2] : memref<1x16x896xbf16, #tpu.memory_space<vmem>>, vector<1x16x512xbf16>
    %13 = vector.shape_cast %12 : vector<1x16x512xbf16> to vector<16x512xbf16>
    %c32 = arith.constant 32 : index
    %c0_14 = arith.constant 0 : index
    %14 = vector.load %arg5[%c32, %c0_14] : memref<176x512xbf16, #tpu.memory_space<vmem>>, vector<16x512xbf16>
    tpu.vector_store %arg5[%c32, %c0_14], %13 {strides = array<i32>} : memref<176x512xbf16, #tpu.memory_space<vmem>>, vector<16x512xbf16>,
    %c0_15 = arith.constant 0 : index
    %c0_16 = arith.constant 0 : index
    %c3 = arith.constant 3 : index
    %15 = vector.load %arg1[%c0_15, %c0_16, %c3] : memref<1x16x896xbf16, #tpu.memory_space<vmem>>, vector<1x16x512xbf16>
    %16 = vector.shape_cast %15 : vector<1x16x512xbf16> to vector<16x512xbf16>
    %c48 = arith.constant 48 : index
    %c0_17 = arith.constant 0 : index
    %17 = vector.load %arg5[%c48, %c0_17] : memref<176x512xbf16, #tpu.memory_space<vmem>>, vector<16x512xbf16>
    tpu.vector_store %arg5[%c48, %c0_17], %16 {strides = array<i32>} : memref<176x512xbf16, #tpu.memory_space<vmem>>, vector<16x512xbf16>,
    %c0_18 = arith.constant 0 : index
    %c0_19 = arith.constant 0 : index
    %c4 = arith.constant 4 : index
    %18 = vector.load %arg1[%c0_18, %c0_19, %c4] : memref<1x16x896xbf16, #tpu.memory_space<vmem>>, vector<1x16x512xbf16>
    %19 = vector.shape_cast %18 : vector<1x16x512xbf16> to vector<16x512xbf16>
    %c64 = arith.constant 64 : index
    %c0_20 = arith.constant 0 : index
    %20 = vector.load %arg5[%c64, %c0_20] : memref<176x512xbf16, #tpu.memory_space<vmem>>, vector<16x512xbf16>
    tpu.vector_store %arg5[%c64, %c0_20], %19 {strides = array<i32>} : memref<176x512xbf16, #tpu.memory_space<vmem>>, vector<16x512xbf16>,
    %c0_21 = arith.constant 0 : index
    %c0_22 = arith.constant 0 : index
    %c5 = arith.constant 5 : index
    %21 = vector.load %arg1[%c0_21, %c0_22, %c5] : memref<1x16x896xbf16, #tpu.memory_space<vmem>>, vector<1x16x512xbf16>
    %22 = vector.shape_cast %21 : vector<1x16x512xbf16> to vector<16x512xbf16>
    %c80 = arith.constant 80 : index
    %c0_23 = arith.constant 0 : index
    %23 = vector.load %arg5[%c80, %c0_23] : memref<176x512xbf16, #tpu.memory_space<vmem>>, vector<16x512xbf16>
    tpu.vector_store %arg5[%c80, %c0_23], %22 {strides = array<i32>} : memref<176x512xbf16, #tpu.memory_space<vmem>>, vector<16x512xbf16>,
    %c0_24 = arith.constant 0 : index
    %c0_25 = arith.constant 0 : index
    %c6 = arith.constant 6 : index
    %24 = vector.load %arg1[%c0_24, %c0_25, %c6] : memref<1x16x896xbf16, #tpu.memory_space<vmem>>, vector<1x16x512xbf16>
    %25 = vector.shape_cast %24 : vector<1x16x512xbf16> to vector<16x512xbf16>
    %c96 = arith.constant 96 : index
    %c0_26 = arith.constant 0 : index
    %26 = vector.load %arg5[%c96, %c0_26] : memref<176x512xbf16, #tpu.memory_space<vmem>>, vector<16x512xbf16>
    tpu.vector_store %arg5[%c96, %c0_26], %25 {strides = array<i32>} : memref<176x512xbf16, #tpu.memory_space<vmem>>, vector<16x512xbf16>,
    %c0_27 = arith.constant 0 : index
    %c0_28 = arith.constant 0 : index
    %c7 = arith.constant 7 : index
    %27 = vector.load %arg1[%c0_27, %c0_28, %c7] : memref<1x16x896xbf16, #tpu.memory_space<vmem>>, vector<1x16x512xbf16>
    %28 = vector.shape_cast %27 : vector<1x16x512xbf16> to vector<16x512xbf16>
    %c112 = arith.constant 112 : index
    %c0_29 = arith.constant 0 : index
    %29 = vector.load %arg5[%c112, %c0_29] : memref<176x512xbf16, #tpu.memory_space<vmem>>, vector<16x512xbf16>
    tpu.vector_store %arg5[%c112, %c0_29], %28 {strides = array<i32>} : memref<176x512xbf16, #tpu.memory_space<vmem>>, vector<16x512xbf16>,
    %c0_30 = arith.constant 0 : index
    %c0_31 = arith.constant 0 : index
    %c8 = arith.constant 8 : index
    %30 = vector.load %arg1[%c0_30, %c0_31, %c8] : memref<1x16x896xbf16, #tpu.memory_space<vmem>>, vector<1x16x512xbf16>
    %31 = vector.shape_cast %30 : vector<1x16x512xbf16> to vector<16x512xbf16>
    %c128 = arith.constant 128 : index
    %c0_32 = arith.constant 0 : index
    %32 = vector.load %arg5[%c128, %c0_32] : memref<176x512xbf16, #tpu.memory_space<vmem>>, vector<16x512xbf16>
    tpu.vector_store %arg5[%c128, %c0_32], %31 {strides = array<i32>} : memref<176x512xbf16, #tpu.memory_space<vmem>>, vector<16x512xbf16>,
    %c0_33 = arith.constant 0 : index
    %c0_34 = arith.constant 0 : index
    %c9 = arith.constant 9 : index
    %33 = vector.load %arg1[%c0_33, %c0_34, %c9] : memref<1x16x896xbf16, #tpu.memory_space<vmem>>, vector<1x16x512xbf16>
    %34 = vector.shape_cast %33 : vector<1x16x512xbf16> to vector<16x512xbf16>
    %c144 = arith.constant 144 : index
    %c0_35 = arith.constant 0 : index
    %35 = vector.load %arg5[%c144, %c0_35] : memref<176x512xbf16, #tpu.memory_space<vmem>>, vector<16x512xbf16>
    tpu.vector_store %arg5[%c144, %c0_35], %34 {strides = array<i32>} : memref<176x512xbf16, #tpu.memory_space<vmem>>, vector<16x512xbf16>,
    %c0_36 = arith.constant 0 : index
    %c0_37 = arith.constant 0 : index
    %c10 = arith.constant 10 : index
    %36 = vector.load %arg1[%c0_36, %c0_37, %c10] : memref<1x16x896xbf16, #tpu.memory_space<vmem>>, vector<1x16x512xbf16>
    %37 = vector.shape_cast %36 : vector<1x16x512xbf16> to vector<16x512xbf16>
    %c160 = arith.constant 160 : index
    %c0_38 = arith.constant 0 : index
    %38 = vector.load %arg5[%c160, %c0_38] : memref<176x512xbf16, #tpu.memory_space<vmem>>, vector<16x512xbf16>
    tpu.vector_store %arg5[%c160, %c0_38], %37 {strides = array<i32>} : memref<176x512xbf16, #tpu.memory_space<vmem>>, vector<16x512xbf16>,
    %c0_39 = arith.constant 0 : index
    %c0_40 = arith.constant 0 : index
    %c0_41 = arith.constant 0 : index
    %39 = vector.load %arg4[%c0_39, %c0_40, %c0_41] : memref<1x8x512xf32, #tpu.memory_space<vmem>>, vector<1x8x512xf32>
    %40 = vector.shape_cast %39 : vector<1x8x512xf32> to vector<8x512xf32>
    %c0_42 = arith.constant 0 : index
    %c0_43 = arith.constant 0 : index
    %c0_44 = arith.constant 0 : index
    %41 = vector.load %arg2[%c0_42, %c0_43, %c0_44] : memref<11x8x176xbf16, #tpu.memory_space<vmem>>, vector<1x8x176xbf16>
    %42 = vector.shape_cast %41 : vector<1x8x176xbf16> to vector<8x176xbf16>
    %c0_45 = arith.constant 0 : index
    %c0_46 = arith.constant 0 : index
    %43 = vector.load %arg5[%c0_45, %c0_46] : memref<176x512xbf16, #tpu.memory_space<vmem>>, vector<176x512xbf16>
    %cst = arith.constant dense<0.000000e+00> : vector<8x512xf32>
    %44 = tpu.matmul %42, %43, %cst {dimension_numbers = #tpu.dot_dimension_numbers<[1], [0], [0], [1], [0, 0, 1, 1], [], []>} : vector<8x176xbf16>, vector<176x512xbf16>, vector<8x512xf32> -> vector<8x512xf32>
    %45 = arith.addf %40, %44 : vector<8x512xf32>
    %c0_47 = arith.constant 0 : index
    %c0_48 = arith.constant 0 : index
    %c0_49 = arith.constant 0 : index
    %46 = vector.load %arg4[%c0_47, %c0_48, %c0_49] : memref<1x8x512xf32, #tpu.memory_space<vmem>>, vector<1x8x512xf32>
    %47 = vector.shape_cast %46 : vector<1x8x512xf32> to vector<8x512xf32>
    %48 = vector.shape_cast %45 : vector<8x512xf32> to vector<1x8x512xf32>
    tpu.vector_store %arg4[%c0_47, %c0_48, %c0_49], %48 {strides = array<i32>} : memref<1x8x512xf32, #tpu.memory_space<vmem>>, vector<1x8x512xf32>,
    %c0_50 = arith.constant 0 : index
    %c0_51 = arith.constant 0 : index
    %c26 = arith.constant 26 : index
    %49 = vector.load %arg1[%c0_50, %c0_51, %c26] : memref<1x16x896xbf16, #tpu.memory_space<vmem>>, vector<1x16x512xbf16>
    %50 = vector.shape_cast %49 : vector<1x16x512xbf16> to vector<16x512xbf16>
    %c0_52 = arith.constant 0 : index
    %c0_53 = arith.constant 0 : index
    %51 = vector.load %arg5[%c0_52, %c0_53] : memref<176x512xbf16, #tpu.memory_space<vmem>>, vector<16x512xbf16>
    tpu.vector_store %arg5[%c0_52, %c0_53], %50 {strides = array<i32>} : memref<176x512xbf16, #tpu.memory_space<vmem>>, vector<16x512xbf16>,
    %c0_54 = arith.constant 0 : index
    %c0_55 = arith.constant 0 : index
    %c27 = arith.constant 27 : index
    %52 = vector.load %arg1[%c0_54, %c0_55, %c27] : memref<1x16x896xbf16, #tpu.memory_space<vmem>>, vector<1x16x512xbf16>
    %53 = vector.shape_cast %52 : vector<1x16x512xbf16> to vector<16x512xbf16>
    %c16_56 = arith.constant 16 : index
    %c0_57 = arith.constant 0 : index
    %54 = vector.load %arg5[%c16_56, %c0_57] : memref<176x512xbf16, #tpu.memory_space<vmem>>, vector<16x512xbf16>
    tpu.vector_store %arg5[%c16_56, %c0_57], %53 {strides = array<i32>} : memref<176x512xbf16, #tpu.memory_space<vmem>>, vector<16x512xbf16>,
    %c0_58 = arith.constant 0 : index
    %c0_59 = arith.constant 0 : index
    %c28 = arith.constant 28 : index
    %55 = vector.load %arg1[%c0_58, %c0_59, %c28] : memref<1x16x896xbf16, #tpu.memory_space<vmem>>, vector<1x16x512xbf16>
    %56 = vector.shape_cast %55 : vector<1x16x512xbf16> to vector<16x512xbf16>
    %c32_60 = arith.constant 32 : index
    %c0_61 = arith.constant 0 : index
    %57 = vector.load %arg5[%c32_60, %c0_61] : memref<176x512xbf16, #tpu.memory_space<vmem>>, vector<16x512xbf16>
    tpu.vector_store %arg5[%c32_60, %c0_61], %56 {strides = array<i32>} : memref<176x512xbf16, #tpu.memory_space<vmem>>, vector<16x512xbf16>,
    %c0_62 = arith.constant 0 : index
    %c0_63 = arith.constant 0 : index
    %c29 = arith.constant 29 : index
    %58 = vector.load %arg1[%c0_62, %c0_63, %c29] : memref<1x16x896xbf16, #tpu.memory_space<vmem>>, vector<1x16x512xbf16>
    %59 = vector.shape_cast %58 : vector<1x16x512xbf16> to vector<16x512xbf16>
    %c48_64 = arith.constant 48 : index
    %c0_65 = arith.constant 0 : index
    %60 = vector.load %arg5[%c48_64, %c0_65] : memref<176x512xbf16, #tpu.memory_space<vmem>>, vector<16x512xbf16>
    tpu.vector_store %arg5[%c48_64, %c0_65], %59 {strides = array<i32>} : memref<176x512xbf16, #tpu.memory_space<vmem>>, vector<16x512xbf16>,
    %c0_66 = arith.constant 0 : index
    %c0_67 = arith.constant 0 : index
    %c30 = arith.constant 30 : index
    %61 = vector.load %arg1[%c0_66, %c0_67, %c30] : memref<1x16x896xbf16, #tpu.memory_space<vmem>>, vector<1x16x512xbf16>
    %62 = vector.shape_cast %61 : vector<1x16x512xbf16> to vector<16x512xbf16>
    %c64_68 = arith.constant 64 : index
    %c0_69 = arith.constant 0 : index
    %63 = vector.load %arg5[%c64_68, %c0_69] : memref<176x512xbf16, #tpu.memory_space<vmem>>, vector<16x512xbf16>
    tpu.vector_store %arg5[%c64_68, %c0_69], %62 {strides = array<i32>} : memref<176x512xbf16, #tpu.memory_space<vmem>>, vector<16x512xbf16>,
    %c0_70 = arith.constant 0 : index
    %c0_71 = arith.constant 0 : index
    %c31 = arith.constant 31 : index
    %64 = vector.load %arg1[%c0_70, %c0_71, %c31] : memref<1x16x896xbf16, #tpu.memory_space<vmem>>, vector<1x16x512xbf16>
    %65 = vector.shape_cast %64 : vector<1x16x512xbf16> to vector<16x512xbf16>
    %c80_72 = arith.constant 80 : index
    %c0_73 = arith.constant 0 : index
    %66 = vector.load %arg5[%c80_72, %c0_73] : memref<176x512xbf16, #tpu.memory_space<vmem>>, vector<16x512xbf16>
    tpu.vector_store %arg5[%c80_72, %c0_73], %65 {strides = array<i32>} : memref<176x512xbf16, #tpu.memory_space<vmem>>, vector<16x512xbf16>,
    %c0_74 = arith.constant 0 : index
    %c0_75 = arith.constant 0 : index
    %c32_76 = arith.constant 32 : index
    %67 = vector.load %arg1[%c0_74, %c0_75, %c32_76] : memref<1x16x896xbf16, #tpu.memory_space<vmem>>, vector<1x16x512xbf16>
    %68 = vector.shape_cast %67 : vector<1x16x512xbf16> to vector<16x512xbf16>
    %c96_77 = arith.constant 96 : index
    %c0_78 = arith.constant 0 : index
    %69 = vector.load %arg5[%c96_77, %c0_78] : memref<176x512xbf16, #tpu.memory_space<vmem>>, vector<16x512xbf16>
    tpu.vector_store %arg5[%c96_77, %c0_78], %68 {strides = array<i32>} : memref<176x512xbf16, #tpu.memory_space<vmem>>, vector<16x512xbf16>,
    %c0_79 = arith.constant 0 : index
    %c0_80 = arith.constant 0 : index
    %c33 = arith.constant 33 : index
    %70 = vector.load %arg1[%c0_79, %c0_80, %c33] : memref<1x16x896xbf16, #tpu.memory_space<vmem>>, vector<1x16x512xbf16>
    %71 = vector.shape_cast %70 : vector<1x16x512xbf16> to vector<16x512xbf16>
    %c112_81 = arith.constant 112 : index
    %c0_82 = arith.constant 0 : index
    %72 = vector.load %arg5[%c112_81, %c0_82] : memref<176x512xbf16, #tpu.memory_space<vmem>>, vector<16x512xbf16>
    tpu.vector_store %arg5[%c112_81, %c0_82], %71 {strides = array<i32>} : memref<176x512xbf16, #tpu.memory_space<vmem>>, vector<16x512xbf16>,
    %c0_83 = arith.constant 0 : index
    %c0_84 = arith.constant 0 : index
    %c34 = arith.constant 34 : index
    %73 = vector.load %arg1[%c0_83, %c0_84, %c34] : memref<1x16x896xbf16, #tpu.memory_space<vmem>>, vector<1x16x512xbf16>
    %74 = vector.shape_cast %73 : vector<1x16x512xbf16> to vector<16x512xbf16>
    %c128_85 = arith.constant 128 : index
    %c0_86 = arith.constant 0 : index
    %75 = vector.load %arg5[%c128_85, %c0_86] : memref<176x512xbf16, #tpu.memory_space<vmem>>, vector<16x512xbf16>
    tpu.vector_store %arg5[%c128_85, %c0_86], %74 {strides = array<i32>} : memref<176x512xbf16, #tpu.memory_space<vmem>>, vector<16x512xbf16>,
    %c0_87 = arith.constant 0 : index
    %c0_88 = arith.constant 0 : index
    %c35 = arith.constant 35 : index
    %76 = vector.load %arg1[%c0_87, %c0_88, %c35] : memref<1x16x896xbf16, #tpu.memory_space<vmem>>, vector<1x16x512xbf16>
    %77 = vector.shape_cast %76 : vector<1x16x512xbf16> to vector<16x512xbf16>
    %c144_89 = arith.constant 144 : index
    %c0_90 = arith.constant 0 : index
    %78 = vector.load %arg5[%c144_89, %c0_90] : memref<176x512xbf16, #tpu.memory_space<vmem>>, vector<16x512xbf16>
    tpu.vector_store %arg5[%c144_89, %c0_90], %77 {strides = array<i32>} : memref<176x512xbf16, #tpu.memory_space<vmem>>, vector<16x512xbf16>,
    %c0_91 = arith.constant 0 : index
    %c0_92 = arith.constant 0 : index
    %c36 = arith.constant 36 : index
    %79 = vector.load %arg1[%c0_91, %c0_92, %c36] : memref<1x16x896xbf16, #tpu.memory_space<vmem>>, vector<1x16x512xbf16>
    %80 = vector.shape_cast %79 : vector<1x16x512xbf16> to vector<16x512xbf16>
    %c160_93 = arith.constant 160 : index
    %c0_94 = arith.constant 0 : index
    %81 = vector.load %arg5[%c160_93, %c0_94] : memref<176x512xbf16, #tpu.memory_space<vmem>>, vector<16x512xbf16>
    tpu.vector_store %arg5[%c160_93, %c0_94], %80 {strides = array<i32>} : memref<176x512xbf16, #tpu.memory_space<vmem>>, vector<16x512xbf16>,
    %c0_95 = arith.constant 0 : index
    %c0_96 = arith.constant 0 : index
    %c0_97 = arith.constant 0 : index
    %82 = vector.load %arg4[%c0_95, %c0_96, %c0_97] : memref<1x8x512xf32, #tpu.memory_space<vmem>>, vector<1x8x512xf32>
    %83 = vector.shape_cast %82 : vector<1x8x512xf32> to vector<8x512xf32>
    %c1_98 = arith.constant 1 : index
    %c0_99 = arith.constant 0 : index
    %c0_100 = arith.constant 0 : index
    %84 = vector.load %arg2[%c1_98, %c0_99, %c0_100] : memref<11x8x176xbf16, #tpu.memory_space<vmem>>, vector<1x8x176xbf16>
    %85 = vector.shape_cast %84 : vector<1x8x176xbf16> to vector<8x176xbf16>
    %c0_101 = arith.constant 0 : index
    %c0_102 = arith.constant 0 : index
    %86 = vector.load %arg5[%c0_101, %c0_102] : memref<176x512xbf16, #tpu.memory_space<vmem>>, vector<176x512xbf16>
    %cst_103 = arith.constant dense<0.000000e+00> : vector<8x512xf32>
    %87 = tpu.matmul %85, %86, %cst_103 {dimension_numbers = #tpu.dot_dimension_numbers<[1], [0], [0], [1], [0, 0, 1, 1], [], []>} : vector<8x176xbf16>, vector<176x512xbf16>, vector<8x512xf32> -> vector<8x512xf32>
    %88 = arith.addf %83, %87 : vector<8x512xf32>
    %c0_104 = arith.constant 0 : index
    %c0_105 = arith.constant 0 : index
    %c0_106 = arith.constant 0 : index
    %89 = vector.load %arg4[%c0_104, %c0_105, %c0_106] : memref<1x8x512xf32, #tpu.memory_space<vmem>>, vector<1x8x512xf32>
    %90 = vector.shape_cast %89 : vector<1x8x512xf32> to vector<8x512xf32>
    %91 = vector.shape_cast %88 : vector<8x512xf32> to vector<1x8x512xf32>
    tpu.vector_store %arg4[%c0_104, %c0_105, %c0_106], %91 {strides = array<i32>} : memref<1x8x512xf32, #tpu.memory_space<vmem>>, vector<1x8x512xf32>,
    %c0_107 = arith.constant 0 : index
    %c0_108 = arith.constant 0 : index
    %c52 = arith.constant 52 : index
    %92 = vector.load %arg1[%c0_107, %c0_108, %c52] : memref<1x16x896xbf16, #tpu.memory_space<vmem>>, vector<1x16x512xbf16>
    %93 = vector.shape_cast %92 : vector<1x16x512xbf16> to vector<16x512xbf16>
    %c0_109 = arith.constant 0 : index
    %c0_110 = arith.constant 0 : index
    %94 = vector.load %arg5[%c0_109, %c0_110] : memref<176x512xbf16, #tpu.memory_space<vmem>>, vector<16x512xbf16>
    tpu.vector_store %arg5[%c0_109, %c0_110], %93 {strides = array<i32>} : memref<176x512xbf16, #tpu.memory_space<vmem>>, vector<16x512xbf16>,
    %c0_111 = arith.constant 0 : index
    %c0_112 = arith.constant 0 : index
    %c53 = arith.constant 53 : index
    %95 = vector.load %arg1[%c0_111, %c0_112, %c53] : memref<1x16x896xbf16, #tpu.memory_space<vmem>>, vector<1x16x512xbf16>
    %96 = vector.shape_cast %95 : vector<1x16x512xbf16> to vector<16x512xbf16>
    %c16_113 = arith.constant 16 : index
    %c0_114 = arith.constant 0 : index
    %97 = vector.load %arg5[%c16_113, %c0_114] : memref<176x512xbf16, #tpu.memory_space<vmem>>, vector<16x512xbf16>
    tpu.vector_store %arg5[%c16_113, %c0_114], %96 {strides = array<i32>} : memref<176x512xbf16, #tpu.memory_space<vmem>>, vector<16x512xbf16>,
    %c0_115 = arith.constant 0 : index
    %c0_116 = arith.constant 0 : index
    %c54 = arith.constant 54 : index
    %98 = vector.load %arg1[%c0_115, %c0_116, %c54] : memref<1x16x896xbf16, #tpu.memory_space<vmem>>, vector<1x16x512xbf16>
    %99 = vector.shape_cast %98 : vector<1x16x512xbf16> to vector<16x512xbf16>
    %c32_117 = arith.constant 32 : index
    %c0_118 = arith.constant 0 : index
    %100 = vector.load %arg5[%c32_117, %c0_118] : memref<176x512xbf16, #tpu.memory_space<vmem>>, vector<16x512xbf16>
    tpu.vector_store %arg5[%c32_117, %c0_118], %99 {strides = array<i32>} : memref<176x512xbf16, #tpu.memory_space<vmem>>, vector<16x512xbf16>,
    %c0_119 = arith.constant 0 : index
    %c0_120 = arith.constant 0 : index
    %c55 = arith.constant 55 : index
    %101 = vector.load %arg1[%c0_119, %c0_120, %c55] : memref<1x16x896xbf16, #tpu.memory_space<vmem>>, vector<1x16x512xbf16>
    %102 = vector.shape_cast %101 : vector<1x16x512xbf16> to vector<16x512xbf16>
    %c48_121 = arith.constant 48 : index
    %c0_122 = arith.constant 0 : index
    %103 = vector.load %arg5[%c48_121, %c0_122] : memref<176x512xbf16, #tpu.memory_space<vmem>>, vector<16x512xbf16>
    tpu.vector_store %arg5[%c48_121, %c0_122], %102 {strides = array<i32>} : memref<176x512xbf16, #tpu.memory_space<vmem>>, vector<16x512xbf16>,
    %c0_123 = arith.constant 0 : index
    %c0_124 = arith.constant 0 : index
    %c56 = arith.constant 56 : index
    %104 = vector.load %arg1[%c0_123, %c0_124, %c56] : memref<1x16x896xbf16, #tpu.memory_space<vmem>>, vector<1x16x512xbf16>
    %105 = vector.shape_cast %104 : vector<1x16x512xbf16> to vector<16x512xbf16>
    %c64_125 = arith.constant 64 : index
    %c0_126 = arith.constant 0 : index
    %106 = vector.load %arg5[%c64_125, %c0_126] : memref<176x512xbf16, #tpu.memory_space<vmem>>, vector<16x512xbf16>
    tpu.vector_store %arg5[%c64_125, %c0_126], %105 {strides = array<i32>} : memref<176x512xbf16, #tpu.memory_space<vmem>>, vector<16x512xbf16>,
    %c0_127 = arith.constant 0 : index
    %c0_128 = arith.constant 0 : index
    %c57 = arith.constant 57 : index
    %107 = vector.load %arg1[%c0_127, %c0_128, %c57] : memref<1x16x896xbf16, #tpu.memory_space<vmem>>, vector<1x16x512xbf16>
    %108 = vector.shape_cast %107 : vector<1x16x512xbf16> to vector<16x512xbf16>
    %c80_129 = arith.constant 80 : index
    %c0_130 = arith.constant 0 : index
    %109 = vector.load %arg5[%c80_129, %c0_130] : memref<176x512xbf16, #tpu.memory_space<vmem>>, vector<16x512xbf16>
    tpu.vector_store %arg5[%c80_129, %c0_130], %108 {strides = array<i32>} : memref<176x512xbf16, #tpu.memory_space<vmem>>, vector<16x512xbf16>,
    %c0_131 = arith.constant 0 : index
    %c0_132 = arith.constant 0 : index
    %c58 = arith.constant 58 : index
    %110 = vector.load %arg1[%c0_131, %c0_132, %c58] : memref<1x16x896xbf16, #tpu.memory_space<vmem>>, vector<1x16x512xbf16>
    %111 = vector.shape_cast %110 : vector<1x16x512xbf16> to vector<16x512xbf16>
    %c96_133 = arith.constant 96 : index
    %c0_134 = arith.constant 0 : index
    %112 = vector.load %arg5[%c96_133, %c0_134] : memref<176x512xbf16, #tpu.memory_space<vmem>>, vector<16x512xbf16>
    tpu.vector_store %arg5[%c96_133, %c0_134], %111 {strides = array<i32>} : memref<176x512xbf16, #tpu.memory_space<vmem>>, vector<16x512xbf16>,
    %c0_135 = arith.constant 0 : index
    %c0_136 = arith.constant 0 : index
    %c59 = arith.constant 59 : index
    %113 = vector.load %arg1[%c0_135, %c0_136, %c59] : memref<1x16x896xbf16, #tpu.memory_space<vmem>>, vector<1x16x512xbf16>
    %114 = vector.shape_cast %113 : vector<1x16x512xbf16> to vector<16x512xbf16>
    %c112_137 = arith.constant 112 : index
    %c0_138 = arith.constant 0 : index
    %115 = vector.load %arg5[%c112_137, %c0_138] : memref<176x512xbf16, #tpu.memory_space<vmem>>, vector<16x512xbf16>
    tpu.vector_store %arg5[%c112_137, %c0_138], %114 {strides = array<i32>} : memref<176x512xbf16, #tpu.memory_space<vmem>>, vector<16x512xbf16>,
    %c0_139 = arith.constant 0 : index
    %c0_140 = arith.constant 0 : index
    %c60 = arith.constant 60 : index
    %116 = vector.load %arg1[%c0_139, %c0_140, %c60] : memref<1x16x896xbf16, #tpu.memory_space<vmem>>, vector<1x16x512xbf16>
    %117 = vector.shape_cast %116 : vector<1x16x512xbf16> to vector<16x512xbf16>
    %c128_141 = arith.constant 128 : index
    %c0_142 = arith.constant 0 : index
    %118 = vector.load %arg5[%c128_141, %c0_142] : memref<176x512xbf16, #tpu.memory_space<vmem>>, vector<16x512xbf16>
    tpu.vector_store %arg5[%c128_141, %c0_142], %117 {strides = array<i32>} : memref<176x512xbf16, #tpu.memory_space<vmem>>, vector<16x512xbf16>,
    %c0_143 = arith.constant 0 : index
    %c0_144 = arith.constant 0 : index
    %c61 = arith.constant 61 : index
    %119 = vector.load %arg1[%c0_143, %c0_144, %c61] : memref<1x16x896xbf16, #tpu.memory_space<vmem>>, vector<1x16x512xbf16>
    %120 = vector.shape_cast %119 : vector<1x16x512xbf16> to vector<16x512xbf16>
    %c144_145 = arith.constant 144 : index
    %c0_146 = arith.constant 0 : index
    %121 = vector.load %arg5[%c144_145, %c0_146] : memref<176x512xbf16, #tpu.memory_space<vmem>>, vector<16x512xbf16>
    tpu.vector_store %arg5[%c144_145, %c0_146], %120 {strides = array<i32>} : memref<176x512xbf16, #tpu.memory_space<vmem>>, vector<16x512xbf16>,
    %c0_147 = arith.constant 0 : index
    %c0_148 = arith.constant 0 : index
    %c62 = arith.constant 62 : index
    %122 = vector.load %arg1[%c0_147, %c0_148, %c62] : memref<1x16x896xbf16, #tpu.memory_space<vmem>>, vector<1x16x512xbf16>
    %123 = vector.shape_cast %122 : vector<1x16x512xbf16> to vector<16x512xbf16>
    %c160_149 = arith.constant 160 : index
    %c0_150 = arith.constant 0 : index
    %124 = vector.load %arg5[%c160_149, %c0_150] : memref<176x512xbf16, #tpu.memory_space<vmem>>, vector<16x512xbf16>
    tpu.vector_store %arg5[%c160_149, %c0_150], %123 {strides = array<i32>} : memref<176x512xbf16, #tpu.memory_space<vmem>>, vector<16x512xbf16>,
    %c0_151 = arith.constant 0 : index
    %c0_152 = arith.constant 0 : index
    %c0_153 = arith.constant 0 : index
    %125 = vector.load %arg4[%c0_151, %c0_152, %c0_153] : memref<1x8x512xf32, #tpu.memory_space<vmem>>, vector<1x8x512xf32>
    %126 = vector.shape_cast %125 : vector<1x8x512xf32> to vector<8x512xf32>
    %c2_154 = arith.constant 2 : index
    %c0_155 = arith.constant 0 : index
    %c0_156 = arith.constant 0 : index
    %127 = vector.load %arg2[%c2_154, %c0_155, %c0_156] : memref<11x8x176xbf16, #tpu.memory_space<vmem>>, vector<1x8x176xbf16>
    %128 = vector.shape_cast %127 : vector<1x8x176xbf16> to vector<8x176xbf16>
    %c0_157 = arith.constant 0 : index
    %c0_158 = arith.constant 0 : index
    %129 = vector.load %arg5[%c0_157, %c0_158] : memref<176x512xbf16, #tpu.memory_space<vmem>>, vector<176x512xbf16>
    %cst_159 = arith.constant dense<0.000000e+00> : vector<8x512xf32>
    %130 = tpu.matmul %128, %129, %cst_159 {dimension_numbers = #tpu.dot_dimension_numbers<[1], [0], [0], [1], [0, 0, 1, 1], [], []>} : vector<8x176xbf16>, vector<176x512xbf16>, vector<8x512xf32> -> vector<8x512xf32>
    %131 = arith.addf %126, %130 : vector<8x512xf32>
    %c0_160 = arith.constant 0 : index
    %c0_161 = arith.constant 0 : index
    %c0_162 = arith.constant 0 : index
    %132 = vector.load %arg4[%c0_160, %c0_161, %c0_162] : memref<1x8x512xf32, #tpu.memory_space<vmem>>, vector<1x8x512xf32>
    %133 = vector.shape_cast %132 : vector<1x8x512xf32> to vector<8x512xf32>
    %134 = vector.shape_cast %131 : vector<8x512xf32> to vector<1x8x512xf32>
    tpu.vector_store %arg4[%c0_160, %c0_161, %c0_162], %134 {strides = array<i32>} : memref<1x8x512xf32, #tpu.memory_space<vmem>>, vector<1x8x512xf32>,
    %c0_163 = arith.constant 0 : index
    %c0_164 = arith.constant 0 : index
    %c78 = arith.constant 78 : index
    %135 = vector.load %arg1[%c0_163, %c0_164, %c78] : memref<1x16x896xbf16, #tpu.memory_space<vmem>>, vector<1x16x512xbf16>
    %136 = vector.shape_cast %135 : vector<1x16x512xbf16> to vector<16x512xbf16>
    %c0_165 = arith.constant 0 : index
    %c0_166 = arith.constant 0 : index
    %137 = vector.load %arg5[%c0_165, %c0_166] : memref<176x512xbf16, #tpu.memory_space<vmem>>, vector<16x512xbf16>
    tpu.vector_store %arg5[%c0_165, %c0_166], %136 {strides = array<i32>} : memref<176x512xbf16, #tpu.memory_space<vmem>>, vector<16x512xbf16>,
    %c0_167 = arith.constant 0 : index
    %c0_168 = arith.constant 0 : index
    %c79 = arith.constant 79 : index
    %138 = vector.load %arg1[%c0_167, %c0_168, %c79] : memref<1x16x896xbf16, #tpu.memory_space<vmem>>, vector<1x16x512xbf16>
    %139 = vector.shape_cast %138 : vector<1x16x512xbf16> to vector<16x512xbf16>
    %c16_169 = arith.constant 16 : index
    %c0_170 = arith.constant 0 : index
    %140 = vector.load %arg5[%c16_169, %c0_170] : memref<176x512xbf16, #tpu.memory_space<vmem>>, vector<16x512xbf16>
    tpu.vector_store %arg5[%c16_169, %c0_170], %139 {strides = array<i32>} : memref<176x512xbf16, #tpu.memory_space<vmem>>, vector<16x512xbf16>,
    %c0_171 = arith.constant 0 : index
    %c0_172 = arith.constant 0 : index
    %c80_173 = arith.constant 80 : index
    %141 = vector.load %arg1[%c0_171, %c0_172, %c80_173] : memref<1x16x896xbf16, #tpu.memory_space<vmem>>, vector<1x16x512xbf16>
    %142 = vector.shape_cast %141 : vector<1x16x512xbf16> to vector<16x512xbf16>
    %c32_174 = arith.constant 32 : index
    %c0_175 = arith.constant 0 : index
    %143 = vector.load %arg5[%c32_174, %c0_175] : memref<176x512xbf16, #tpu.memory_space<vmem>>, vector<16x512xbf16>
    tpu.vector_store %arg5[%c32_174, %c0_175], %142 {strides = array<i32>} : memref<176x512xbf16, #tpu.memory_space<vmem>>, vector<16x512xbf16>,
    %c0_176 = arith.constant 0 : index
    %c0_177 = arith.constant 0 : index
    %c81 = arith.constant 81 : index
    %144 = vector.load %arg1[%c0_176, %c0_177, %c81] : memref<1x16x896xbf16, #tpu.memory_space<vmem>>, vector<1x16x512xbf16>
    %145 = vector.shape_cast %144 : vector<1x16x512xbf16> to vector<16x512xbf16>
    %c48_178 = arith.constant 48 : index
    %c0_179 = arith.constant 0 : index
    %146 = vector.load %arg5[%c48_178, %c0_179] : memref<176x512xbf16, #tpu.memory_space<vmem>>, vector<16x512xbf16>
    tpu.vector_store %arg5[%c48_178, %c0_179], %145 {strides = array<i32>} : memref<176x512xbf16, #tpu.memory_space<vmem>>, vector<16x512xbf16>,
    %c0_180 = arith.constant 0 : index
    %c0_181 = arith.constant 0 : index
    %c82 = arith.constant 82 : index
    %147 = vector.load %arg1[%c0_180, %c0_181, %c82] : memref<1x16x896xbf16, #tpu.memory_space<vmem>>, vector<1x16x512xbf16>
    %148 = vector.shape_cast %147 : vector<1x16x512xbf16> to vector<16x512xbf16>
    %c64_182 = arith.constant 64 : index
    %c0_183 = arith.constant 0 : index
    %149 = vector.load %arg5[%c64_182, %c0_183] : memref<176x512xbf16, #tpu.memory_space<vmem>>, vector<16x512xbf16>
    tpu.vector_store %arg5[%c64_182, %c0_183], %148 {strides = array<i32>} : memref<176x512xbf16, #tpu.memory_space<vmem>>, vector<16x512xbf16>,
    %c0_184 = arith.constant 0 : index
    %c0_185 = arith.constant 0 : index
    %c83 = arith.constant 83 : index
    %150 = vector.load %arg1[%c0_184, %c0_185, %c83] : memref<1x16x896xbf16, #tpu.memory_space<vmem>>, vector<1x16x512xbf16>
    %151 = vector.shape_cast %150 : vector<1x16x512xbf16> to vector<16x512xbf16>
    %c80_186 = arith.constant 80 : index
    %c0_187 = arith.constant 0 : index
    %152 = vector.load %arg5[%c80_186, %c0_187] : memref<176x512xbf16, #tpu.memory_space<vmem>>, vector<16x512xbf16>
    tpu.vector_store %arg5[%c80_186, %c0_187], %151 {strides = array<i32>} : memref<176x512xbf16, #tpu.memory_space<vmem>>, vector<16x512xbf16>,
    %c0_188 = arith.constant 0 : index
    %c0_189 = arith.constant 0 : index
    %c84 = arith.constant 84 : index
    %153 = vector.load %arg1[%c0_188, %c0_189, %c84] : memref<1x16x896xbf16, #tpu.memory_space<vmem>>, vector<1x16x512xbf16>
    %154 = vector.shape_cast %153 : vector<1x16x512xbf16> to vector<16x512xbf16>
    %c96_190 = arith.constant 96 : index
    %c0_191 = arith.constant 0 : index
    %155 = vector.load %arg5[%c96_190, %c0_191] : memref<176x512xbf16, #tpu.memory_space<vmem>>, vector<16x512xbf16>
    tpu.vector_store %arg5[%c96_190, %c0_191], %154 {strides = array<i32>} : memref<176x512xbf16, #tpu.memory_space<vmem>>, vector<16x512xbf16>,
    %c0_192 = arith.constant 0 : index
    %c0_193 = arith.constant 0 : index
    %c85 = arith.constant 85 : index
    %156 = vector.load %arg1[%c0_192, %c0_193, %c85] : memref<1x16x896xbf16, #tpu.memory_space<vmem>>, vector<1x16x512xbf16>
    %157 = vector.shape_cast %156 : vector<1x16x512xbf16> to vector<16x512xbf16>
    %c112_194 = arith.constant 112 : index
    %c0_195 = arith.constant 0 : index
    %158 = vector.load %arg5[%c112_194, %c0_195] : memref<176x512xbf16, #tpu.memory_space<vmem>>, vector<16x512xbf16>
    tpu.vector_store %arg5[%c112_194, %c0_195], %157 {strides = array<i32>} : memref<176x512xbf16, #tpu.memory_space<vmem>>, vector<16x512xbf16>,
    %c0_196 = arith.constant 0 : index
    %c0_197 = arith.constant 0 : index
    %c86 = arith.constant 86 : index
    %159 = vector.load %arg1[%c0_196, %c0_197, %c86] : memref<1x16x896xbf16, #tpu.memory_space<vmem>>, vector<1x16x512xbf16>
    %160 = vector.shape_cast %159 : vector<1x16x512xbf16> to vector<16x512xbf16>
    %c128_198 = arith.constant 128 : index
    %c0_199 = arith.constant 0 : index
    %161 = vector.load %arg5[%c128_198, %c0_199] : memref<176x512xbf16, #tpu.memory_space<vmem>>, vector<16x512xbf16>
    tpu.vector_store %arg5[%c128_198, %c0_199], %160 {strides = array<i32>} : memref<176x512xbf16, #tpu.memory_space<vmem>>, vector<16x512xbf16>,
    %c0_200 = arith.constant 0 : index
    %c0_201 = arith.constant 0 : index
    %c87 = arith.constant 87 : index
    %162 = vector.load %arg1[%c0_200, %c0_201, %c87] : memref<1x16x896xbf16, #tpu.memory_space<vmem>>, vector<1x16x512xbf16>
    %163 = vector.shape_cast %162 : vector<1x16x512xbf16> to vector<16x512xbf16>
    %c144_202 = arith.constant 144 : index
    %c0_203 = arith.constant 0 : index
    %164 = vector.load %arg5[%c144_202, %c0_203] : memref<176x512xbf16, #tpu.memory_space<vmem>>, vector<16x512xbf16>
    tpu.vector_store %arg5[%c144_202, %c0_203], %163 {strides = array<i32>} : memref<176x512xbf16, #tpu.memory_space<vmem>>, vector<16x512xbf16>,
    %c0_204 = arith.constant 0 : index
    %c0_205 = arith.constant 0 : index
    %c88 = arith.constant 88 : index
    %165 = vector.load %arg1[%c0_204, %c0_205, %c88] : memref<1x16x896xbf16, #tpu.memory_space<vmem>>, vector<1x16x512xbf16>
    %166 = vector.shape_cast %165 : vector<1x16x512xbf16> to vector<16x512xbf16>
    %c160_206 = arith.constant 160 : index
    %c0_207 = arith.constant 0 : index
    %167 = vector.load %arg5[%c160_206, %c0_207] : memref<176x512xbf16, #tpu.memory_space<vmem>>, vector<16x512xbf16>
    tpu.vector_store %arg5[%c160_206, %c0_207], %166 {strides = array<i32>} : memref<176x512xbf16, #tpu.memory_space<vmem>>, vector<16x512xbf16>,
    %c0_208 = arith.constant 0 : index
    %c0_209 = arith.constant 0 : index
    %c0_210 = arith.constant 0 : index
    %168 = vector.load %arg4[%c0_208, %c0_209, %c0_210] : memref<1x8x512xf32, #tpu.memory_space<vmem>>, vector<1x8x512xf32>
    %169 = vector.shape_cast %168 : vector<1x8x512xf32> to vector<8x512xf32>
    %c3_211 = arith.constant 3 : index
    %c0_212 = arith.constant 0 : index
    %c0_213 = arith.constant 0 : index
    %170 = vector.load %arg2[%c3_211, %c0_212, %c0_213] : memref<11x8x176xbf16, #tpu.memory_space<vmem>>, vector<1x8x176xbf16>
    %171 = vector.shape_cast %170 : vector<1x8x176xbf16> to vector<8x176xbf16>
    %c0_214 = arith.constant 0 : index
    %c0_215 = arith.constant 0 : index
    %172 = vector.load %arg5[%c0_214, %c0_215] : memref<176x512xbf16, #tpu.memory_space<vmem>>, vector<176x512xbf16>
    %cst_216 = arith.constant dense<0.000000e+00> : vector<8x512xf32>
    %173 = tpu.matmul %171, %172, %cst_216 {dimension_numbers = #tpu.dot_dimension_numbers<[1], [0], [0], [1], [0, 0, 1, 1], [], []>} : vector<8x176xbf16>, vector<176x512xbf16>, vector<8x512xf32> -> vector<8x512xf32>
    %174 = arith.addf %169, %173 : vector<8x512xf32>
    %c0_217 = arith.constant 0 : index
    %c0_218 = arith.constant 0 : index
    %c0_219 = arith.constant 0 : index
    %175 = vector.load %arg4[%c0_217, %c0_218, %c0_219] : memref<1x8x512xf32, #tpu.memory_space<vmem>>, vector<1x8x512xf32>
    %176 = vector.shape_cast %175 : vector<1x8x512xf32> to vector<8x512xf32>
    %177 = vector.shape_cast %174 : vector<8x512xf32> to vector<1x8x512xf32>
    tpu.vector_store %arg4[%c0_217, %c0_218, %c0_219], %177 {strides = array<i32>} : memref<1x8x512xf32, #tpu.memory_space<vmem>>, vector<1x8x512xf32>,
    %c0_220 = arith.constant 0 : index
    %c0_221 = arith.constant 0 : index
    %c104 = arith.constant 104 : index
    %178 = vector.load %arg1[%c0_220, %c0_221, %c104] : memref<1x16x896xbf16, #tpu.memory_space<vmem>>, vector<1x16x512xbf16>
    %179 = vector.shape_cast %178 : vector<1x16x512xbf16> to vector<16x512xbf16>
    %c0_222 = arith.constant 0 : index
    %c0_223 = arith.constant 0 : index
    %180 = vector.load %arg5[%c0_222, %c0_223] : memref<176x512xbf16, #tpu.memory_space<vmem>>, vector<16x512xbf16>
    tpu.vector_store %arg5[%c0_222, %c0_223], %179 {strides = array<i32>} : memref<176x512xbf16, #tpu.memory_space<vmem>>, vector<16x512xbf16>,
    %c0_224 = arith.constant 0 : index
    %c0_225 = arith.constant 0 : index
    %c105 = arith.constant 105 : index
    %181 = vector.load %arg1[%c0_224, %c0_225, %c105] : memref<1x16x896xbf16, #tpu.memory_space<vmem>>, vector<1x16x512xbf16>
    %182 = vector.shape_cast %181 : vector<1x16x512xbf16> to vector<16x512xbf16>
    %c16_226 = arith.constant 16 : index
    %c0_227 = arith.constant 0 : index
    %183 = vector.load %arg5[%c16_226, %c0_227] : memref<176x512xbf16, #tpu.memory_space<vmem>>, vector<16x512xbf16>
    tpu.vector_store %arg5[%c16_226, %c0_227], %182 {strides = array<i32>} : memref<176x512xbf16, #tpu.memory_space<vmem>>, vector<16x512xbf16>,
    %c0_228 = arith.constant 0 : index
    %c0_229 = arith.constant 0 : index
    %c106 = arith.constant 106 : index
    %184 = vector.load %arg1[%c0_228, %c0_229, %c106] : memref<1x16x896xbf16, #tpu.memory_space<vmem>>, vector<1x16x512xbf16>
    %185 = vector.shape_cast %184 : vector<1x16x512xbf16> to vector<16x512xbf16>
    %c32_230 = arith.constant 32 : index
    %c0_231 = arith.constant 0 : index
    %186 = vector.load %arg5[%c32_230, %c0_231] : memref<176x512xbf16, #tpu.memory_space<vmem>>, vector<16x512xbf16>
    tpu.vector_store %arg5[%c32_230, %c0_231], %185 {strides = array<i32>} : memref<176x512xbf16, #tpu.memory_space<vmem>>, vector<16x512xbf16>,
    %c0_232 = arith.constant 0 : index
    %c0_233 = arith.constant 0 : index
    %c107 = arith.constant 107 : index
    %187 = vector.load %arg1[%c0_232, %c0_233, %c107] : memref<1x16x896xbf16, #tpu.memory_space<vmem>>, vector<1x16x512xbf16>
    %188 = vector.shape_cast %187 : vector<1x16x512xbf16> to vector<16x512xbf16>
    %c48_234 = arith.constant 48 : index
    %c0_235 = arith.constant 0 : index
    %189 = vector.load %arg5[%c48_234, %c0_235] : memref<176x512xbf16, #tpu.memory_space<vmem>>, vector<16x512xbf16>
    tpu.vector_store %arg5[%c48_234, %c0_235], %188 {strides = array<i32>} : memref<176x512xbf16, #tpu.memory_space<vmem>>, vector<16x512xbf16>,
    %c0_236 = arith.constant 0 : index
    %c0_237 = arith.constant 0 : index
    %c108 = arith.constant 108 : index
    %190 = vector.load %arg1[%c0_236, %c0_237, %c108] : memref<1x16x896xbf16, #tpu.memory_space<vmem>>, vector<1x16x512xbf16>
    %191 = vector.shape_cast %190 : vector<1x16x512xbf16> to vector<16x512xbf16>
    %c64_238 = arith.constant 64 : index
    %c0_239 = arith.constant 0 : index
    %192 = vector.load %arg5[%c64_238, %c0_239] : memref<176x512xbf16, #tpu.memory_space<vmem>>, vector<16x512xbf16>
    tpu.vector_store %arg5[%c64_238, %c0_239], %191 {strides = array<i32>} : memref<176x512xbf16, #tpu.memory_space<vmem>>, vector<16x512xbf16>,
    %c0_240 = arith.constant 0 : index
    %c0_241 = arith.constant 0 : index
    %c109 = arith.constant 109 : index
    %193 = vector.load %arg1[%c0_240, %c0_241, %c109] : memref<1x16x896xbf16, #tpu.memory_space<vmem>>, vector<1x16x512xbf16>
    %194 = vector.shape_cast %193 : vector<1x16x512xbf16> to vector<16x512xbf16>
    %c80_242 = arith.constant 80 : index
    %c0_243 = arith.constant 0 : index
    %195 = vector.load %arg5[%c80_242, %c0_243] : memref<176x512xbf16, #tpu.memory_space<vmem>>, vector<16x512xbf16>
    tpu.vector_store %arg5[%c80_242, %c0_243], %194 {strides = array<i32>} : memref<176x512xbf16, #tpu.memory_space<vmem>>, vector<16x512xbf16>,
    %c0_244 = arith.constant 0 : index
    %c0_245 = arith.constant 0 : index
    %c110 = arith.constant 110 : index
    %196 = vector.load %arg1[%c0_244, %c0_245, %c110] : memref<1x16x896xbf16, #tpu.memory_space<vmem>>, vector<1x16x512xbf16>
    %197 = vector.shape_cast %196 : vector<1x16x512xbf16> to vector<16x512xbf16>
    %c96_246 = arith.constant 96 : index
    %c0_247 = arith.constant 0 : index
    %198 = vector.load %arg5[%c96_246, %c0_247] : memref<176x512xbf16, #tpu.memory_space<vmem>>, vector<16x512xbf16>
    tpu.vector_store %arg5[%c96_246, %c0_247], %197 {strides = array<i32>} : memref<176x512xbf16, #tpu.memory_space<vmem>>, vector<16x512xbf16>,
    %c0_248 = arith.constant 0 : index
    %c0_249 = arith.constant 0 : index
    %c111 = arith.constant 111 : index
    %199 = vector.load %arg1[%c0_248, %c0_249, %c111] : memref<1x16x896xbf16, #tpu.memory_space<vmem>>, vector<1x16x512xbf16>
    %200 = vector.shape_cast %199 : vector<1x16x512xbf16> to vector<16x512xbf16>
    %c112_250 = arith.constant 112 : index
    %c0_251 = arith.constant 0 : index
    %201 = vector.load %arg5[%c112_250, %c0_251] : memref<176x512xbf16, #tpu.memory_space<vmem>>, vector<16x512xbf16>
    tpu.vector_store %arg5[%c112_250, %c0_251], %200 {strides = array<i32>} : memref<176x512xbf16, #tpu.memory_space<vmem>>, vector<16x512xbf16>,
    %c0_252 = arith.constant 0 : index
    %c0_253 = arith.constant 0 : index
    %c112_254 = arith.constant 112 : index
    %202 = vector.load %arg1[%c0_252, %c0_253, %c112_254] : memref<1x16x896xbf16, #tpu.memory_space<vmem>>, vector<1x16x512xbf16>
    %203 = vector.shape_cast %202 : vector<1x16x512xbf16> to vector<16x512xbf16>
    %c128_255 = arith.constant 128 : index
    %c0_256 = arith.constant 0 : index
    %204 = vector.load %arg5[%c128_255, %c0_256] : memref<176x512xbf16, #tpu.memory_space<vmem>>, vector<16x512xbf16>
    tpu.vector_store %arg5[%c128_255, %c0_256], %203 {strides = array<i32>} : memref<176x512xbf16, #tpu.memory_space<vmem>>, vector<16x512xbf16>,
    %c0_257 = arith.constant 0 : index
    %c0_258 = arith.constant 0 : index
    %c113 = arith.constant 113 : index
    %205 = vector.load %arg1[%c0_257, %c0_258, %c113] : memref<1x16x896xbf16, #tpu.memory_space<vmem>>, vector<1x16x512xbf16>
    %206 = vector.shape_cast %205 : vector<1x16x512xbf16> to vector<16x512xbf16>
    %c144_259 = arith.constant 144 : index
    %c0_260 = arith.constant 0 : index
    %207 = vector.load %arg5[%c144_259, %c0_260] : memref<176x512xbf16, #tpu.memory_space<vmem>>, vector<16x512xbf16>
    tpu.vector_store %arg5[%c144_259, %c0_260], %206 {strides = array<i32>} : memref<176x512xbf16, #tpu.memory_space<vmem>>, vector<16x512xbf16>,
    %c0_261 = arith.constant 0 : index
    %c0_262 = arith.constant 0 : index
    %c114 = arith.constant 114 : index
    %208 = vector.load %arg1[%c0_261, %c0_262, %c114] : memref<1x16x896xbf16, #tpu.memory_space<vmem>>, vector<1x16x512xbf16>
    %209 = vector.shape_cast %208 : vector<1x16x512xbf16> to vector<16x512xbf16>
    %c160_263 = arith.constant 160 : index
    %c0_264 = arith.constant 0 : index
    %210 = vector.load %arg5[%c160_263, %c0_264] : memref<176x512xbf16, #tpu.memory_space<vmem>>, vector<16x512xbf16>
    tpu.vector_store %arg5[%c160_263, %c0_264], %209 {strides = array<i32>} : memref<176x512xbf16, #tpu.memory_space<vmem>>, vector<16x512xbf16>,
    %c0_265 = arith.constant 0 : index
    %c0_266 = arith.constant 0 : index
    %c0_267 = arith.constant 0 : index
    %211 = vector.load %arg4[%c0_265, %c0_266, %c0_267] : memref<1x8x512xf32, #tpu.memory_space<vmem>>, vector<1x8x512xf32>
    %212 = vector.shape_cast %211 : vector<1x8x512xf32> to vector<8x512xf32>
    %c4_268 = arith.constant 4 : index
    %c0_269 = arith.constant 0 : index
    %c0_270 = arith.constant 0 : index
    %213 = vector.load %arg2[%c4_268, %c0_269, %c0_270] : memref<11x8x176xbf16, #tpu.memory_space<vmem>>, vector<1x8x176xbf16>
    %214 = vector.shape_cast %213 : vector<1x8x176xbf16> to vector<8x176xbf16>
    %c0_271 = arith.constant 0 : index
    %c0_272 = arith.constant 0 : index
    %215 = vector.load %arg5[%c0_271, %c0_272] : memref<176x512xbf16, #tpu.memory_space<vmem>>, vector<176x512xbf16>
    %cst_273 = arith.constant dense<0.000000e+00> : vector<8x512xf32>
    %216 = tpu.matmul %214, %215, %cst_273 {dimension_numbers = #tpu.dot_dimension_numbers<[1], [0], [0], [1], [0, 0, 1, 1], [], []>} : vector<8x176xbf16>, vector<176x512xbf16>, vector<8x512xf32> -> vector<8x512xf32>
    %217 = arith.addf %212, %216 : vector<8x512xf32>
    %c0_274 = arith.constant 0 : index
    %c0_275 = arith.constant 0 : index
    %c0_276 = arith.constant 0 : index
    %218 = vector.load %arg4[%c0_274, %c0_275, %c0_276] : memref<1x8x512xf32, #tpu.memory_space<vmem>>, vector<1x8x512xf32>
    %219 = vector.shape_cast %218 : vector<1x8x512xf32> to vector<8x512xf32>
    %220 = vector.shape_cast %217 : vector<8x512xf32> to vector<1x8x512xf32>
    tpu.vector_store %arg4[%c0_274, %c0_275, %c0_276], %220 {strides = array<i32>} : memref<1x8x512xf32, #tpu.memory_space<vmem>>, vector<1x8x512xf32>,
    %c0_277 = arith.constant 0 : index
    %c0_278 = arith.constant 0 : index
    %c130 = arith.constant 130 : index
    %221 = vector.load %arg1[%c0_277, %c0_278, %c130] : memref<1x16x896xbf16, #tpu.memory_space<vmem>>, vector<1x16x512xbf16>
    %222 = vector.shape_cast %221 : vector<1x16x512xbf16> to vector<16x512xbf16>
    %c0_279 = arith.constant 0 : index
    %c0_280 = arith.constant 0 : index
    %223 = vector.load %arg5[%c0_279, %c0_280] : memref<176x512xbf16, #tpu.memory_space<vmem>>, vector<16x512xbf16>
    tpu.vector_store %arg5[%c0_279, %c0_280], %222 {strides = array<i32>} : memref<176x512xbf16, #tpu.memory_space<vmem>>, vector<16x512xbf16>,
    %c0_281 = arith.constant 0 : index
    %c0_282 = arith.constant 0 : index
    %c131 = arith.constant 131 : index
    %224 = vector.load %arg1[%c0_281, %c0_282, %c131] : memref<1x16x896xbf16, #tpu.memory_space<vmem>>, vector<1x16x512xbf16>
    %225 = vector.shape_cast %224 : vector<1x16x512xbf16> to vector<16x512xbf16>
    %c16_283 = arith.constant 16 : index
    %c0_284 = arith.constant 0 : index
    %226 = vector.load %arg5[%c16_283, %c0_284] : memref<176x512xbf16, #tpu.memory_space<vmem>>, vector<16x512xbf16>
    tpu.vector_store %arg5[%c16_283, %c0_284], %225 {strides = array<i32>} : memref<176x512xbf16, #tpu.memory_space<vmem>>, vector<16x512xbf16>,
    %c0_285 = arith.constant 0 : index
    %c0_286 = arith.constant 0 : index
    %c132 = arith.constant 132 : index
    %227 = vector.load %arg1[%c0_285, %c0_286, %c132] : memref<1x16x896xbf16, #tpu.memory_space<vmem>>, vector<1x16x512xbf16>
    %228 = vector.shape_cast %227 : vector<1x16x512xbf16> to vector<16x512xbf16>
    %c32_287 = arith.constant 32 : index
    %c0_288 = arith.constant 0 : index
    %229 = vector.load %arg5[%c32_287, %c0_288] : memref<176x512xbf16, #tpu.memory_space<vmem>>, vector<16x512xbf16>
    tpu.vector_store %arg5[%c32_287, %c0_288], %228 {strides = array<i32>} : memref<176x512xbf16, #tpu.memory_space<vmem>>, vector<16x512xbf16>,
    %c0_289 = arith.constant 0 : index
    %c0_290 = arith.constant 0 : index
    %c133 = arith.constant 133 : index
    %230 = vector.load %arg1[%c0_289, %c0_290, %c133] : memref<1x16x896xbf16, #tpu.memory_space<vmem>>, vector<1x16x512xbf16>
    %231 = vector.shape_cast %230 : vector<1x16x512xbf16> to vector<16x512xbf16>
    %c48_291 = arith.constant 48 : index
    %c0_292 = arith.constant 0 : index
    %232 = vector.load %arg5[%c48_291, %c0_292] : memref<176x512xbf16, #tpu.memory_space<vmem>>, vector<16x512xbf16>
    tpu.vector_store %arg5[%c48_291, %c0_292], %231 {strides = array<i32>} : memref<176x512xbf16, #tpu.memory_space<vmem>>, vector<16x512xbf16>,
    %c0_293 = arith.constant 0 : index
    %c0_294 = arith.constant 0 : index
    %c134 = arith.constant 134 : index
    %233 = vector.load %arg1[%c0_293, %c0_294, %c134] : memref<1x16x896xbf16, #tpu.memory_space<vmem>>, vector<1x16x512xbf16>
    %234 = vector.shape_cast %233 : vector<1x16x512xbf16> to vector<16x512xbf16>
    %c64_295 = arith.constant 64 : index
    %c0_296 = arith.constant 0 : index
    %235 = vector.load %arg5[%c64_295, %c0_296] : memref<176x512xbf16, #tpu.memory_space<vmem>>, vector<16x512xbf16>
    tpu.vector_store %arg5[%c64_295, %c0_296], %234 {strides = array<i32>} : memref<176x512xbf16, #tpu.memory_space<vmem>>, vector<16x512xbf16>,
    %c0_297 = arith.constant 0 : index
    %c0_298 = arith.constant 0 : index
    %c135 = arith.constant 135 : index
    %236 = vector.load %arg1[%c0_297, %c0_298, %c135] : memref<1x16x896xbf16, #tpu.memory_space<vmem>>, vector<1x16x512xbf16>
    %237 = vector.shape_cast %236 : vector<1x16x512xbf16> to vector<16x512xbf16>
    %c80_299 = arith.constant 80 : index
    %c0_300 = arith.constant 0 : index
    %238 = vector.load %arg5[%c80_299, %c0_300] : memref<176x512xbf16, #tpu.memory_space<vmem>>, vector<16x512xbf16>
    tpu.vector_store %arg5[%c80_299, %c0_300], %237 {strides = array<i32>} : memref<176x512xbf16, #tpu.memory_space<vmem>>, vector<16x512xbf16>,
    %c0_301 = arith.constant 0 : index
    %c0_302 = arith.constant 0 : index
    %c136 = arith.constant 136 : index
    %239 = vector.load %arg1[%c0_301, %c0_302, %c136] : memref<1x16x896xbf16, #tpu.memory_space<vmem>>, vector<1x16x512xbf16>
    %240 = vector.shape_cast %239 : vector<1x16x512xbf16> to vector<16x512xbf16>
    %c96_303 = arith.constant 96 : index
    %c0_304 = arith.constant 0 : index
    %241 = vector.load %arg5[%c96_303, %c0_304] : memref<176x512xbf16, #tpu.memory_space<vmem>>, vector<16x512xbf16>
    tpu.vector_store %arg5[%c96_303, %c0_304], %240 {strides = array<i32>} : memref<176x512xbf16, #tpu.memory_space<vmem>>, vector<16x512xbf16>,
    %c0_305 = arith.constant 0 : index
    %c0_306 = arith.constant 0 : index
    %c137 = arith.constant 137 : index
    %242 = vector.load %arg1[%c0_305, %c0_306, %c137] : memref<1x16x896xbf16, #tpu.memory_space<vmem>>, vector<1x16x512xbf16>
    %243 = vector.shape_cast %242 : vector<1x16x512xbf16> to vector<16x512xbf16>
    %c112_307 = arith.constant 112 : index
    %c0_308 = arith.constant 0 : index
    %244 = vector.load %arg5[%c112_307, %c0_308] : memref<176x512xbf16, #tpu.memory_space<vmem>>, vector<16x512xbf16>
    tpu.vector_store %arg5[%c112_307, %c0_308], %243 {strides = array<i32>} : memref<176x512xbf16, #tpu.memory_space<vmem>>, vector<16x512xbf16>,
    %c0_309 = arith.constant 0 : index
    %c0_310 = arith.constant 0 : index
    %c138 = arith.constant 138 : index
    %245 = vector.load %arg1[%c0_309, %c0_310, %c138] : memref<1x16x896xbf16, #tpu.memory_space<vmem>>, vector<1x16x512xbf16>
    %246 = vector.shape_cast %245 : vector<1x16x512xbf16> to vector<16x512xbf16>
    %c128_311 = arith.constant 128 : index
    %c0_312 = arith.constant 0 : index
    %247 = vector.load %arg5[%c128_311, %c0_312] : memref<176x512xbf16, #tpu.memory_space<vmem>>, vector<16x512xbf16>
    tpu.vector_store %arg5[%c128_311, %c0_312], %246 {strides = array<i32>} : memref<176x512xbf16, #tpu.memory_space<vmem>>, vector<16x512xbf16>,
    %c0_313 = arith.constant 0 : index
    %c0_314 = arith.constant 0 : index
    %c139 = arith.constant 139 : index
    %248 = vector.load %arg1[%c0_313, %c0_314, %c139] : memref<1x16x896xbf16, #tpu.memory_space<vmem>>, vector<1x16x512xbf16>
    %249 = vector.shape_cast %248 : vector<1x16x512xbf16> to vector<16x512xbf16>
    %c144_315 = arith.constant 144 : index
    %c0_316 = arith.constant 0 : index
    %250 = vector.load %arg5[%c144_315, %c0_316] : memref<176x512xbf16, #tpu.memory_space<vmem>>, vector<16x512xbf16>
    tpu.vector_store %arg5[%c144_315, %c0_316], %249 {strides = array<i32>} : memref<176x512xbf16, #tpu.memory_space<vmem>>, vector<16x512xbf16>,
    %c0_317 = arith.constant 0 : index
    %c0_318 = arith.constant 0 : index
    %c140 = arith.constant 140 : index
    %251 = vector.load %arg1[%c0_317, %c0_318, %c140] : memref<1x16x896xbf16, #tpu.memory_space<vmem>>, vector<1x16x512xbf16>
    %252 = vector.shape_cast %251 : vector<1x16x512xbf16> to vector<16x512xbf16>
    %c160_319 = arith.constant 160 : index
    %c0_320 = arith.constant 0 : index
    %253 = vector.load %arg5[%c160_319, %c0_320] : memref<176x512xbf16, #tpu.memory_space<vmem>>, vector<16x512xbf16>
    tpu.vector_store %arg5[%c160_319, %c0_320], %252 {strides = array<i32>} : memref<176x512xbf16, #tpu.memory_space<vmem>>, vector<16x512xbf16>,
    %c0_321 = arith.constant 0 : index
    %c0_322 = arith.constant 0 : index
    %c0_323 = arith.constant 0 : index
    %254 = vector.load %arg4[%c0_321, %c0_322, %c0_323] : memref<1x8x512xf32, #tpu.memory_space<vmem>>, vector<1x8x512xf32>
    %255 = vector.shape_cast %254 : vector<1x8x512xf32> to vector<8x512xf32>
    %c5_324 = arith.constant 5 : index
    %c0_325 = arith.constant 0 : index
    %c0_326 = arith.constant 0 : index
    %256 = vector.load %arg2[%c5_324, %c0_325, %c0_326] : memref<11x8x176xbf16, #tpu.memory_space<vmem>>, vector<1x8x176xbf16>
    %257 = vector.shape_cast %256 : vector<1x8x176xbf16> to vector<8x176xbf16>
    %c0_327 = arith.constant 0 : index
    %c0_328 = arith.constant 0 : index
    %258 = vector.load %arg5[%c0_327, %c0_328] : memref<176x512xbf16, #tpu.memory_space<vmem>>, vector<176x512xbf16>
    %cst_329 = arith.constant dense<0.000000e+00> : vector<8x512xf32>
    %259 = tpu.matmul %257, %258, %cst_329 {dimension_numbers = #tpu.dot_dimension_numbers<[1], [0], [0], [1], [0, 0, 1, 1], [], []>} : vector<8x176xbf16>, vector<176x512xbf16>, vector<8x512xf32> -> vector<8x512xf32>
    %260 = arith.addf %255, %259 : vector<8x512xf32>
    %c0_330 = arith.constant 0 : index
    %c0_331 = arith.constant 0 : index
    %c0_332 = arith.constant 0 : index
    %261 = vector.load %arg4[%c0_330, %c0_331, %c0_332] : memref<1x8x512xf32, #tpu.memory_space<vmem>>, vector<1x8x512xf32>
    %262 = vector.shape_cast %261 : vector<1x8x512xf32> to vector<8x512xf32>
    %263 = vector.shape_cast %260 : vector<8x512xf32> to vector<1x8x512xf32>
    tpu.vector_store %arg4[%c0_330, %c0_331, %c0_332], %263 {strides = array<i32>} : memref<1x8x512xf32, #tpu.memory_space<vmem>>, vector<1x8x512xf32>,
    %c0_333 = arith.constant 0 : index
    %c0_334 = arith.constant 0 : index
    %c156 = arith.constant 156 : index
    %264 = vector.load %arg1[%c0_333, %c0_334, %c156] : memref<1x16x896xbf16, #tpu.memory_space<vmem>>, vector<1x16x512xbf16>
    %265 = vector.shape_cast %264 : vector<1x16x512xbf16> to vector<16x512xbf16>
    %c0_335 = arith.constant 0 : index
    %c0_336 = arith.constant 0 : index
    %266 = vector.load %arg5[%c0_335, %c0_336] : memref<176x512xbf16, #tpu.memory_space<vmem>>, vector<16x512xbf16>
    tpu.vector_store %arg5[%c0_335, %c0_336], %265 {strides = array<i32>} : memref<176x512xbf16, #tpu.memory_space<vmem>>, vector<16x512xbf16>,
    %c0_337 = arith.constant 0 : index
    %c0_338 = arith.constant 0 : index
    %c157 = arith.constant 157 : index
    %267 = vector.load %arg1[%c0_337, %c0_338, %c157] : memref<1x16x896xbf16, #tpu.memory_space<vmem>>, vector<1x16x512xbf16>
    %268 = vector.shape_cast %267 : vector<1x16x512xbf16> to vector<16x512xbf16>
    %c16_339 = arith.constant 16 : index
    %c0_340 = arith.constant 0 : index
    %269 = vector.load %arg5[%c16_339, %c0_340] : memref<176x512xbf16, #tpu.memory_space<vmem>>, vector<16x512xbf16>
    tpu.vector_store %arg5[%c16_339, %c0_340], %268 {strides = array<i32>} : memref<176x512xbf16, #tpu.memory_space<vmem>>, vector<16x512xbf16>,
    %c0_341 = arith.constant 0 : index
    %c0_342 = arith.constant 0 : index
    %c158 = arith.constant 158 : index
    %270 = vector.load %arg1[%c0_341, %c0_342, %c158] : memref<1x16x896xbf16, #tpu.memory_space<vmem>>, vector<1x16x512xbf16>
    %271 = vector.shape_cast %270 : vector<1x16x512xbf16> to vector<16x512xbf16>
    %c32_343 = arith.constant 32 : index
    %c0_344 = arith.constant 0 : index
    %272 = vector.load %arg5[%c32_343, %c0_344] : memref<176x512xbf16, #tpu.memory_space<vmem>>, vector<16x512xbf16>
    tpu.vector_store %arg5[%c32_343, %c0_344], %271 {strides = array<i32>} : memref<176x512xbf16, #tpu.memory_space<vmem>>, vector<16x512xbf16>,
    %c0_345 = arith.constant 0 : index
    %c0_346 = arith.constant 0 : index
    %c159 = arith.constant 159 : index
    %273 = vector.load %arg1[%c0_345, %c0_346, %c159] : memref<1x16x896xbf16, #tpu.memory_space<vmem>>, vector<1x16x512xbf16>
    %274 = vector.shape_cast %273 : vector<1x16x512xbf16> to vector<16x512xbf16>
    %c48_347 = arith.constant 48 : index
    %c0_348 = arith.constant 0 : index
    %275 = vector.load %arg5[%c48_347, %c0_348] : memref<176x512xbf16, #tpu.memory_space<vmem>>, vector<16x512xbf16>
    tpu.vector_store %arg5[%c48_347, %c0_348], %274 {strides = array<i32>} : memref<176x512xbf16, #tpu.memory_space<vmem>>, vector<16x512xbf16>,
    %c0_349 = arith.constant 0 : index
    %c0_350 = arith.constant 0 : index
    %c160_351 = arith.constant 160 : index
    %276 = vector.load %arg1[%c0_349, %c0_350, %c160_351] : memref<1x16x896xbf16, #tpu.memory_space<vmem>>, vector<1x16x512xbf16>
    %277 = vector.shape_cast %276 : vector<1x16x512xbf16> to vector<16x512xbf16>
    %c64_352 = arith.constant 64 : index
    %c0_353 = arith.constant 0 : index
    %278 = vector.load %arg5[%c64_352, %c0_353] : memref<176x512xbf16, #tpu.memory_space<vmem>>, vector<16x512xbf16>
    tpu.vector_store %arg5[%c64_352, %c0_353], %277 {strides = array<i32>} : memref<176x512xbf16, #tpu.memory_space<vmem>>, vector<16x512xbf16>,
    %c0_354 = arith.constant 0 : index
    %c0_355 = arith.constant 0 : index
    %c161 = arith.constant 161 : index
    %279 = vector.load %arg1[%c0_354, %c0_355, %c161] : memref<1x16x896xbf16, #tpu.memory_space<vmem>>, vector<1x16x512xbf16>
    %280 = vector.shape_cast %279 : vector<1x16x512xbf16> to vector<16x512xbf16>
    %c80_356 = arith.constant 80 : index
    %c0_357 = arith.constant 0 : index
    %281 = vector.load %arg5[%c80_356, %c0_357] : memref<176x512xbf16, #tpu.memory_space<vmem>>, vector<16x512xbf16>
    tpu.vector_store %arg5[%c80_356, %c0_357], %280 {strides = array<i32>} : memref<176x512xbf16, #tpu.memory_space<vmem>>, vector<16x512xbf16>,
    %c0_358 = arith.constant 0 : index
    %c0_359 = arith.constant 0 : index
    %c162 = arith.constant 162 : index
    %282 = vector.load %arg1[%c0_358, %c0_359, %c162] : memref<1x16x896xbf16, #tpu.memory_space<vmem>>, vector<1x16x512xbf16>
    %283 = vector.shape_cast %282 : vector<1x16x512xbf16> to vector<16x512xbf16>
    %c96_360 = arith.constant 96 : index
    %c0_361 = arith.constant 0 : index
    %284 = vector.load %arg5[%c96_360, %c0_361] : memref<176x512xbf16, #tpu.memory_space<vmem>>, vector<16x512xbf16>
    tpu.vector_store %arg5[%c96_360, %c0_361], %283 {strides = array<i32>} : memref<176x512xbf16, #tpu.memory_space<vmem>>, vector<16x512xbf16>,
    %c0_362 = arith.constant 0 : index
    %c0_363 = arith.constant 0 : index
    %c163 = arith.constant 163 : index
    %285 = vector.load %arg1[%c0_362, %c0_363, %c163] : memref<1x16x896xbf16, #tpu.memory_space<vmem>>, vector<1x16x512xbf16>
    %286 = vector.shape_cast %285 : vector<1x16x512xbf16> to vector<16x512xbf16>
    %c112_364 = arith.constant 112 : index
    %c0_365 = arith.constant 0 : index
    %287 = vector.load %arg5[%c112_364, %c0_365] : memref<176x512xbf16, #tpu.memory_space<vmem>>, vector<16x512xbf16>
    tpu.vector_store %arg5[%c112_364, %c0_365], %286 {strides = array<i32>} : memref<176x512xbf16, #tpu.memory_space<vmem>>, vector<16x512xbf16>,
    %c0_366 = arith.constant 0 : index
    %c0_367 = arith.constant 0 : index
    %c164 = arith.constant 164 : index
    %288 = vector.load %arg1[%c0_366, %c0_367, %c164] : memref<1x16x896xbf16, #tpu.memory_space<vmem>>, vector<1x16x512xbf16>
    %289 = vector.shape_cast %288 : vector<1x16x512xbf16> to vector<16x512xbf16>
    %c128_368 = arith.constant 128 : index
    %c0_369 = arith.constant 0 : index
    %290 = vector.load %arg5[%c128_368, %c0_369] : memref<176x512xbf16, #tpu.memory_space<vmem>>, vector<16x512xbf16>
    tpu.vector_store %arg5[%c128_368, %c0_369], %289 {strides = array<i32>} : memref<176x512xbf16, #tpu.memory_space<vmem>>, vector<16x512xbf16>,
    %c0_370 = arith.constant 0 : index
    %c0_371 = arith.constant 0 : index
    %c165 = arith.constant 165 : index
    %291 = vector.load %arg1[%c0_370, %c0_371, %c165] : memref<1x16x896xbf16, #tpu.memory_space<vmem>>, vector<1x16x512xbf16>
    %292 = vector.shape_cast %291 : vector<1x16x512xbf16> to vector<16x512xbf16>
    %c144_372 = arith.constant 144 : index
    %c0_373 = arith.constant 0 : index
    %293 = vector.load %arg5[%c144_372, %c0_373] : memref<176x512xbf16, #tpu.memory_space<vmem>>, vector<16x512xbf16>
    tpu.vector_store %arg5[%c144_372, %c0_373], %292 {strides = array<i32>} : memref<176x512xbf16, #tpu.memory_space<vmem>>, vector<16x512xbf16>,
    %c0_374 = arith.constant 0 : index
    %c0_375 = arith.constant 0 : index
    %c166 = arith.constant 166 : index
    %294 = vector.load %arg1[%c0_374, %c0_375, %c166] : memref<1x16x896xbf16, #tpu.memory_space<vmem>>, vector<1x16x512xbf16>
    %295 = vector.shape_cast %294 : vector<1x16x512xbf16> to vector<16x512xbf16>
    %c160_376 = arith.constant 160 : index
    %c0_377 = arith.constant 0 : index
    %296 = vector.load %arg5[%c160_376, %c0_377] : memref<176x512xbf16, #tpu.memory_space<vmem>>, vector<16x512xbf16>
    tpu.vector_store %arg5[%c160_376, %c0_377], %295 {strides = array<i32>} : memref<176x512xbf16, #tpu.memory_space<vmem>>, vector<16x512xbf16>,
    %c0_378 = arith.constant 0 : index
    %c0_379 = arith.constant 0 : index
    %c0_380 = arith.constant 0 : index
    %297 = vector.load %arg4[%c0_378, %c0_379, %c0_380] : memref<1x8x512xf32, #tpu.memory_space<vmem>>, vector<1x8x512xf32>
    %298 = vector.shape_cast %297 : vector<1x8x512xf32> to vector<8x512xf32>
    %c6_381 = arith.constant 6 : index
    %c0_382 = arith.constant 0 : index
    %c0_383 = arith.constant 0 : index
    %299 = vector.load %arg2[%c6_381, %c0_382, %c0_383] : memref<11x8x176xbf16, #tpu.memory_space<vmem>>, vector<1x8x176xbf16>
    %300 = vector.shape_cast %299 : vector<1x8x176xbf16> to vector<8x176xbf16>
    %c0_384 = arith.constant 0 : index
    %c0_385 = arith.constant 0 : index
    %301 = vector.load %arg5[%c0_384, %c0_385] : memref<176x512xbf16, #tpu.memory_space<vmem>>, vector<176x512xbf16>
    %cst_386 = arith.constant dense<0.000000e+00> : vector<8x512xf32>
    %302 = tpu.matmul %300, %301, %cst_386 {dimension_numbers = #tpu.dot_dimension_numbers<[1], [0], [0], [1], [0, 0, 1, 1], [], []>} : vector<8x176xbf16>, vector<176x512xbf16>, vector<8x512xf32> -> vector<8x512xf32>
    %303 = arith.addf %298, %302 : vector<8x512xf32>
    %c0_387 = arith.constant 0 : index
    %c0_388 = arith.constant 0 : index
    %c0_389 = arith.constant 0 : index
    %304 = vector.load %arg4[%c0_387, %c0_388, %c0_389] : memref<1x8x512xf32, #tpu.memory_space<vmem>>, vector<1x8x512xf32>
    %305 = vector.shape_cast %304 : vector<1x8x512xf32> to vector<8x512xf32>
    %306 = vector.shape_cast %303 : vector<8x512xf32> to vector<1x8x512xf32>
    tpu.vector_store %arg4[%c0_387, %c0_388, %c0_389], %306 {strides = array<i32>} : memref<1x8x512xf32, #tpu.memory_space<vmem>>, vector<1x8x512xf32>,
    %c0_390 = arith.constant 0 : index
    %c0_391 = arith.constant 0 : index
    %c182 = arith.constant 182 : index
    %307 = vector.load %arg1[%c0_390, %c0_391, %c182] : memref<1x16x896xbf16, #tpu.memory_space<vmem>>, vector<1x16x512xbf16>
    %308 = vector.shape_cast %307 : vector<1x16x512xbf16> to vector<16x512xbf16>
    %c0_392 = arith.constant 0 : index
    %c0_393 = arith.constant 0 : index
    %309 = vector.load %arg5[%c0_392, %c0_393] : memref<176x512xbf16, #tpu.memory_space<vmem>>, vector<16x512xbf16>
    tpu.vector_store %arg5[%c0_392, %c0_393], %308 {strides = array<i32>} : memref<176x512xbf16, #tpu.memory_space<vmem>>, vector<16x512xbf16>,
    %c0_394 = arith.constant 0 : index
    %c0_395 = arith.constant 0 : index
    %c183 = arith.constant 183 : index
    %310 = vector.load %arg1[%c0_394, %c0_395, %c183] : memref<1x16x896xbf16, #tpu.memory_space<vmem>>, vector<1x16x512xbf16>
    %311 = vector.shape_cast %310 : vector<1x16x512xbf16> to vector<16x512xbf16>
    %c16_396 = arith.constant 16 : index
    %c0_397 = arith.constant 0 : index
    %312 = vector.load %arg5[%c16_396, %c0_397] : memref<176x512xbf16, #tpu.memory_space<vmem>>, vector<16x512xbf16>
    tpu.vector_store %arg5[%c16_396, %c0_397], %311 {strides = array<i32>} : memref<176x512xbf16, #tpu.memory_space<vmem>>, vector<16x512xbf16>,
    %c0_398 = arith.constant 0 : index
    %c0_399 = arith.constant 0 : index
    %c184 = arith.constant 184 : index
    %313 = vector.load %arg1[%c0_398, %c0_399, %c184] : memref<1x16x896xbf16, #tpu.memory_space<vmem>>, vector<1x16x512xbf16>
    %314 = vector.shape_cast %313 : vector<1x16x512xbf16> to vector<16x512xbf16>
    %c32_400 = arith.constant 32 : index
    %c0_401 = arith.constant 0 : index
    %315 = vector.load %arg5[%c32_400, %c0_401] : memref<176x512xbf16, #tpu.memory_space<vmem>>, vector<16x512xbf16>
    tpu.vector_store %arg5[%c32_400, %c0_401], %314 {strides = array<i32>} : memref<176x512xbf16, #tpu.memory_space<vmem>>, vector<16x512xbf16>,
    %c0_402 = arith.constant 0 : index
    %c0_403 = arith.constant 0 : index
    %c185 = arith.constant 185 : index
    %316 = vector.load %arg1[%c0_402, %c0_403, %c185] : memref<1x16x896xbf16, #tpu.memory_space<vmem>>, vector<1x16x512xbf16>
    %317 = vector.shape_cast %316 : vector<1x16x512xbf16> to vector<16x512xbf16>
    %c48_404 = arith.constant 48 : index
    %c0_405 = arith.constant 0 : index
    %318 = vector.load %arg5[%c48_404, %c0_405] : memref<176x512xbf16, #tpu.memory_space<vmem>>, vector<16x512xbf16>
    tpu.vector_store %arg5[%c48_404, %c0_405], %317 {strides = array<i32>} : memref<176x512xbf16, #tpu.memory_space<vmem>>, vector<16x512xbf16>,
    %c0_406 = arith.constant 0 : index
    %c0_407 = arith.constant 0 : index
    %c186 = arith.constant 186 : index
    %319 = vector.load %arg1[%c0_406, %c0_407, %c186] : memref<1x16x896xbf16, #tpu.memory_space<vmem>>, vector<1x16x512xbf16>
    %320 = vector.shape_cast %319 : vector<1x16x512xbf16> to vector<16x512xbf16>
    %c64_408 = arith.constant 64 : index
    %c0_409 = arith.constant 0 : index
    %321 = vector.load %arg5[%c64_408, %c0_409] : memref<176x512xbf16, #tpu.memory_space<vmem>>, vector<16x512xbf16>
    tpu.vector_store %arg5[%c64_408, %c0_409], %320 {strides = array<i32>} : memref<176x512xbf16, #tpu.memory_space<vmem>>, vector<16x512xbf16>,
    %c0_410 = arith.constant 0 : index
    %c0_411 = arith.constant 0 : index
    %c187 = arith.constant 187 : index
    %322 = vector.load %arg1[%c0_410, %c0_411, %c187] : memref<1x16x896xbf16, #tpu.memory_space<vmem>>, vector<1x16x512xbf16>
    %323 = vector.shape_cast %322 : vector<1x16x512xbf16> to vector<16x512xbf16>
    %c80_412 = arith.constant 80 : index
    %c0_413 = arith.constant 0 : index
    %324 = vector.load %arg5[%c80_412, %c0_413] : memref<176x512xbf16, #tpu.memory_space<vmem>>, vector<16x512xbf16>
    tpu.vector_store %arg5[%c80_412, %c0_413], %323 {strides = array<i32>} : memref<176x512xbf16, #tpu.memory_space<vmem>>, vector<16x512xbf16>,
    %c0_414 = arith.constant 0 : index
    %c0_415 = arith.constant 0 : index
    %c188 = arith.constant 188 : index
    %325 = vector.load %arg1[%c0_414, %c0_415, %c188] : memref<1x16x896xbf16, #tpu.memory_space<vmem>>, vector<1x16x512xbf16>
    %326 = vector.shape_cast %325 : vector<1x16x512xbf16> to vector<16x512xbf16>
    %c96_416 = arith.constant 96 : index
    %c0_417 = arith.constant 0 : index
    %327 = vector.load %arg5[%c96_416, %c0_417] : memref<176x512xbf16, #tpu.memory_space<vmem>>, vector<16x512xbf16>
    tpu.vector_store %arg5[%c96_416, %c0_417], %326 {strides = array<i32>} : memref<176x512xbf16, #tpu.memory_space<vmem>>, vector<16x512xbf16>,
    %c0_418 = arith.constant 0 : index
    %c0_419 = arith.constant 0 : index
    %c189 = arith.constant 189 : index
    %328 = vector.load %arg1[%c0_418, %c0_419, %c189] : memref<1x16x896xbf16, #tpu.memory_space<vmem>>, vector<1x16x512xbf16>
    %329 = vector.shape_cast %328 : vector<1x16x512xbf16> to vector<16x512xbf16>
    %c112_420 = arith.constant 112 : index
    %c0_421 = arith.constant 0 : index
    %330 = vector.load %arg5[%c112_420, %c0_421] : memref<176x512xbf16, #tpu.memory_space<vmem>>, vector<16x512xbf16>
    tpu.vector_store %arg5[%c112_420, %c0_421], %329 {strides = array<i32>} : memref<176x512xbf16, #tpu.memory_space<vmem>>, vector<16x512xbf16>,
    %c0_422 = arith.constant 0 : index
    %c0_423 = arith.constant 0 : index
    %c190 = arith.constant 190 : index
    %331 = vector.load %arg1[%c0_422, %c0_423, %c190] : memref<1x16x896xbf16, #tpu.memory_space<vmem>>, vector<1x16x512xbf16>
    %332 = vector.shape_cast %331 : vector<1x16x512xbf16> to vector<16x512xbf16>
    %c128_424 = arith.constant 128 : index
    %c0_425 = arith.constant 0 : index
    %333 = vector.load %arg5[%c128_424, %c0_425] : memref<176x512xbf16, #tpu.memory_space<vmem>>, vector<16x512xbf16>
    tpu.vector_store %arg5[%c128_424, %c0_425], %332 {strides = array<i32>} : memref<176x512xbf16, #tpu.memory_space<vmem>>, vector<16x512xbf16>,
    %c0_426 = arith.constant 0 : index
    %c0_427 = arith.constant 0 : index
    %c191 = arith.constant 191 : index
    %334 = vector.load %arg1[%c0_426, %c0_427, %c191] : memref<1x16x896xbf16, #tpu.memory_space<vmem>>, vector<1x16x512xbf16>
    %335 = vector.shape_cast %334 : vector<1x16x512xbf16> to vector<16x512xbf16>
    %c144_428 = arith.constant 144 : index
    %c0_429 = arith.constant 0 : index
    %336 = vector.load %arg5[%c144_428, %c0_429] : memref<176x512xbf16, #tpu.memory_space<vmem>>, vector<16x512xbf16>
    tpu.vector_store %arg5[%c144_428, %c0_429], %335 {strides = array<i32>} : memref<176x512xbf16, #tpu.memory_space<vmem>>, vector<16x512xbf16>,
    %c0_430 = arith.constant 0 : index
    %c0_431 = arith.constant 0 : index
    %c192 = arith.constant 192 : index
    %337 = vector.load %arg1[%c0_430, %c0_431, %c192] : memref<1x16x896xbf16, #tpu.memory_space<vmem>>, vector<1x16x512xbf16>
    %338 = vector.shape_cast %337 : vector<1x16x512xbf16> to vector<16x512xbf16>
    %c160_432 = arith.constant 160 : index
    %c0_433 = arith.constant 0 : index
    %339 = vector.load %arg5[%c160_432, %c0_433] : memref<176x512xbf16, #tpu.memory_space<vmem>>, vector<16x512xbf16>
    tpu.vector_store %arg5[%c160_432, %c0_433], %338 {strides = array<i32>} : memref<176x512xbf16, #tpu.memory_space<vmem>>, vector<16x512xbf16>,
    %c0_434 = arith.constant 0 : index
    %c0_435 = arith.constant 0 : index
    %c0_436 = arith.constant 0 : index
    %340 = vector.load %arg4[%c0_434, %c0_435, %c0_436] : memref<1x8x512xf32, #tpu.memory_space<vmem>>, vector<1x8x512xf32>
    %341 = vector.shape_cast %340 : vector<1x8x512xf32> to vector<8x512xf32>
    %c7_437 = arith.constant 7 : index
    %c0_438 = arith.constant 0 : index
    %c0_439 = arith.constant 0 : index
    %342 = vector.load %arg2[%c7_437, %c0_438, %c0_439] : memref<11x8x176xbf16, #tpu.memory_space<vmem>>, vector<1x8x176xbf16>
    %343 = vector.shape_cast %342 : vector<1x8x176xbf16> to vector<8x176xbf16>
    %c0_440 = arith.constant 0 : index
    %c0_441 = arith.constant 0 : index
    %344 = vector.load %arg5[%c0_440, %c0_441] : memref<176x512xbf16, #tpu.memory_space<vmem>>, vector<176x512xbf16>
    %cst_442 = arith.constant dense<0.000000e+00> : vector<8x512xf32>
    %345 = tpu.matmul %343, %344, %cst_442 {dimension_numbers = #tpu.dot_dimension_numbers<[1], [0], [0], [1], [0, 0, 1, 1], [], []>} : vector<8x176xbf16>, vector<176x512xbf16>, vector<8x512xf32> -> vector<8x512xf32>
    %346 = arith.addf %341, %345 : vector<8x512xf32>
    %c0_443 = arith.constant 0 : index
    %c0_444 = arith.constant 0 : index
    %c0_445 = arith.constant 0 : index
    %347 = vector.load %arg4[%c0_443, %c0_444, %c0_445] : memref<1x8x512xf32, #tpu.memory_space<vmem>>, vector<1x8x512xf32>
    %348 = vector.shape_cast %347 : vector<1x8x512xf32> to vector<8x512xf32>
    %349 = vector.shape_cast %346 : vector<8x512xf32> to vector<1x8x512xf32>
    tpu.vector_store %arg4[%c0_443, %c0_444, %c0_445], %349 {strides = array<i32>} : memref<1x8x512xf32, #tpu.memory_space<vmem>>, vector<1x8x512xf32>,
    %c0_446 = arith.constant 0 : index
    %c0_447 = arith.constant 0 : index
    %c208 = arith.constant 208 : index
    %350 = vector.load %arg1[%c0_446, %c0_447, %c208] : memref<1x16x896xbf16, #tpu.memory_space<vmem>>, vector<1x16x512xbf16>
    %351 = vector.shape_cast %350 : vector<1x16x512xbf16> to vector<16x512xbf16>
    %c0_448 = arith.constant 0 : index
    %c0_449 = arith.constant 0 : index
    %352 = vector.load %arg5[%c0_448, %c0_449] : memref<176x512xbf16, #tpu.memory_space<vmem>>, vector<16x512xbf16>
    tpu.vector_store %arg5[%c0_448, %c0_449], %351 {strides = array<i32>} : memref<176x512xbf16, #tpu.memory_space<vmem>>, vector<16x512xbf16>,
    %c0_450 = arith.constant 0 : index
    %c0_451 = arith.constant 0 : index
    %c209 = arith.constant 209 : index
    %353 = vector.load %arg1[%c0_450, %c0_451, %c209] : memref<1x16x896xbf16, #tpu.memory_space<vmem>>, vector<1x16x512xbf16>
    %354 = vector.shape_cast %353 : vector<1x16x512xbf16> to vector<16x512xbf16>
    %c16_452 = arith.constant 16 : index
    %c0_453 = arith.constant 0 : index
    %355 = vector.load %arg5[%c16_452, %c0_453] : memref<176x512xbf16, #tpu.memory_space<vmem>>, vector<16x512xbf16>
    tpu.vector_store %arg5[%c16_452, %c0_453], %354 {strides = array<i32>} : memref<176x512xbf16, #tpu.memory_space<vmem>>, vector<16x512xbf16>,
    %c0_454 = arith.constant 0 : index
    %c0_455 = arith.constant 0 : index
    %c210 = arith.constant 210 : index
    %356 = vector.load %arg1[%c0_454, %c0_455, %c210] : memref<1x16x896xbf16, #tpu.memory_space<vmem>>, vector<1x16x512xbf16>
    %357 = vector.shape_cast %356 : vector<1x16x512xbf16> to vector<16x512xbf16>
    %c32_456 = arith.constant 32 : index
    %c0_457 = arith.constant 0 : index
    %358 = vector.load %arg5[%c32_456, %c0_457] : memref<176x512xbf16, #tpu.memory_space<vmem>>, vector<16x512xbf16>
    tpu.vector_store %arg5[%c32_456, %c0_457], %357 {strides = array<i32>} : memref<176x512xbf16, #tpu.memory_space<vmem>>, vector<16x512xbf16>,
    %c0_458 = arith.constant 0 : index
    %c0_459 = arith.constant 0 : index
    %c211 = arith.constant 211 : index
    %359 = vector.load %arg1[%c0_458, %c0_459, %c211] : memref<1x16x896xbf16, #tpu.memory_space<vmem>>, vector<1x16x512xbf16>
    %360 = vector.shape_cast %359 : vector<1x16x512xbf16> to vector<16x512xbf16>
    %c48_460 = arith.constant 48 : index
    %c0_461 = arith.constant 0 : index
    %361 = vector.load %arg5[%c48_460, %c0_461] : memref<176x512xbf16, #tpu.memory_space<vmem>>, vector<16x512xbf16>
    tpu.vector_store %arg5[%c48_460, %c0_461], %360 {strides = array<i32>} : memref<176x512xbf16, #tpu.memory_space<vmem>>, vector<16x512xbf16>,
    %c0_462 = arith.constant 0 : index
    %c0_463 = arith.constant 0 : index
    %c212 = arith.constant 212 : index
    %362 = vector.load %arg1[%c0_462, %c0_463, %c212] : memref<1x16x896xbf16, #tpu.memory_space<vmem>>, vector<1x16x512xbf16>
    %363 = vector.shape_cast %362 : vector<1x16x512xbf16> to vector<16x512xbf16>
    %c64_464 = arith.constant 64 : index
    %c0_465 = arith.constant 0 : index
    %364 = vector.load %arg5[%c64_464, %c0_465] : memref<176x512xbf16, #tpu.memory_space<vmem>>, vector<16x512xbf16>
    tpu.vector_store %arg5[%c64_464, %c0_465], %363 {strides = array<i32>} : memref<176x512xbf16, #tpu.memory_space<vmem>>, vector<16x512xbf16>,
    %c0_466 = arith.constant 0 : index
    %c0_467 = arith.constant 0 : index
    %c213 = arith.constant 213 : index
    %365 = vector.load %arg1[%c0_466, %c0_467, %c213] : memref<1x16x896xbf16, #tpu.memory_space<vmem>>, vector<1x16x512xbf16>
    %366 = vector.shape_cast %365 : vector<1x16x512xbf16> to vector<16x512xbf16>
    %c80_468 = arith.constant 80 : index
    %c0_469 = arith.constant 0 : index
    %367 = vector.load %arg5[%c80_468, %c0_469] : memref<176x512xbf16, #tpu.memory_space<vmem>>, vector<16x512xbf16>
    tpu.vector_store %arg5[%c80_468, %c0_469], %366 {strides = array<i32>} : memref<176x512xbf16, #tpu.memory_space<vmem>>, vector<16x512xbf16>,
    %c0_470 = arith.constant 0 : index
    %c0_471 = arith.constant 0 : index
    %c214 = arith.constant 214 : index
    %368 = vector.load %arg1[%c0_470, %c0_471, %c214] : memref<1x16x896xbf16, #tpu.memory_space<vmem>>, vector<1x16x512xbf16>
    %369 = vector.shape_cast %368 : vector<1x16x512xbf16> to vector<16x512xbf16>
    %c96_472 = arith.constant 96 : index
    %c0_473 = arith.constant 0 : index
    %370 = vector.load %arg5[%c96_472, %c0_473] : memref<176x512xbf16, #tpu.memory_space<vmem>>, vector<16x512xbf16>
    tpu.vector_store %arg5[%c96_472, %c0_473], %369 {strides = array<i32>} : memref<176x512xbf16, #tpu.memory_space<vmem>>, vector<16x512xbf16>,
    %c0_474 = arith.constant 0 : index
    %c0_475 = arith.constant 0 : index
    %c215 = arith.constant 215 : index
    %371 = vector.load %arg1[%c0_474, %c0_475, %c215] : memref<1x16x896xbf16, #tpu.memory_space<vmem>>, vector<1x16x512xbf16>
    %372 = vector.shape_cast %371 : vector<1x16x512xbf16> to vector<16x512xbf16>
    %c112_476 = arith.constant 112 : index
    %c0_477 = arith.constant 0 : index
    %373 = vector.load %arg5[%c112_476, %c0_477] : memref<176x512xbf16, #tpu.memory_space<vmem>>, vector<16x512xbf16>
    tpu.vector_store %arg5[%c112_476, %c0_477], %372 {strides = array<i32>} : memref<176x512xbf16, #tpu.memory_space<vmem>>, vector<16x512xbf16>,
    %c0_478 = arith.constant 0 : index
    %c0_479 = arith.constant 0 : index
    %c216 = arith.constant 216 : index
    %374 = vector.load %arg1[%c0_478, %c0_479, %c216] : memref<1x16x896xbf16, #tpu.memory_space<vmem>>, vector<1x16x512xbf16>
    %375 = vector.shape_cast %374 : vector<1x16x512xbf16> to vector<16x512xbf16>
    %c128_480 = arith.constant 128 : index
    %c0_481 = arith.constant 0 : index
    %376 = vector.load %arg5[%c128_480, %c0_481] : memref<176x512xbf16, #tpu.memory_space<vmem>>, vector<16x512xbf16>
    tpu.vector_store %arg5[%c128_480, %c0_481], %375 {strides = array<i32>} : memref<176x512xbf16, #tpu.memory_space<vmem>>, vector<16x512xbf16>,
    %c0_482 = arith.constant 0 : index
    %c0_483 = arith.constant 0 : index
    %c217 = arith.constant 217 : index
    %377 = vector.load %arg1[%c0_482, %c0_483, %c217] : memref<1x16x896xbf16, #tpu.memory_space<vmem>>, vector<1x16x512xbf16>
    %378 = vector.shape_cast %377 : vector<1x16x512xbf16> to vector<16x512xbf16>
    %c144_484 = arith.constant 144 : index
    %c0_485 = arith.constant 0 : index
    %379 = vector.load %arg5[%c144_484, %c0_485] : memref<176x512xbf16, #tpu.memory_space<vmem>>, vector<16x512xbf16>
    tpu.vector_store %arg5[%c144_484, %c0_485], %378 {strides = array<i32>} : memref<176x512xbf16, #tpu.memory_space<vmem>>, vector<16x512xbf16>,
    %c0_486 = arith.constant 0 : index
    %c0_487 = arith.constant 0 : index
    %c218 = arith.constant 218 : index
    %380 = vector.load %arg1[%c0_486, %c0_487, %c218] : memref<1x16x896xbf16, #tpu.memory_space<vmem>>, vector<1x16x512xbf16>
    %381 = vector.shape_cast %380 : vector<1x16x512xbf16> to vector<16x512xbf16>
    %c160_488 = arith.constant 160 : index
    %c0_489 = arith.constant 0 : index
    %382 = vector.load %arg5[%c160_488, %c0_489] : memref<176x512xbf16, #tpu.memory_space<vmem>>, vector<16x512xbf16>
    tpu.vector_store %arg5[%c160_488, %c0_489], %381 {strides = array<i32>} : memref<176x512xbf16, #tpu.memory_space<vmem>>, vector<16x512xbf16>,
    %c0_490 = arith.constant 0 : index
    %c0_491 = arith.constant 0 : index
    %c0_492 = arith.constant 0 : index
    %383 = vector.load %arg4[%c0_490, %c0_491, %c0_492] : memref<1x8x512xf32, #tpu.memory_space<vmem>>, vector<1x8x512xf32>
    %384 = vector.shape_cast %383 : vector<1x8x512xf32> to vector<8x512xf32>
    %c8_493 = arith.constant 8 : index
    %c0_494 = arith.constant 0 : index
    %c0_495 = arith.constant 0 : index
    %385 = vector.load %arg2[%c8_493, %c0_494, %c0_495] : memref<11x8x176xbf16, #tpu.memory_space<vmem>>, vector<1x8x176xbf16>
    %386 = vector.shape_cast %385 : vector<1x8x176xbf16> to vector<8x176xbf16>
    %c0_496 = arith.constant 0 : index
    %c0_497 = arith.constant 0 : index
    %387 = vector.load %arg5[%c0_496, %c0_497] : memref<176x512xbf16, #tpu.memory_space<vmem>>, vector<176x512xbf16>
    %cst_498 = arith.constant dense<0.000000e+00> : vector<8x512xf32>
    %388 = tpu.matmul %386, %387, %cst_498 {dimension_numbers = #tpu.dot_dimension_numbers<[1], [0], [0], [1], [0, 0, 1, 1], [], []>} : vector<8x176xbf16>, vector<176x512xbf16>, vector<8x512xf32> -> vector<8x512xf32>
    %389 = arith.addf %384, %388 : vector<8x512xf32>
    %c0_499 = arith.constant 0 : index
    %c0_500 = arith.constant 0 : index
    %c0_501 = arith.constant 0 : index
    %390 = vector.load %arg4[%c0_499, %c0_500, %c0_501] : memref<1x8x512xf32, #tpu.memory_space<vmem>>, vector<1x8x512xf32>
    %391 = vector.shape_cast %390 : vector<1x8x512xf32> to vector<8x512xf32>
    %392 = vector.shape_cast %389 : vector<8x512xf32> to vector<1x8x512xf32>
    tpu.vector_store %arg4[%c0_499, %c0_500, %c0_501], %392 {strides = array<i32>} : memref<1x8x512xf32, #tpu.memory_space<vmem>>, vector<1x8x512xf32>,
    %c0_502 = arith.constant 0 : index
    %c0_503 = arith.constant 0 : index
    %c234 = arith.constant 234 : index
    %393 = vector.load %arg1[%c0_502, %c0_503, %c234] : memref<1x16x896xbf16, #tpu.memory_space<vmem>>, vector<1x16x512xbf16>
    %394 = vector.shape_cast %393 : vector<1x16x512xbf16> to vector<16x512xbf16>
    %c0_504 = arith.constant 0 : index
    %c0_505 = arith.constant 0 : index
    %395 = vector.load %arg5[%c0_504, %c0_505] : memref<176x512xbf16, #tpu.memory_space<vmem>>, vector<16x512xbf16>
    tpu.vector_store %arg5[%c0_504, %c0_505], %394 {strides = array<i32>} : memref<176x512xbf16, #tpu.memory_space<vmem>>, vector<16x512xbf16>,
    %c0_506 = arith.constant 0 : index
    %c0_507 = arith.constant 0 : index
    %c235 = arith.constant 235 : index
    %396 = vector.load %arg1[%c0_506, %c0_507, %c235] : memref<1x16x896xbf16, #tpu.memory_space<vmem>>, vector<1x16x512xbf16>
    %397 = vector.shape_cast %396 : vector<1x16x512xbf16> to vector<16x512xbf16>
    %c16_508 = arith.constant 16 : index
    %c0_509 = arith.constant 0 : index
    %398 = vector.load %arg5[%c16_508, %c0_509] : memref<176x512xbf16, #tpu.memory_space<vmem>>, vector<16x512xbf16>
    tpu.vector_store %arg5[%c16_508, %c0_509], %397 {strides = array<i32>} : memref<176x512xbf16, #tpu.memory_space<vmem>>, vector<16x512xbf16>,
    %c0_510 = arith.constant 0 : index
    %c0_511 = arith.constant 0 : index
    %c236 = arith.constant 236 : index
    %399 = vector.load %arg1[%c0_510, %c0_511, %c236] : memref<1x16x896xbf16, #tpu.memory_space<vmem>>, vector<1x16x512xbf16>
    %400 = vector.shape_cast %399 : vector<1x16x512xbf16> to vector<16x512xbf16>
    %c32_512 = arith.constant 32 : index
    %c0_513 = arith.constant 0 : index
    %401 = vector.load %arg5[%c32_512, %c0_513] : memref<176x512xbf16, #tpu.memory_space<vmem>>, vector<16x512xbf16>
    tpu.vector_store %arg5[%c32_512, %c0_513], %400 {strides = array<i32>} : memref<176x512xbf16, #tpu.memory_space<vmem>>, vector<16x512xbf16>,
    %c0_514 = arith.constant 0 : index
    %c0_515 = arith.constant 0 : index
    %c237 = arith.constant 237 : index
    %402 = vector.load %arg1[%c0_514, %c0_515, %c237] : memref<1x16x896xbf16, #tpu.memory_space<vmem>>, vector<1x16x512xbf16>
    %403 = vector.shape_cast %402 : vector<1x16x512xbf16> to vector<16x512xbf16>
    %c48_516 = arith.constant 48 : index
    %c0_517 = arith.constant 0 : index
    %404 = vector.load %arg5[%c48_516, %c0_517] : memref<176x512xbf16, #tpu.memory_space<vmem>>, vector<16x512xbf16>
    tpu.vector_store %arg5[%c48_516, %c0_517], %403 {strides = array<i32>} : memref<176x512xbf16, #tpu.memory_space<vmem>>, vector<16x512xbf16>,
    %c0_518 = arith.constant 0 : index
    %c0_519 = arith.constant 0 : index
    %c238 = arith.constant 238 : index
    %405 = vector.load %arg1[%c0_518, %c0_519, %c238] : memref<1x16x896xbf16, #tpu.memory_space<vmem>>, vector<1x16x512xbf16>
    %406 = vector.shape_cast %405 : vector<1x16x512xbf16> to vector<16x512xbf16>
    %c64_520 = arith.constant 64 : index
    %c0_521 = arith.constant 0 : index
    %407 = vector.load %arg5[%c64_520, %c0_521] : memref<176x512xbf16, #tpu.memory_space<vmem>>, vector<16x512xbf16>
    tpu.vector_store %arg5[%c64_520, %c0_521], %406 {strides = array<i32>} : memref<176x512xbf16, #tpu.memory_space<vmem>>, vector<16x512xbf16>,
    %c0_522 = arith.constant 0 : index
    %c0_523 = arith.constant 0 : index
    %c239 = arith.constant 239 : index
    %408 = vector.load %arg1[%c0_522, %c0_523, %c239] : memref<1x16x896xbf16, #tpu.memory_space<vmem>>, vector<1x16x512xbf16>
    %409 = vector.shape_cast %408 : vector<1x16x512xbf16> to vector<16x512xbf16>
    %c80_524 = arith.constant 80 : index
    %c0_525 = arith.constant 0 : index
    %410 = vector.load %arg5[%c80_524, %c0_525] : memref<176x512xbf16, #tpu.memory_space<vmem>>, vector<16x512xbf16>
    tpu.vector_store %arg5[%c80_524, %c0_525], %409 {strides = array<i32>} : memref<176x512xbf16, #tpu.memory_space<vmem>>, vector<16x512xbf16>,
    %c0_526 = arith.constant 0 : index
    %c0_527 = arith.constant 0 : index
    %c240 = arith.constant 240 : index
    %411 = vector.load %arg1[%c0_526, %c0_527, %c240] : memref<1x16x896xbf16, #tpu.memory_space<vmem>>, vector<1x16x512xbf16>
    %412 = vector.shape_cast %411 : vector<1x16x512xbf16> to vector<16x512xbf16>
    %c96_528 = arith.constant 96 : index
    %c0_529 = arith.constant 0 : index
    %413 = vector.load %arg5[%c96_528, %c0_529] : memref<176x512xbf16, #tpu.memory_space<vmem>>, vector<16x512xbf16>
    tpu.vector_store %arg5[%c96_528, %c0_529], %412 {strides = array<i32>} : memref<176x512xbf16, #tpu.memory_space<vmem>>, vector<16x512xbf16>,
    %c0_530 = arith.constant 0 : index
    %c0_531 = arith.constant 0 : index
    %c241 = arith.constant 241 : index
    %414 = vector.load %arg1[%c0_530, %c0_531, %c241] : memref<1x16x896xbf16, #tpu.memory_space<vmem>>, vector<1x16x512xbf16>
    %415 = vector.shape_cast %414 : vector<1x16x512xbf16> to vector<16x512xbf16>
    %c112_532 = arith.constant 112 : index
    %c0_533 = arith.constant 0 : index
    %416 = vector.load %arg5[%c112_532, %c0_533] : memref<176x512xbf16, #tpu.memory_space<vmem>>, vector<16x512xbf16>
    tpu.vector_store %arg5[%c112_532, %c0_533], %415 {strides = array<i32>} : memref<176x512xbf16, #tpu.memory_space<vmem>>, vector<16x512xbf16>,
    %c0_534 = arith.constant 0 : index
    %c0_535 = arith.constant 0 : index
    %c242 = arith.constant 242 : index
    %417 = vector.load %arg1[%c0_534, %c0_535, %c242] : memref<1x16x896xbf16, #tpu.memory_space<vmem>>, vector<1x16x512xbf16>
    %418 = vector.shape_cast %417 : vector<1x16x512xbf16> to vector<16x512xbf16>
    %c128_536 = arith.constant 128 : index
    %c0_537 = arith.constant 0 : index
    %419 = vector.load %arg5[%c128_536, %c0_537] : memref<176x512xbf16, #tpu.memory_space<vmem>>, vector<16x512xbf16>
    tpu.vector_store %arg5[%c128_536, %c0_537], %418 {strides = array<i32>} : memref<176x512xbf16, #tpu.memory_space<vmem>>, vector<16x512xbf16>,
    %c0_538 = arith.constant 0 : index
    %c0_539 = arith.constant 0 : index
    %c243 = arith.constant 243 : index
    %420 = vector.load %arg1[%c0_538, %c0_539, %c243] : memref<1x16x896xbf16, #tpu.memory_space<vmem>>, vector<1x16x512xbf16>
    %421 = vector.shape_cast %420 : vector<1x16x512xbf16> to vector<16x512xbf16>
    %c144_540 = arith.constant 144 : index
    %c0_541 = arith.constant 0 : index
    %422 = vector.load %arg5[%c144_540, %c0_541] : memref<176x512xbf16, #tpu.memory_space<vmem>>, vector<16x512xbf16>
    tpu.vector_store %arg5[%c144_540, %c0_541], %421 {strides = array<i32>} : memref<176x512xbf16, #tpu.memory_space<vmem>>, vector<16x512xbf16>,
    %c0_542 = arith.constant 0 : index
    %c0_543 = arith.constant 0 : index
    %c244 = arith.constant 244 : index
    %423 = vector.load %arg1[%c0_542, %c0_543, %c244] : memref<1x16x896xbf16, #tpu.memory_space<vmem>>, vector<1x16x512xbf16>
    %424 = vector.shape_cast %423 : vector<1x16x512xbf16> to vector<16x512xbf16>
    %c160_544 = arith.constant 160 : index
    %c0_545 = arith.constant 0 : index
    %425 = vector.load %arg5[%c160_544, %c0_545] : memref<176x512xbf16, #tpu.memory_space<vmem>>, vector<16x512xbf16>
    tpu.vector_store %arg5[%c160_544, %c0_545], %424 {strides = array<i32>} : memref<176x512xbf16, #tpu.memory_space<vmem>>, vector<16x512xbf16>,
    %c0_546 = arith.constant 0 : index
    %c0_547 = arith.constant 0 : index
    %c0_548 = arith.constant 0 : index
    %426 = vector.load %arg4[%c0_546, %c0_547, %c0_548] : memref<1x8x512xf32, #tpu.memory_space<vmem>>, vector<1x8x512xf32>
    %427 = vector.shape_cast %426 : vector<1x8x512xf32> to vector<8x512xf32>
    %c9_549 = arith.constant 9 : index
    %c0_550 = arith.constant 0 : index
    %c0_551 = arith.constant 0 : index
    %428 = vector.load %arg2[%c9_549, %c0_550, %c0_551] : memref<11x8x176xbf16, #tpu.memory_space<vmem>>, vector<1x8x176xbf16>
    %429 = vector.shape_cast %428 : vector<1x8x176xbf16> to vector<8x176xbf16>
    %c0_552 = arith.constant 0 : index
    %c0_553 = arith.constant 0 : index
    %430 = vector.load %arg5[%c0_552, %c0_553] : memref<176x512xbf16, #tpu.memory_space<vmem>>, vector<176x512xbf16>
    %cst_554 = arith.constant dense<0.000000e+00> : vector<8x512xf32>
    %431 = tpu.matmul %429, %430, %cst_554 {dimension_numbers = #tpu.dot_dimension_numbers<[1], [0], [0], [1], [0, 0, 1, 1], [], []>} : vector<8x176xbf16>, vector<176x512xbf16>, vector<8x512xf32> -> vector<8x512xf32>
    %432 = arith.addf %427, %431 : vector<8x512xf32>
    %c0_555 = arith.constant 0 : index
    %c0_556 = arith.constant 0 : index
    %c0_557 = arith.constant 0 : index
    %433 = vector.load %arg4[%c0_555, %c0_556, %c0_557] : memref<1x8x512xf32, #tpu.memory_space<vmem>>, vector<1x8x512xf32>
    %434 = vector.shape_cast %433 : vector<1x8x512xf32> to vector<8x512xf32>
    %435 = vector.shape_cast %432 : vector<8x512xf32> to vector<1x8x512xf32>
    tpu.vector_store %arg4[%c0_555, %c0_556, %c0_557], %435 {strides = array<i32>} : memref<1x8x512xf32, #tpu.memory_space<vmem>>, vector<1x8x512xf32>,
    %c0_558 = arith.constant 0 : index
    %c0_559 = arith.constant 0 : index
    %c260 = arith.constant 260 : index
    %436 = vector.load %arg1[%c0_558, %c0_559, %c260] : memref<1x16x896xbf16, #tpu.memory_space<vmem>>, vector<1x16x512xbf16>
    %437 = vector.shape_cast %436 : vector<1x16x512xbf16> to vector<16x512xbf16>
    %c0_560 = arith.constant 0 : index
    %c0_561 = arith.constant 0 : index
    %438 = vector.load %arg5[%c0_560, %c0_561] : memref<176x512xbf16, #tpu.memory_space<vmem>>, vector<16x512xbf16>
    tpu.vector_store %arg5[%c0_560, %c0_561], %437 {strides = array<i32>} : memref<176x512xbf16, #tpu.memory_space<vmem>>, vector<16x512xbf16>,
    %c0_562 = arith.constant 0 : index
    %c0_563 = arith.constant 0 : index
    %c261 = arith.constant 261 : index
    %439 = vector.load %arg1[%c0_562, %c0_563, %c261] : memref<1x16x896xbf16, #tpu.memory_space<vmem>>, vector<1x16x512xbf16>
    %440 = vector.shape_cast %439 : vector<1x16x512xbf16> to vector<16x512xbf16>
    %c16_564 = arith.constant 16 : index
    %c0_565 = arith.constant 0 : index
    %441 = vector.load %arg5[%c16_564, %c0_565] : memref<176x512xbf16, #tpu.memory_space<vmem>>, vector<16x512xbf16>
    tpu.vector_store %arg5[%c16_564, %c0_565], %440 {strides = array<i32>} : memref<176x512xbf16, #tpu.memory_space<vmem>>, vector<16x512xbf16>,
    %c0_566 = arith.constant 0 : index
    %c0_567 = arith.constant 0 : index
    %c262 = arith.constant 262 : index
    %442 = vector.load %arg1[%c0_566, %c0_567, %c262] : memref<1x16x896xbf16, #tpu.memory_space<vmem>>, vector<1x16x512xbf16>
    %443 = vector.shape_cast %442 : vector<1x16x512xbf16> to vector<16x512xbf16>
    %c32_568 = arith.constant 32 : index
    %c0_569 = arith.constant 0 : index
    %444 = vector.load %arg5[%c32_568, %c0_569] : memref<176x512xbf16, #tpu.memory_space<vmem>>, vector<16x512xbf16>
    tpu.vector_store %arg5[%c32_568, %c0_569], %443 {strides = array<i32>} : memref<176x512xbf16, #tpu.memory_space<vmem>>, vector<16x512xbf16>,
    %c0_570 = arith.constant 0 : index
    %c0_571 = arith.constant 0 : index
    %c263 = arith.constant 263 : index
    %445 = vector.load %arg1[%c0_570, %c0_571, %c263] : memref<1x16x896xbf16, #tpu.memory_space<vmem>>, vector<1x16x512xbf16>
    %446 = vector.shape_cast %445 : vector<1x16x512xbf16> to vector<16x512xbf16>
    %c48_572 = arith.constant 48 : index
    %c0_573 = arith.constant 0 : index
    %447 = vector.load %arg5[%c48_572, %c0_573] : memref<176x512xbf16, #tpu.memory_space<vmem>>, vector<16x512xbf16>
    tpu.vector_store %arg5[%c48_572, %c0_573], %446 {strides = array<i32>} : memref<176x512xbf16, #tpu.memory_space<vmem>>, vector<16x512xbf16>,
    %c0_574 = arith.constant 0 : index
    %c0_575 = arith.constant 0 : index
    %c264 = arith.constant 264 : index
    %448 = vector.load %arg1[%c0_574, %c0_575, %c264] : memref<1x16x896xbf16, #tpu.memory_space<vmem>>, vector<1x16x512xbf16>
    %449 = vector.shape_cast %448 : vector<1x16x512xbf16> to vector<16x512xbf16>
    %c64_576 = arith.constant 64 : index
    %c0_577 = arith.constant 0 : index
    %450 = vector.load %arg5[%c64_576, %c0_577] : memref<176x512xbf16, #tpu.memory_space<vmem>>, vector<16x512xbf16>
    tpu.vector_store %arg5[%c64_576, %c0_577], %449 {strides = array<i32>} : memref<176x512xbf16, #tpu.memory_space<vmem>>, vector<16x512xbf16>,
    %c0_578 = arith.constant 0 : index
    %c0_579 = arith.constant 0 : index
    %c265 = arith.constant 265 : index
    %451 = vector.load %arg1[%c0_578, %c0_579, %c265] : memref<1x16x896xbf16, #tpu.memory_space<vmem>>, vector<1x16x512xbf16>
    %452 = vector.shape_cast %451 : vector<1x16x512xbf16> to vector<16x512xbf16>
    %c80_580 = arith.constant 80 : index
    %c0_581 = arith.constant 0 : index
    %453 = vector.load %arg5[%c80_580, %c0_581] : memref<176x512xbf16, #tpu.memory_space<vmem>>, vector<16x512xbf16>
    tpu.vector_store %arg5[%c80_580, %c0_581], %452 {strides = array<i32>} : memref<176x512xbf16, #tpu.memory_space<vmem>>, vector<16x512xbf16>,
    %c0_582 = arith.constant 0 : index
    %c0_583 = arith.constant 0 : index
    %c266 = arith.constant 266 : index
    %454 = vector.load %arg1[%c0_582, %c0_583, %c266] : memref<1x16x896xbf16, #tpu.memory_space<vmem>>, vector<1x16x512xbf16>
    %455 = vector.shape_cast %454 : vector<1x16x512xbf16> to vector<16x512xbf16>
    %c96_584 = arith.constant 96 : index
    %c0_585 = arith.constant 0 : index
    %456 = vector.load %arg5[%c96_584, %c0_585] : memref<176x512xbf16, #tpu.memory_space<vmem>>, vector<16x512xbf16>
    tpu.vector_store %arg5[%c96_584, %c0_585], %455 {strides = array<i32>} : memref<176x512xbf16, #tpu.memory_space<vmem>>, vector<16x512xbf16>,
    %c0_586 = arith.constant 0 : index
    %c0_587 = arith.constant 0 : index
    %c267 = arith.constant 267 : index
    %457 = vector.load %arg1[%c0_586, %c0_587, %c267] : memref<1x16x896xbf16, #tpu.memory_space<vmem>>, vector<1x16x512xbf16>
    %458 = vector.shape_cast %457 : vector<1x16x512xbf16> to vector<16x512xbf16>
    %c112_588 = arith.constant 112 : index
    %c0_589 = arith.constant 0 : index
    %459 = vector.load %arg5[%c112_588, %c0_589] : memref<176x512xbf16, #tpu.memory_space<vmem>>, vector<16x512xbf16>
    tpu.vector_store %arg5[%c112_588, %c0_589], %458 {strides = array<i32>} : memref<176x512xbf16, #tpu.memory_space<vmem>>, vector<16x512xbf16>,
    %c0_590 = arith.constant 0 : index
    %c0_591 = arith.constant 0 : index
    %c268 = arith.constant 268 : index
    %460 = vector.load %arg1[%c0_590, %c0_591, %c268] : memref<1x16x896xbf16, #tpu.memory_space<vmem>>, vector<1x16x512xbf16>
    %461 = vector.shape_cast %460 : vector<1x16x512xbf16> to vector<16x512xbf16>
    %c128_592 = arith.constant 128 : index
    %c0_593 = arith.constant 0 : index
    %462 = vector.load %arg5[%c128_592, %c0_593] : memref<176x512xbf16, #tpu.memory_space<vmem>>, vector<16x512xbf16>
    tpu.vector_store %arg5[%c128_592, %c0_593], %461 {strides = array<i32>} : memref<176x512xbf16, #tpu.memory_space<vmem>>, vector<16x512xbf16>,
    %c0_594 = arith.constant 0 : index
    %c0_595 = arith.constant 0 : index
    %c269 = arith.constant 269 : index
    %463 = vector.load %arg1[%c0_594, %c0_595, %c269] : memref<1x16x896xbf16, #tpu.memory_space<vmem>>, vector<1x16x512xbf16>
    %464 = vector.shape_cast %463 : vector<1x16x512xbf16> to vector<16x512xbf16>
    %c144_596 = arith.constant 144 : index
    %c0_597 = arith.constant 0 : index
    %465 = vector.load %arg5[%c144_596, %c0_597] : memref<176x512xbf16, #tpu.memory_space<vmem>>, vector<16x512xbf16>
    tpu.vector_store %arg5[%c144_596, %c0_597], %464 {strides = array<i32>} : memref<176x512xbf16, #tpu.memory_space<vmem>>, vector<16x512xbf16>,
    %c0_598 = arith.constant 0 : index
    %c0_599 = arith.constant 0 : index
    %c270 = arith.constant 270 : index
    %466 = vector.load %arg1[%c0_598, %c0_599, %c270] : memref<1x16x896xbf16, #tpu.memory_space<vmem>>, vector<1x16x512xbf16>
    %467 = vector.shape_cast %466 : vector<1x16x512xbf16> to vector<16x512xbf16>
    %c160_600 = arith.constant 160 : index
    %c0_601 = arith.constant 0 : index
    %468 = vector.load %arg5[%c160_600, %c0_601] : memref<176x512xbf16, #tpu.memory_space<vmem>>, vector<16x512xbf16>
    tpu.vector_store %arg5[%c160_600, %c0_601], %467 {strides = array<i32>} : memref<176x512xbf16, #tpu.memory_space<vmem>>, vector<16x512xbf16>,
    %c0_602 = arith.constant 0 : index
    %c0_603 = arith.constant 0 : index
    %c0_604 = arith.constant 0 : index
    %469 = vector.load %arg4[%c0_602, %c0_603, %c0_604] : memref<1x8x512xf32, #tpu.memory_space<vmem>>, vector<1x8x512xf32>
    %470 = vector.shape_cast %469 : vector<1x8x512xf32> to vector<8x512xf32>
    %c10_605 = arith.constant 10 : index
    %c0_606 = arith.constant 0 : index
    %c0_607 = arith.constant 0 : index
    %471 = vector.load %arg2[%c10_605, %c0_606, %c0_607] : memref<11x8x176xbf16, #tpu.memory_space<vmem>>, vector<1x8x176xbf16>
    %472 = vector.shape_cast %471 : vector<1x8x176xbf16> to vector<8x176xbf16>
    %c0_608 = arith.constant 0 : index
    %c0_609 = arith.constant 0 : index
    %473 = vector.load %arg5[%c0_608, %c0_609] : memref<176x512xbf16, #tpu.memory_space<vmem>>, vector<176x512xbf16>
    %cst_610 = arith.constant dense<0.000000e+00> : vector<8x512xf32>
    %474 = tpu.matmul %472, %473, %cst_610 {dimension_numbers = #tpu.dot_dimension_numbers<[1], [0], [0], [1], [0, 0, 1, 1], [], []>} : vector<8x176xbf16>, vector<176x512xbf16>, vector<8x512xf32> -> vector<8x512xf32>
    %475 = arith.addf %470, %474 : vector<8x512xf32>
    %c0_611 = arith.constant 0 : index
    %c0_612 = arith.constant 0 : index
    %c0_613 = arith.constant 0 : index
    %476 = vector.load %arg4[%c0_611, %c0_612, %c0_613] : memref<1x8x512xf32, #tpu.memory_space<vmem>>, vector<1x8x512xf32>
    %477 = vector.shape_cast %476 : vector<1x8x512xf32> to vector<8x512xf32>
    %478 = vector.shape_cast %475 : vector<8x512xf32> to vector<1x8x512xf32>
    tpu.vector_store %arg4[%c0_611, %c0_612, %c0_613], %478 {strides = array<i32>} : memref<1x8x512xf32, #tpu.memory_space<vmem>>, vector<1x8x512xf32>,
    return
  }
  func.func @transform_0(%arg0: i32) -> (i32, i32, i32) {
    %c0_i32 = arith.constant 0 : i32
    %c0_i32_0 = arith.constant 0 : i32
    %c0_i32_1 = arith.constant 0 : i32
    return %arg0, %c0_i32, %c0_i32_0 : i32, i32, i32
  }
  func.func @transform_1(%arg0: i32) -> (i32, i32, i32) {
    %c0_i32 = arith.constant 0 : i32
    %c0_i32_0 = arith.constant 0 : i32
    %c0_i32_1 = arith.constant 0 : i32
    %c0_i32_2 = arith.constant 0 : i32
    return %c0_i32, %c0_i32_0, %c0_i32_1 : i32, i32, i32
  }
  func.func @transform_2(%arg0: i32) -> (i32, i32) {
    %c0_i32 = arith.constant 0 : i32
    %c0_i32_0 = arith.constant 0 : i32
    %c0_i32_1 = arith.constant 0 : i32
    return %c0_i32, %c0_i32_0 : i32, i32
  }
  func.func @transform_3(%arg0: i32) -> (i32, i32, i32) {
    %c0_i32 = arith.constant 0 : i32
    %c0_i32_0 = arith.constant 0 : i32
    %c0_i32_1 = arith.constant 0 : i32
    return %arg0, %c0_i32, %c0_i32_0 : i32, i32, i32
  }
}

</mosaic_0001>

<bundles_post_ra>
// kernel: tpu_custom_call.1
= control target key start
LH: loop header
LB: loop body
LE: loop exit
PB: predicated region body
PF: predicated region fallthrough
CT: control target
= control target key end

     0   :  { %8 = vsyncpa [#allocation4], 0  ;;  %s15973_s0 = inlined_call_operand.hbm [shape: bf16[2,16,896], index: 0, kind: input, shape index: {}]   ;;  %s15974_s1 = inlined_call_operand.hbm [shape: bf16[11,8,176], index: 1, kind: input, shape index: {}]   ;;  %s15975_s2 = inlined_call_operand.vmem [shape: f32[8,1], index: 2, kind: input, shape index: {}]   ;;  %s15976_s3 = inlined_call_operand.hbm [shape: f32[2,8,512], index: 3, kind: output, shape index: {}]  }
   0x1   :  { %10 = vsyncpa [#allocation4 + $0x1], 0 }
   0x2   :  { %11 = vsyncpa [#allocation7], 0 }
   0x3   :  { %12 = vsyncpa [#allocation5], 0 }
   0x4   :  { %14 = vsyncpa [#allocation5 + $0x1], 0  ;;  %s10885_s12 = smov 0   ;;  %s10887_s13 = smov 0  }
   0x5   :  { %s10889_s14 = smov 0   ;;  %s10891_s15 = smov 0  }
   0x6 LB: > { %s10906_s16 = sadd.s32 4294967295, %s10789_s15   ;;  %s9964_s17 = sadd.s32 4294967294, %s10789_s15   ;;  %s10789_s15 = sphi %s10891_s15, %s16803_s15   ;;  %s10785_s14 = sphi %s10889_s14, %s16802_s14   ;;  %s10781_s13 = sphi %s10887_s13, %s16801_s13   ;;  %s10777_s12 = sphi %s10885_s12, %s16800_s12  }
   0x7   : > { %p40_p0 = scmp.ne.s32.totalorder %s10781_s13, %s10777_s12  ;;  %p15977_p1 = scmp.eq.s32.totalorder %s10906_s16, 0 }
   0x8   : > { %p112_p3 = scmp.eq.s32.totalorder %s9964_s17, 1  ;;  %p9965_p5 = scmp.ge.s32.totalorder %s10789_s15, 1 }
   0x9   : > { %p10915_p4 = por %p15977_p1, %p40_p0  ;;  %p119_p7 = scmp.lt.s32.totalorder %s10789_s15, 3 }
   0xa   : > { %p10920_p6 = por %p112_p3, %p40_p0  ;;  %s10791_s21 = smov [#allocation6]  }
   0xb   : > { %s16180_s18 = scalar_select %p10915_p4, 1, 0 }
   0xc   : > { %s16181_s19 = scalar_select %p10920_p6, 1, 0 }
   0xd   : > { %p10925_p8 = pnand %p9965_p5, %p119_p7  ;;  %s131_s22 = sshll.u32 %s10791_s21, 4  ;;  %s132_s22 = int_to_ptr.vmem [resolvable:$true] %s131_s22 }
   0xe   : > { %s10939_s24 = sadd.s32 1, %s10789_s15   ;;  %s27_s25 = sadd.s32 1, %s10785_s14 }
   0xf   : > { %s16182_s20 = scalar_select %p10925_p8, 1, 0 }
  0x10   : > { %p10517_p9 = pneg %p10925_p8  ;;  %s24_s26 = ssub.s32 %s10789_s15, %s10939_s24 }
  0x11   : > { %s10678_s27 = scalar_lea.vmem %s132_s22, 1408  ;;  %p10686_p5 = scmp.lt.s32.totalorder %s132_s22, %s132_s22 }
  0x12   : > { %p10934_p11 = pnand %p10517_p9, %p15977_p1  ;;  %p10679_p13 = scmp.ne.s32.totalorder %s132_s22, %s10678_s27 }
  0x13   : > { %p10687_p7 = scmp.lt.s32.totalorder %s10678_s27, %s10678_s27 }
  0x14   : > { %p10669_p12 = pneg %p10934_p11 }
  0x15   : > { %p10688_p10 = por %p10687_p7, %p10686_p5 }
  0x16   : > { %p10681_p0 = pnand %p10679_p13, %p10669_p12 }
  0x18   : > { %p10682_p3 = pneg %p10681_p0 }
  0x1a   : > { %p10689_p2 = pnand %p10688_p10, %p10682_p3 }
  0x1c   : > { %10692 = shalt.err (!%p10689_p2)
}
  0x1d   : > { %s10792_s28 = smov 128   ;;  %s10793_s29 = smov 8  }
  0x1e   : > { %10520 = dma.hbm_to_vmem [thread:$0]  (!%p10934_p11), %s15974_s1, 1408, %s132_s22, [#allocation7], %s10792_s28, %s10792_s28, %s10793_s29  }
  0x1f   : > { %p25_p9 = scmp.eq.s32.totalorder %s24_s26, 0  ;;  %p34_p12 = scmp.ne.s32.totalorder %s10785_s14, %s10781_s13 }
  0x20   : > { %p35_p10 = scmp.eq.s32.totalorder %s10789_s15, 0  ;;  %p10530_p2 = scmp.lt.s32.totalorder %s10789_s15, 2 }
  0x21   : > { %s10956_s5 = scalar_select %p25_p9, %s10785_s14, %s27_s25  }
  0x22   : > { %p36_p13 = por %p35_p10, %p34_p12  ;;  %p16184_p0 = scmp.eq.s32.totalorder %s10906_s16, 1 }
  0x23   : > { %s148_s7 = sand.u32 1, %s10785_s14   ;;  %s10507_s8 = smul.u32 896, %s10789_s15 }
  0x24   : > { %p10960_p3 = por %p16184_p0, %p34_p12  ;;  %s10506_s9 = smul.u32 56, %s148_s7 }
  0x25   : > { %s10969_s17 = scalar_lea.hbm %s15973_s0, %s10507_s8  ;;  %p10971_p11 = pnand %p10530_p2, %p36_p13 }
  0x26   : > { %s16185_s6 = scalar_select %p10960_p3, 1, 0 }
  0x27   : > { %s152_s22 = scalar_lea.vmem [#allocation3], %s10506_s9  ;;  %s10977_s25 = scalar_lea.sflag [#allocation4], %s148_s7 }
  0x28   : > { %s159_s23 = sshll.u32 %s152_s22, 4  ;;  %s10693_s26 = scalar_lea.hbm %s10969_s17, 896  ;;  %s10975_s23 = int_to_ptr.vmem [resolvable:$true] %s159_s23 }
  0x29   : > { %p10694_p5 = scmp.ne.s32.totalorder %s10969_s17, %s10693_s26  ;;  %p10695_p7 = pneg %p10971_p11 }
  0x2a   : > { %s10698_s29 = scalar_lea.hbm %s15973_s0, 1792  ;;  %p10699_p10 = scmp.lt.s32.totalorder %s10969_s17, %s15973_s0 }
  0x2b   : > { %p10696_p9 = pnand %p10695_p7, %p10694_p5  ;;  %p10700_p2 = scmp.lt.s32.totalorder %s10698_s29, %s10693_s26 }
  0x2d   : > { %p10697_p12 = pneg %p10696_p9  ;;  %p10701_p13 = por %p10700_p2, %p10699_p10 }
  0x2f   : > { %p10702_p0 = pnand %p10701_p13, %p10697_p12 }
  0x31   : > { %10705 = shalt.err (!%p10702_p0)
}
  0x32   : > { %s10706_s7 = scalar_lea.vmem %s10975_s23, 896  ;;  %s10794_s8 = smov [#allocation3]  }
  0x33   : > { %p10707_p1 = scmp.ne.s32.totalorder %s10975_s23, %s10706_s7  ;;  %s10711_s9 = sshll.u32 %s10794_s8, 4  ;;  %s10712_s9 = int_to_ptr.vmem [resolvable:$false] %s10711_s9 }
  0x34   : > { %s10713_s10 = scalar_lea.vmem %s10712_s9, 1792  ;;  %p10714_p9 = scmp.lt.s32.totalorder %s10975_s23, %s10712_s9 }
  0x35   : > { %p10709_p6 = pnand %p10707_p1, %p10695_p7  ;;  %p10715_p3 = scmp.lt.s32.totalorder %s10713_s10, %s10706_s7 }
  0x37   : > { %p10710_p5 = pneg %p10709_p6  ;;  %p10716_p4 = por %p10715_p3, %p10714_p9 }
  0x39   : > { %p10717_p8 = pnand %p10716_p4, %p10710_p5 }
  0x3b   : > { %10720 = shalt.err (!%p10717_p8)
}
  0x3c   : > { %s10795_s11 = smov 448   ;;  %s10796_s22 = smov 28  }
  0x3d   : > { %10524 = dma.hbm_to_vmem [thread:$0]  (!%p10971_p11), %s10969_s17, 896, %s10975_s23, %s10977_s25, %s10795_s11, %s10795_s11, %s10796_s22  }
  0x3e   : > { %p16187_p1 = scmp.ne.s32.totalorder %s16182_s20, 0 }
  0x40   : > { %171 = sbr.rel (%p16187_p1) target bundleno = 1864 (0x748), region = 32 }
  0x45   : > { %s11001_s26 = sand.u32 1, %s10781_s13   ;;  %p16188_p4 = scmp.ne.s32.totalorder %s16180_s18, 0 }
  0x46   : > { %s10508_s27 = smul.u32 56, %s11001_s26  ;;  %s174_s28 = scalar_lea.sflag [#allocation4], %s11001_s26 }
  0x48   : > { %s11005_s29 = scalar_lea.vmem [#allocation3], %s10508_s27 }
  0x49   : > { %10764 = dma.done.wait (%p16188_p4), %s174_s28, 896  }
  0x4a   : > { %10766 = vsyncadd (%p16188_p4), %s174_s28, 4294966400  ;;  %p16189_p6 = scmp.eq.s32.totalorder %s10906_s16, 0 }
  0x4c   : > { %10768 = dma.done.wait (%p16189_p6), [#allocation7], 1408   ;;  %p16190_p8 = pmov %p16189_p6 }
  0x4d   : > { %v10797_v0 = vmov 0   ;;  %v205_v1 = vld [vmem:[%s15975_s2] sm:$0xff]  ;;  %s10798_s18 = smov 127   ;;  %v225_v3 = vld [vmem:[%s11005_s29 + $0x10] sm:$0xf]  ;;  %s10799_s21 = smov 126  }
  0x4e   : > { %10770 = vsyncadd (%p16190_p8), [#allocation7], 4294965888  ;;  %10637 = vset.pattern.permute.xlu0 %v10797_v0  ;;  %v11019_v2 = vld [vmem:[%s11005_s29 + $0x8] sm:$0xff]  ;;  %v11024_v4 = vld [vmem:[%s11005_s29] sm:$0xff]  ;;  %s10800_s23 = smov 125   ;;  %s10801_s25 = smov 124  }
  0x4f   : > { %208 = vperm.xlu0 %10637, %v205_v1   ;;  %237 = vrot.lane.b32.xlu1 %v11019_v2, %s10798_s18  ;;  %v11028_v5 = vld [vmem:[%s11005_s29 + $0x24] sm:$0xff]  ;;  %v11031_v6 = vld [vmem:[%s11005_s29 + $0x1c] sm:$0xff]  ;;  %v228_v7 = vld [vmem:[%s11005_s29 + $0x2c] sm:$0xf]  ;;  %s10802_s30 = smov 123   ;;  %s10803_s4 = smov 122  }
  0x50   : > { %v273_v8 = vld [vmem:[%s11005_s29 + $0x10] sm:$0xf]  ;;  %v276_v9 = vld [vmem:[%s11005_s29 + $0x2c] sm:$0xf]  ;;  %s10804_s7 = smov 121   ;;  %s10805_s8 = smov 120  }
  0x51   : > { %v320_v10 = vld [vmem:[%s11005_s29 + $0x10] sm:$0xf]  ;;  %v323_v11 = vld [vmem:[%s11005_s29 + $0x2c] sm:$0xf]  ;;  %s10806_s9 = smov 119   ;;  %s10807_s10 = smov 118  }
  0x52   : > { %v367_v12 = vld [vmem:[%s11005_s29 + $0x10] sm:$0xf]  ;;  %v370_v13 = vld [vmem:[%s11005_s29 + $0x2c] sm:$0xf]  ;;  %s9971_s11 = sshll.u32 %s11001_s26, 5  ;;  %s10808_s22 = smov 102  }
  0x53   : > { %239 = vrot.lane.b32.xlu1 %v225_v3, %s10798_s18  ;;  %235 = vrot.lane.b32.xlu0 %v11024_v4, %s10798_s18  ;;  %v414_v14 = vld [vmem:[%s11005_s29 + $0x10] sm:$0xf]  ;;  %v417_v15 = vld [vmem:[%s11005_s29 + $0x2c] sm:$0xf]  ;;  %s11153_s27 = scalar_lea.vmem [#allocation8], %s9971_s11  ;;  %vm969_vm0 = vcmask 392192  }
  0x54   : > { %v461_v16 = vld [vmem:[%s11005_s29 + $0x10] sm:$0xf]  ;;  %v464_v17 = vld [vmem:[%s11005_s29 + $0x2c] sm:$0xf]  ;;  %s10809_s28 = smov 101   ;;  %s10810_s20 = smov 100  }
  0x55   : > { %v508_v18 = vld [vmem:[%s11005_s29 + $0x10] sm:$0xf]  ;;  %v511_v19 = vld [vmem:[%s11005_s29 + $0x2c] sm:$0xf]  ;;  %s10811_s17 = smov 99   ;;  %s10813_s11 = smov 97  }
  0x56   : > { %v555_v20 = vld [vmem:[%s11005_s29 + $0x10] sm:$0xf]  ;;  %v558_v21 = vld [vmem:[%s11005_s29 + $0x2c] sm:$0xf]  ;;  %vm253_vm1 = vcmask 1043456   ;;  %vm16163_vm2 = vcmask 998400  }
  0x57   : > { %243 = vrot.lane.b32.xlu1 %v11028_v5, %s10798_s18  ;;  %241 = vrot.lane.b32.xlu0 %v11031_v6, %s10798_s18  ;;  %v602_v22 = vld [vmem:[%s11005_s29 + $0x10] sm:$0xf]  ;;  %v605_v23 = vld [vmem:[%s11005_s29 + $0x2c] sm:$0xf]  ;;  %vm537_vm3 = vcmask 990208   ;;  %vm16157_vm4 = vcmask 1006592  }
  0x58   : > { %v649_v24 = vld [vmem:[%s11005_s29 + $0x10] sm:$0xf]  ;;  %v652_v26 = vld [vmem:[%s11005_s29 + $0x2c] sm:$0xf]  ;;  %vm16144_vm5 = vcmask 1014784   ;;  %vm349_vm6 = vcmask 1022976  }
  0x59   : > { %v1065_v28 = vld [vmem:[%s11005_s29 + $0x10] sm:$0xf]  ;;  %v1068_v35 = vld [vmem:[%s11005_s29 + $0x2c] sm:$0xf]  ;;  %vm302_vm7 = vcmask 1031168   ;;  %vm255_vm8 = vcmask 1039360  }
  0x5a   : > { %v11162_v32 = vld [vmem:[#allocation6] sm:$0xff]  ;;  %v1115_v43 = vld [vmem:[%s11005_s29 + $0x2c] sm:$0xf]  ;;  %vm16018_vm9 = vcmask 965632   ;;  %vm631_vm10 = vcmask 973824   ;;  %vm584_vm11 = vcmask 982016  }
  0x5b   : > { %283 = vrot.lane.b32.xlu1 %v11024_v4, %s10799_s21  ;;  %245 = vrot.lane.b32.xlu0 %v228_v7, %s10798_s18  ;;  %16194 = vst [vmem:[#allocation15_spill] sm:$0xff] %v11162_v32  ;;  %v9973_v34 = vcombine.high %v11162_v32, %v11162_v32  ;;  %v1112_v38 = vld [vmem:[%s11005_s29 + $0x10] sm:$0xf]  ;;  %v1162_v51 = vld [vmem:[%s11005_s29 + $0x2c] sm:$0xf]  ;;  %s10812_s18 = smov 98  }
  0x5c   : > { %v1159_v46 = vld [vmem:[%s11005_s29 + $0x10] sm:$0xf]  ;;  %v1209_v59 = vld [vmem:[%s11005_s29 + $0x2c] sm:$0xf]  ;;  %vm16040_vm12 = vcmask 785408   ;;  %vm16047_vm13 = vcmask 777216  }
  0x5d   : > { %10018 = vmatprep.mubr.msk.bf16.mxu0 %vm969_vm0, %v9973_v34  ;;  %10019 = vmatprep.mubr.msk.bf16.mxu1 %vm969_vm0, %v9973_v34  ;;  %v1206_v54 = vld [vmem:[%s11005_s29 + $0x10] sm:$0xf]  ;;  %v1256_v7 = vld [vmem:[%s11005_s29 + $0x2c] sm:$0xf]  ;;  %vm16039_vm14 = vcmask 793600   ;;  %vm16021_vm15 = vcmask 801792  }
  0x5e   : > { %v1253_v62 = vld [vmem:[%s11005_s29 + $0x10] sm:$0xf]  ;;  %p16797_p11 = scmp.ne.s32.totalorder %s16185_s6, 0 }
  0x5f   : > { %287 = vrot.lane.b32.xlu1 %v273_v8, %s10799_s21  ;;  %285 = vrot.lane.b32.xlu0 %v11019_v2, %s10799_s21 }
  0x63   : > { %291 = vrot.lane.b32.xlu1 %v11028_v5, %s10799_s21  ;;  %289 = vrot.lane.b32.xlu0 %v11031_v6, %s10799_s21 }
  0x67   : > { %330 = vrot.lane.b32.xlu1 %v11024_v4, %s10800_s23  ;;  %293 = vrot.lane.b32.xlu0 %v276_v9, %s10799_s21 }
  0x6b   : > { %334 = vrot.lane.b32.xlu1 %v320_v10, %s10800_s23  ;;  %332 = vrot.lane.b32.xlu0 %v11019_v2, %s10800_s23  ;;  %v1300_v10 = vld [vmem:[%s11005_s29 + $0x10] sm:$0xf] }
  0x6f   : > { %338 = vrot.lane.b32.xlu1 %v11028_v5, %s10800_s23  ;;  %336 = vrot.lane.b32.xlu0 %v11031_v6, %s10800_s23 }
  0x73   : > { %377 = vrot.lane.b32.xlu1 %v11024_v4, %s10801_s25  ;;  %340 = vrot.lane.b32.xlu0 %v323_v11, %s10800_s23 }
  0x77   : > { %381 = vrot.lane.b32.xlu1 %v367_v12, %s10801_s25  ;;  %379 = vrot.lane.b32.xlu0 %v11019_v2, %s10801_s25 }
  0x7b   : > { %385 = vrot.lane.b32.xlu1 %v11028_v5, %s10801_s25  ;;  %383 = vrot.lane.b32.xlu0 %v11031_v6, %s10801_s25 }
  0x7f   : > { %424 = vrot.lane.b32.xlu1 %v11024_v4, %s10802_s30  ;;  %387 = vrot.lane.b32.xlu0 %v370_v13, %s10801_s25 }
  0x83   : > { %428 = vrot.lane.b32.xlu1 %v414_v14, %s10802_s30  ;;  %426 = vrot.lane.b32.xlu0 %v11019_v2, %s10802_s30 }
  0x87   : > { %432 = vrot.lane.b32.xlu1 %v11028_v5, %s10802_s30  ;;  %430 = vrot.lane.b32.xlu0 %v11031_v6, %s10802_s30 }
  0x8b   : > { %471 = vrot.lane.b32.xlu1 %v11024_v4, %s10803_s4  ;;  %434 = vrot.lane.b32.xlu0 %v417_v15, %s10802_s30  ;;  %v1303_v15 = vld [vmem:[%s11005_s29 + $0x2c] sm:$0xf] }
  0x8f   : > { %475 = vrot.lane.b32.xlu1 %v461_v16, %s10803_s4  ;;  %473 = vrot.lane.b32.xlu0 %v11019_v2, %s10803_s4 }
  0x93   : > { %479 = vrot.lane.b32.xlu1 %v11028_v5, %s10803_s4  ;;  %477 = vrot.lane.b32.xlu0 %v11031_v6, %s10803_s4 }
  0x97   : > { %518 = vrot.lane.b32.xlu1 %v11024_v4, %s10804_s7  ;;  %481 = vrot.lane.b32.xlu0 %v464_v17, %s10803_s4 }
  0x9b   : > { %522 = vrot.lane.b32.xlu1 %v508_v18, %s10804_s7  ;;  %520 = vrot.lane.b32.xlu0 %v11019_v2, %s10804_s7  ;;  %v1347_v18 = vld [vmem:[%s11005_s29 + $0x10] sm:$0xf] }
  0x9f   : > { %526 = vrot.lane.b32.xlu1 %v11028_v5, %s10804_s7  ;;  %524 = vrot.lane.b32.xlu0 %v11031_v6, %s10804_s7 }
  0xa3   : > { %565 = vrot.lane.b32.xlu1 %v11024_v4, %s10805_s8  ;;  %528 = vrot.lane.b32.xlu0 %v511_v19, %s10804_s7 }
  0xa7   : > { %569 = vrot.lane.b32.xlu1 %v555_v20, %s10805_s8  ;;  %567 = vrot.lane.b32.xlu0 %v11019_v2, %s10805_s8 }
  0xab   : > { %573 = vrot.lane.b32.xlu1 %v11028_v5, %s10805_s8  ;;  %571 = vrot.lane.b32.xlu0 %v11031_v6, %s10805_s8 }
  0xaf   : > { %612 = vrot.lane.b32.xlu1 %v11024_v4, %s10806_s9  ;;  %575 = vrot.lane.b32.xlu0 %v558_v21, %s10805_s8 }
  0xb3   : > { %616 = vrot.lane.b32.xlu1 %v602_v22, %s10806_s9  ;;  %614 = vrot.lane.b32.xlu0 %v11019_v2, %s10806_s9 }
  0xb7   : > { %620 = vrot.lane.b32.xlu1 %v11028_v5, %s10806_s9  ;;  %618 = vrot.lane.b32.xlu0 %v11031_v6, %s10806_s9 }
  0xbb   : > { %659 = vrot.lane.b32.xlu1 %v11024_v4, %s10807_s10  ;;  %622 = vrot.lane.b32.xlu0 %v605_v23, %s10806_s9  ;;  %v1394_v23 = vld [vmem:[%s11005_s29 + $0x10] sm:$0xf] }
  0xbf   : > { %663 = vrot.lane.b32.xlu1 %v649_v24, %s10807_s10  ;;  %661 = vrot.lane.b32.xlu0 %v11019_v2, %s10807_s10 }
  0xc1   : > { %v11138_v25 = vpop.permute.xlu1 %237 }
  0xc2   : > { %16191 = vst [vmem:[#allocation12_spill] sm:$0xff] %v11138_v25 }
  0xc3   : > { %667 = vrot.lane.b32.xlu1 %v11028_v5, %s10807_s10  ;;  %665 = vrot.lane.b32.xlu0 %v11031_v6, %s10807_s10 }
  0xc5   : > { %v11146_v27 = vpop.permute.xlu1 %239 }
  0xc6   : > { %16192 = vst [vmem:[#allocation13_spill] sm:$0xff] %v11146_v27 }
  0xc7   : > { %1075 = vrot.lane.b32.xlu1 %v11024_v4, %s10808_s22  ;;  %669 = vrot.lane.b32.xlu0 %v652_v26, %s10807_s10 }
  0xc9   : > { %v11151_v29 = vpop.permute.xlu1 %243 }
  0xca   : > { %16193 = vst [vmem:[#allocation14_spill] sm:$0xff] %v11151_v29  ;;  %v209_v30 = vpop.permute.xlu0 %208 }
  0xcb   : > { %211 = vst [vmem:[%s11153_s27] sm:$0xff] %v209_v30  ;;  %212 = vst [vmem:[%s11153_s27 + $0x8] sm:$0xff] %v209_v30  ;;  %1079 = vrot.lane.b32.xlu1 %v1065_v28, %s10808_s22  ;;  %1077 = vrot.lane.b32.xlu0 %v11019_v2, %s10808_s22 }
  0xcc   : > { %213 = vst [vmem:[%s11153_s27 + $0x10] sm:$0xff] %v209_v30  ;;  %214 = vst [vmem:[%s11153_s27 + $0x18] sm:$0xff] %v209_v30 }
  0xcd   : > { %v11160_v31 = vpop.permute.xlu1 %283 }
  0xce   : > { %v11164_v33 = vpop.permute.xlu0 %235 }
  0xcf   : > { %1083 = vrot.lane.b32.xlu1 %v11028_v5, %s10808_s22  ;;  %1081 = vrot.lane.b32.xlu0 %v11031_v6, %s10808_s22 }
  0xd1   : > { %v11173_v36 = vpop.permute.xlu1 %287 }
  0xd2   : > { %16195 = vst [vmem:[#allocation16_spill] sm:$0xff] %v11173_v36  ;;  %v11175_v37 = vpop.permute.xlu0 %241 }
  0xd3   : > { %1122 = vrot.lane.b32.xlu1 %v11024_v4, %s10809_s28  ;;  %1085 = vrot.lane.b32.xlu0 %v1068_v35, %s10808_s22  ;;  %s15988_s22 = smov 96  }
  0xd5   : > { %v11179_v39 = vpop.permute.xlu1 %291 }
  0xd6   : > { %16196 = vst [vmem:[#allocation17_spill] sm:$0xff] %v11179_v39  ;;  %v11181_v40 = vpop.permute.xlu0 %245 }
  0xd7   : > { %16197 = vst [vmem:[#allocation18_spill] sm:$0xff] %v11181_v40  ;;  %1126 = vrot.lane.b32.xlu1 %v1112_v38, %s10809_s28  ;;  %1124 = vrot.lane.b32.xlu0 %v11019_v2, %s10809_s28 }
  0xd9   : > { %v11184_v41 = vpop.permute.xlu1 %330 }
  0xda   : > { %v11186_v42 = vpop.permute.xlu0 %285 }
  0xdb   : > { %1130 = vrot.lane.b32.xlu1 %v11028_v5, %s10809_s28  ;;  %1128 = vrot.lane.b32.xlu0 %v11031_v6, %s10809_s28 }
  0xdd   : > { %v11191_v44 = vpop.permute.xlu1 %334 }
  0xde   : > { %v11193_v45 = vpop.permute.xlu0 %289 }
  0xdf   : > { %1169 = vrot.lane.b32.xlu1 %v11024_v4, %s10810_s20  ;;  %1132 = vrot.lane.b32.xlu0 %v1115_v43, %s10809_s28  ;;  %s15990_s28 = smov 95  }
  0xe1   : > { %v11198_v47 = vpop.permute.xlu1 %338 }
  0xe2   : > { %v11200_v48 = vpop.permute.xlu0 %293 }
  0xe3   : > { %16198 = vst [vmem:[#allocation19_spill] sm:$0xff] %v11200_v48  ;;  %1173 = vrot.lane.b32.xlu1 %v1159_v46, %s10810_s20  ;;  %1171 = vrot.lane.b32.xlu0 %v11019_v2, %s10810_s20 }
  0xe5   : > { %v11205_v49 = vpop.permute.xlu1 %377 }
  0xe6   : > { %v11207_v50 = vpop.permute.xlu0 %332 }
  0xe7   : > { %1177 = vrot.lane.b32.xlu1 %v11028_v5, %s10810_s20  ;;  %1175 = vrot.lane.b32.xlu0 %v11031_v6, %s10810_s20 }
  0xe9   : > { %v11214_v52 = vpop.permute.xlu1 %381 }
  0xea   : > { %v11216_v53 = vpop.permute.xlu0 %336 }
  0xeb   : > { %1216 = vrot.lane.b32.xlu1 %v11024_v4, %s10811_s17  ;;  %1179 = vrot.lane.b32.xlu0 %v1162_v51, %s10810_s20 }
  0xed   : > { %v11222_v55 = vpop.permute.xlu1 %385 }
  0xee   : > { %v11224_v56 = vpop.permute.xlu0 %340 }
  0xef   : > { %1220 = vrot.lane.b32.xlu1 %v1206_v54, %s10811_s17  ;;  %1218 = vrot.lane.b32.xlu0 %v11019_v2, %s10811_s17 }
  0xf1   : > { %v11229_v57 = vpop.permute.xlu1 %424 }
  0xf2   : > { %v11231_v58 = vpop.permute.xlu0 %379  ;;  %v436_v22 = vrot.slane %v11229_v57, 4 }
  0xf3   : > { %1224 = vrot.lane.b32.xlu1 %v11028_v5, %s10811_s17  ;;  %1222 = vrot.lane.b32.xlu0 %v11031_v6, %s10811_s17 }
  0xf5   : > { %v11238_v60 = vpop.permute.xlu1 %428 }
  0xf6   : > { %v11240_v61 = vpop.permute.xlu0 %383 }
  0xf7   : > { %1263 = vrot.lane.b32.xlu1 %v11024_v4, %s10812_s18  ;;  %1226 = vrot.lane.b32.xlu0 %v1209_v59, %s10811_s17  ;;  %v1350_v59 = vld [vmem:[%s11005_s29 + $0x2c] sm:$0xf]  ;;  %v392_v24 = vrot.slane %v11240_v61, 4 }
  0xf9   : > { %v11246_v63 = vpop.permute.xlu1 %432 }
  0xfa   : > { %v11248_v0 = vpop.permute.xlu0 %387  ;;  %v440_v54 = vrot.slane %v11246_v63, 4 }
  0xfb   : > { %1267 = vrot.lane.b32.xlu1 %v1253_v62, %s10812_s18  ;;  %1265 = vrot.lane.b32.xlu0 %v11019_v2, %s10812_s18 }
  0xfd   : > { %v11253_v1 = vpop.permute.xlu1 %471 }
  0xfe   : > { %v11255_v3 = vpop.permute.xlu0 %426 }
  0xff   : > { %1271 = vrot.lane.b32.xlu1 %v11028_v5, %s10812_s18  ;;  %1269 = vrot.lane.b32.xlu0 %v11031_v6, %s10812_s18 }
 0x101   : > { %v11262_v8 = vpop.permute.xlu1 %475 }
 0x102   : > { %v11264_v9 = vpop.permute.xlu0 %430 }
 0x103   : > { %1310 = vrot.lane.b32.xlu1 %v11024_v4, %s10813_s11  ;;  %1273 = vrot.lane.b32.xlu0 %v1256_v7, %s10812_s18  ;;  %v439_v62 = vrot.slane %v11264_v9, 4  ;;  %v483_v7 = vrot.slane %v11253_v1, 4 }
 0x105   : > { %v11270_v11 = vpop.permute.xlu1 %479 }
 0x106   : > { %v11272_v12 = vpop.permute.xlu0 %434  ;;  %v487_v30 = vrot.slane %v11270_v11, 4 }
 0x107   : > { %1314 = vrot.lane.b32.xlu1 %v1300_v10, %s10813_s11  ;;  %1312 = vrot.lane.b32.xlu0 %v11019_v2, %s10813_s11 }
 0x109   : > { %v11277_v13 = vpop.permute.xlu1 %518 }
 0x10a   : > { %v11279_v14 = vpop.permute.xlu0 %473  ;;  %v530_v35 = vrot.slane %v11277_v13, 4 }
 0x10b   : > { %1318 = vrot.lane.b32.xlu1 %v11028_v5, %s10813_s11  ;;  %1316 = vrot.lane.b32.xlu0 %v11031_v6, %s10813_s11  ;;  %v484_v10 = vrot.slane %v11279_v14, 4 }
 0x10d   : > { %v11286_v16 = vpop.permute.xlu1 %522  ;;  %v489_v27 = vsel %vm253_vm1, %v483_v7, %v484_v10 }
 0x10e   : > { %v478_v17 = vpop.permute.xlu0 %477  ;;  %v532_v51 = vrot.slane %v11286_v16, 4  ;;  %v447_v16 = vsel %vm253_vm1, %v439_v62, %v440_v54 }
 0x10f   : > { %1357 = vrot.lane.b32.xlu1 %v11024_v4, %s15988_s22  ;;  %1320 = vrot.lane.b32.xlu0 %v1303_v15, %s10813_s11  ;;  %v486_v34 = vrot.slane %v478_v17, 4 }
 0x111   : > { %v11292_v19 = vpop.permute.xlu1 %526  ;;  %v494_v26 = vsel %vm253_vm1, %v486_v34, %v487_v30  ;;  %v485_v34 = vrot.slane %v11262_v8, 4 }
 0x112   : > { %v482_v20 = vpop.permute.xlu0 %481  ;;  %v534_v15 = vrot.slane %v11292_v19, 4 }
 0x113   : > { %1361 = vrot.lane.b32.xlu1 %v1347_v18, %s15988_s22  ;;  %1359 = vrot.lane.b32.xlu0 %v11019_v2, %s15988_s22  ;;  %v488_v43 = vrot.slane %v482_v20, 4  ;;  %v437_v20 = vrot.slane %v11255_v3, 4 }
 0x115   : > { %v11297_v21 = vpop.permute.xlu1 %565  ;;  %v496_v29 = vsel %vm253_vm1, %v487_v30, %v488_v43  ;;  %v442_v30 = vsel %vm253_vm1, %v436_v22, %v437_v20  ;;  %v448_v43 = vsel %vm16157_vm4, %v11264_v9, %v447_v16 }
 0x116   : > { %16199 = vst [vmem:[#allocation20_spill] sm:$0xff] %v11297_v21  ;;  %v11303_v28 = vpop.permute.xlu0 %520 }
 0x117   : > { %v531_v38 = vrot.slane %v11303_v28, 4  ;;  %1365 = vrot.lane.b32.xlu1 %v11028_v5, %s15988_s22  ;;  %1363 = vrot.lane.b32.xlu0 %v11031_v6, %s15988_s22 }
 0x119   : > { %v11321_v18 = vpop.permute.xlu1 %569  ;;  %v536_v21 = vsel %vm253_vm1, %v530_v35, %v531_v38  ;;  %v441_v35 = vrot.slane %v11272_v12, 4  ;;  %v539_v12 = vsel %vm253_vm1, %v531_v38, %v532_v51 }
 0x11a   : > { %16200 = vst [vmem:[#allocation21_spill] sm:$0xff] %v11321_v18  ;;  %v525_v46 = vpop.permute.xlu0 %524  ;;  %v538_v25 = vsel %vm537_vm3, %v11277_v13, %v536_v21  ;;  %v438_v13 = vrot.slane %v11238_v60, 4  ;;  %v540_v60 = vsel %vm537_vm3, %v11303_v28, %v539_v12 }
 0x11b   : > { %v533_v32 = vrot.slane %v525_v46, 4  ;;  %1404 = vrot.lane.b32.xlu1 %v11024_v4, %s15990_s28  ;;  %1367 = vrot.lane.b32.xlu0 %v1350_v59, %s15988_s22  ;;  %v495_v59 = vsel %vm16163_vm2, %v478_v17, %v494_v26  ;;  %v16201_v17 = vrot.slane %v11222_v55, 4  ;;  %v449_v22 = vsel %vm253_vm1, %v440_v54, %v441_v35  ;;  %s15992_s22 = smov 94  }
 0x11c   : > { %v445_v51 = vsel %vm253_vm1, %v437_v20, %v438_v13  ;;  %v16203_v20 = vrot.slane %v11207_v50, 4  ;;  %v16205_v35 = vrot.slane %v11198_v47, 4 }
 0x11d   : > { %v541_v18 = vsel %vm253_vm1, %v533_v32, %v534_v15  ;;  %v11341_v40 = vpop.permute.xlu1 %573  ;;  %v390_v32 = vrot.slane %v11231_v58, 4  ;;  %v400_v26 = vsel %vm253_vm1, %v392_v24, %v16201_v17 }
 0x11e   : > { %v529_v36 = vpop.permute.xlu0 %528  ;;  %v542_v8 = vsel %vm537_vm3, %v525_v46, %v541_v18 }
 0x11f   : > { %v535_v48 = vrot.slane %v529_v36, 4  ;;  %v10003_v62 = vcombine.high %v538_v25, %v542_v8  ;;  %v10002_v39 = vcombine.low %v538_v25, %v542_v8  ;;  %1408 = vrot.lane.b32.xlu1 %v1394_v23, %s15990_s28  ;;  %1406 = vrot.lane.b32.xlu0 %v11019_v2, %s15990_s28  ;;  %v491_v36 = vsel %vm16163_vm2, %v11253_v1, %v489_v27 }
 0x120   : > { %v492_v25 = vsel %vm253_vm1, %v484_v10, %v485_v34  ;;  %v9999_v21 = vcombine.high %v491_v36, %v495_v59  ;;  %v497_v1 = vsel %vm16163_vm2, %v11270_v11, %v496_v29  ;;  %v9998_v28 = vcombine.low %v491_v36, %v495_v59 }
 0x121   : > { %973 = vmatprep.subr.bf16.mxu0 %v10003_v62  ;;  %v543_v23 = vsel %vm253_vm1, %v534_v15, %v535_v48  ;;  %v11362_v38 = vpop.permute.xlu1 %612  ;;  %v394_v48 = vrot.slane %v11248_v0, 4  ;;  %v16202_v29 = vrot.slane %v11205_v49, 4  ;;  %v391_v11 = vrot.slane %v11214_v52, 4 }
 0x122   : > { %974 = vmatpush1.bf16.msra.mxu0 %v10002_v39  ;;  %v11366_v24 = vpop.permute.xlu0 %567  ;;  %v544_v27 = vsel %vm537_vm3, %v11292_v19, %v543_v23  ;;  %v493_v39 = vsel %vm16163_vm2, %v11279_v14, %v492_v25  ;;  %v444_v19 = vsel %vm16157_vm4, %v11229_v57, %v442_v30  ;;  %v1397_v14 = vld [vmem:[%s11005_s29 + $0x2c] sm:$0xf]  ;;  %v298_v15 = vrot.slane %v11193_v45, 4  ;;  %v1441_v30 = vld [vmem:[%s11005_s29 + $0x10] sm:$0xf] }
 0x123   : > { %975 = vmatprep.subr.bf16.mxu0 %v9999_v21  ;;  %v10005_v46 = vcombine.high %v540_v60, %v544_v27  ;;  %v10004_v9 = vcombine.low %v540_v60, %v544_v27  ;;  %1412 = vrot.lane.b32.xlu1 %v11028_v5, %s15990_s28  ;;  %v395_v0 = vsel %vm253_vm1, %v16202_v29, %v390_v32  ;;  %v16204_v34 = vrot.slane %v11184_v41, 4 }
 0x124   : > { %1410 = vrot.lane.b32.xlu0 %v11031_v6, %s15990_s28  ;;  %v9995_v54 = vcombine.high %v444_v19, %v448_v43  ;;  %v10001_v7 = vcombine.high %v493_v39, %v497_v1  ;;  %v401_v57 = vsel %vm16144_vm5, %v11240_v61, %v400_v26  ;;  %v450_v52 = vsel %vm16157_vm4, %v11246_v63, %v449_v22 }
 0x125   : > { %1014 = vmatprep.subr.bf16.mxu1 %v10005_v46  ;;  %v11389_v10 = vpop.permute.xlu1 %616  ;;  %v348_v16 = vsel %vm253_vm1, %v16204_v34, %v16203_v20  ;;  %v16206_v59 = vrot.slane %v11216_v53, 4  ;;  %v347_v61 = vrot.slane %v11224_v56, 4  ;;  %v16207_v62 = vmov %v16201_v17 }
 0x126   : > { %976 = vmatpush1.bf16.msra.mxu0 %v9998_v28  ;;  %1015 = vmatpush1.bf16.msra.mxu1 %v10004_v9  ;;  %v11395_v18 = vpop.permute.xlu0 %571  ;;  %v402_v12 = vsel %vm253_vm1, %v16207_v62, %v394_v48  ;;  %v397_v63 = vsel %vm16144_vm5, %v11205_v49, %v395_v0  ;;  %v247_v17 = vrot.slane %v11164_v33, 4  ;;  %v446_v26 = vsel %vm16157_vm4, %v11255_v3, %v445_v51  ;;  %v16210_v48 = vld [vmem:[#allocation17_spill] sm:$0xff]  ;;  %v16212_v9 = vld [vmem:[#allocation19_spill] sm:$0xff] }
 0x127   : > { %v353_v8 = vsel %vm253_vm1, %v16206_v59, %v16205_v35  ;;  %977 = vmatprep.subr.bf16.mxu0 %v9995_v54  ;;  %1016 = vmatprep.subr.bf16.mxu1 %v10001_v7  ;;  %v9994_v13 = vcombine.low %v444_v19, %v448_v43  ;;  %v10000_v36 = vcombine.low %v493_v39, %v497_v1  ;;  %v344_v56 = vrot.slane %v11191_v44, 4  ;;  %v16214_v19 = vld [vmem:[#allocation12_spill] sm:$0xff] }
 0x128   : > { %1451 = vrot.lane.b32.xlu1 %v11024_v4, %s15992_s22  ;;  %1414 = vrot.lane.b32.xlu0 %v1397_v14, %s15990_s28  ;;  %v398_v25 = vsel %vm253_vm1, %v390_v32, %v391_v11  ;;  %v9991_v21 = vcombine.high %v397_v63, %v401_v57  ;;  %v9997_v23 = vcombine.high %v446_v26, %v450_v52  ;;  %v250_v60 = vrot.slane %v11175_v37, 4  ;;  %v16215_v54 = vld [vmem:[#allocation16_spill] sm:$0xff]  ;;  %s15994_s28 = smov 93  }
 0x129   : > { %v11423_v49 = vpop.permute.xlu1 %620  ;;  %v354_v3 = vsel %vm349_vm6, %v11216_v53, %v353_v8  ;;  %v403_v27 = vsel %vm16144_vm5, %v11222_v55, %v402_v12  ;;  %v16208_v44 = vrot.slane %v11186_v42, 4  ;;  %v16209_v32 = vrot.slane %v11160_v31, 4  ;;  %v16219_v8 = vld [vmem:[#allocation18_spill] sm:$0xff] }
 0x12a   : > { %978 = vmatpush1.bf16.msra.mxu0 %v9994_v13  ;;  %1017 = vmatpush1.bf16.msra.mxu1 %v10000_v36  ;;  %v11429_v43 = vpop.permute.xlu0 %575  ;;  %v16211_v22 = vrot.slane %v16210_v48, 4  ;;  %v300_v39 = vrot.slane %v16212_v9, 4  ;;  %v16213_v53 = vmov %v16205_v35  ;;  %v350_v55 = vsel %vm349_vm6, %v11184_v41, %v348_v16  ;;  %v11509_v9 = vld [vmem:[%s11005_s29 + $0x8] sm:$0xff] }
 0x12b   : > { %v301_v1 = vsel %vm253_vm1, %v16209_v32, %v16208_v44  ;;  %v355_v28 = vsel %vm253_vm1, %v16213_v53, %v347_v61  ;;  %979 = vmatprep.subr.bf16.mxu0 %v9991_v21  ;;  %1018 = vmatprep.subr.bf16.mxu1 %v9997_v23  ;;  %v248_v29 = vrot.slane %v16214_v19, 4  ;;  %v399_v0 = vsel %vm16144_vm5, %v11231_v58, %v398_v25  ;;  %v1444_v23 = vld [vmem:[%s11005_s29 + $0x2c] sm:$0xf] }
 0x12c   : > { %v306_v46 = vsel %vm253_vm1, %v298_v15, %v16211_v22  ;;  %v9990_v11 = vcombine.low %v397_v63, %v401_v57  ;;  %v9996_v51 = vcombine.low %v446_v26, %v450_v52  ;;  %1455 = vrot.lane.b32.xlu1 %v1441_v30, %s15992_s22  ;;  %1453 = vrot.lane.b32.xlu0 %v11019_v2, %s15992_s22  ;;  %v297_v7 = vrot.slane %v16215_v54, 4  ;;  %v16217_v52 = vld [vmem:[#allocation14_spill] sm:$0xff]  ;;  %v16221_v26 = vld [vmem:[#allocation13_spill] sm:$0xff] }
 0x12d   : > { %v16216_v14 = vmov %v16203_v20  ;;  %v9987_v20 = vcombine.high %v350_v55, %v354_v3  ;;  %v9993_v41 = vcombine.high %v399_v0, %v403_v27  ;;  %v11457_v34 = vpop.permute.xlu1 %659  ;;  %v254_v16 = vsel %vm253_vm1, %v247_v17, %v248_v29  ;;  %v11528_v54 = vld [vmem:[%s11005_s29 + $0x1c] sm:$0xff] }
 0x12e   : > { %v351_v15 = vsel %vm253_vm1, %v16216_v14, %v344_v56  ;;  %v307_v58 = vsel %vm302_vm7, %v11193_v45, %v306_v46  ;;  %980 = vmatpush1.bf16.msra.mxu0 %v9990_v11  ;;  %1019 = vmatpush1.bf16.msra.mxu1 %v9996_v51  ;;  %v11462_v57 = vpop.permute.xlu0 %614  ;;  %v356_v2 = vsel %vm349_vm6, %v11198_v47, %v355_v28  ;;  %v16218_v35 = vrot.slane %v16217_v52, 4  ;;  %v1488_v46 = vld [vmem:[%s11005_s29 + $0x10] sm:$0xf]  ;;  %v11518_v28 = vld [vmem:[%s11005_s29 + $0x24] sm:$0xff] }
 0x12f   : > { %v252_v61 = vrot.slane %v16219_v8, 4  ;;  %v16220_v62 = vmov %v16211_v22  ;;  %981 = vmatprep.subr.bf16.mxu0 %v9987_v20  ;;  %1020 = vmatprep.subr.bf16.mxu1 %v9993_v41  ;;  %v303_v45 = vsel %vm302_vm7, %v11160_v31, %v301_v1  ;;  %v352_v47 = vsel %vm349_vm6, %v11207_v50, %v351_v15 }
 0x130   : > { %v259_v59 = vsel %vm253_vm1, %v250_v60, %v16218_v35  ;;  %v308_v12 = vsel %vm253_vm1, %v16220_v62, %v300_v39  ;;  %v9986_v63 = vcombine.low %v350_v55, %v354_v3  ;;  %v9992_v17 = vcombine.low %v399_v0, %v403_v27  ;;  %1459 = vrot.lane.b32.xlu1 %v11028_v5, %s15992_s22 }
 0x131   : > { %1457 = vrot.lane.b32.xlu0 %v11031_v6, %s15992_s22  ;;  %v249_v13 = vrot.slane %v16221_v26, 4  ;;  %v16222_v36 = vmov %v16208_v44  ;;  %v9983_v25 = vcombine.high %v303_v45, %v307_v58  ;;  %v9989_v31 = vcombine.high %v352_v47, %v356_v2  ;;  %v11485_v21 = vpop.permute.xlu1 %663 }
 0x132   : > { %v304_v56 = vsel %vm253_vm1, %v16222_v36, %v297_v7  ;;  %v260_v50 = vsel %vm255_vm8, %v11175_v37, %v259_v59  ;;  %982 = vmatpush1.bf16.msra.mxu0 %v9986_v63  ;;  %1021 = vmatpush1.bf16.msra.mxu1 %v9992_v17  ;;  %v11490_v5 = vpop.permute.xlu0 %618  ;;  %v309_v30 = vsel %vm302_vm7, %v16210_v48, %v308_v12  ;;  %v628_v15 = vrot.slane %v11423_v49, 4 }
 0x133   : > { %v256_v60 = vsel %vm255_vm8, %v11164_v33, %v254_v16  ;;  %v16223_v3 = vmov %v16218_v35  ;;  %983 = vmatprep.subr.bf16.mxu0 %v9983_v25  ;;  %1022 = vmatprep.subr.bf16.mxu1 %v9989_v31  ;;  %v305_v37 = vsel %vm302_vm7, %v11186_v42, %v304_v56  ;;  %v9982_v44 = vcombine.low %v303_v45, %v307_v58 }
 0x134   : > { %v261_v27 = vsel %vm253_vm1, %v16223_v3, %v252_v61  ;;  %v9988_v32 = vcombine.low %v352_v47, %v356_v2  ;;  %1498 = vrot.lane.b32.xlu1 %v11024_v4, %s15994_s28  ;;  %v257_v33 = vsel %vm253_vm1, %v248_v29, %v249_v13  ;;  %v9979_v1 = vcombine.high %v256_v60, %v260_v50  ;;  %v1491_v61 = vld [vmem:[%s11005_s29 + $0x2c] sm:$0xf] }
 0x135   : > { %1461 = vrot.lane.b32.xlu0 %v1444_v23, %s15992_s22  ;;  %v9985_v48 = vcombine.high %v305_v37, %v309_v30  ;;  %v11505_v22 = vpop.permute.xlu1 %667  ;;  %v262_v39 = vsel %vm255_vm8, %v16217_v52, %v261_v27  ;;  %v9975_v53 = vcombine.high %v11024_v4, %v11031_v6  ;;  %v9978_v55 = vcombine.low %v256_v60, %v260_v50  ;;  %v16226_v13 = vld [vmem:[#allocation20_spill] sm:$0xff]  ;;  %s15996_s22 = smov 92  }
 0x136   : > { %984 = vmatpush1.bf16.msra.mxu0 %v9982_v44  ;;  %1023 = vmatpush1.bf16.msra.mxu1 %v9988_v32  ;;  %v11511_v42 = vpop.permute.xlu0 %622  ;;  %v9984_v29 = vcombine.low %v305_v37, %v309_v30  ;;  %v258_v0 = vsel %vm255_vm8, %v16214_v19, %v257_v33  ;;  %v9974_v14 = vcombine.low %v11024_v4, %v11031_v6  ;;  %v627_v20 = vrot.slane %v11490_v5, 4  ;;  %v11546_v4 = vld [vmem:[%s11005_s29] sm:$0xff] }
 0x137   : > { %985 = vmatprep.subr.bf16.mxu0 %v9979_v1  ;;  %1024 = vmatprep.subr.bf16.mxu1 %v9985_v48  ;;  %v9981_v11 = vcombine.high %v258_v0, %v262_v39  ;;  %v9977_v19 = vcombine.high %v11509_v9, %v11518_v28  ;;  %v671_v41 = vrot.slane %v11457_v34, 4  ;;  %v581_v58 = vrot.slane %v11341_v40, 4  ;;  %v16228_v48 = vld [vmem:[#allocation21_spill] sm:$0xff] }
 0x138   : > { %1502 = vrot.lane.b32.xlu1 %v1488_v46, %s15994_s28  ;;  %v9980_v2 = vcombine.low %v258_v0, %v262_v39  ;;  %v580_v6 = vrot.slane %v11395_v18, 4  ;;  %v624_v52 = vrot.slane %v11362_v38, 4  ;;  %v625_v35 = vrot.slane %v11462_v57, 4 }
 0x139   : > { %1500 = vrot.lane.b32.xlu0 %v11509_v9, %s15994_s28  ;;  %v11525_v51 = vpop.permute.xlu1 %1075  ;;  %v675_v59 = vrot.slane %v11505_v22, 4  ;;  %v629_v62 = vrot.slane %v11511_v42, 4  ;;  %v9976_v45 = vcombine.low %v11509_v9, %v11518_v28  ;;  %v635_v47 = vsel %vm253_vm1, %v627_v20, %v628_v15 }
 0x13a   : > { %16224 = vst [vmem:[#allocation17_spill] sm:$0xff] %v11525_v51  ;;  %986 = vmatpush1.bf16.msra.mxu0 %v9978_v55  ;;  %1025 = vmatpush1.bf16.msra.mxu1 %v9984_v29  ;;  %v11530_v7 = vpop.permute.xlu0 %661  ;;  %v673_v63 = vrot.slane %v11485_v21, 4  ;;  %v577_v36 = vrot.slane %v16226_v13, 4  ;;  %v578_v56 = vrot.slane %v11366_v24, 4  ;;  %v626_v25 = vrot.slane %v11389_v10, 4 }
 0x13b   : > { %v672_v16 = vrot.slane %v11530_v7, 4  ;;  %1026 = vmatprep.subr.bf16.mxu1 %v9981_v11  ;;  %987 = vmatprep.subr.bf16.mxu0 %v9975_v53  ;;  %v588_v31 = vsel %vm253_vm1, %v580_v6, %v581_v58  ;;  %v582_v21 = vrot.slane %v11429_v43, 4  ;;  %v630_v50 = vsel %vm253_vm1, %v624_v52, %v625_v35  ;;  %v1535_v10 = vld [vmem:[%s11005_s29 + $0x10] sm:$0xf] }
 0x13c   : > { %1506 = vrot.lane.b32.xlu1 %v11518_v28, %s15994_s28  ;;  %v636_v60 = vsel %vm631_vm10, %v11490_v5, %v635_v47  ;;  %v637_v3 = vsel %vm253_vm1, %v628_v15, %v629_v62  ;;  %v579_v46 = vrot.slane %v16228_v48, 4  ;;  %v632_v5 = vsel %vm631_vm10, %v11362_v38, %v630_v50  ;;  %v16233_v62 = vld [vmem:[#allocation15_spill] sm:$0xff] }
 0x13d   : > { %1504 = vrot.lane.b32.xlu0 %v11528_v54, %s15994_s28  ;;  %v11552_v8 = vpop.permute.xlu1 %1079  ;;  %v677_v26 = vsel %vm253_vm1, %v671_v41, %v672_v16  ;;  %v680_v43 = vsel %vm253_vm1, %v672_v16, %v673_v63  ;;  %v633_v42 = vsel %vm253_vm1, %v625_v35, %v626_v25  ;;  %v10011_v39 = vcombine.high %v632_v5, %v636_v60  ;;  %v2048_v48 = vld [vmem:[%s11005_s29 + $0x2c] sm:$0xf] }
 0x13e   : > { %16225 = vst [vmem:[#allocation19_spill] sm:$0xff] %v11552_v8  ;;  %1027 = vmatpush1.bf16.msra.mxu1 %v9980_v2  ;;  %v666_v12 = vpop.permute.xlu0 %665  ;;  %988 = vmatpush1.bf16.msra.mxu0 %v9974_v14  ;;  %v679_v44 = vsel %vm16018_vm9, %v11457_v34, %v677_v26  ;;  %v583_v53 = vsel %vm253_vm1, %v577_v36, %v578_v56  ;;  %v1538_v2 = vld [vmem:[%s11005_s29 + $0x2c] sm:$0xf]  ;;  %vm16022_vm8 = vcmask 809984  }
 0x13f   : > { %v674_v17 = vrot.slane %v666_v12, 4  ;;  %1028 = vmatprep.subr.bf16.mxu1 %v9977_v19  ;;  %v589_v29 = vsel %vm584_vm11, %v11395_v18, %v588_v31  ;;  %v681_v38 = vsel %vm16018_vm9, %v11530_v7, %v680_v43  ;;  %v638_v14 = vsel %vm631_vm10, %v11423_v49, %v637_v3  ;;  %v2001_v3 = vld [vmem:[%s11005_s29 + $0x2c] sm:$0xf] }
 0x140   : > { %1545 = vrot.lane.b32.xlu1 %v11546_v4, %s15996_s22  ;;  %v590_v19 = vsel %vm253_vm1, %v581_v58, %v582_v21  ;;  %v634_v7 = vsel %vm631_vm10, %v11462_v57, %v633_v42  ;;  %v10010_v20 = vcombine.low %v632_v5, %v636_v60  ;;  %v585_v41 = vsel %vm584_vm11, %v16226_v13, %v583_v53  ;;  %v1998_v21 = vld [vmem:[%s11005_s29 + $0x10] sm:$0xf] }
 0x141   : > { %1508 = vrot.lane.b32.xlu0 %v1491_v61, %s15994_s28  ;;  %v682_v23 = vsel %vm253_vm1, %v674_v17, %v675_v59  ;;  %v11573_v30 = vpop.permute.xlu1 %1083  ;;  %v586_v49 = vsel %vm253_vm1, %v578_v56, %v579_v46  ;;  %v10013_v16 = vcombine.high %v634_v7, %v638_v14  ;;  %v591_v6 = vsel %vm584_vm11, %v11341_v40, %v590_v19  ;;  %s10819_s28 = smov 76   ;;  %v1951_v40 = vld [vmem:[%s11005_s29 + $0x10] sm:$0xf]  ;;  %v11640_v17 = vld [vmem:[#allocation6 + $0x8] sm:$0xff]  ;;  %v1954_v56 = vld [vmem:[%s11005_s29 + $0x2c] sm:$0xf] }
 0x142   : > { %16227 = vst [vmem:[#allocation12_spill] sm:$0xff] %v11573_v30  ;;  %v683_v27 = vsel %vm16018_vm9, %v666_v12, %v682_v23  ;;  %v670_v37 = vpop.permute.xlu0 %669  ;;  %1029 = vmatpush1.bf16.msra.mxu1 %v9976_v45  ;;  %v587_v52 = vsel %vm584_vm11, %v11366_v24, %v586_v49  ;;  %v10006_v35 = vcombine.low %v585_v41, %v589_v29  ;;  %16236 = vst [vmem:[#allocation15_spill] sm:$0xff] %v11640_v17  ;;  %v2092_v42 = vld [vmem:[%s11005_s29 + $0x10] sm:$0xf] }
 0x143   : > { %v676_v32 = vrot.slane %v670_v37, 4  ;;  %v10015_v33 = vcombine.high %v679_v44, %v683_v27  ;;  %v10014_v1 = vcombine.low %v679_v44, %v683_v27  ;;  %v10009_v61 = vcombine.high %v587_v52, %v591_v6  ;;  %v2045_v44 = vld [vmem:[%s11005_s29 + $0x10] sm:$0xf] }
 0x144   : > { %1549 = vrot.lane.b32.xlu1 %v1535_v10, %s15996_s22  ;;  %v9972_v12 = vcombine.low %v16233_v62, %v16233_v62  ;;  %v10008_v24 = vcombine.low %v587_v52, %v591_v6  ;;  %v10021_v13 = vcombine.high %v11640_v17, %v11640_v17  ;;  %v2139_v19 = vld [vmem:[%s11005_s29 + $0x10] sm:$0xf] }
 0x145   : > { %1547 = vrot.lane.b32.xlu0 %v11509_v9, %s15996_s22  ;;  %v684_v34 = vsel %vm253_vm1, %v675_v59, %v676_v32  ;;  %999 = vmatprep.subr.bf16.mxu0 %v10015_v33  ;;  %v11592_v55 = vpop.permute.xlu1 %1122  ;;  %v10012_v59 = vcombine.low %v634_v7, %v638_v14 }
 0x146   : > { %16229 = vst [vmem:[#allocation16_spill] sm:$0xff] %v11592_v55  ;;  %1000 = vmatpush2.bf16.msra.mxu0 %v10014_v1  ;;  %v11598_v0 = vpop.permute.xlu0 %1077  ;;  %v685_v11 = vsel %vm16018_vm9, %v11505_v22, %v684_v34  ;;  %v10007_v22 = vcombine.high %v585_v41, %v589_v29  ;;  %v2142_v41 = vld [vmem:[%s11005_s29 + $0x2c] sm:$0xf]  ;;  %v2280_v55 = vld [vmem:[%s11005_s29 + $0x10] sm:$0xf]  ;;  %vm16027_vm9 = vcmask 818176  }
 0x147   : > { %16230 = vst [vmem:[#allocation14_spill] sm:$0xff] %v11598_v0  ;;  %1001 = vmatprep.subr.bf16.mxu0 %v10011_v39  ;;  %v10017_v15 = vcombine.high %v681_v38, %v685_v11  ;;  %v10016_v18 = vcombine.low %v681_v38, %v685_v11  ;;  %v2095_v38 = vld [vmem:[%s11005_s29 + $0x2c] sm:$0xf] }
 0x148   : > { %1553 = vrot.lane.b32.xlu1 %v11518_v28, %s15996_s22 }
 0x149   : > { %1551 = vrot.lane.b32.xlu0 %v11528_v54, %s15996_s22  ;;  %1040 = vmatprep.subr.bf16.mxu1 %v10017_v15  ;;  %v11616_v58 = vpop.permute.xlu1 %1126 }
 0x14a   : > { %16231 = vst [vmem:[#allocation18_spill] sm:$0xff] %v11616_v58  ;;  %1002 = vmatpush2.bf16.msra.mxu0 %v10010_v20  ;;  %1041 = vmatpush2.bf16.msra.mxu1 %v10016_v18  ;;  %v11619_v57 = vpop.permute.xlu0 %1081 }
 0x14b   : > { %16232 = vst [vmem:[#allocation13_spill] sm:$0xff] %v11619_v57  ;;  %1003 = vmatprep.subr.bf16.mxu0 %v10007_v22  ;;  %1042 = vmatprep.subr.bf16.mxu1 %v10013_v16  ;;  %v2186_v16 = vld [vmem:[%s11005_s29 + $0x10] sm:$0xf] }
 0x14c   : > { %1961 = vrot.lane.b32.xlu1 %v11546_v4, %s10819_s28 }
 0x14d   : > { %1555 = vrot.lane.b32.xlu0 %v1538_v2, %s15996_s22  ;;  %v11630_v45 = vpop.permute.xlu1 %1130  ;;  %s10820_s22 = smov 75  }
 0x14e   : > { %16234 = vst [vmem:[#allocation20_spill] sm:$0xff] %v11630_v45  ;;  %1004 = vmatpush2.bf16.msra.mxu0 %v10006_v35  ;;  %1043 = vmatpush2.bf16.msra.mxu1 %v10012_v59  ;;  %v11633_v47 = vpop.permute.xlu0 %1085  ;;  %v2189_v59 = vld [vmem:[%s11005_s29 + $0x2c] sm:$0xf] }
 0x14f   : > { %16235 = vst [vmem:[#allocation21_spill] sm:$0xff] %v11633_v47  ;;  %1044 = vmatprep.subr.bf16.mxu1 %v10009_v61 }
 0x150   : > { %1965 = vrot.lane.b32.xlu1 %v1951_v40, %s10819_s28 }
 0x151   : > { %1963 = vrot.lane.b32.xlu0 %v11509_v9, %s10819_s28  ;;  %1006 = vmatmul.mubr.bf16.vlgmr.msra.gmra.mxu0 %v9972_v12  ;;  %v11638_v63 = vpop.permute.xlu1 %1169 }
 0x152   : > { %1045 = vmatpush2.bf16.msra.mxu1 %v10008_v24  ;;  %v11642_v26 = vpop.permute.xlu0 %1124  ;;  %10066 = vmatprep.mubr.msk.bf16.mxu0 %vm969_vm0, %v10021_v13 }
 0x154   : > { %1969 = vrot.lane.b32.xlu1 %v11518_v28, %s10819_s28 }
 0x155   : > { %1967 = vrot.lane.b32.xlu0 %v11528_v54, %s10819_s28  ;;  %1047 = vmatmul.mubr.bf16.vlgmr.msra.gmra.mxu1 %v9972_v12  ;;  %v11650_v36 = vpop.permute.xlu1 %1173  ;;  %v2233_v12 = vld [vmem:[%s11005_s29 + $0x10] sm:$0xf] }
 0x156   : > { %16237 = vst [vmem:[#allocation22_spill] sm:$0xff] %v11650_v36  ;;  %v11654_v25 = vpop.permute.xlu0 %1128  ;;  %10067 = vmatprep.mubr.msk.bf16.mxu1 %vm969_vm0, %v10021_v13  ;;  %v2236_v13 = vld [vmem:[%s11005_s29 + $0x2c] sm:$0xf] }
 0x158   : > { %2008 = vrot.lane.b32.xlu1 %v11546_v4, %s10820_s22 }
 0x159   : > { %1971 = vrot.lane.b32.xlu0 %v1954_v56, %s10819_s28  ;;  %v11659_v31 = vpop.permute.xlu1 %1177  ;;  %s15998_s28 = smov 74  }
 0x15a   : > { %v11662_v23 = vpop.permute.xlu0 %1132 }
 0x15b   : > { %16238 = vst [vmem:[#allocation23_spill] sm:$0xff] %v11662_v23 }
 0x15c   : > { %2012 = vrot.lane.b32.xlu1 %v1998_v21, %s10820_s22 }
 0x15d   : > { %2010 = vrot.lane.b32.xlu0 %v11509_v9, %s10820_s22  ;;  %v11665_v50 = vpop.permute.xlu1 %1216 }
 0x15e   : > { %v11667_v10 = vpop.permute.xlu0 %1171 }
 0x160   : > { %2016 = vrot.lane.b32.xlu1 %v11518_v28, %s10820_s22 }
 0x161   : > { %2014 = vrot.lane.b32.xlu0 %v11528_v54, %s10820_s22  ;;  %v11671_v60 = vpop.permute.xlu1 %1220 }
 0x162   : > { %v11674_v27 = vpop.permute.xlu0 %1175 }
 0x164   : > { %2055 = vrot.lane.b32.xlu1 %v11546_v4, %s15998_s28 }
 0x165   : > { %2018 = vrot.lane.b32.xlu0 %v2001_v3, %s10820_s22  ;;  %v11678_v37 = vpop.permute.xlu1 %1224  ;;  %s16000_s22 = smov 73  }
 0x166   : > { %v11681_v43 = vpop.permute.xlu0 %1179 }
 0x167   : > { %16239 = vst [vmem:[#allocation24_spill] sm:$0xff] %v11681_v43 }
 0x168   : > { %2059 = vrot.lane.b32.xlu1 %v2045_v44, %s15998_s28 }
 0x169   : > { %2057 = vrot.lane.b32.xlu0 %v11509_v9, %s15998_s28  ;;  %v11686_v32 = vpop.permute.xlu1 %1263 }
 0x16a   : > { %v11688_v33 = vpop.permute.xlu0 %1218  ;;  %v1275_v24 = vrot.slane %v11686_v32, 4 }
 0x16c   : > { %2063 = vrot.lane.b32.xlu1 %v11518_v28, %s15998_s28 }
 0x16d   : > { %2061 = vrot.lane.b32.xlu0 %v11528_v54, %s15998_s28  ;;  %v11694_v1 = vpop.permute.xlu1 %1267 }
 0x16e   : > { %v11697_v46 = vpop.permute.xlu0 %1222 }
 0x170   : > { %2102 = vrot.lane.b32.xlu1 %v11546_v4, %s16000_s22 }
 0x171   : > { %2065 = vrot.lane.b32.xlu0 %v2048_v48, %s15998_s28  ;;  %v11702_v5 = vpop.permute.xlu1 %1271  ;;  %s16002_s28 = smov 72  }
 0x172   : > { %v11705_v34 = vpop.permute.xlu0 %1226 }
 0x174   : > { %2106 = vrot.lane.b32.xlu1 %v2092_v42, %s16000_s22 }
 0x175   : > { %2104 = vrot.lane.b32.xlu0 %v11509_v9, %s16000_s22  ;;  %v11710_v39 = vpop.permute.xlu1 %1310 }
 0x176   : > { %v11712_v53 = vpop.permute.xlu0 %1265  ;;  %v1322_v17 = vrot.slane %v11710_v39, 4 }
 0x178   : > { %2110 = vrot.lane.b32.xlu1 %v11518_v28, %s16000_s22 }
 0x179   : > { %2108 = vrot.lane.b32.xlu0 %v11528_v54, %s16000_s22  ;;  %v11718_v29 = vpop.permute.xlu1 %1314 }
 0x17a   : > { %v11721_v11 = vpop.permute.xlu0 %1269 }
 0x17c   : > { %2149 = vrot.lane.b32.xlu1 %v11546_v4, %s16002_s28 }
 0x17d   : > { %2112 = vrot.lane.b32.xlu0 %v2095_v38, %s16000_s22  ;;  %v11726_v14 = vpop.permute.xlu1 %1318  ;;  %s16012_s22 = smov 71  }
 0x17e   : > { %v11729_v15 = vpop.permute.xlu0 %1273 }
 0x180   : > { %2153 = vrot.lane.b32.xlu1 %v2139_v19, %s16002_s28 }
 0x181   : > { %2151 = vrot.lane.b32.xlu0 %v11509_v9, %s16002_s28  ;;  %v11734_v18 = vpop.permute.xlu1 %1357 }
 0x182   : > { %v11736_v7 = vpop.permute.xlu0 %1312  ;;  %v1369_v44 = vrot.slane %v11734_v18, 4 }
 0x183   : > { %v1323_v21 = vrot.slane %v11736_v7, 4 }
 0x184   : > { %2157 = vrot.lane.b32.xlu1 %v11518_v28, %s16002_s28 }
 0x185   : > { %2155 = vrot.lane.b32.xlu0 %v11528_v54, %s16002_s28  ;;  %v11742_v20 = vpop.permute.xlu1 %1361 }
 0x186   : > { %v11745_v49 = vpop.permute.xlu0 %1316 }
 0x187   : > { %v1325_v56 = vrot.slane %v11745_v49, 4 }
 0x188   : > { %2196 = vrot.lane.b32.xlu1 %v11546_v4, %s16012_s22 }
 0x189   : > { %2159 = vrot.lane.b32.xlu0 %v2142_v41, %s16002_s28  ;;  %v11750_v22 = vpop.permute.xlu1 %1365  ;;  %s16019_s28 = smov 70  }
 0x18a   : > { %v11753_v2 = vpop.permute.xlu0 %1320  ;;  %v1373_v19 = vrot.slane %v11750_v22, 4 }
 0x18c   : > { %2200 = vrot.lane.b32.xlu1 %v2186_v16, %s16012_s22 }
 0x18d   : > { %2198 = vrot.lane.b32.xlu0 %v11509_v9, %s16012_s22  ;;  %v11758_v6 = vpop.permute.xlu1 %1404 }
 0x18e   : > { %v11760_v52 = vpop.permute.xlu0 %1359  ;;  %v1416_v16 = vrot.slane %v11758_v6, 4 }
 0x18f   : > { %v1370_v3 = vrot.slane %v11760_v52, 4 }
 0x190   : > { %2204 = vrot.lane.b32.xlu1 %v11518_v28, %s16012_s22 }
 0x191   : > { %2202 = vrot.lane.b32.xlu0 %v11528_v54, %s16012_s22  ;;  %v11766_v35 = vpop.permute.xlu1 %1408  ;;  %v1375_v45 = vsel %vm253_vm1, %v1369_v44, %v1370_v3 }
 0x192   : > { %v1364_v61 = vpop.permute.xlu0 %1363  ;;  %v1418_v51 = vrot.slane %v11766_v35, 4  ;;  %v16242_v35 = vrot.slane %v11726_v14, 4 }
 0x193   : > { %v1372_v41 = vrot.slane %v1364_v61, 4 }
 0x194   : > { %2243 = vrot.lane.b32.xlu1 %v11546_v4, %s16019_s28 }
 0x195   : > { %2206 = vrot.lane.b32.xlu0 %v2189_v59, %s16012_s22  ;;  %v11772_v62 = vpop.permute.xlu1 %1412  ;;  %v1380_v47 = vsel %vm253_vm1, %v1372_v41, %v1373_v19  ;;  %s16023_s22 = smov 69   ;;  %v1333_v41 = vsel %vm253_vm1, %v1325_v56, %v16242_v35 }
 0x196   : > { %v1368_v40 = vpop.permute.xlu0 %1367  ;;  %v1420_v48 = vrot.slane %v11772_v62, 4  ;;  %v1381_v57 = vsel %vm16040_vm12, %v1364_v61, %v1380_v47  ;;  %v16244_v61 = vrot.slane %v11702_v5, 4 }
 0x198   : > { %2247 = vrot.lane.b32.xlu1 %v2233_v12, %s16019_s28  ;;  %v1278_v12 = vrot.slane %v11721_v11, 4 }
 0x199   : > { %2245 = vrot.lane.b32.xlu0 %v11509_v9, %s16019_s28 }
 0x19a   : > { %v11785_v42 = vpop.permute.xlu0 %1406  ;;  %v11787_v38 = vpop.permute.xlu1 %1451 }
 0x19b   : > { %16240 = vst [vmem:[#allocation25_spill] sm:$0xff] %v11787_v38  ;;  %v1417_v59 = vrot.slane %v11785_v42, 4  ;;  %v1374_v38 = vrot.slane %v1368_v40, 4  ;;  %v1371_v40 = vrot.slane %v11742_v20, 4 }
 0x19c   : > { %2251 = vrot.lane.b32.xlu1 %v11518_v28, %s16019_s28 }
 0x19d   : > { %2249 = vrot.lane.b32.xlu0 %v11528_v54, %s16019_s28  ;;  %v1422_v58 = vsel %vm253_vm1, %v1416_v16, %v1417_v59  ;;  %v1327_v16 = vrot.slane %v11753_v2, 4  ;;  %v1382_v20 = vsel %vm253_vm1, %v1373_v19, %v1374_v38  ;;  %v1425_v56 = vsel %vm253_vm1, %v1417_v59, %v1418_v51 }
 0x19e   : > { %v1411_v30 = vpop.permute.xlu0 %1410  ;;  %v11808_v8 = vpop.permute.xlu1 %1455  ;;  %v1424_v36 = vsel %vm16047_vm13, %v11758_v6, %v1422_v58  ;;  %v1286_v38 = vsel %vm253_vm1, %v1278_v12, %v16244_v61  ;;  %v1324_v58 = vrot.slane %v11718_v29, 4  ;;  %v1328_v51 = vsel %vm253_vm1, %v1322_v17, %v1323_v21 }
 0x19f   : > { %16241 = vst [vmem:[#allocation26_spill] sm:$0xff] %v11808_v8  ;;  %v1419_v23 = vrot.slane %v1411_v30, 4  ;;  %v1334_v6 = vsel %vm16039_vm14, %v11745_v49, %v1333_v41  ;;  %v1426_v29 = vsel %vm16047_vm13, %v11785_v42, %v1425_v56  ;;  %v1383_v17 = vsel %vm16040_vm12, %v11750_v22, %v1382_v20 }
 0x1a0   : > { %2290 = vrot.lane.b32.xlu1 %v11546_v4, %s16023_s22  ;;  %v1182_v19 = vrot.slane %v11667_v10, 4  ;;  %v1331_v12 = vsel %vm253_vm1, %v1323_v21, %v1324_v58  ;;  %v16246_v20 = vrot.slane %v11688_v33, 4 }
 0x1a1   : > { %2253 = vrot.lane.b32.xlu0 %v2236_v13, %s16019_s28  ;;  %v1427_v8 = vsel %vm253_vm1, %v1419_v23, %v1420_v48  ;;  %v16243_v23 = vrot.slane %v11712_v53, 4  ;;  %v1332_v58 = vsel %vm16039_vm14, %v11736_v7, %v1331_v12  ;;  %s16025_s28 = smov 68   ;;  %v16251_v7 = vrot.slane %v11638_v63, 4 }
 0x1a2   : > { %v1428_v13 = vsel %vm16047_vm13, %v1411_v30, %v1427_v8  ;;  %v1415_v0 = vpop.permute.xlu0 %1414  ;;  %v11832_v43 = vpop.permute.xlu1 %1459  ;;  %v1377_v8 = vsel %vm16040_vm12, %v11734_v18, %v1375_v45  ;;  %v1378_v30 = vsel %vm253_vm1, %v1370_v3, %v1371_v40  ;;  %v16245_v3 = vrot.slane %v11726_v14, 4 }
 0x1a3   : > { %v10050_v2 = vcombine.low %v1424_v36, %v1428_v13  ;;  %v1421_v35 = vrot.slane %v1415_v0, 4  ;;  %v10051_v44 = vcombine.high %v1424_v36, %v1428_v13  ;;  %v1281_v47 = vsel %vm253_vm1, %v1275_v24, %v16243_v23 }
 0x1a4   : > { %2294 = vrot.lane.b32.xlu1 %v2280_v55, %s16023_s22  ;;  %v10047_v36 = vcombine.high %v1377_v8, %v1381_v57  ;;  %v1280_v24 = vrot.slane %v11729_v15, 4  ;;  %v1335_v49 = vsel %vm253_vm1, %v16245_v3, %v1327_v16  ;;  %v1379_v22 = vsel %vm16040_vm12, %v11760_v52, %v1378_v30  ;;  %v2283_v16 = vld [vmem:[%s11005_s29 + $0x2c] sm:$0xf] }
 0x1a5   : > { %2292 = vrot.lane.b32.xlu0 %v11509_v9, %s16023_s22  ;;  %v1429_v0 = vsel %vm253_vm1, %v1420_v48, %v1421_v35  ;;  %1859 = vmatprep.subr.bf16.mxu0 %v10051_v44  ;;  %v10046_v59 = vcombine.low %v1377_v8, %v1381_v57  ;;  %v1277_v15 = vrot.slane %v11694_v1, 4  ;;  %v10049_v41 = vcombine.high %v1379_v22, %v1383_v17 }
 0x1a6   : > { %1860 = vmatpush1.bf16.msra.mxu0 %v10050_v2  ;;  %v11854_v45 = vpop.permute.xlu0 %1453  ;;  %v1430_v55 = vsel %vm16047_vm13, %v11772_v62, %v1429_v0  ;;  %v11860_v18 = vpop.permute.xlu1 %1498  ;;  %v1330_v62 = vsel %vm16039_vm14, %v11710_v39, %v1328_v51  ;;  %v1184_v39 = vrot.slane %v11674_v27, 4  ;;  %v16247_v57 = vrot.slane %v11665_v50, 4 }
 0x1a7   : > { %1861 = vmatprep.subr.bf16.mxu0 %v10047_v36  ;;  %v10052_v48 = vcombine.low %v1426_v29, %v1430_v55  ;;  %v10053_v42 = vcombine.high %v1426_v29, %v1430_v55  ;;  %v10043_v40 = vcombine.high %v1330_v62, %v1334_v6  ;;  %v1287_v13 = vsel %vm16021_vm15, %v11721_v11, %v1286_v38  ;;  %v2327_v36 = vld [vmem:[%s11005_s29 + $0x10] sm:$0xf] }
 0x1a8   : > { %2298 = vrot.lane.b32.xlu1 %v11518_v28, %s16023_s22  ;;  %v1234_v52 = vsel %vm253_vm1, %v16247_v57, %v16246_v20  ;;  %v1336_v21 = vsel %vm16039_vm14, %v11726_v14, %v1335_v49  ;;  %v16248_v2 = vrot.slane %v11678_v37, 4  ;;  %v16249_v35 = vrot.slane %v11697_v46, 4 }
 0x1a9   : > { %2296 = vrot.lane.b32.xlu0 %v11528_v54, %s16023_s22  ;;  %1900 = vmatprep.subr.bf16.mxu1 %v10053_v42  ;;  %v1233_v23 = vrot.slane %v11705_v34, 4  ;;  %v1283_v11 = vsel %vm16021_vm15, %v11686_v32, %v1281_v47  ;;  %v1288_v38 = vsel %vm253_vm1, %v16244_v61, %v1280_v24  ;;  %v1135_v14 = vrot.slane %v11642_v26, 4  ;;  %v16261_v61 = vld [vmem:[#allocation20_spill] sm:$0xff] }
 0x1aa   : > { %1862 = vmatpush1.bf16.msra.mxu0 %v10046_v59  ;;  %1901 = vmatpush1.bf16.msra.mxu1 %v10052_v48  ;;  %v11886_v1 = vpop.permute.xlu0 %1457  ;;  %v11890_v56 = vpop.permute.xlu1 %1502  ;;  %v1239_v44 = vsel %vm253_vm1, %v16249_v35, %v16248_v2  ;;  %v10042_v8 = vcombine.low %v1330_v62, %v1334_v6  ;;  %v10048_v51 = vcombine.low %v1379_v22, %v1383_v17  ;;  %v1230_v32 = vrot.slane %v11671_v60, 4  ;;  %v16253_v48 = vld [vmem:[#allocation24_spill] sm:$0xff]  ;;  %v16255_v59 = vld [vmem:[#allocation14_spill] sm:$0xff] }
 0x1ab   : > { %1863 = vmatprep.subr.bf16.mxu0 %v10043_v40  ;;  %1902 = vmatprep.subr.bf16.mxu1 %v10049_v41  ;;  %v16250_v34 = vrot.slane %v11712_v53, 4  ;;  %v10039_v30 = vcombine.high %v1283_v11, %v1287_v13  ;;  %v10045_v0 = vcombine.high %v1332_v58, %v1336_v21  ;;  %v1137_v29 = vrot.slane %v11654_v25, 4  ;;  %v16256_v41 = vld [vmem:[#allocation22_spill] sm:$0xff] }
 0x1ac   : > { %2337 = vrot.lane.b32.xlu1 %v11546_v4, %s16025_s28  ;;  %v1187_v6 = vsel %vm253_vm1, %v16251_v7, %v1182_v19  ;;  %v1240_v55 = vsel %vm16022_vm8, %v11697_v46, %v1239_v44  ;;  %v1289_v17 = vsel %vm16021_vm15, %v11702_v5, %v1288_v38  ;;  %v16252_v3 = vrot.slane %v11659_v31, 4 }
 0x1ad   : > { %2300 = vrot.lane.b32.xlu0 %v2283_v16, %s16023_s22  ;;  %v1284_v47 = vsel %vm253_vm1, %v16250_v34, %v1277_v15  ;;  %v1186_v42 = vrot.slane %v16253_v48, 4  ;;  %v1236_v62 = vsel %vm16022_vm8, %v11665_v50, %v1234_v52  ;;  %v16254_v46 = vmov %v16248_v2  ;;  %v16258_v52 = vld [vmem:[#allocation13_spill] sm:$0xff]  ;;  %s16028_s22 = smov 67  }
 0x1ae   : > { %1864 = vmatpush1.bf16.msra.mxu0 %v10042_v8  ;;  %1903 = vmatpush1.bf16.msra.mxu1 %v10048_v51  ;;  %v11922_v60 = vpop.permute.xlu0 %1461  ;;  %v11926_v24 = vpop.permute.xlu1 %1506  ;;  %v1192_v49 = vsel %vm253_vm1, %v1184_v39, %v16252_v3  ;;  %v1241_v22 = vsel %vm253_vm1, %v16254_v46, %v1233_v23  ;;  %v1088_v15 = vrot.slane %v16255_v59, 4  ;;  %v1285_v5 = vsel %vm16021_vm15, %v11712_v53, %v1284_v47  ;;  %v16259_v53 = vld [vmem:[#allocation16_spill] sm:$0xff]  ;;  %v16263_v8 = vld [vmem:[#allocation23_spill] sm:$0xff] }
 0x1af   : > { %1865 = vmatprep.subr.bf16.mxu0 %v10039_v30  ;;  %1904 = vmatprep.subr.bf16.mxu1 %v10045_v0  ;;  %v10038_v12 = vcombine.low %v1283_v11, %v1287_v13  ;;  %v10044_v40 = vcombine.low %v1332_v58, %v1336_v21  ;;  %v1183_v50 = vrot.slane %v16256_v41, 4  ;;  %v16257_v16 = vmov %v16246_v20  ;;  %v16265_v0 = vld [vmem:[#allocation18_spill] sm:$0xff]  ;;  %v16269_v46 = vld [vmem:[#allocation19_spill] sm:$0xff] }
 0x1b0   : > { %2341 = vrot.lane.b32.xlu1 %v2327_v36, %s16025_s28  ;;  %v1237_v39 = vsel %vm253_vm1, %v16257_v16, %v1230_v32  ;;  %v10035_v20 = vcombine.high %v1236_v62, %v1240_v55  ;;  %v10041_v57 = vcombine.high %v1285_v5, %v1289_v17  ;;  %v1090_v2 = vrot.slane %v16258_v52, 4 }
 0x1b1   : > { %2339 = vrot.lane.b32.xlu0 %v11509_v9, %s16025_s28  ;;  %v16260_v13 = vrot.slane %v16259_v53, 4  ;;  %v1193_v35 = vsel %vm16027_vm9, %v11674_v27, %v1192_v49  ;;  %v1242_v23 = vsel %vm16022_vm8, %v11678_v37, %v1241_v22  ;;  %v16262_v38 = vrot.slane %v16261_v61, 4 }
 0x1b2   : > { %1866 = vmatpush1.bf16.msra.mxu0 %v10038_v12  ;;  %1905 = vmatpush1.bf16.msra.mxu1 %v10044_v40  ;;  %v11955_v44 = vpop.permute.xlu0 %1500  ;;  %v11959_v11 = vpop.permute.xlu1 %1545  ;;  %v1139_v51 = vrot.slane %v16263_v8, 4  ;;  %v1189_v32 = vsel %vm16027_vm9, %v11638_v63, %v1187_v6  ;;  %v16264_v27 = vmov %v16252_v3  ;;  %vm1141_vm15 = vcmask 826368   ;;  %v2330_v6 = vld [vmem:[%s11005_s29 + $0x2c] sm:$0xf]  ;;  %v16268_v3 = vld [vmem:[#allocation21_spill] sm:$0xff] }
 0x1b3   : > { %v1140_v21 = vsel %vm253_vm1, %v16260_v13, %v1135_v14  ;;  %v1145_v58 = vsel %vm253_vm1, %v1137_v29, %v16262_v38  ;;  %v1194_v34 = vsel %vm253_vm1, %v16264_v27, %v1186_v42  ;;  %1867 = vmatprep.subr.bf16.mxu0 %v10035_v20  ;;  %1906 = vmatprep.subr.bf16.mxu1 %v10041_v57  ;;  %v1136_v63 = vrot.slane %v16265_v0, 4 }
 0x1b4   : > { %v1238_v37 = vsel %vm16022_vm8, %v11688_v33, %v1237_v39  ;;  %v10034_v47 = vcombine.low %v1236_v62, %v1240_v55  ;;  %v10040_v30 = vcombine.low %v1285_v5, %v1289_v17  ;;  %2345 = vrot.lane.b32.xlu1 %v11518_v28, %s16025_s28  ;;  %v1190_v36 = vsel %vm253_vm1, %v1182_v19, %v1183_v50  ;;  %v16266_v33 = vld [vmem:[#allocation17_spill] sm:$0xff]  ;;  %v16270_v5 = vld [vmem:[#allocation12_spill] sm:$0xff] }
 0x1b5   : > { %2343 = vrot.lane.b32.xlu0 %v11528_v54, %s16025_s28  ;;  %v10031_v29 = vcombine.high %v1189_v32, %v1193_v35  ;;  %v10037_v7 = vcombine.high %v1238_v37, %v1242_v23  ;;  %v16267_v55 = vrot.slane %v16266_v33, 4  ;;  %v1092_v49 = vrot.slane %v16268_v3, 4 }
 0x1b6   : > { %v1146_v48 = vsel %vm1141_vm15, %v11654_v25, %v1145_v58  ;;  %1868 = vmatpush1.bf16.msra.mxu0 %v10034_v47  ;;  %1907 = vmatpush1.bf16.msra.mxu1 %v10040_v30  ;;  %v11989_v42 = vpop.permute.xlu0 %1504  ;;  %v1195_v19 = vsel %vm16027_vm9, %v11659_v31, %v1194_v34  ;;  %v11993_v62 = vpop.permute.xlu1 %1549  ;;  %v1089_v22 = vrot.slane %v16269_v46, 4  ;;  %v16271_v12 = vrot.slane %v16270_v5, 4  ;;  %v16276_v46 = vld [vmem:[#allocation25_spill] sm:$0xff] }
 0x1b7   : > { %v1093_v17 = vsel %vm253_vm1, %v16267_v55, %v1088_v15  ;;  %v1142_v41 = vsel %vm1141_vm15, %v16259_v53, %v1140_v21  ;;  %v16272_v25 = vmov %v16262_v38  ;;  %1869 = vmatprep.subr.bf16.mxu0 %v10031_v29  ;;  %1908 = vmatprep.subr.bf16.mxu1 %v10037_v7  ;;  %vm1094_vm8 = vcmask 834560   ;;  %v2374_v53 = vld [vmem:[%s11005_s29 + $0x10] sm:$0xf]  ;;  %v2377_v55 = vld [vmem:[%s11005_s29 + $0x2c] sm:$0xf] }
 0x1b8   : > { %v1098_v40 = vsel %vm253_vm1, %v1090_v2, %v16271_v12  ;;  %v1147_v50 = vsel %vm253_vm1, %v16272_v25, %v1139_v51  ;;  %v1191_v31 = vsel %vm16027_vm9, %v11667_v10, %v1190_v36  ;;  %v10030_v16 = vcombine.low %v1189_v32, %v1193_v35  ;;  %2384 = vrot.lane.b32.xlu1 %v11546_v4, %s16028_s22 }
 0x1b9   : > { %v10036_v39 = vcombine.low %v1238_v37, %v1242_v23  ;;  %2347 = vrot.lane.b32.xlu0 %v2330_v6, %s16025_s28  ;;  %v1143_v20 = vsel %vm253_vm1, %v1135_v14, %v1136_v63  ;;  %v10027_v57 = vcombine.high %v1142_v41, %v1146_v48  ;;  %v10033_v2 = vcombine.high %v1191_v31, %v1195_v19  ;;  %s16030_s28 = smov 66  }
 0x1ba   : > { %v1099_v13 = vsel %vm1094_vm8, %v16258_v52, %v1098_v40  ;;  %v16273_v10 = vmov %v16271_v12  ;;  %1870 = vmatpush1.bf16.msra.mxu0 %v10030_v16  ;;  %v12018_v35 = vpop.permute.xlu0 %1508  ;;  %v1148_v23 = vsel %vm1141_vm15, %v16261_v61, %v1147_v50  ;;  %v12022_v38 = vpop.permute.xlu1 %1553  ;;  %v1096_v14 = vsel %vm253_vm1, %v1088_v15, %v1089_v22  ;;  %v12076_v16 = vld [vmem:[%s11005_s29 + $0x8] sm:$0xff] }
 0x1bb   : > { %v1100_v21 = vsel %vm253_vm1, %v16273_v10, %v1092_v49  ;;  %1909 = vmatpush1.bf16.msra.mxu1 %v10036_v39  ;;  %v1095_v52 = vsel %vm1094_vm8, %v16266_v33, %v1093_v17  ;;  %1871 = vmatprep.subr.bf16.mxu0 %v10027_v57  ;;  %v1144_v58 = vsel %vm1141_vm15, %v11642_v26, %v1143_v20  ;;  %v1514_v37 = vrot.slane %v11926_v24, 4 }
 0x1bc   : > { %1910 = vmatprep.subr.bf16.mxu1 %v10033_v2  ;;  %v10026_v8 = vcombine.low %v1142_v41, %v1146_v48  ;;  %v10032_v51 = vcombine.low %v1191_v31, %v1195_v19  ;;  %2388 = vrot.lane.b32.xlu1 %v2374_v53, %s16028_s22  ;;  %v10023_v61 = vcombine.high %v1095_v52, %v1099_v13  ;;  %v1513_v47 = vrot.slane %v11989_v42, 4  ;;  %v2421_v31 = vld [vmem:[%s11005_s29 + $0x10] sm:$0xf] }
 0x1bd   : > { %2386 = vrot.lane.b32.xlu0 %v11509_v9, %s16028_s22  ;;  %v10029_v32 = vcombine.high %v1144_v58, %v1148_v23  ;;  %v1101_v15 = vsel %vm1094_vm8, %v16270_v5, %v1100_v21  ;;  %v1097_v27 = vsel %vm1094_vm8, %v16255_v59, %v1096_v14  ;;  %v1557_v9 = vrot.slane %v11959_v11, 4  ;;  %v16278_v21 = vld [vmem:[#allocation26_spill] sm:$0xff] }
 0x1be   : > { %1872 = vmatpush1.bf16.msra.mxu0 %v10026_v8  ;;  %v12038_v34 = vpop.permute.xlu0 %1547  ;;  %v12040_v26 = vpop.permute.xlu1 %1961  ;;  %v10022_v0 = vcombine.low %v1095_v52, %v1099_v13  ;;  %v1467_v59 = vrot.slane %v11832_v43, 4  ;;  %v10028_v63 = vcombine.low %v1144_v58, %v1148_v23  ;;  %v10025_v36 = vcombine.high %v1097_v27, %v1101_v15  ;;  %v12097_v58 = vld [vmem:[%s11005_s29 + $0x24] sm:$0xff]  ;;  %v12100_v8 = vld [vmem:[%s11005_s29 + $0x1c] sm:$0xff] }
 0x1bf   : > { %1911 = vmatpush1.bf16.msra.mxu1 %v10032_v51  ;;  %16274 = vst [vmem:[#allocation24_spill] sm:$0xff] %v12040_v26  ;;  %v1558_v30 = vrot.slane %v12038_v34, 4  ;;  %1873 = vmatprep.subr.bf16.mxu0 %v10023_v61  ;;  %v1466_v29 = vrot.slane %v11886_v1, 4  ;;  %v1510_v7 = vrot.slane %v11860_v18, 4  ;;  %v1511_v6 = vrot.slane %v11955_v44, 4 }
 0x1c0   : > { %1912 = vmatprep.subr.bf16.mxu1 %v10029_v32  ;;  %2392 = vrot.lane.b32.xlu1 %v11518_v28, %s16028_s22  ;;  %v1561_v33 = vrot.slane %v12022_v38, 4  ;;  %vm16056_vm15 = vcmask 760832   ;;  %v1515_v17 = vrot.slane %v12018_v35, 4  ;;  %vm16038_vm8 = vcmask 752640  }
 0x1c1   : > { %2390 = vrot.lane.b32.xlu0 %v11528_v54, %s16028_s22  ;;  %v1521_v54 = vsel %vm253_vm1, %v1513_v47, %v1514_v37  ;;  %v1559_v49 = vrot.slane %v11993_v62, 4  ;;  %v1563_v48 = vsel %vm253_vm1, %v1557_v9, %v1558_v30  ;;  %v1463_v22 = vrot.slane %v16276_v46, 4 }
 0x1c2   : > { %1874 = vmatpush1.bf16.msra.mxu0 %v10022_v0  ;;  %v1552_v3 = vpop.permute.xlu0 %1551  ;;  %v12057_v28 = vpop.permute.xlu1 %1965  ;;  %v1464_v5 = vrot.slane %v11854_v45, 4  ;;  %v1512_v12 = vrot.slane %v11890_v56, 4  ;;  %v10024_v40 = vcombine.low %v1097_v27, %v1101_v15  ;;  %v1474_v62 = vsel %vm253_vm1, %v1466_v29, %v1467_v59 }
 0x1c3   : > { %1913 = vmatpush1.bf16.msra.mxu1 %v10028_v63  ;;  %16275 = vst [vmem:[#allocation14_spill] sm:$0xff] %v12057_v28  ;;  %v1560_v19 = vrot.slane %v1552_v3, 4  ;;  %v1468_v41 = vrot.slane %v11922_v60, 4  ;;  %v1516_v25 = vsel %vm253_vm1, %v1510_v7, %v1511_v6  ;;  %v1522_v56 = vsel %vm16056_vm15, %v11989_v42, %v1521_v54  ;;  %v2424_v63 = vld [vmem:[%s11005_s29 + $0x2c] sm:$0xf] }
 0x1c4   : > { %1914 = vmatprep.subr.bf16.mxu1 %v10025_v36  ;;  %2431 = vrot.lane.b32.xlu1 %v11546_v4, %s16030_s28  ;;  %v1523_v4 = vsel %vm253_vm1, %v1514_v37, %v1515_v17  ;;  %v1565_v39 = vsel %vm16038_vm8, %v11959_v11, %v1563_v48  ;;  %v1566_v2 = vsel %vm253_vm1, %v1558_v30, %v1559_v49  ;;  %v1465_v42 = vrot.slane %v16278_v21, 4  ;;  %v16283_v17 = vld [vmem:[#allocation15_spill] sm:$0xff] }
 0x1c5   : > { %2394 = vrot.lane.b32.xlu0 %v2377_v55, %s16028_s22  ;;  %v1568_v50 = vsel %vm253_vm1, %v1560_v19, %v1561_v33  ;;  %vm16057_vm9 = vcmask 769024   ;;  %v1518_v35 = vsel %vm16056_vm15, %v11860_v18, %v1516_v25  ;;  %v1469_v11 = vsel %vm253_vm1, %v1463_v22, %v1464_v5  ;;  %s10830_s22 = smov 50  }
 0x1c6   : > { %v1569_v20 = vsel %vm16038_vm8, %v1552_v3, %v1568_v50  ;;  %v1556_v57 = vpop.permute.xlu0 %1555  ;;  %v12084_v60 = vpop.permute.xlu1 %1969  ;;  %v1519_v23 = vsel %vm253_vm1, %v1511_v6, %v1512_v12  ;;  %v10059_v52 = vcombine.high %v1518_v35, %v1522_v56  ;;  %v1475_v18 = vsel %vm16057_vm9, %v11886_v1, %v1474_v62  ;;  %v2884_v62 = vld [vmem:[%s11005_s29 + $0x10] sm:$0xf] }
 0x1c7   : > { %1915 = vmatpush1.bf16.msra.mxu1 %v10024_v40  ;;  %16277 = vst [vmem:[#allocation22_spill] sm:$0xff] %v12084_v60  ;;  %v10062_v53 = vcombine.low %v1565_v39, %v1569_v20  ;;  %v1562_v13 = vrot.slane %v1556_v57, 4  ;;  %v10063_v10 = vcombine.high %v1565_v39, %v1569_v20  ;;  %v1567_v51 = vsel %vm16038_vm8, %v12038_v34, %v1566_v2  ;;  %v2931_v20 = vld [vmem:[%s11005_s29 + $0x10] sm:$0xf] }
 0x1c8   : > { %2435 = vrot.lane.b32.xlu1 %v2421_v31, %s16030_s28  ;;  %v1524_v15 = vsel %vm16056_vm15, %v11926_v24, %v1523_v4  ;;  %v1476_v1 = vsel %vm253_vm1, %v1467_v59, %v1468_v41  ;;  %v1471_v47 = vsel %vm16057_vm9, %v16276_v46, %v1469_v11  ;;  %v10058_v9 = vcombine.low %v1518_v35, %v1522_v56  ;;  %v12127_v59 = vld [vmem:[%s11005_s29] sm:$0xff]  ;;  %v2887_v56 = vld [vmem:[%s11005_s29 + $0x2c] sm:$0xf]  ;;  %v2978_v35 = vld [vmem:[%s11005_s29 + $0x10] sm:$0xf] }
 0x1c9   : > { %2433 = vrot.lane.b32.xlu0 %v12076_v16, %s16030_s28  ;;  %v1570_v14 = vsel %vm253_vm1, %v1561_v33, %v1562_v13  ;;  %1885 = vmatprep.subr.bf16.mxu0 %v10063_v10  ;;  %v1472_v24 = vsel %vm253_vm1, %v1464_v5, %v1465_v42  ;;  %v10055_v30 = vcombine.high %v1471_v47, %v1475_v18  ;;  %v12155_v46 = vld [vmem:[#allocation6 + $0x10] sm:$0xff]  ;;  %vm16086_vm14 = vcmask 564224  }
 0x1ca   : > { %1886 = vmatpush2.bf16.msra.mxu0 %v10062_v53  ;;  %v12106_v61 = vpop.permute.xlu0 %1963  ;;  %v1571_v32 = vsel %vm16038_vm8, %v12022_v38, %v1570_v14  ;;  %v12112_v27 = vpop.permute.xlu1 %2008  ;;  %v1520_v38 = vsel %vm16056_vm15, %v11955_v44, %v1519_v23  ;;  %v1477_v44 = vsel %vm16057_vm9, %v11832_v43, %v1476_v1  ;;  %v1473_v7 = vsel %vm16057_vm9, %v11854_v45, %v1472_v24  ;;  %v2837_v43 = vld [vmem:[%s11005_s29 + $0x10] sm:$0xf]  ;;  %v2840_v5 = vld [vmem:[%s11005_s29 + $0x2c] sm:$0xf] }
 0x1cb   : > { %16279 = vst [vmem:[#allocation13_spill] sm:$0xff] %v12106_v61  ;;  %16280 = vst [vmem:[#allocation16_spill] sm:$0xff] %v12112_v27  ;;  %1887 = vmatprep.subr.bf16.mxu0 %v10059_v52  ;;  %v10064_v37 = vcombine.low %v1567_v51, %v1571_v32  ;;  %v10065_v34 = vcombine.high %v1567_v51, %v1571_v32  ;;  %v10061_v0 = vcombine.high %v1520_v38, %v1524_v15  ;;  %v2934_v10 = vld [vmem:[%s11005_s29 + $0x2c] sm:$0xf]  ;;  %vm16079_vm8 = vcmask 572416  }
 0x1cc   : > { %2439 = vrot.lane.b32.xlu1 %v12097_v58, %s16030_s28  ;;  %v10054_v6 = vcombine.low %v1471_v47, %v1475_v18  ;;  %v10060_v33 = vcombine.low %v1520_v38, %v1524_v15  ;;  %v10057_v55 = vcombine.high %v1473_v7, %v1477_v44  ;;  %v10020_v3 = vcombine.low %v16283_v17, %v16283_v17  ;;  %v2981_v18 = vld [vmem:[%s11005_s29 + $0x2c] sm:$0xf]  ;;  %v3025_v15 = vld [vmem:[%s11005_s29 + $0x10] sm:$0xf] }
 0x1cd   : > { %2437 = vrot.lane.b32.xlu0 %v12100_v8, %s16030_s28  ;;  %1926 = vmatprep.subr.bf16.mxu1 %v10065_v34  ;;  %v10056_v45 = vcombine.low %v1473_v7, %v1477_v44  ;;  %16286 = vst [vmem:[#allocation21_spill] sm:$0xff] %v12155_v46  ;;  %v10069_v22 = vcombine.high %v12155_v46, %v12155_v46  ;;  %v3028_v38 = vld [vmem:[%s11005_s29 + $0x2c] sm:$0xf]  ;;  %vm16078_vm12 = vcmask 580608   ;;  %vm16060_vm13 = vcmask 588800  }
 0x1ce   : > { %1888 = vmatpush2.bf16.msra.mxu0 %v10058_v9  ;;  %1927 = vmatpush2.bf16.msra.mxu1 %v10064_v37  ;;  %v12130_v36 = vpop.permute.xlu0 %1967  ;;  %v12134_v29 = vpop.permute.xlu1 %2012  ;;  %v3075_v17 = vld [vmem:[%s11005_s29 + $0x2c] sm:$0xf]  ;;  %v3166_v27 = vld [vmem:[%s11005_s29 + $0x10] sm:$0xf]  ;;  %vm16061_vm15 = vcmask 596992   ;;  %vm16066_vm9 = vcmask 605184  }
 0x1cf   : > { %16281 = vst [vmem:[#allocation20_spill] sm:$0xff] %v12130_v36  ;;  %16282 = vst [vmem:[#allocation23_spill] sm:$0xff] %v12134_v29  ;;  %1889 = vmatprep.subr.bf16.mxu0 %v10055_v30  ;;  %1928 = vmatprep.subr.bf16.mxu1 %v10061_v0  ;;  %v3072_v30 = vld [vmem:[%s11005_s29 + $0x10] sm:$0xf] }
 0x1d0   : > { %2847 = vrot.lane.b32.xlu1 %v12127_v59, %s10830_s22 }
 0x1d1   : > { %2441 = vrot.lane.b32.xlu0 %v2424_v63, %s16030_s28  ;;  %s10831_s28 = smov 49  }
 0x1d2   : > { %1890 = vmatpush2.bf16.msra.mxu0 %v10054_v6  ;;  %1929 = vmatpush2.bf16.msra.mxu1 %v10060_v33  ;;  %v12144_v54 = vpop.permute.xlu0 %1971  ;;  %v12146_v49 = vpop.permute.xlu1 %2016 }
 0x1d3   : > { %16284 = vst [vmem:[#allocation18_spill] sm:$0xff] %v12144_v54  ;;  %16285 = vst [vmem:[#allocation17_spill] sm:$0xff] %v12146_v49  ;;  %1930 = vmatprep.subr.bf16.mxu1 %v10057_v55 }
 0x1d4   : > { %2851 = vrot.lane.b32.xlu1 %v2837_v43, %s10830_s22 }
 0x1d5   : > { %2849 = vrot.lane.b32.xlu0 %v12076_v16, %s10830_s22  ;;  %1892 = vmatmul.mubr.bf16.vlgmr.msra.gmra.mxu0 %v10020_v3 }
 0x1d6   : > { %1931 = vmatpush2.bf16.msra.mxu1 %v10056_v45  ;;  %v12151_v48 = vpop.permute.xlu0 %2010  ;;  %v12153_v19 = vpop.permute.xlu1 %2055  ;;  %10114 = vmatprep.mubr.msk.bf16.mxu0 %vm969_vm0, %v10069_v22 }
 0x1d8   : > { %2855 = vrot.lane.b32.xlu1 %v12097_v58, %s10830_s22 }
 0x1d9   : > { %2853 = vrot.lane.b32.xlu0 %v12100_v8, %s10830_s22  ;;  %1933 = vmatmul.mubr.bf16.vlgmr.msra.gmra.mxu1 %v10020_v3 }
 0x1da   : > { %v12164_v12 = vpop.permute.xlu0 %2014  ;;  %v12166_v40 = vpop.permute.xlu1 %2059  ;;  %10115 = vmatprep.mubr.msk.bf16.mxu1 %vm969_vm0, %v10069_v22 }
 0x1db   : > { %16287 = vst [vmem:[#allocation19_spill] sm:$0xff] %v12166_v40 }
 0x1dc   : > { %2894 = vrot.lane.b32.xlu1 %v12127_v59, %s10831_s28 }
 0x1dd   : > { %2857 = vrot.lane.b32.xlu0 %v2840_v5, %s10830_s22  ;;  %s16032_s22 = smov 48  }
 0x1de   : > { %v12173_v41 = vpop.permute.xlu0 %2018  ;;  %v12175_v25 = vpop.permute.xlu1 %2063 }
 0x1df   : > { %16288 = vst [vmem:[#allocation12_spill] sm:$0xff] %v12173_v41 }
 0x1e0   : > { %2898 = vrot.lane.b32.xlu1 %v2884_v62, %s10831_s28  ;;  %v3119_v62 = vld [vmem:[%s11005_s29 + $0x10] sm:$0xf] }
 0x1e1   : > { %2896 = vrot.lane.b32.xlu0 %v12076_v16, %s10831_s28 }
 0x1e2   : > { %v12178_v50 = vpop.permute.xlu0 %2057  ;;  %v12180_v31 = vpop.permute.xlu1 %2102 }
 0x1e4   : > { %2902 = vrot.lane.b32.xlu1 %v12097_v58, %s10831_s28 }
 0x1e5   : > { %2900 = vrot.lane.b32.xlu0 %v12100_v8, %s10831_s28 }
 0x1e6   : > { %v12185_v4 = vpop.permute.xlu0 %2061  ;;  %v12187_v39 = vpop.permute.xlu1 %2106 }
 0x1e8   : > { %2941 = vrot.lane.b32.xlu1 %v12127_v59, %s16032_s22 }
 0x1e9   : > { %2904 = vrot.lane.b32.xlu0 %v2887_v56, %s10831_s28  ;;  %s16034_s28 = smov 47  }
 0x1ea   : > { %v12192_v57 = vpop.permute.xlu0 %2065  ;;  %v12194_v2 = vpop.permute.xlu1 %2110 }
 0x1eb   : > { %16289 = vst [vmem:[#allocation25_spill] sm:$0xff] %v12192_v57 }
 0x1ec   : > { %2945 = vrot.lane.b32.xlu1 %v2931_v20, %s16032_s22 }
 0x1ed   : > { %2943 = vrot.lane.b32.xlu0 %v12076_v16, %s16032_s22 }
 0x1ee   : > { %v12199_v53 = vpop.permute.xlu0 %2104  ;;  %v12201_v13 = vpop.permute.xlu1 %2149 }
 0x1f0   : > { %2949 = vrot.lane.b32.xlu1 %v12097_v58, %s16032_s22 }
 0x1f1   : > { %2947 = vrot.lane.b32.xlu0 %v12100_v8, %s16032_s22 }
 0x1f2   : > { %v12208_v21 = vpop.permute.xlu0 %2108  ;;  %v12210_v42 = vpop.permute.xlu1 %2153 }
 0x1f4   : > { %2988 = vrot.lane.b32.xlu1 %v12127_v59, %s16034_s28 }
 0x1f5   : > { %2951 = vrot.lane.b32.xlu0 %v2934_v10, %s16032_s22  ;;  %s16036_s22 = smov 46  }
 0x1f6   : > { %v12216_v11 = vpop.permute.xlu0 %2112  ;;  %v12218_v23 = vpop.permute.xlu1 %2157 }
 0x1f8   : > { %2992 = vrot.lane.b32.xlu1 %v2978_v35, %s16034_s28 }
 0x1f9   : > { %2990 = vrot.lane.b32.xlu0 %v12076_v16, %s16034_s28 }
 0x1fa   : > { %v12223_v14 = vpop.permute.xlu0 %2151  ;;  %v12225_v52 = vpop.permute.xlu1 %2196 }
 0x1fc   : > { %2996 = vrot.lane.b32.xlu1 %v12097_v58, %s16034_s28 }
 0x1fd   : > { %2994 = vrot.lane.b32.xlu0 %v12100_v8, %s16034_s28 }
 0x1fe   : > { %v12232_v51 = vpop.permute.xlu0 %2155  ;;  %v12234_v32 = vpop.permute.xlu1 %2200 }
 0x1ff   : > { %v2164_v49 = vrot.slane %v12232_v51, 4 }
 0x200   : > { %3035 = vrot.lane.b32.xlu1 %v12127_v59, %s16036_s22 }
 0x201   : > { %2998 = vrot.lane.b32.xlu0 %v2981_v18, %s16034_s28  ;;  %s16050_s28 = smov 45  }
 0x202   : > { %v12240_v1 = vpop.permute.xlu0 %2159  ;;  %v12242_v37 = vpop.permute.xlu1 %2204 }
 0x204   : > { %3039 = vrot.lane.b32.xlu1 %v3025_v15, %s16036_s22 }
 0x205   : > { %3037 = vrot.lane.b32.xlu0 %v12076_v16, %s16036_s22 }
 0x206   : > { %v12247_v34 = vpop.permute.xlu0 %2198  ;;  %v12249_v47 = vpop.permute.xlu1 %2243 }
 0x208   : > { %3043 = vrot.lane.b32.xlu1 %v12097_v58, %s16036_s22 }
 0x209   : > { %3041 = vrot.lane.b32.xlu0 %v12100_v8, %s16036_s22 }
 0x20a   : > { %v12256_v9 = vpop.permute.xlu0 %2202  ;;  %v12258_v24 = vpop.permute.xlu1 %2247 }
 0x20c   : > { %3082 = vrot.lane.b32.xlu1 %v12127_v59, %s16050_s28 }
 0x20d   : > { %3045 = vrot.lane.b32.xlu0 %v3028_v38, %s16036_s22  ;;  %s16058_s22 = smov 44  }
 0x20e   : > { %v12264_v0 = vpop.permute.xlu0 %2206  ;;  %v12266_v63 = vpop.permute.xlu1 %2251 }
 0x210   : > { %3086 = vrot.lane.b32.xlu1 %v3072_v30, %s16050_s28 }
 0x211   : > { %3084 = vrot.lane.b32.xlu0 %v12076_v16, %s16050_s28  ;;  %v12271_v44 = vpop.f32.mrf.mxu0 }
 0x212   : > { %16290 = vst [vmem:[#allocation26_spill] sm:$0xff] %v12271_v44  ;;  %v12273_v7 = vpop.permute.xlu0 %2245  ;;  %v12275_v6 = vpop.permute.xlu1 %2290  ;;  %v2208_v44 = vrot.slane %v12225_v52, 4 }
 0x213   : > { %v12277_v33 = vpop.f32.mrf.mxu0  ;;  %v2302_v18 = vrot.slane %v12275_v6, 4 }
 0x214   : > { %16291 = vst [vmem:[#allocation15_spill] sm:$0xff] %v12277_v33  ;;  %3090 = vrot.lane.b32.xlu1 %v12097_v58, %s16050_s28  ;;  %v2256_v33 = vrot.slane %v12273_v7, 4 }
 0x215   : > { %3088 = vrot.lane.b32.xlu0 %v12100_v8, %s16050_s28  ;;  %v12283_v55 = vpop.f32.mrf.mxu1  ;;  %v1011_v3 = vpop.f32.mrf.mxu0 }
 0x216   : > { %16292 = vst [vmem:[#allocation27_spill] sm:$0xff] %v12283_v55  ;;  %v12286_v43 = vpop.permute.xlu0 %2249  ;;  %v12288_v45 = vpop.permute.xlu1 %2294  ;;  %v2161_v3 = vrot.slane %v12201_v13, 4  ;;  %v2255_v55 = vrot.slane %v12249_v47, 4 }
 0x217   : > { %v12290_v22 = vpop.f32.mrf.mxu1  ;;  %v1012_v5 = vpop.f32.mrf.mxu0  ;;  %v2258_v15 = vrot.slane %v12286_v43, 4  ;;  %v2304_v26 = vrot.slane %v12288_v45, 4  ;;  %v16296_v45 = vrot.slane %v12242_v37, 4 }
 0x218   : > { %16293 = vst [vmem:[#allocation28_spill] sm:$0xff] %v12290_v22  ;;  %3129 = vrot.lane.b32.xlu1 %v12127_v59, %s16058_s22  ;;  %v2211_v22 = vrot.slane %v12256_v9, 4  ;;  %v2209_v5 = vrot.slane %v12247_v34, 4  ;;  %v2261_v46 = vsel %vm253_vm1, %v2255_v55, %v2256_v33 }
 0x219   : > { %3092 = vrot.lane.b32.xlu0 %v3075_v17, %s16050_s28  ;;  %v1052_v56 = vpop.f32.mrf.mxu1  ;;  %v3122_v17 = vld [vmem:[%s11005_s29 + $0x2c] sm:$0xf]  ;;  %s16062_s28 = smov 43  }
 0x21a   : > { %v2254_v20 = vpop.permute.xlu0 %2253  ;;  %v12296_v10 = vpop.permute.xlu1 %2298 }
 0x21b   : > { %v1053_v35 = vpop.f32.mrf.mxu1  ;;  %v2306_v30 = vrot.slane %v12296_v10, 4 }
 0x21c   : > { %3133 = vrot.lane.b32.xlu1 %v3119_v62, %s16058_s22  ;;  %v2259_v35 = vrot.slane %v12266_v63, 4 }
 0x21d   : > { %3131 = vrot.lane.b32.xlu0 %v12076_v16, %s16058_s22 }
 0x21e   : > { %v12308_v62 = vpop.permute.xlu0 %2292  ;;  %v12310_v56 = vpop.permute.xlu1 %2337  ;;  %v2266_v54 = vsel %vm253_vm1, %v2258_v15, %v2259_v35  ;;  %v2213_v15 = vrot.slane %v12264_v0, 4 }
 0x21f   : > { %16294 = vst [vmem:[#allocation29_spill] sm:$0xff] %v12310_v56  ;;  %v2303_v38 = vrot.slane %v12308_v62, 4  ;;  %v2260_v56 = vrot.slane %v2254_v20, 4  ;;  %v2257_v20 = vrot.slane %v12258_v24, 4  ;;  %v2267_v24 = vsel %vm16079_vm8, %v12286_v43, %v2266_v54 }
 0x220   : > { %3137 = vrot.lane.b32.xlu1 %v12097_v58, %s16058_s22  ;;  %v16298_v43 = vrot.slane %v12218_v23, 4 }
 0x221   : > { %3135 = vrot.lane.b32.xlu0 %v12100_v8, %s16058_s22  ;;  %v2308_v29 = vsel %vm253_vm1, %v2302_v18, %v2303_v38  ;;  %v2219_v18 = vsel %vm253_vm1, %v2211_v22, %v16296_v45  ;;  %v2268_v36 = vsel %vm253_vm1, %v2259_v35, %v2260_v56  ;;  %v2311_v0 = vsel %vm253_vm1, %v2303_v38, %v2304_v26 }
 0x222   : > { %v2297_v60 = vpop.permute.xlu0 %2296  ;;  %v12332_v28 = vpop.permute.xlu1 %2341  ;;  %v2310_v40 = vsel %vm16086_vm14, %v12275_v6, %v2308_v29  ;;  %v2172_v56 = vsel %vm253_vm1, %v2164_v49, %v16298_v43  ;;  %v2210_v29 = vrot.slane %v12234_v32, 4  ;;  %v2214_v26 = vsel %vm253_vm1, %v2208_v44, %v2209_v5 }
 0x223   : > { %16295 = vst [vmem:[#allocation30_spill] sm:$0xff] %v12332_v28  ;;  %v2305_v41 = vrot.slane %v2297_v60, 4  ;;  %v2220_v49 = vsel %vm16078_vm12, %v12256_v9, %v2219_v18  ;;  %v2312_v32 = vsel %vm16086_vm14, %v12308_v62, %v2311_v0  ;;  %v2166_v6 = vrot.slane %v12240_v1, 4  ;;  %v3169_v18 = vld [vmem:[%s11005_s29 + $0x2c] sm:$0xf] }
 0x224   : > { %3176 = vrot.lane.b32.xlu1 %v12127_v59, %s16062_s28  ;;  %v2163_v1 = vrot.slane %v12210_v42, 4  ;;  %v2217_v62 = vsel %vm253_vm1, %v2209_v5, %v2210_v29 }
 0x225   : > { %3139 = vrot.lane.b32.xlu0 %v3122_v17, %s16058_s22  ;;  %v2313_v28 = vsel %vm253_vm1, %v2305_v41, %v2306_v30  ;;  %v16297_v41 = vrot.slane %v12223_v14, 4  ;;  %v2218_v29 = vsel %vm16078_vm12, %v12247_v34, %v2217_v62  ;;  %s16064_s22 = smov 42   ;;  %v16305_v34 = vrot.slane %v12153_v19, 4 }
 0x226   : > { %v2314_v17 = vsel %vm16086_vm14, %v2297_v60, %v2313_v28  ;;  %v2301_v61 = vpop.permute.xlu0 %2300  ;;  %v12357_v57 = vpop.permute.xlu1 %2345  ;;  %v2263_v28 = vsel %vm16079_vm8, %v12249_v47, %v2261_v46  ;;  %v2264_v60 = vsel %vm253_vm1, %v2256_v33, %v2257_v20  ;;  %v2269_v47 = vsel %vm16079_vm8, %v12266_v63, %v2268_v36 }
 0x227   : > { %v10098_v22 = vcombine.low %v2310_v40, %v2314_v17  ;;  %v2307_v55 = vrot.slane %v2301_v61, 4  ;;  %v10099_v45 = vcombine.high %v2310_v40, %v2314_v17  ;;  %v2167_v54 = vsel %vm253_vm1, %v2161_v3, %v16297_v41 }
 0x228   : > { %3180 = vrot.lane.b32.xlu1 %v3166_v27, %s16062_s28  ;;  %v10095_v40 = vcombine.high %v2263_v28, %v2267_v24  ;;  %v16299_v33 = vrot.slane %v12242_v37, 4  ;;  %v2068_v3 = vrot.slane %v12178_v50, 4  ;;  %v2265_v36 = vsel %vm16079_vm8, %v12273_v7, %v2264_v60 }
 0x229   : > { %3178 = vrot.lane.b32.xlu0 %v12076_v16, %s16062_s28  ;;  %v2315_v61 = vsel %vm253_vm1, %v2306_v30, %v2307_v55  ;;  %2745 = vmatprep.subr.bf16.mxu0 %v10099_v45  ;;  %v10094_v63 = vcombine.low %v2263_v28, %v2267_v24  ;;  %v10097_v20 = vcombine.high %v2265_v36, %v2269_v47  ;;  %v16301_v7 = vrot.slane %v12180_v31, 4 }
 0x22a   : > { %2746 = vmatpush1.bf16.msra.mxu0 %v10098_v22  ;;  %v12379_v46 = vpop.permute.xlu0 %2339  ;;  %v2316_v27 = vsel %vm16086_vm14, %v12296_v10, %v2315_v61  ;;  %v12385_v44 = vpop.permute.xlu1 %2384  ;;  %v2221_v9 = vsel %vm253_vm1, %v16299_v33, %v2213_v15  ;;  %v2216_v10 = vsel %vm16078_vm12, %v12225_v52, %v2214_v26  ;;  %v2070_v52 = vrot.slane %v12185_v4, 4 }
 0x22b   : > { %2747 = vmatprep.subr.bf16.mxu0 %v10095_v40  ;;  %v10100_v38 = vcombine.low %v2312_v32, %v2316_v27  ;;  %v10101_v30 = vcombine.high %v2312_v32, %v2316_v27  ;;  %v10091_v35 = vcombine.high %v2216_v10, %v2220_v49  ;;  %v16300_v15 = vrot.slane %v12199_v53, 4  ;;  %v3213_v40 = vld [vmem:[%s11005_s29 + $0x10] sm:$0xf] }
 0x22c   : > { %3184 = vrot.lane.b32.xlu1 %v12097_v58, %s16062_s28  ;;  %v2173_v17 = vsel %vm16060_vm13, %v12232_v51, %v2172_v56  ;;  %v2222_v5 = vsel %vm16078_vm12, %v12242_v37, %v2221_v9  ;;  %v16302_v22 = vrot.slane %v12194_v2, 4  ;;  %v16303_v55 = vrot.slane %v12208_v21, 4 }
 0x22d   : > { %3182 = vrot.lane.b32.xlu0 %v12100_v8, %s16062_s28  ;;  %2786 = vmatprep.subr.bf16.mxu1 %v10101_v30  ;;  %v2120_v24 = vsel %vm253_vm1, %v16301_v7, %v16300_v15  ;;  %v2119_v41 = vrot.slane %v12216_v11, 4  ;;  %v2169_v51 = vsel %vm16060_vm13, %v12201_v13, %v2167_v54  ;;  %v2174_v56 = vsel %vm253_vm1, %v16298_v43, %v2166_v6  ;;  %v16315_v43 = vld [vmem:[#allocation17_spill] sm:$0xff] }
 0x22e   : > { %2748 = vmatpush1.bf16.msra.mxu0 %v10094_v63  ;;  %2787 = vmatpush1.bf16.msra.mxu1 %v10100_v38  ;;  %v12411_v42 = vpop.permute.xlu0 %2343  ;;  %v12415_v0 = vpop.permute.xlu1 %2388  ;;  %v2125_v45 = vsel %vm253_vm1, %v16303_v55, %v16302_v22  ;;  %v2021_v37 = vrot.slane %v12151_v48, 4  ;;  %v10090_v28 = vcombine.low %v2216_v10, %v2220_v49  ;;  %v10096_v26 = vcombine.low %v2265_v36, %v2269_v47  ;;  %v16307_v38 = vld [vmem:[#allocation25_spill] sm:$0xff] }
 0x22f   : > { %2749 = vmatprep.subr.bf16.mxu0 %v10091_v35  ;;  %2788 = vmatprep.subr.bf16.mxu1 %v10097_v20  ;;  %v2116_v13 = vrot.slane %v12187_v39, 4  ;;  %v16304_v11 = vrot.slane %v12223_v14, 4  ;;  %v10087_v60 = vcombine.high %v2169_v51, %v2173_v17  ;;  %v10093_v61 = vcombine.high %v2218_v29, %v2222_v5  ;;  %v16309_v63 = vld [vmem:[#allocation13_spill] sm:$0xff]  ;;  %v16310_v20 = vld [vmem:[#allocation19_spill] sm:$0xff] }
 0x230   : > { %3223 = vrot.lane.b32.xlu1 %v12127_v59, %s16064_s22  ;;  %v2023_v32 = vrot.slane %v12164_v12, 4  ;;  %v2073_v49 = vsel %vm253_vm1, %v16305_v34, %v2068_v3  ;;  %v2126_v27 = vsel %vm16061_vm15, %v12208_v21, %v2125_v45  ;;  %v2175_v47 = vsel %vm16060_vm13, %v12218_v23, %v2174_v56 }
 0x231   : > { %3186 = vrot.lane.b32.xlu0 %v3169_v18, %s16062_s28  ;;  %v2170_v54 = vsel %vm253_vm1, %v16304_v11, %v2163_v1  ;;  %v16306_v33 = vrot.slane %v12175_v25, 4  ;;  %v2072_v30 = vrot.slane %v16307_v38, 4  ;;  %v2122_v10 = vsel %vm16061_vm15, %v12180_v31, %v2120_v24  ;;  %v16312_v24 = vld [vmem:[#allocation20_spill] sm:$0xff]  ;;  %s16067_s28 = smov 41  }
 0x232   : > { %2750 = vmatpush1.bf16.msra.mxu0 %v10090_v28  ;;  %2789 = vmatpush1.bf16.msra.mxu1 %v10096_v26  ;;  %v12447_v39 = vpop.permute.xlu0 %2347  ;;  %v12451_v6 = vpop.permute.xlu1 %2392  ;;  %v16308_v21 = vmov %v16302_v22  ;;  %v1974_v1 = vrot.slane %v16309_v63, 4  ;;  %v2171_v23 = vsel %vm16060_vm13, %v12223_v14, %v2170_v54  ;;  %v10086_v62 = vcombine.low %v2169_v51, %v2173_v17  ;;  %v16313_v14 = vld [vmem:[#allocation16_spill] sm:$0xff] }
 0x233   : > { %v2078_v9 = vsel %vm253_vm1, %v2070_v52, %v16306_v33  ;;  %v2127_v36 = vsel %vm253_vm1, %v16308_v21, %v2119_v41  ;;  %2751 = vmatprep.subr.bf16.mxu0 %v10087_v60  ;;  %2790 = vmatprep.subr.bf16.mxu1 %v10093_v61  ;;  %v10092_v35 = vcombine.low %v2218_v29, %v2222_v5  ;;  %v2069_v31 = vrot.slane %v16310_v20, 4  ;;  %v16317_v28 = vld [vmem:[#allocation12_spill] sm:$0xff]  ;;  %v16319_v61 = vld [vmem:[#allocation23_spill] sm:$0xff]  ;;  %v16323_v21 = vld [vmem:[#allocation14_spill] sm:$0xff] }
 0x234   : > { %3227 = vrot.lane.b32.xlu1 %v3213_v40, %s16064_s22  ;;  %v16311_v18 = vmov %v16300_v15  ;;  %v10083_v15 = vcombine.high %v2122_v10, %v2126_v27  ;;  %v10089_v7 = vcombine.high %v2171_v23, %v2175_v47  ;;  %v1976_v22 = vrot.slane %v16312_v24, 4 }
 0x235   : > { %3225 = vrot.lane.b32.xlu0 %v12076_v16, %s16064_s22  ;;  %v2123_v52 = vsel %vm253_vm1, %v16311_v18, %v2116_v13  ;;  %v16314_v17 = vrot.slane %v16313_v14, 4  ;;  %v2079_v55 = vsel %vm16066_vm9, %v12185_v4, %v2078_v9  ;;  %v2128_v41 = vsel %vm16061_vm15, %v12194_v2, %v2127_v36 }
 0x236   : > { %2752 = vmatpush1.bf16.msra.mxu0 %v10086_v62  ;;  %2791 = vmatpush1.bf16.msra.mxu1 %v10092_v35  ;;  %v12480_v45 = vpop.permute.xlu0 %2386  ;;  %v12484_v51 = vpop.permute.xlu1 %2431  ;;  %v16316_v56 = vrot.slane %v16315_v43, 4  ;;  %v2025_v26 = vrot.slane %v16317_v28, 4  ;;  %v2075_v13 = vsel %vm16066_vm9, %v12153_v19, %v2073_v49  ;;  %v16318_v4 = vmov %v16306_v33  ;;  %v3216_v49 = vld [vmem:[%s11005_s29 + $0x2c] sm:$0xf]  ;;  %v16322_v33 = vld [vmem:[#allocation18_spill] sm:$0xff] }
 0x237   : > { %v2026_v5 = vsel %vm253_vm1, %v16314_v17, %v2021_v37  ;;  %v2080_v11 = vsel %vm253_vm1, %v16318_v4, %v2072_v30  ;;  %2753 = vmatprep.subr.bf16.mxu0 %v10083_v15  ;;  %2792 = vmatprep.subr.bf16.mxu1 %v10089_v7  ;;  %vm2027_vm13 = vcmask 613376   ;;  %v2124_v2 = vsel %vm16061_vm15, %v12199_v53, %v2123_v52  ;;  %v16320_v53 = vld [vmem:[#allocation24_spill] sm:$0xff] }
 0x238   : > { %v2031_v29 = vsel %vm253_vm1, %v2023_v32, %v16316_v56  ;;  %v10082_v54 = vcombine.low %v2122_v10, %v2126_v27  ;;  %v10088_v60 = vcombine.low %v2171_v23, %v2175_v47  ;;  %3231 = vrot.lane.b32.xlu1 %v12097_v58, %s16064_s22  ;;  %v2022_v19 = vrot.slane %v16319_v61, 4  ;;  %v16324_v23 = vld [vmem:[#allocation22_spill] sm:$0xff] }
 0x239   : > { %3229 = vrot.lane.b32.xlu0 %v12100_v8, %s16064_s22  ;;  %v2076_v40 = vsel %vm253_vm1, %v2068_v3, %v2069_v31  ;;  %v10079_v32 = vcombine.high %v2075_v13, %v2079_v55  ;;  %v10085_v34 = vcombine.high %v2124_v2, %v2128_v41  ;;  %v16321_v27 = vrot.slane %v16320_v53, 4 }
 0x23a   : > { %v1978_v9 = vrot.slane %v16322_v33, 4  ;;  %v2032_v38 = vsel %vm2027_vm13, %v12164_v12, %v2031_v29  ;;  %2754 = vmatpush1.bf16.msra.mxu0 %v10082_v54  ;;  %2793 = vmatpush1.bf16.msra.mxu1 %v10088_v60  ;;  %v12514_v30 = vpop.permute.xlu0 %2390  ;;  %v2081_v3 = vsel %vm16066_vm9, %v12175_v25, %v2080_v11  ;;  %v12518_v10 = vpop.permute.xlu1 %2435  ;;  %v1975_v36 = vrot.slane %v16323_v21, 4 }
 0x23b   : > { %v1979_v47 = vsel %vm253_vm1, %v16321_v27, %v1974_v1  ;;  %v16325_v62 = vrot.slane %v16324_v23, 4  ;;  %v2028_v20 = vsel %vm2027_vm13, %v16313_v14, %v2026_v5  ;;  %v16326_v12 = vmov %v16316_v56  ;;  %2755 = vmatprep.subr.bf16.mxu0 %v10079_v32  ;;  %2794 = vmatprep.subr.bf16.mxu1 %v10085_v34  ;;  %v3260_v14 = vld [vmem:[%s11005_s29 + $0x10] sm:$0xf] }
 0x23c   : > { %v2033_v31 = vsel %vm253_vm1, %v16326_v12, %v2025_v26  ;;  %vm1980_vm15 = vcmask 621568   ;;  %v2077_v25 = vsel %vm16066_vm9, %v12178_v50, %v2076_v40  ;;  %v10078_v18 = vcombine.low %v2075_v13, %v2079_v55  ;;  %3270 = vrot.lane.b32.xlu1 %v12127_v59, %s16067_s28 }
 0x23d   : > { %v1984_v35 = vsel %vm253_vm1, %v1976_v22, %v16325_v62  ;;  %v10084_v52 = vcombine.low %v2124_v2, %v2128_v41  ;;  %3233 = vrot.lane.b32.xlu0 %v3216_v49, %s16064_s22  ;;  %v2029_v15 = vsel %vm253_vm1, %v2021_v37, %v2022_v19  ;;  %v10075_v7 = vcombine.high %v2028_v20, %v2032_v38  ;;  %s16069_s22 = smov 40  }
 0x23e   : > { %v10081_v22 = vcombine.high %v2077_v25, %v2081_v3  ;;  %v1985_v17 = vsel %vm1980_vm15, %v16312_v24, %v1984_v35  ;;  %v16327_v50 = vmov %v16325_v62  ;;  %2756 = vmatpush1.bf16.msra.mxu0 %v10078_v18  ;;  %v12543_v55 = vpop.permute.xlu0 %2394  ;;  %v2034_v41 = vsel %vm2027_vm13, %v16315_v43, %v2033_v31  ;;  %v12547_v56 = vpop.permute.xlu1 %2439  ;;  %v16330_v62 = vld [vmem:[#allocation29_spill] sm:$0xff] }
 0x23f   : > { %v1986_v5 = vsel %vm253_vm1, %v16327_v50, %v1978_v9  ;;  %2795 = vmatpush1.bf16.msra.mxu1 %v10084_v52  ;;  %v1982_v37 = vsel %vm253_vm1, %v1974_v1, %v1975_v36  ;;  %v1981_v24 = vsel %vm1980_vm15, %v16320_v53, %v1979_v47  ;;  %2757 = vmatprep.subr.bf16.mxu0 %v10075_v7  ;;  %v2400_v2 = vrot.slane %v12451_v6, 4  ;;  %v3263_v47 = vld [vmem:[%s11005_s29 + $0x2c] sm:$0xf] }
 0x240   : > { %2796 = vmatprep.subr.bf16.mxu1 %v10081_v22  ;;  %v2030_v29 = vsel %vm2027_vm13, %v12151_v48, %v2029_v15  ;;  %v10074_v28 = vcombine.low %v2028_v20, %v2032_v38  ;;  %v10080_v26 = vcombine.low %v2077_v25, %v2081_v3  ;;  %3274 = vrot.lane.b32.xlu1 %v3260_v14, %s16067_s28  ;;  %v2399_v54 = vrot.slane %v12514_v30, 4  ;;  %v3307_v15 = vld [vmem:[%s11005_s29 + $0x10] sm:$0xf] }
 0x241   : > { %3272 = vrot.lane.b32.xlu0 %v12076_v16, %s16067_s28  ;;  %v10071_v43 = vcombine.high %v1981_v24, %v1985_v17  ;;  %v10077_v13 = vcombine.high %v2030_v29, %v2034_v41  ;;  %v1987_v1 = vsel %vm1980_vm15, %v16324_v23, %v1986_v5  ;;  %v1983_v4 = vsel %vm1980_vm15, %v16309_v63, %v1982_v37  ;;  %v16332_v37 = vld [vmem:[#allocation30_spill] sm:$0xff] }
 0x242   : > { %2758 = vmatpush1.bf16.msra.mxu0 %v10074_v28  ;;  %v12563_v11 = vpop.permute.xlu0 %2433  ;;  %v12565_v48 = vpop.permute.xlu1 %2847  ;;  %v2443_v60 = vrot.slane %v12484_v51, 4  ;;  %v10070_v19 = vcombine.low %v1981_v24, %v1985_v17  ;;  %v2353_v63 = vrot.slane %v12357_v57, 4  ;;  %v10076_v40 = vcombine.low %v2030_v29, %v2034_v41 }
 0x243   : > { %2797 = vmatpush1.bf16.msra.mxu1 %v10080_v26  ;;  %16328 = vst [vmem:[#allocation25_spill] sm:$0xff] %v12565_v48  ;;  %v2444_v61 = vrot.slane %v12563_v11, 4  ;;  %2759 = vmatprep.subr.bf16.mxu0 %v10071_v43  ;;  %v10073_v32 = vcombine.high %v1983_v4, %v1987_v1  ;;  %v2352_v34 = vrot.slane %v12411_v42, 4  ;;  %v2396_v49 = vrot.slane %v12385_v44, 4 }
 0x244   : > { %2798 = vmatprep.subr.bf16.mxu1 %v10077_v13  ;;  %3278 = vrot.lane.b32.xlu1 %v12097_v58, %s16067_s28  ;;  %v2397_v53 = vrot.slane %v12480_v45, 4  ;;  %v2447_v27 = vrot.slane %v12547_v56, 4  ;;  %vm16095_vm13 = vcmask 547840   ;;  %v2401_v33 = vrot.slane %v12543_v55, 4 }
 0x245   : > { %3276 = vrot.lane.b32.xlu0 %v12100_v8, %s16067_s28  ;;  %vm16077_vm15 = vcmask 539648   ;;  %v2407_v3 = vsel %vm253_vm1, %v2399_v54, %v2400_v2  ;;  %v2445_v21 = vrot.slane %v12518_v10, 4  ;;  %v2449_v36 = vsel %vm253_vm1, %v2443_v60, %v2444_v61 }
 0x246   : > { %2760 = vmatpush1.bf16.msra.mxu0 %v10070_v19  ;;  %v2438_v9 = vpop.permute.xlu0 %2437  ;;  %v12582_v38 = vpop.permute.xlu1 %2851  ;;  %v2349_v35 = vrot.slane %v16330_v62, 4  ;;  %v2350_v20 = vrot.slane %v12379_v46, 4  ;;  %v2398_v12 = vrot.slane %v12415_v0, 4  ;;  %v10072_v31 = vcombine.low %v1983_v4, %v1987_v1 }
 0x247   : > { %2799 = vmatpush1.bf16.msra.mxu1 %v10076_v40  ;;  %16329 = vst [vmem:[#allocation13_spill] sm:$0xff] %v12582_v38  ;;  %v2446_v23 = vrot.slane %v2438_v9, 4  ;;  %v2360_v10 = vsel %vm253_vm1, %v2352_v34, %v2353_v63  ;;  %v2354_v25 = vrot.slane %v12447_v39, 4  ;;  %v2402_v18 = vsel %vm253_vm1, %v2396_v49, %v2397_v53 }
 0x248   : > { %2800 = vmatprep.subr.bf16.mxu1 %v10073_v32  ;;  %3317 = vrot.lane.b32.xlu1 %v12127_v59, %s16069_s22  ;;  %v2408_v0 = vsel %vm16095_vm13, %v12514_v30, %v2407_v3  ;;  %v2409_v7 = vsel %vm253_vm1, %v2400_v2, %v2401_v33  ;;  %v2451_v22 = vsel %vm16077_vm15, %v12484_v51, %v2449_v36  ;;  %v2351_v24 = vrot.slane %v16332_v37, 4  ;;  %v12671_v3 = vld [vmem:[%s11005_s29 + $0x1c] sm:$0xff] }
 0x249   : > { %3280 = vrot.lane.b32.xlu0 %v3263_v47, %s16067_s28  ;;  %v2454_v52 = vsel %vm253_vm1, %v2446_v23, %v2447_v27  ;;  %v2452_v39 = vsel %vm253_vm1, %v2444_v61, %v2445_v21  ;;  %vm16124_vm9 = vcmask 556032   ;;  %v2404_v30 = vsel %vm16095_vm13, %v12385_v44, %v2402_v18  ;;  %s10841_s28 = smov 24   ;;  %v12658_v47 = vld [vmem:[%s11005_s29 + $0x8] sm:$0xff] }
 0x24a   : > { %v2455_v14 = vsel %vm16077_vm15, %v2438_v9, %v2454_v52  ;;  %v2442_v17 = vpop.permute.xlu0 %2441  ;;  %v12606_v50 = vpop.permute.xlu1 %2855  ;;  %v2355_v51 = vsel %vm253_vm1, %v2349_v35, %v2350_v20  ;;  %v2405_v29 = vsel %vm253_vm1, %v2397_v53, %v2398_v12  ;;  %v10107_v26 = vcombine.high %v2404_v30, %v2408_v0  ;;  %v16337_v53 = vld [vmem:[#allocation21_spill] sm:$0xff]  ;;  %v12668_v9 = vld [vmem:[%s11005_s29 + $0x24] sm:$0xff] }
 0x24b   : > { %2801 = vmatpush1.bf16.msra.mxu1 %v10072_v31  ;;  %16331 = vst [vmem:[#allocation19_spill] sm:$0xff] %v12606_v50  ;;  %v10110_v5 = vcombine.low %v2451_v22, %v2455_v14  ;;  %v2448_v55 = vrot.slane %v2442_v17, 4  ;;  %v10111_v41 = vcombine.high %v2451_v22, %v2455_v14  ;;  %v2361_v43 = vsel %vm16124_vm9, %v12411_v42, %v2360_v10  ;;  %v12677_v23 = vld [vmem:[#allocation6 + $0x18] sm:$0xff]  ;;  %v12686_v35 = vld [vmem:[%s11005_s29] sm:$0xff] }
 0x24c   : > { %3321 = vrot.lane.b32.xlu1 %v3307_v15, %s16069_s22  ;;  %v2453_v13 = vsel %vm16077_vm15, %v12563_v11, %v2452_v39  ;;  %v2410_v1 = vsel %vm16095_vm13, %v12451_v6, %v2409_v7  ;;  %v2362_v2 = vsel %vm253_vm1, %v2353_v63, %v2354_v25  ;;  %v2357_v11 = vsel %vm16124_vm9, %v16330_v62, %v2355_v51  ;;  %v3310_v63 = vld [vmem:[%s11005_s29 + $0x2c] sm:$0xf]  ;;  %v3770_v10 = vld [vmem:[%s11005_s29 + $0x10] sm:$0xf] }
 0x24d   : > { %3319 = vrot.lane.b32.xlu0 %v12076_v16, %s16069_s22  ;;  %v2456_v28 = vsel %vm253_vm1, %v2447_v27, %v2448_v55  ;;  %2771 = vmatprep.subr.bf16.mxu0 %v10111_v41  ;;  %v2406_v60 = vsel %vm16095_vm13, %v12480_v45, %v2405_v29  ;;  %v2358_v6 = vsel %vm253_vm1, %v2350_v20, %v2351_v24  ;;  %v3723_v27 = vld [vmem:[%s11005_s29 + $0x10] sm:$0xf]  ;;  %v3726_v20 = vld [vmem:[%s11005_s29 + $0x2c] sm:$0xf]  ;;  %vm16107_vm12 = vcmask 351232  }
 0x24e   : > { %2772 = vmatpush2.bf16.msra.mxu0 %v10110_v5  ;;  %v12622_v44 = vpop.permute.xlu0 %2849  ;;  %v2457_v16 = vsel %vm16077_vm15, %v12547_v56, %v2456_v28  ;;  %v12628_v4 = vpop.permute.xlu1 %2894  ;;  %v10106_v56 = vcombine.low %v2404_v30, %v2408_v0  ;;  %v10103_v61 = vcombine.high %v2357_v11, %v2361_v43  ;;  %v10109_v19 = vcombine.high %v2406_v60, %v2410_v1  ;;  %v3773_v0 = vld [vmem:[%s11005_s29 + $0x2c] sm:$0xf]  ;;  %v3817_v14 = vld [vmem:[%s11005_s29 + $0x10] sm:$0xf] }
 0x24f   : > { %16333 = vst [vmem:[#allocation20_spill] sm:$0xff] %v12622_v44  ;;  %16334 = vst [vmem:[#allocation16_spill] sm:$0xff] %v12628_v4  ;;  %2773 = vmatprep.subr.bf16.mxu0 %v10107_v26  ;;  %v10112_v42 = vcombine.low %v2453_v13, %v2457_v16  ;;  %v10113_v54 = vcombine.high %v2453_v13, %v2457_v16  ;;  %v2363_v45 = vsel %vm16124_vm9, %v12357_v57, %v2362_v2  ;;  %v3820_v41 = vld [vmem:[%s11005_s29 + $0x2c] sm:$0xf]  ;;  %v3864_v30 = vld [vmem:[%s11005_s29 + $0x10] sm:$0xf] }
 0x250   : > { %3325 = vrot.lane.b32.xlu1 %v12097_v58, %s16069_s22  ;;  %v2359_v58 = vsel %vm16124_vm9, %v12379_v46, %v2358_v6  ;;  %v10108_v34 = vcombine.low %v2406_v60, %v2410_v1  ;;  %v10068_v57 = vcombine.low %v16337_v53, %v16337_v53  ;;  %16340 = vst [vmem:[#allocation18_spill] sm:$0xff] %v12677_v23  ;;  %v3911_v1 = vld [vmem:[%s11005_s29 + $0x10] sm:$0xf]  ;;  %v3914_v60 = vld [vmem:[%s11005_s29 + $0x2c] sm:$0xf]  ;;  %vm16106_vm15 = vcmask 359424  }
 0x251   : > { %3323 = vrot.lane.b32.xlu0 %v12100_v8, %s16069_s22  ;;  %2812 = vmatprep.subr.bf16.mxu1 %v10113_v54  ;;  %v10102_v8 = vcombine.low %v2357_v11, %v2361_v43  ;;  %v10105_v49 = vcombine.high %v2359_v58, %v2363_v45  ;;  %v10117_v62 = vcombine.high %v12677_v23, %v12677_v23  ;;  %v3867_v43 = vld [vmem:[%s11005_s29 + $0x2c] sm:$0xf]  ;;  %vm16104_vm8 = vcmask 367616   ;;  %v4052_v4 = vld [vmem:[%s11005_s29 + $0x10] sm:$0xf] }
 0x252   : > { %2774 = vmatpush2.bf16.msra.mxu0 %v10106_v56  ;;  %2813 = vmatpush2.bf16.msra.mxu1 %v10112_v42  ;;  %v12643_v40 = vpop.permute.xlu0 %2853  ;;  %v12647_v32 = vpop.permute.xlu1 %2898  ;;  %v16345_v53 = vld [vmem:[#allocation15_spill] sm:$0xff]  ;;  %vm16098_vm14 = vcmask 375808   ;;  %vm16099_vm13 = vcmask 384000   ;;  %vm16127_vm9 = vcmask 179200  }
 0x253   : > { %16335 = vst [vmem:[#allocation17_spill] sm:$0xff] %v12643_v40  ;;  %16336 = vst [vmem:[#allocation12_spill] sm:$0xff] %v12647_v32  ;;  %2775 = vmatprep.subr.bf16.mxu0 %v10103_v61  ;;  %2814 = vmatprep.subr.bf16.mxu1 %v10109_v19  ;;  %v3958_v61 = vld [vmem:[%s11005_s29 + $0x10] sm:$0xf] }
 0x254   : > { %3733 = vrot.lane.b32.xlu1 %v12127_v59, %s10841_s28  ;;  %v10104_v59 = vcombine.low %v2359_v58, %v2363_v45  ;;  %v694_v45 = vld [vmem:[%s11153_s27] sm:$0xff]  ;;  %v16344_v58 = vld [vmem:[#allocation26_spill] sm:$0xff] }
 0x255   : > { %3327 = vrot.lane.b32.xlu0 %v3310_v63, %s16069_s22  ;;  %s10842_s22 = smov 23  }
 0x256   : > { %2776 = vmatpush2.bf16.msra.mxu0 %v10102_v8  ;;  %2815 = vmatpush2.bf16.msra.mxu1 %v10108_v34  ;;  %v12660_v46 = vpop.permute.xlu0 %2857  ;;  %v12662_v33 = vpop.permute.xlu1 %2902  ;;  %v1055_v8 = vadd.f32 %v16344_v58, %v694_v45  ;;  %v695_v34 = vld [vmem:[%s11153_s27 + $0x8] sm:$0xff] }
 0x257   : > { %16338 = vst [vmem:[#allocation23_spill] sm:$0xff] %v12660_v46  ;;  %16339 = vst [vmem:[#allocation24_spill] sm:$0xff] %v12662_v33  ;;  %2816 = vmatprep.subr.bf16.mxu1 %v10105_v49 }
 0x258   : > { %3737 = vrot.lane.b32.xlu1 %v3723_v27, %s10841_s28 }
 0x259   : > { %3735 = vrot.lane.b32.xlu0 %v12658_v47, %s10841_s28  ;;  %2778 = vmatmul.mubr.bf16.vlgmr.msra.gmra.mxu0 %v10068_v57 }
 0x25a   : > { %2817 = vmatpush2.bf16.msra.mxu1 %v10104_v59  ;;  %v12673_v21 = vpop.permute.xlu0 %2896  ;;  %v12675_v36 = vpop.permute.xlu1 %2941  ;;  %10162 = vmatprep.mubr.msk.bf16.mxu0 %vm969_vm0, %v10117_v62 }
 0x25c   : > { %3741 = vrot.lane.b32.xlu1 %v12668_v9, %s10841_s28 }
 0x25d   : > { %3739 = vrot.lane.b32.xlu0 %v12671_v3, %s10841_s28  ;;  %2819 = vmatmul.mubr.bf16.vlgmr.msra.gmra.mxu1 %v10068_v57  ;;  %v1056_v57 = vadd.f32 %v16345_v53, %v695_v34 }
 0x25e   : > { %v12689_v12 = vpop.permute.xlu0 %2900  ;;  %v12691_v31 = vpop.permute.xlu1 %2945  ;;  %10163 = vmatprep.mubr.msk.bf16.mxu1 %vm969_vm0, %v10117_v62 }
 0x25f   : > { %16341 = vst [vmem:[#allocation14_spill] sm:$0xff] %v12691_v31 }
 0x260   : > { %3780 = vrot.lane.b32.xlu1 %v12686_v35, %s10842_s22 }
 0x261   : > { %3743 = vrot.lane.b32.xlu0 %v3726_v20, %s10841_s28  ;;  %s16071_s28 = smov 22   ;;  %v696_v20 = vld [vmem:[%s11153_s27 + $0x10] sm:$0xff] }
 0x262   : > { %v12698_v25 = vpop.permute.xlu0 %2904  ;;  %v12700_v18 = vpop.permute.xlu1 %2949 }
 0x263   : > { %16342 = vst [vmem:[#allocation22_spill] sm:$0xff] %v12698_v25 }
 0x264   : > { %3784 = vrot.lane.b32.xlu1 %v3770_v10, %s10842_s22 }
 0x265   : > { %3782 = vrot.lane.b32.xlu0 %v12658_v47, %s10842_s22 }
 0x266   : > { %v12703_v52 = vpop.permute.xlu0 %2943  ;;  %v12705_v15 = vpop.permute.xlu1 %2988 }
 0x268   : > { %3788 = vrot.lane.b32.xlu1 %v12668_v9, %s10842_s22 }
 0x269   : > { %3786 = vrot.lane.b32.xlu0 %v12671_v3, %s10842_s22 }
 0x26a   : > { %v12710_v7 = vpop.permute.xlu0 %2947  ;;  %v12712_v22 = vpop.permute.xlu1 %2992 }
 0x26c   : > { %3827 = vrot.lane.b32.xlu1 %v12686_v35, %s16071_s28 }
 0x26d   : > { %3790 = vrot.lane.b32.xlu0 %v3773_v0, %s10842_s22  ;;  %s16073_s22 = smov 21   ;;  %v16347_v0 = vld [vmem:[#allocation27_spill] sm:$0xff] }
 0x26e   : > { %v12717_v17 = vpop.permute.xlu0 %2951  ;;  %v12719_v39 = vpop.permute.xlu1 %2996 }
 0x26f   : > { %16343 = vst [vmem:[#allocation29_spill] sm:$0xff] %v12717_v17 }
 0x270   : > { %3831 = vrot.lane.b32.xlu1 %v3817_v14, %s16071_s28  ;;  %v1057_v14 = vadd.f32 %v16347_v0, %v696_v20  ;;  %v4005_v20 = vld [vmem:[%s11005_s29 + $0x10] sm:$0xf] }
 0x271   : > { %3829 = vrot.lane.b32.xlu0 %v12658_v47, %s16071_s28 }
 0x272   : > { %v12724_v5 = vpop.permute.xlu0 %2990  ;;  %v12726_v55 = vpop.permute.xlu1 %3035 }
 0x274   : > { %3835 = vrot.lane.b32.xlu1 %v12668_v9, %s16071_s28 }
 0x275   : > { %3833 = vrot.lane.b32.xlu0 %v12671_v3, %s16071_s28 }
 0x276   : > { %v12733_v37 = vpop.permute.xlu0 %2994  ;;  %v12735_v24 = vpop.permute.xlu1 %3039 }
 0x278   : > { %3874 = vrot.lane.b32.xlu1 %v12686_v35, %s16073_s22 }
 0x279   : > { %3837 = vrot.lane.b32.xlu0 %v3820_v41, %s16071_s28  ;;  %s16075_s28 = smov 20  }
 0x27a   : > { %v12741_v51 = vpop.permute.xlu0 %2998  ;;  %v12743_v29 = vpop.permute.xlu1 %3043 }
 0x27c   : > { %3878 = vrot.lane.b32.xlu1 %v3864_v30, %s16073_s22  ;;  %v697_v30 = vld [vmem:[%s11153_s27 + $0x18] sm:$0xff] }
 0x27d   : > { %3876 = vrot.lane.b32.xlu0 %v12658_v47, %s16073_s22 }
 0x27e   : > { %v12748_v28 = vpop.permute.xlu0 %3037  ;;  %v12750_v26 = vpop.permute.xlu1 %3082 }
 0x280   : > { %3882 = vrot.lane.b32.xlu1 %v12668_v9, %s16073_s22 }
 0x281   : > { %3880 = vrot.lane.b32.xlu0 %v12671_v3, %s16073_s22 }
 0x282   : > { %v12757_v13 = vpop.permute.xlu0 %3041  ;;  %v12759_v16 = vpop.permute.xlu1 %3086 }
 0x283   : > { %v3050_v33 = vrot.slane %v12757_v13, 4 }
 0x284   : > { %3921 = vrot.lane.b32.xlu1 %v12686_v35, %s16075_s28 }
 0x285   : > { %3884 = vrot.lane.b32.xlu0 %v3867_v43, %s16073_s22  ;;  %s16089_s22 = smov 19  }
 0x286   : > { %v12765_v2 = vpop.permute.xlu0 %3045  ;;  %v12767_v42 = vpop.permute.xlu1 %3090 }
 0x288   : > { %3925 = vrot.lane.b32.xlu1 %v3911_v1, %s16075_s28  ;;  %v3961_v1 = vld [vmem:[%s11005_s29 + $0x2c] sm:$0xf] }
 0x289   : > { %3923 = vrot.lane.b32.xlu0 %v12658_v47, %s16075_s28 }
 0x28a   : > { %v12772_v54 = vpop.permute.xlu0 %3084  ;;  %v12774_v11 = vpop.permute.xlu1 %3129 }
 0x28c   : > { %3929 = vrot.lane.b32.xlu1 %v12668_v9, %s16075_s28 }
 0x28d   : > { %3927 = vrot.lane.b32.xlu0 %v12671_v3, %s16075_s28 }
 0x28e   : > { %v12781_v56 = vpop.permute.xlu0 %3088  ;;  %v12783_v6 = vpop.permute.xlu1 %3133 }
 0x290   : > { %3968 = vrot.lane.b32.xlu1 %v12686_v35, %s16089_s22 }
 0x291   : > { %3931 = vrot.lane.b32.xlu0 %v3914_v60, %s16075_s28  ;;  %s16096_s28 = smov 18  }
 0x292   : > { %v12789_v19 = vpop.permute.xlu0 %3092  ;;  %v12791_v63 = vpop.permute.xlu1 %3137 }
 0x294   : > { %3972 = vrot.lane.b32.xlu1 %v3958_v61, %s16089_s22  ;;  %v16349_v61 = vld [vmem:[#allocation28_spill] sm:$0xff] }
 0x295   : > { %3970 = vrot.lane.b32.xlu0 %v12658_v47, %s16089_s22  ;;  %v1893_v49 = vpop.f32.mrf.mxu0  ;;  %v1058_v45 = vadd.f32 %v16349_v61, %v697_v30 }
 0x296   : > { %v12800_v27 = vadd.f32 %v1893_v49, %v1055_v8  ;;  %v12802_v59 = vpop.permute.xlu0 %3131  ;;  %v12804_v62 = vpop.permute.xlu1 %3176 }
 0x297   : > { %v1895_v10 = vpop.f32.mrf.mxu0 }
 0x298   : > { %16346 = vst [vmem:[#allocation30_spill] sm:$0xff] %v12800_v27  ;;  %v12808_v41 = vadd.f32 %v1895_v10, %v1056_v57  ;;  %3976 = vrot.lane.b32.xlu1 %v12668_v9, %s16089_s22  ;;  %v3094_v27 = vrot.slane %v12750_v26, 4 }
 0x299   : > { %3974 = vrot.lane.b32.xlu0 %v12671_v3, %s16089_s22  ;;  %v1934_v43 = vpop.f32.mrf.mxu1  ;;  %v1897_v60 = vpop.f32.mrf.mxu0 }
 0x29a   : > { %16348 = vst [vmem:[#allocation21_spill] sm:$0xff] %v12808_v41  ;;  %v12817_v58 = vadd.f32 %v1934_v43, %v1057_v14  ;;  %v12819_v8 = vpop.permute.xlu0 %3135  ;;  %v12821_v34 = vpop.permute.xlu1 %3180  ;;  %v3188_v43 = vrot.slane %v12804_v62, 4  ;;  %v3142_v41 = vrot.slane %v12802_v59, 4 }
 0x29b   : > { %v1936_v49 = vpop.f32.mrf.mxu1  ;;  %v1898_v53 = vpop.f32.mrf.mxu0  ;;  %v3144_v60 = vrot.slane %v12819_v8, 4  ;;  %v3190_v48 = vrot.slane %v12821_v34, 4  ;;  %v16354_v34 = vrot.slane %v12767_v42, 4 }
 0x29c   : > { %16350 = vst [vmem:[#allocation26_spill] sm:$0xff] %v12817_v58  ;;  %v12823_v57 = vadd.f32 %v1936_v49, %v1058_v45  ;;  %4015 = vrot.lane.b32.xlu1 %v12686_v35, %s16096_s28  ;;  %v3047_v49 = vrot.slane %v12726_v55, 4  ;;  %v3141_v58 = vrot.slane %v12774_v11, 4  ;;  %v4008_v45 = vld [vmem:[%s11005_s29 + $0x2c] sm:$0xf]  ;;  %v3095_v53 = vrot.slane %v12772_v54, 4 }
 0x29d   : > { %3978 = vrot.lane.b32.xlu0 %v3961_v1, %s16089_s22  ;;  %v1938_v10 = vpop.f32.mrf.mxu1  ;;  %s16100_s22 = smov 17  }
 0x29e   : > { %16351 = vst [vmem:[#allocation15_spill] sm:$0xff] %v12823_v57  ;;  %v3140_v0 = vpop.permute.xlu0 %3139  ;;  %v12829_v30 = vpop.permute.xlu1 %3184  ;;  %v3097_v57 = vrot.slane %v12781_v56, 4  ;;  %v3147_v23 = vsel %vm253_vm1, %v3141_v58, %v3142_v41 }
 0x29f   : > { %v1939_v14 = vpop.f32.mrf.mxu1  ;;  %v3192_v1 = vrot.slane %v12829_v30, 4 }
 0x2a0   : > { %4019 = vrot.lane.b32.xlu1 %v4005_v20, %s16096_s28  ;;  %v3145_v14 = vrot.slane %v12791_v63, 4 }
 0x2a1   : > { %4017 = vrot.lane.b32.xlu0 %v12658_v47, %s16096_s28 }
 0x2a2   : > { %v12841_v20 = vpop.permute.xlu0 %3178  ;;  %v12843_v10 = vpop.permute.xlu1 %3223  ;;  %v3152_v46 = vsel %vm253_vm1, %v3144_v60, %v3145_v14  ;;  %v3099_v60 = vrot.slane %v12789_v19, 4 }
 0x2a3   : > { %16352 = vst [vmem:[#allocation27_spill] sm:$0xff] %v12843_v10  ;;  %v3189_v61 = vrot.slane %v12841_v20, 4  ;;  %v3146_v10 = vrot.slane %v3140_v0, 4  ;;  %v3143_v0 = vrot.slane %v12783_v6, 4  ;;  %v3153_v6 = vsel %vm16106_vm15, %v12819_v8, %v3152_v46 }
 0x2a4   : > { %4023 = vrot.lane.b32.xlu1 %v12668_v9, %s16096_s28  ;;  %v16356_v8 = vrot.slane %v12743_v29, 4 }
 0x2a5   : > { %4021 = vrot.lane.b32.xlu0 %v12671_v3, %s16096_s28  ;;  %v3194_v32 = vsel %vm253_vm1, %v3188_v43, %v3189_v61  ;;  %v3105_v43 = vsel %vm253_vm1, %v3097_v57, %v16354_v34  ;;  %v3154_v40 = vsel %vm253_vm1, %v3145_v14, %v3146_v10  ;;  %v3197_v19 = vsel %vm253_vm1, %v3189_v61, %v3190_v48 }
 0x2a6   : > { %v3183_v50 = vpop.permute.xlu0 %3182  ;;  %v12865_v38 = vpop.permute.xlu1 %3227  ;;  %v3196_v31 = vsel %vm16107_vm12, %v12804_v62, %v3194_v32  ;;  %v3058_v10 = vsel %vm253_vm1, %v3050_v33, %v16356_v8  ;;  %v3096_v32 = vrot.slane %v12759_v16, 4  ;;  %v3100_v48 = vsel %vm253_vm1, %v3094_v27, %v3095_v53 }
 0x2a7   : > { %16353 = vst [vmem:[#allocation28_spill] sm:$0xff] %v12865_v38  ;;  %v3191_v25 = vrot.slane %v3183_v50, 4  ;;  %v3106_v33 = vsel %vm16104_vm8, %v12781_v56, %v3105_v43  ;;  %v3198_v16 = vsel %vm16107_vm12, %v12841_v20, %v3197_v19  ;;  %v3052_v62 = vrot.slane %v12765_v2, 4  ;;  %v4055_v43 = vld [vmem:[%s11005_s29 + $0x2c] sm:$0xf] }
 0x2a8   : > { %4062 = vrot.lane.b32.xlu1 %v12686_v35, %s16100_s22  ;;  %v3049_v2 = vrot.slane %v12735_v24, 4  ;;  %v3103_v20 = vsel %vm253_vm1, %v3095_v53, %v3096_v32 }
 0x2a9   : > { %4025 = vrot.lane.b32.xlu0 %v4008_v45, %s16096_s28  ;;  %v3199_v38 = vsel %vm253_vm1, %v3191_v25, %v3192_v1  ;;  %v16355_v25 = vrot.slane %v12748_v28, 4  ;;  %v3104_v32 = vsel %vm16104_vm8, %v12772_v54, %v3103_v20  ;;  %s16102_s28 = smov 16   ;;  %v16363_v54 = vrot.slane %v12675_v36, 4 }
 0x2aa   : > { %v3200_v45 = vsel %vm16107_vm12, %v3183_v50, %v3199_v38  ;;  %v3187_v44 = vpop.permute.xlu0 %3186  ;;  %v12890_v17 = vpop.permute.xlu1 %3231  ;;  %v3149_v38 = vsel %vm16106_vm15, %v12774_v11, %v3147_v23  ;;  %v3150_v50 = vsel %vm253_vm1, %v3142_v41, %v3143_v0  ;;  %v3155_v11 = vsel %vm16106_vm15, %v12791_v63, %v3154_v40 }
 0x2ab   : > { %v10146_v57 = vcombine.low %v3196_v31, %v3200_v45  ;;  %v3193_v58 = vrot.slane %v3187_v44, 4  ;;  %v10147_v34 = vcombine.high %v3196_v31, %v3200_v45  ;;  %v3053_v46 = vsel %vm253_vm1, %v3047_v49, %v16355_v25 }
 0x2ac   : > { %4066 = vrot.lane.b32.xlu1 %v4052_v4, %s16100_s22  ;;  %v10143_v31 = vcombine.high %v3149_v38, %v3153_v6  ;;  %v16357_v41 = vrot.slane %v12767_v42, 4  ;;  %v2954_v49 = vrot.slane %v12703_v52, 4  ;;  %v3151_v40 = vsel %vm16106_vm15, %v12802_v59, %v3150_v50 }
 0x2ad   : > { %4064 = vrot.lane.b32.xlu0 %v12658_v47, %s16100_s22  ;;  %v3201_v44 = vsel %vm253_vm1, %v3192_v1, %v3193_v58  ;;  %3631 = vmatprep.subr.bf16.mxu0 %v10147_v34  ;;  %v10142_v63 = vcombine.low %v3149_v38, %v3153_v6  ;;  %v10145_v0 = vcombine.high %v3151_v40, %v3155_v11  ;;  %v16359_v59 = vrot.slane %v12705_v15, 4 }
 0x2ae   : > { %3632 = vmatpush1.bf16.msra.mxu0 %v10146_v57  ;;  %v12912_v23 = vpop.permute.xlu0 %3225  ;;  %v3202_v4 = vsel %vm16107_vm12, %v12829_v30, %v3201_v44  ;;  %v12918_v27 = vpop.permute.xlu1 %3270  ;;  %v3107_v56 = vsel %vm253_vm1, %v16357_v41, %v3099_v60  ;;  %v3102_v30 = vsel %vm16104_vm8, %v12750_v26, %v3100_v48  ;;  %v2956_v26 = vrot.slane %v12710_v7, 4 }
 0x2af   : > { %3633 = vmatprep.subr.bf16.mxu0 %v10143_v31  ;;  %v10148_v61 = vcombine.low %v3198_v16, %v3202_v4  ;;  %v10149_v1 = vcombine.high %v3198_v16, %v3202_v4  ;;  %v10139_v14 = vcombine.high %v3102_v30, %v3106_v33  ;;  %v16358_v60 = vrot.slane %v12724_v5, 4  ;;  %v4099_v31 = vld [vmem:[%s11005_s29 + $0x10] sm:$0xf] }
 0x2b0   : > { %4070 = vrot.lane.b32.xlu1 %v12668_v9, %s16100_s22  ;;  %v3059_v45 = vsel %vm16098_vm14, %v12757_v13, %v3058_v10  ;;  %v3108_v53 = vsel %vm16104_vm8, %v12767_v42, %v3107_v56  ;;  %v16360_v57 = vrot.slane %v12719_v39, 4  ;;  %v16361_v58 = vrot.slane %v12733_v37, 4 }
 0x2b1   : > { %4068 = vrot.lane.b32.xlu0 %v12671_v3, %s16100_s22  ;;  %3672 = vmatprep.subr.bf16.mxu1 %v10149_v1  ;;  %v3006_v6 = vsel %vm253_vm1, %v16359_v59, %v16358_v60  ;;  %v3005_v25 = vrot.slane %v12741_v51, 4  ;;  %v3055_v13 = vsel %vm16098_vm14, %v12726_v55, %v3053_v46  ;;  %v3060_v10 = vsel %vm253_vm1, %v16356_v8, %v3052_v62  ;;  %v16373_v8 = vld [vmem:[#allocation24_spill] sm:$0xff] }
 0x2b2   : > { %3634 = vmatpush1.bf16.msra.mxu0 %v10142_v63  ;;  %3673 = vmatpush1.bf16.msra.mxu1 %v10148_v61  ;;  %v12944_v24 = vpop.permute.xlu0 %3229  ;;  %v12948_v19 = vpop.permute.xlu1 %3274  ;;  %v3011_v34 = vsel %vm253_vm1, %v16361_v58, %v16360_v57  ;;  %v2907_v42 = vrot.slane %v12673_v21, 4  ;;  %v10138_v38 = vcombine.low %v3102_v30, %v3106_v33  ;;  %v10144_v48 = vcombine.low %v3151_v40, %v3155_v11  ;;  %v16365_v61 = vld [vmem:[#allocation29_spill] sm:$0xff]  ;;  %v16367_v63 = vld [vmem:[#allocation20_spill] sm:$0xff] }
 0x2b3   : > { %3635 = vmatprep.subr.bf16.mxu0 %v10139_v14  ;;  %3674 = vmatprep.subr.bf16.mxu1 %v10145_v0  ;;  %v3002_v55 = vrot.slane %v12712_v22, 4  ;;  %v16362_v51 = vrot.slane %v12748_v28, 4  ;;  %v10135_v50 = vcombine.high %v3055_v13, %v3059_v45  ;;  %v10141_v44 = vcombine.high %v3104_v32, %v3108_v53  ;;  %v16368_v0 = vld [vmem:[#allocation14_spill] sm:$0xff] }
 0x2b4   : > { %4109 = vrot.lane.b32.xlu1 %v12686_v35, %s16102_s28  ;;  %v2909_v16 = vrot.slane %v12689_v12, 4  ;;  %v2959_v33 = vsel %vm253_vm1, %v16363_v54, %v2954_v49  ;;  %v3012_v4 = vsel %vm16099_vm13, %v12733_v37, %v3011_v34  ;;  %v3061_v11 = vsel %vm16098_vm14, %v12743_v29, %v3060_v10 }
 0x2b5   : > { %4072 = vrot.lane.b32.xlu0 %v4055_v43, %s16100_s22  ;;  %v3056_v46 = vsel %vm253_vm1, %v16362_v51, %v3049_v2  ;;  %v16364_v41 = vrot.slane %v12700_v18, 4  ;;  %v2958_v1 = vrot.slane %v16365_v61, 4  ;;  %v3008_v30 = vsel %vm16099_vm13, %v12705_v15, %v3006_v6  ;;  %v16370_v6 = vld [vmem:[#allocation17_spill] sm:$0xff]  ;;  %s10850_s22 = smov 15  }
 0x2b6   : > { %3636 = vmatpush1.bf16.msra.mxu0 %v10138_v38  ;;  %3675 = vmatpush1.bf16.msra.mxu1 %v10144_v48  ;;  %v12980_v22 = vpop.permute.xlu0 %3233  ;;  %v12984_v62 = vpop.permute.xlu1 %3278  ;;  %v16366_v37 = vmov %v16360_v57  ;;  %v2860_v2 = vrot.slane %v16367_v63, 4  ;;  %v3057_v29 = vsel %vm16098_vm14, %v12748_v28, %v3056_v46  ;;  %v10134_v20 = vcombine.low %v3055_v13, %v3059_v45  ;;  %v16371_v28 = vld [vmem:[#allocation16_spill] sm:$0xff]  ;;  %v16375_v38 = vld [vmem:[#allocation22_spill] sm:$0xff] }
 0x2b7   : > { %v2964_v56 = vsel %vm253_vm1, %v2956_v26, %v16364_v41  ;;  %v3013_v40 = vsel %vm253_vm1, %v16366_v37, %v3005_v25  ;;  %3637 = vmatprep.subr.bf16.mxu0 %v10135_v50  ;;  %3676 = vmatprep.subr.bf16.mxu1 %v10141_v44  ;;  %v10140_v14 = vcombine.low %v3104_v32, %v3108_v53  ;;  %v2955_v15 = vrot.slane %v16368_v0, 4  ;;  %v16377_v44 = vld [vmem:[#allocation12_spill] sm:$0xff]  ;;  %v16381_v37 = vld [vmem:[#allocation13_spill] sm:$0xff] }
 0x2b8   : > { %4113 = vrot.lane.b32.xlu1 %v4099_v31, %s16102_s28  ;;  %v16369_v43 = vmov %v16358_v60  ;;  %v10131_v60 = vcombine.high %v3008_v30, %v3012_v4  ;;  %v10137_v59 = vcombine.high %v3057_v29, %v3061_v11  ;;  %v2862_v57 = vrot.slane %v16370_v6, 4 }
 0x2b9   : > { %4111 = vrot.lane.b32.xlu0 %v12658_v47, %s16102_s28  ;;  %v3009_v26 = vsel %vm253_vm1, %v16369_v43, %v3002_v55  ;;  %v16372_v45 = vrot.slane %v16371_v28, 4  ;;  %v2965_v58 = vsel %vm969_vm0, %v12710_v7, %v2964_v56  ;;  %v3014_v25 = vsel %vm16099_vm13, %v12719_v39, %v3013_v40 }
 0x2ba   : > { %3638 = vmatpush1.bf16.msra.mxu0 %v10134_v20  ;;  %3677 = vmatpush1.bf16.msra.mxu1 %v10140_v14  ;;  %v13013_v34 = vpop.permute.xlu0 %3272  ;;  %v13017_v13 = vpop.permute.xlu1 %3317  ;;  %v16374_v10 = vrot.slane %v16373_v8, 4  ;;  %v2911_v48 = vrot.slane %v16375_v38, 4  ;;  %v2961_v55 = vsel %vm969_vm0, %v12675_v36, %v2959_v33  ;;  %v16376_v7 = vmov %v16364_v41  ;;  %v4102_v33 = vld [vmem:[%s11005_s29 + $0x2c] sm:$0xf] }
 0x2bb   : > { %v2912_v53 = vsel %vm253_vm1, %v16372_v45, %v2907_v42  ;;  %v2966_v51 = vsel %vm253_vm1, %v16376_v7, %v2958_v1  ;;  %3639 = vmatprep.subr.bf16.mxu0 %v10131_v60  ;;  %3678 = vmatprep.subr.bf16.mxu1 %v10137_v59  ;;  %vm2913_vm14 = vcmask 400384   ;;  %v3010_v39 = vsel %vm16099_vm13, %v12724_v5, %v3009_v26  ;;  %v16378_v5 = vld [vmem:[#allocation25_spill] sm:$0xff]  ;;  %v16380_v41 = vld [vmem:[#allocation23_spill] sm:$0xff] }
 0x2bc   : > { %v2917_v32 = vsel %vm253_vm1, %v2909_v16, %v16374_v10  ;;  %v10130_v46 = vcombine.low %v3008_v30, %v3012_v4  ;;  %v10136_v50 = vcombine.low %v3057_v29, %v3061_v11  ;;  %4117 = vrot.lane.b32.xlu1 %v12668_v9, %s16102_s28  ;;  %v2908_v36 = vrot.slane %v16377_v44, 4  ;;  %v16382_v29 = vld [vmem:[#allocation19_spill] sm:$0xff] }
 0x2bd   : > { %4115 = vrot.lane.b32.xlu0 %v12671_v3, %s16102_s28  ;;  %v2962_v31 = vsel %vm253_vm1, %v2954_v49, %v2955_v15  ;;  %v10127_v16 = vcombine.high %v2961_v55, %v2965_v58  ;;  %v10133_v54 = vcombine.high %v3010_v39, %v3014_v25  ;;  %v16379_v4 = vrot.slane %v16378_v5, 4 }
 0x2be   : > { %v2864_v56 = vrot.slane %v16380_v41, 4  ;;  %v2918_v61 = vsel %vm2913_vm14, %v12689_v12, %v2917_v32  ;;  %3640 = vmatpush1.bf16.msra.mxu0 %v10130_v46  ;;  %3679 = vmatpush1.bf16.msra.mxu1 %v10136_v50  ;;  %v13047_v1 = vpop.permute.xlu0 %3276  ;;  %v2967_v49 = vsel %vm969_vm0, %v12700_v18, %v2966_v51  ;;  %v13051_v30 = vpop.permute.xlu1 %3321  ;;  %v2861_v40 = vrot.slane %v16381_v37, 4 }
 0x2bf   : > { %v2865_v11 = vsel %vm253_vm1, %v16379_v4, %v2860_v2  ;;  %v16383_v20 = vrot.slane %v16382_v29, 4  ;;  %v2914_v0 = vsel %vm2913_vm14, %v16371_v28, %v2912_v53  ;;  %v16384_v12 = vmov %v16374_v10  ;;  %3641 = vmatprep.subr.bf16.mxu0 %v10127_v16  ;;  %3680 = vmatprep.subr.bf16.mxu1 %v10133_v54  ;;  %v4146_v28 = vld [vmem:[%s11005_s29 + $0x10] sm:$0xf] }
 0x2c0   : > { %v2919_v15 = vsel %vm253_vm1, %v16384_v12, %v2911_v48  ;;  %vm2866_vm13 = vcmask 408576   ;;  %v2963_v18 = vsel %vm969_vm0, %v12703_v52, %v2962_v31  ;;  %v10126_v43 = vcombine.low %v2961_v55, %v2965_v58  ;;  %4156 = vrot.lane.b32.xlu1 %v12686_v35, %s10850_s22 }
 0x2c1   : > { %v2870_v14 = vsel %vm253_vm1, %v2862_v57, %v16383_v20  ;;  %v10132_v26 = vcombine.low %v3010_v39, %v3014_v25  ;;  %4119 = vrot.lane.b32.xlu0 %v4102_v33, %s16102_s28  ;;  %v2915_v60 = vsel %vm253_vm1, %v2907_v42, %v2908_v36  ;;  %v10123_v59 = vcombine.high %v2914_v0, %v2918_v61  ;;  %s10851_s28 = smov 14  }
 0x2c2   : > { %v10129_v57 = vcombine.high %v2963_v18, %v2967_v49  ;;  %v2871_v45 = vsel %vm2866_vm13, %v16370_v6, %v2870_v14  ;;  %v16385_v52 = vmov %v16383_v20  ;;  %3642 = vmatpush1.bf16.msra.mxu0 %v10126_v43  ;;  %v13076_v58 = vpop.permute.xlu0 %3280  ;;  %v2920_v25 = vsel %vm2913_vm14, %v16373_v8, %v2919_v15  ;;  %v13080_v10 = vpop.permute.xlu1 %3325  ;;  %v16388_v20 = vld [vmem:[#allocation27_spill] sm:$0xff] }
 0x2c3   : > { %v2872_v53 = vsel %vm253_vm1, %v16385_v52, %v2864_v56  ;;  %3681 = vmatpush1.bf16.msra.mxu1 %v10132_v26  ;;  %v2868_v42 = vsel %vm253_vm1, %v2860_v2, %v2861_v40  ;;  %v2867_v6 = vsel %vm2866_vm13, %v16378_v5, %v2865_v11  ;;  %3643 = vmatprep.subr.bf16.mxu0 %v10123_v59  ;;  %v3286_v39 = vrot.slane %v12984_v62, 4  ;;  %v4149_v11 = vld [vmem:[%s11005_s29 + $0x2c] sm:$0xf] }
 0x2c4   : > { %3682 = vmatprep.subr.bf16.mxu1 %v10129_v57  ;;  %v2916_v32 = vsel %vm2913_vm14, %v12673_v21, %v2915_v60  ;;  %v10122_v38 = vcombine.low %v2914_v0, %v2918_v61  ;;  %v10128_v48 = vcombine.low %v2963_v18, %v2967_v49  ;;  %4160 = vrot.lane.b32.xlu1 %v4146_v28, %s10850_s22  ;;  %v3285_v46 = vrot.slane %v13047_v1, 4  ;;  %v4193_v60 = vld [vmem:[%s11005_s29 + $0x10] sm:$0xf] }
 0x2c5   : > { %4158 = vrot.lane.b32.xlu0 %v12658_v47, %s10850_s22  ;;  %v10119_v8 = vcombine.high %v2867_v6, %v2871_v45  ;;  %v10125_v55 = vcombine.high %v2916_v32, %v2920_v25  ;;  %v2873_v2 = vsel %vm2866_vm13, %v16382_v29, %v2872_v53  ;;  %v2869_v7 = vsel %vm2866_vm13, %v16367_v63, %v2868_v42 }
 0x2c6   : > { %3644 = vmatpush1.bf16.msra.mxu0 %v10122_v38  ;;  %v13096_v51 = vpop.permute.xlu0 %3319  ;;  %v13098_v21 = vpop.permute.xlu1 %3733  ;;  %v3329_v50 = vrot.slane %v13017_v13, 4  ;;  %v10118_v36 = vcombine.low %v2867_v6, %v2871_v45  ;;  %v3239_v63 = vrot.slane %v12890_v17, 4  ;;  %v10124_v31 = vcombine.low %v2916_v32, %v2920_v25  ;;  %v16390_v25 = vld [vmem:[#allocation28_spill] sm:$0xff] }
 0x2c7   : > { %3683 = vmatpush1.bf16.msra.mxu1 %v10128_v48  ;;  %16386 = vst [vmem:[#allocation29_spill] sm:$0xff] %v13098_v21  ;;  %v3330_v44 = vrot.slane %v13096_v51, 4  ;;  %3645 = vmatprep.subr.bf16.mxu0 %v10119_v8  ;;  %v10121_v16 = vcombine.high %v2869_v7, %v2873_v2  ;;  %v3238_v54 = vrot.slane %v12944_v24, 4  ;;  %v3282_v33 = vrot.slane %v12918_v27, 4 }
 0x2c8   : > { %3684 = vmatprep.subr.bf16.mxu1 %v10125_v55  ;;  %4164 = vrot.lane.b32.xlu1 %v12668_v9, %s10850_s22  ;;  %v3283_v5 = vrot.slane %v13013_v34, 4  ;;  %v3333_v4 = vrot.slane %v13080_v10, 4  ;;  %vm16123_vm14 = vcmask 334848   ;;  %v3287_v41 = vrot.slane %v13076_v58, 4 }
 0x2c9   : > { %4162 = vrot.lane.b32.xlu0 %v12671_v3, %s10850_s22  ;;  %vm16105_vm13 = vcmask 326656   ;;  %v3293_v49 = vsel %vm253_vm1, %v3285_v46, %v3286_v39  ;;  %v3331_v37 = vrot.slane %v13051_v30, 4  ;;  %v3335_v40 = vsel %vm253_vm1, %v3329_v50, %v3330_v44 }
 0x2ca   : > { %3646 = vmatpush1.bf16.msra.mxu0 %v10118_v36  ;;  %v3324_v56 = vpop.permute.xlu0 %3323  ;;  %v13115_v61 = vpop.permute.xlu1 %3737  ;;  %v3235_v14 = vrot.slane %v16388_v20, 4  ;;  %v3236_v0 = vrot.slane %v12912_v23, 4  ;;  %v3284_v12 = vrot.slane %v12948_v19, 4  ;;  %v10120_v15 = vcombine.low %v2869_v7, %v2873_v2  ;;  %v13176_v36 = vld [vmem:[%s11005_s29 + $0x4] sm:$0xff] }
 0x2cb   : > { %3685 = vmatpush1.bf16.msra.mxu1 %v10124_v31  ;;  %16387 = vst [vmem:[#allocation20_spill] sm:$0xff] %v13115_v61  ;;  %v3332_v29 = vrot.slane %v3324_v56, 4  ;;  %v3246_v30 = vsel %vm253_vm1, %v3238_v54, %v3239_v63  ;;  %v3240_v18 = vrot.slane %v12980_v22, 4  ;;  %v3288_v43 = vsel %vm253_vm1, %v3282_v33, %v3283_v5 }
 0x2cc   : > { %3686 = vmatprep.subr.bf16.mxu1 %v10121_v16  ;;  %4203 = vrot.lane.b32.xlu1 %v12686_v35, %s10851_s28  ;;  %v3294_v19 = vsel %vm16123_vm14, %v13047_v1, %v3293_v49  ;;  %v3295_v59 = vsel %vm253_vm1, %v3286_v39, %v3287_v41  ;;  %v3337_v35 = vsel %vm16105_vm13, %v13017_v13, %v3335_v40  ;;  %v3237_v42 = vrot.slane %v16390_v25, 4  ;;  %v13204_v49 = vld [vmem:[%s11005_s29 + $0x28] sm:$0xff] }
 0x2cd   : > { %4166 = vrot.lane.b32.xlu0 %v4149_v11, %s10850_s22  ;;  %v3340_v26 = vsel %vm253_vm1, %v3332_v29, %v3333_v4  ;;  %v3338_v22 = vsel %vm253_vm1, %v3330_v44, %v3331_v37  ;;  %vm16116_vm8 = vcmask 343040   ;;  %v3290_v1 = vsel %vm16123_vm14, %v12918_v27, %v3288_v43  ;;  %v13194_v11 = vld [vmem:[%s11005_s29 + $0xc] sm:$0xff]  ;;  %v13207_v37 = vld [vmem:[%s11005_s29 + $0x20] sm:$0xff] }
 0x2ce   : > { %v3341_v57 = vsel %vm16105_vm13, %v3324_v56, %v3340_v26  ;;  %v3328_v28 = vpop.permute.xlu0 %3327  ;;  %v13139_v45 = vpop.permute.xlu1 %3741  ;;  %v3241_v13 = vsel %vm253_vm1, %v3235_v14, %v3236_v0  ;;  %v3291_v6 = vsel %vm253_vm1, %v3283_v5, %v3284_v12  ;;  %v10155_v38 = vcombine.high %v3290_v1, %v3294_v19  ;;  %v16395_v5 = vld [vmem:[#allocation18_spill] sm:$0xff] }
 0x2cf   : > { %3687 = vmatpush1.bf16.msra.mxu1 %v10120_v15  ;;  %16389 = vst [vmem:[#allocation14_spill] sm:$0xff] %v13139_v45  ;;  %v10158_v52 = vcombine.low %v3337_v35, %v3341_v57  ;;  %v3334_v53 = vrot.slane %v3328_v28, 4  ;;  %v10159_v58 = vcombine.high %v3337_v35, %v3341_v57  ;;  %v3247_v48 = vsel %vm16116_vm8, %v12944_v24, %v3246_v30  ;;  %v4655_v30 = vld [vmem:[%s11005_s29 + $0x14] sm:$0xf] }
 0x2d0   : > { %4207 = vrot.lane.b32.xlu1 %v4193_v60, %s10851_s28  ;;  %v3339_v8 = vsel %vm16105_vm13, %v13096_v51, %v3338_v22  ;;  %v3296_v55 = vsel %vm16123_vm14, %v12984_v62, %v3295_v59  ;;  %v3248_v24 = vsel %vm253_vm1, %v3239_v63, %v3240_v18  ;;  %v3243_v39 = vsel %vm16116_vm8, %v16388_v20, %v3241_v13  ;;  %v4196_v63 = vld [vmem:[%s11005_s29 + $0x2c] sm:$0xf]  ;;  %v13213_v20 = vld [vmem:[#allocation6 + $0x20] sm:$0xff] }
 0x2d1   : > { %4205 = vrot.lane.b32.xlu0 %v12658_v47, %s10851_s28  ;;  %v3342_v32 = vsel %vm253_vm1, %v3333_v4, %v3334_v53  ;;  %3657 = vmatprep.subr.bf16.mxu0 %v10159_v58  ;;  %v10154_v46 = vcombine.low %v3290_v1, %v3294_v19  ;;  %v3244_v62 = vsel %vm253_vm1, %v3236_v0, %v3237_v42  ;;  %v4609_v4 = vld [vmem:[%s11005_s29 + $0x14] sm:$0xf]  ;;  %v4612_v0 = vld [vmem:[%s11005_s29 + $0x30] sm:$0xf]  ;;  %vm4081_vm15 = vcmask 138240  }
 0x2d2   : > { %3658 = vmatpush2.bf16.msra.mxu0 %v10158_v52  ;;  %v13155_v27 = vpop.permute.xlu0 %3735  ;;  %v3343_v47 = vsel %vm16105_vm13, %v13080_v10, %v3342_v32  ;;  %v13161_v2 = vpop.permute.xlu1 %3780  ;;  %v3292_v10 = vsel %vm16123_vm14, %v13013_v34, %v3291_v6  ;;  %v10151_v50 = vcombine.high %v3243_v39, %v3247_v48  ;;  %v10150_v16 = vcombine.low %v3243_v39, %v3247_v48  ;;  %v4658_v19 = vld [vmem:[%s11005_s29 + $0x30] sm:$0xf]  ;;  %v4701_v57 = vld [vmem:[%s11005_s29 + $0x14] sm:$0xf] }
 0x2d3   : > { %16391 = vst [vmem:[#allocation17_spill] sm:$0xff] %v13155_v27  ;;  %16392 = vst [vmem:[#allocation16_spill] sm:$0xff] %v13161_v2  ;;  %3659 = vmatprep.subr.bf16.mxu0 %v10155_v38  ;;  %v10160_v7 = vcombine.low %v3339_v8, %v3343_v47  ;;  %v10161_v51 = vcombine.high %v3339_v8, %v3343_v47  ;;  %v10157_v44 = vcombine.high %v3292_v10, %v3296_v55  ;;  %v4704_v58 = vld [vmem:[%s11005_s29 + $0x30] sm:$0xf]  ;;  %v4747_v1 = vld [vmem:[%s11005_s29 + $0x14] sm:$0xf] }
 0x2d4   : > { %4211 = vrot.lane.b32.xlu1 %v12668_v9, %s10851_s28  ;;  %v3249_v9 = vsel %vm16116_vm8, %v12890_v17, %v3248_v24  ;;  %v10156_v54 = vcombine.low %v3292_v10, %v3296_v55  ;;  %v10116_v17 = vcombine.low %v16395_v5, %v16395_v5  ;;  %16398 = vst [vmem:[#allocation23_spill] sm:$0xff] %v13213_v20  ;;  %v4750_v48 = vld [vmem:[%s11005_s29 + $0x30] sm:$0xf]  ;;  %v4793_v55 = vld [vmem:[%s11005_s29 + $0x14] sm:$0xf]  ;;  %vm4034_vm13 = vcmask 146432  }
 0x2d5   : > { %4209 = vrot.lane.b32.xlu0 %v12671_v3, %s10851_s28  ;;  %3698 = vmatprep.subr.bf16.mxu1 %v10161_v51  ;;  %v3245_v3 = vsel %vm16116_vm8, %v12912_v23, %v3244_v62  ;;  %v10165_v14 = vcombine.high %v13213_v20, %v13213_v20  ;;  %v4796_v10 = vld [vmem:[%s11005_s29 + $0x30] sm:$0xf]  ;;  %vm3987_vm12 = vcmask 154624   ;;  %vm16125_vm8 = vcmask 162816  }
 0x2d6   : > { %3660 = vmatpush2.bf16.msra.mxu0 %v10154_v46  ;;  %3699 = vmatpush2.bf16.msra.mxu1 %v10160_v7  ;;  %v13179_v34 = vpop.permute.xlu0 %3739  ;;  %v13183_v31 = vpop.permute.xlu1 %3784  ;;  %v10153_v33 = vcombine.high %v3245_v3, %v3249_v9  ;;  %v10152_v56 = vcombine.low %v3245_v3, %v3249_v9  ;;  %v16403_v3 = vld [vmem:[#allocation30_spill] sm:$0xff]  ;;  %vm16126_vm14 = vcmask 171008  }
 0x2d7   : > { %16393 = vst [vmem:[#allocation24_spill] sm:$0xff] %v13179_v34  ;;  %16394 = vst [vmem:[#allocation22_spill] sm:$0xff] %v13183_v31  ;;  %3661 = vmatprep.subr.bf16.mxu0 %v10151_v50  ;;  %3700 = vmatprep.subr.bf16.mxu1 %v10157_v44  ;;  %v4839_v50 = vld [vmem:[%s11005_s29 + $0x14] sm:$0xf] }
 0x2d8   : > { %4619 = vrot.lane.b32.xlu1 %v13176_v36, %s10799_s21 }
 0x2d9   : > { %4213 = vrot.lane.b32.xlu0 %v4196_v63, %s10851_s28 }
 0x2da   : > { %3662 = vmatpush2.bf16.msra.mxu0 %v10150_v16  ;;  %3701 = vmatpush2.bf16.msra.mxu1 %v10156_v54  ;;  %v13196_v41 = vpop.permute.xlu0 %3743  ;;  %v13198_v23 = vpop.permute.xlu1 %3788 }
 0x2db   : > { %16396 = vst [vmem:[#allocation12_spill] sm:$0xff] %v13196_v41  ;;  %16397 = vst [vmem:[#allocation25_spill] sm:$0xff] %v13198_v23  ;;  %3702 = vmatprep.subr.bf16.mxu1 %v10153_v33 }
 0x2dc   : > { %4623 = vrot.lane.b32.xlu1 %v4609_v4, %s10799_s21 }
 0x2dd   : > { %4621 = vrot.lane.b32.xlu0 %v13194_v11, %s10799_s21  ;;  %3664 = vmatmul.mubr.bf16.vlgmr.msra.gmra.mxu0 %v10116_v17 }
 0x2de   : > { %3703 = vmatpush2.bf16.msra.mxu1 %v10152_v56  ;;  %v13209_v40 = vpop.permute.xlu0 %3782  ;;  %v13211_v29 = vpop.permute.xlu1 %3827  ;;  %10210 = vmatprep.mubr.msk.bf16.mxu0 %vm969_vm0, %v10165_v14 }
 0x2e0   : > { %4627 = vrot.lane.b32.xlu1 %v13204_v49, %s10799_s21 }
 0x2e1   : > { %4625 = vrot.lane.b32.xlu0 %v13207_v37, %s10799_s21  ;;  %3705 = vmatmul.mubr.bf16.vlgmr.msra.gmra.mxu1 %v10116_v17  ;;  %v16405_v17 = vld [vmem:[#allocation21_spill] sm:$0xff] }
 0x2e2   : > { %v13222_v12 = vpop.permute.xlu0 %3786  ;;  %v13224_v15 = vpop.permute.xlu1 %3831  ;;  %10211 = vmatprep.mubr.msk.bf16.mxu1 %vm969_vm0, %v10165_v14  ;;  %v4842_v14 = vld [vmem:[%s11005_s29 + $0x30] sm:$0xf] }
 0x2e3   : > { %16399 = vst [vmem:[#allocation13_spill] sm:$0xff] %v13224_v15 }
 0x2e4   : > { %4665 = vrot.lane.b32.xlu1 %v13176_v36, %s10800_s23 }
 0x2e5   : > { %4629 = vrot.lane.b32.xlu0 %v4612_v0, %s10799_s21  ;;  %s10852_s21 = smov 117  }
 0x2e6   : > { %v13232_v18 = vpop.permute.xlu0 %3790  ;;  %v13234_v43 = vpop.permute.xlu1 %3835 }
 0x2e7   : > { %16400 = vst [vmem:[#allocation19_spill] sm:$0xff] %v13232_v18  ;;  %16401 = vst [vmem:[#allocation27_spill] sm:$0xff] %v13234_v43 }
 0x2e8   : > { %4669 = vrot.lane.b32.xlu1 %v4655_v30, %s10800_s23  ;;  %v16407_v30 = vld [vmem:[#allocation26_spill] sm:$0xff] }
 0x2e9   : > { %4667 = vrot.lane.b32.xlu0 %v13194_v11, %s10800_s23 }
 0x2ea   : > { %v13239_v26 = vpop.permute.xlu0 %3829  ;;  %v13241_v60 = vpop.permute.xlu1 %3874 }
 0x2ec   : > { %4673 = vrot.lane.b32.xlu1 %v13204_v49, %s10800_s23 }
 0x2ed   : > { %4671 = vrot.lane.b32.xlu0 %v13207_v37, %s10800_s23 }
 0x2ee   : > { %v13248_v59 = vpop.permute.xlu0 %3833  ;;  %v13250_v35 = vpop.permute.xlu1 %3878 }
 0x2f0   : > { %4711 = vrot.lane.b32.xlu1 %v13176_v36, %s10801_s25 }
 0x2f1   : > { %4675 = vrot.lane.b32.xlu0 %v4658_v19, %s10800_s23  ;;  %s10853_s23 = smov 116  }
 0x2f2   : > { %v13256_v28 = vpop.permute.xlu0 %3837  ;;  %v13258_v22 = vpop.permute.xlu1 %3882 }
 0x2f3   : > { %16402 = vst [vmem:[#allocation28_spill] sm:$0xff] %v13256_v28 }
 0x2f4   : > { %4715 = vrot.lane.b32.xlu1 %v4701_v57, %s10801_s25 }
 0x2f5   : > { %4713 = vrot.lane.b32.xlu0 %v13194_v11, %s10801_s25 }
 0x2f6   : > { %v13263_v52 = vpop.permute.xlu0 %3876  ;;  %v13265_v53 = vpop.permute.xlu1 %3921 }
 0x2f8   : > { %4719 = vrot.lane.b32.xlu1 %v13204_v49, %s10801_s25 }
 0x2f9   : > { %4717 = vrot.lane.b32.xlu0 %v13207_v37, %s10801_s25 }
 0x2fa   : > { %v13272_v25 = vpop.permute.xlu0 %3880  ;;  %v13274_v42 = vpop.permute.xlu1 %3925 }
 0x2fc   : > { %4757 = vrot.lane.b32.xlu1 %v13176_v36, %s10802_s30 }
 0x2fd   : > { %4721 = vrot.lane.b32.xlu0 %v4704_v58, %s10801_s25 }
 0x2fe   : > { %v13280_v13 = vpop.permute.xlu0 %3884  ;;  %v13282_v6 = vpop.permute.xlu1 %3929 }
 0x300   : > { %4761 = vrot.lane.b32.xlu1 %v4747_v1, %s10802_s30 }
 0x301   : > { %4759 = vrot.lane.b32.xlu0 %v13194_v11, %s10802_s30 }
 0x302   : > { %v13287_v32 = vpop.permute.xlu0 %3923  ;;  %v13289_v38 = vpop.permute.xlu1 %3968 }
 0x304   : > { %4765 = vrot.lane.b32.xlu1 %v13204_v49, %s10802_s30 }
 0x305   : > { %4763 = vrot.lane.b32.xlu0 %v13207_v37, %s10802_s30 }
 0x306   : > { %v13296_v8 = vpop.permute.xlu0 %3927  ;;  %v13298_v47 = vpop.permute.xlu1 %3972 }
 0x307   : > { %v3936_v2 = vrot.slane %v13296_v8, 4 }
 0x308   : > { %4803 = vrot.lane.b32.xlu1 %v13176_v36, %s10803_s4 }
 0x309   : > { %4767 = vrot.lane.b32.xlu0 %v4750_v48, %s10802_s30 }
 0x30a   : > { %v13304_v24 = vpop.permute.xlu0 %3931  ;;  %v13306_v7 = vpop.permute.xlu1 %3976 }
 0x30c   : > { %4807 = vrot.lane.b32.xlu1 %v4793_v55, %s10803_s4  ;;  %v16409_v55 = vld [vmem:[#allocation15_spill] sm:$0xff] }
 0x30d   : > { %4805 = vrot.lane.b32.xlu0 %v13194_v11, %s10803_s4 }
 0x30e   : > { %v13311_v51 = vpop.permute.xlu0 %3970  ;;  %v13313_v39 = vpop.permute.xlu1 %4015 }
 0x30f   : > { %v3981_v20 = vrot.slane %v13311_v51, 4 }
 0x310   : > { %4811 = vrot.lane.b32.xlu1 %v13204_v49, %s10803_s4 }
 0x311   : > { %4809 = vrot.lane.b32.xlu0 %v13207_v37, %s10803_s4 }
 0x312   : > { %v13320_v46 = vpop.permute.xlu0 %3974  ;;  %v13322_v62 = vpop.permute.xlu1 %4019 }
 0x314   : > { %4849 = vrot.lane.b32.xlu1 %v13176_v36, %s10804_s7 }
 0x315   : > { %4813 = vrot.lane.b32.xlu0 %v4796_v10, %s10803_s4 }
 0x316   : > { %v13328_v44 = vpop.permute.xlu0 %3978  ;;  %v13330_v63 = vpop.permute.xlu1 %4023 }
 0x318   : > { %4853 = vrot.lane.b32.xlu1 %v4839_v50, %s10804_s7  ;;  %v4885_v50 = vld [vmem:[%s11005_s29 + $0x14] sm:$0xf] }
 0x319   : > { %4851 = vrot.lane.b32.xlu0 %v13194_v11, %s10804_s7  ;;  %v2779_v9 = vpop.f32.mrf.mxu0 }
 0x31a   : > { %v13336_v16 = vadd.f32 %v2779_v9, %v16403_v3  ;;  %v13338_v54 = vpop.permute.xlu0 %4017  ;;  %v13340_v33 = vpop.permute.xlu1 %4062 }
 0x31b   : > { %v2781_v5 = vpop.f32.mrf.mxu0 }
 0x31c   : > { %16404 = vst [vmem:[#allocation18_spill] sm:$0xff] %v13336_v16  ;;  %v13343_v4 = vadd.f32 %v2781_v5, %v16405_v17  ;;  %4857 = vrot.lane.b32.xlu1 %v13204_v49, %s10804_s7  ;;  %v3980_v16 = vrot.slane %v13289_v38, 4 }
 0x31d   : > { %4855 = vrot.lane.b32.xlu0 %v13207_v37, %s10804_s7  ;;  %v2820_v56 = vpop.f32.mrf.mxu1  ;;  %v2783_v0 = vpop.f32.mrf.mxu0 }
 0x31e   : > { %16406 = vst [vmem:[#allocation30_spill] sm:$0xff] %v13343_v4  ;;  %v13351_v19 = vadd.f32 %v2820_v56, %v16407_v30  ;;  %v13353_v57 = vpop.permute.xlu0 %4021  ;;  %v13355_v58 = vpop.permute.xlu1 %4066  ;;  %v4074_v56 = vrot.slane %v13340_v33, 4  ;;  %v4028_v4 = vrot.slane %v13338_v54, 4 }
 0x31f   : > { %v2822_v1 = vpop.f32.mrf.mxu1  ;;  %v2784_v48 = vpop.f32.mrf.mxu0  ;;  %v4030_v0 = vrot.slane %v13353_v57, 4  ;;  %v4076_v31 = vrot.slane %v13355_v58, 4  ;;  %v3985_v58 = vrot.slane %v13328_v44, 4 }
 0x320   : > { %16408 = vst [vmem:[#allocation21_spill] sm:$0xff] %v13351_v19  ;;  %v13358_v10 = vadd.f32 %v2822_v1, %v16409_v55  ;;  %4895 = vrot.lane.b32.xlu1 %v13176_v36, %s10805_s8  ;;  %v3933_v48 = vrot.slane %v13265_v53, 4  ;;  %v3984_v55 = vrot.slane %v13306_v7, 4  ;;  %v4027_v19 = vrot.slane %v13313_v39, 4  ;;  %v4888_v1 = vld [vmem:[%s11005_s29 + $0x30] sm:$0xf] }
 0x321   : > { %4859 = vrot.lane.b32.xlu0 %v4842_v14, %s10804_s7  ;;  %v2824_v9 = vpop.f32.mrf.mxu1 }
 0x322   : > { %16410 = vst [vmem:[#allocation26_spill] sm:$0xff] %v13358_v10  ;;  %v4026_v3 = vpop.permute.xlu0 %4025  ;;  %v13364_v5 = vpop.permute.xlu1 %4070  ;;  %v3983_v10 = vrot.slane %v13320_v46, 4 }
 0x323   : > { %v2825_v17 = vpop.f32.mrf.mxu1  ;;  %v4078_v14 = vrot.slane %v13364_v5, 4  ;;  %v4032_v45 = vrot.slane %v4026_v3, 4  ;;  %v4029_v3 = vrot.slane %v13322_v62, 4 }
 0x324   : > { %4899 = vrot.lane.b32.xlu1 %v4885_v50, %s10805_s8  ;;  %v4031_v17 = vrot.slane %v13330_v63, 4 }
 0x325   : > { %4897 = vrot.lane.b32.xlu0 %v13194_v11, %s10805_s8 }
 0x326   : > { %v13376_v50 = vpop.permute.xlu0 %4064  ;;  %v13378_v9 = vpop.permute.xlu1 %4109  ;;  %v4038_v21 = vsel %vm253_vm1, %v4030_v0, %v4031_v17  ;;  %v3991_v0 = vsel %vm253_vm1, %v3983_v10, %v3984_v55  ;;  %v4040_v15 = vsel %vm253_vm1, %v4031_v17, %v4032_v45  ;;  %v16414_v45 = vrot.slane %v13282_v6, 4 }
 0x327   : > { %16411 = vst [vmem:[#allocation15_spill] sm:$0xff] %v13378_v9  ;;  %v4075_v30 = vrot.slane %v13376_v50, 4  ;;  %v4039_v34 = vsel %vm4034_vm13, %v13353_v57, %v4038_v21 }
 0x328   : > { %4903 = vrot.lane.b32.xlu1 %v13204_v49, %s10805_s8  ;;  %v3944_v57 = vsel %vm253_vm1, %v3936_v2, %v16414_v45  ;;  %v3992_v2 = vsel %vm3987_vm12, %v13320_v46, %v3991_v0  ;;  %v16415_v0 = vrot.slane %v13263_v52, 4 }
 0x329   : > { %4901 = vrot.lane.b32.xlu0 %v13207_v37, %s10805_s8  ;;  %v4080_v18 = vsel %vm253_vm1, %v4074_v56, %v4075_v30  ;;  %v4033_v56 = vsel %vm253_vm1, %v4027_v19, %v4028_v4  ;;  %v4083_v44 = vsel %vm253_vm1, %v4075_v30, %v4076_v31  ;;  %v4036_v31 = vsel %vm253_vm1, %v4028_v4, %v4029_v3  ;;  %v4934_v3 = vld [vmem:[%s11005_s29 + $0x30] sm:$0xf] }
 0x32a   : > { %v4069_v61 = vpop.permute.xlu0 %4068  ;;  %v13400_v41 = vpop.permute.xlu1 %4113  ;;  %v4082_v62 = vsel %vm4081_vm15, %v13340_v33, %v4080_v18  ;;  %v3982_v18 = vrot.slane %v13298_v47, 4  ;;  %v4084_v47 = vsel %vm4081_vm15, %v13376_v50, %v4083_v44  ;;  %v3840_v50 = vrot.slane %v13239_v26, 4 }
 0x32b   : > { %16412 = vst [vmem:[#allocation31_spill] sm:$0xff] %v13400_v41  ;;  %v4077_v23 = vrot.slane %v4069_v61, 4  ;;  %v4931_v41 = vld [vmem:[%s11005_s29 + $0x14] sm:$0xf] }
 0x32c   : > { %4941 = vrot.lane.b32.xlu1 %v13176_v36, %s10806_s9 }
 0x32d   : > { %4905 = vrot.lane.b32.xlu0 %v4888_v1, %s10805_s8  ;;  %v4085_v9 = vsel %vm253_vm1, %v4077_v23, %v4078_v14  ;;  %v16413_v23 = vrot.slane %v13287_v32, 4 }
 0x32e   : > { %v4086_v27 = vsel %vm4081_vm15, %v4069_v61, %v4085_v9  ;;  %v4073_v1 = vpop.permute.xlu0 %4072  ;;  %v13423_v28 = vpop.permute.xlu1 %4117  ;;  %v4035_v61 = vsel %vm4034_vm13, %v13313_v39, %v4033_v56 }
 0x32f   : > { %v10194_v10 = vcombine.low %v4082_v62, %v4086_v27  ;;  %v4079_v19 = vrot.slane %v4073_v1, 4  ;;  %v10195_v43 = vcombine.high %v4082_v62, %v4086_v27  ;;  %v3939_v21 = vsel %vm253_vm1, %v3933_v48, %v16413_v23 }
 0x330   : > { %4945 = vrot.lane.b32.xlu1 %v4931_v41, %s10806_s9  ;;  %v3986_v27 = vsel %vm253_vm1, %v3980_v16, %v3981_v20  ;;  %v10191_v30 = vcombine.high %v4035_v61, %v4039_v34  ;;  %v4041_v16 = vsel %vm4034_vm13, %v13330_v63, %v4040_v15  ;;  %v10190_v15 = vcombine.low %v4035_v61, %v4039_v34 }
 0x331   : > { %4943 = vrot.lane.b32.xlu0 %v13194_v11, %s10806_s9  ;;  %v4087_v33 = vsel %vm253_vm1, %v4078_v14, %v4079_v19  ;;  %4517 = vmatprep.subr.bf16.mxu0 %v10195_v43  ;;  %v3938_v43 = vrot.slane %v13304_v24, 4  ;;  %v3993_v14 = vsel %vm253_vm1, %v3984_v55, %v3985_v58  ;;  %v3988_v9 = vsel %vm3987_vm12, %v13289_v38, %v3986_v27 }
 0x332   : > { %4518 = vmatpush1.bf16.msra.mxu0 %v10194_v10  ;;  %v13445_v39 = vpop.permute.xlu0 %4111  ;;  %v4088_v41 = vsel %vm4081_vm15, %v13364_v5, %v4087_v33  ;;  %v13451_v4 = vpop.permute.xlu1 %4156  ;;  %v4037_v5 = vsel %vm4034_vm13, %v13338_v54, %v4036_v31  ;;  %v3935_v24 = vrot.slane %v13274_v42, 4  ;;  %v3989_v63 = vsel %vm253_vm1, %v3981_v20, %v3982_v18  ;;  %v4977_v31 = vld [vmem:[%s11005_s29 + $0x14] sm:$0xf] }
 0x333   : > { %4519 = vmatprep.subr.bf16.mxu0 %v10191_v30  ;;  %v10196_v46 = vcombine.low %v4084_v47, %v4088_v41  ;;  %v10197_v48 = vcombine.high %v4084_v47, %v4088_v41  ;;  %v10187_v55 = vcombine.high %v3988_v9, %v3992_v2  ;;  %v10193_v17 = vcombine.high %v4037_v5, %v4041_v16 }
 0x334   : > { %4949 = vrot.lane.b32.xlu1 %v13204_v49, %s10806_s9  ;;  %v3842_v38 = vrot.slane %v13248_v59, 4  ;;  %v16416_v34 = vrot.slane %v13241_v60, 4  ;;  %v3945_v58 = vsel %vm16125_vm8, %v13296_v8, %v3944_v57  ;;  %v3994_v20 = vsel %vm3987_vm12, %v13306_v7, %v3993_v14 }
 0x335   : > { %4947 = vrot.lane.b32.xlu0 %v13207_v37, %s10806_s9  ;;  %4558 = vmatprep.subr.bf16.mxu1 %v10197_v48  ;;  %v16417_v62 = vrot.slane %v13258_v22, 4  ;;  %v16418_v1 = vrot.slane %v13272_v25, 4  ;;  %v3891_v10 = vrot.slane %v13280_v13, 4  ;;  %v3941_v8 = vsel %vm16125_vm8, %v13265_v53, %v3939_v21 }
 0x336   : > { %v3892_v54 = vsel %vm253_vm1, %v16416_v34, %v16415_v0  ;;  %4520 = vmatpush1.bf16.msra.mxu0 %v10190_v15  ;;  %4559 = vmatpush1.bf16.msra.mxu1 %v10196_v46  ;;  %v13475_v42 = vpop.permute.xlu0 %4115  ;;  %v13479_v56 = vpop.permute.xlu1 %4160  ;;  %v16419_v19 = vmov %v16414_v45  ;;  %v3793_v7 = vrot.slane %v13209_v40, 4  ;;  %v3990_v45 = vsel %vm3987_vm12, %v13311_v51, %v3989_v63  ;;  %v16424_v46 = vld [vmem:[#allocation28_spill] sm:$0xff]  ;;  %v16426_v15 = vld [vmem:[#allocation17_spill] sm:$0xff] }
 0x337   : > { %v3897_v44 = vsel %vm253_vm1, %v16418_v1, %v16417_v62  ;;  %v3946_v23 = vsel %vm253_vm1, %v16419_v19, %v3938_v43  ;;  %4521 = vmatprep.subr.bf16.mxu0 %v10187_v55  ;;  %4560 = vmatprep.subr.bf16.mxu1 %v10193_v17  ;;  %v10186_v57 = vcombine.low %v3988_v9, %v3992_v2  ;;  %v3888_v53 = vrot.slane %v13250_v35, 4  ;;  %v16427_v17 = vld [vmem:[#allocation13_spill] sm:$0xff] }
 0x338   : > { %v10192_v18 = vcombine.low %v4037_v5, %v4041_v16  ;;  %4987 = vrot.lane.b32.xlu1 %v13176_v36, %s10807_s10  ;;  %v16420_v13 = vrot.slane %v13287_v32, 4  ;;  %v10183_v61 = vcombine.high %v3941_v8, %v3945_v58  ;;  %v10189_v27 = vcombine.high %v3990_v45, %v3994_v20  ;;  %v16422_v16 = vld [vmem:[#allocation27_spill] sm:$0xff]  ;;  %v16432_v19 = vld [vmem:[#allocation25_spill] sm:$0xff] }
 0x339   : > { %4951 = vrot.lane.b32.xlu0 %v4934_v3, %s10806_s9  ;;  %v3795_v33 = vrot.slane %v13222_v12, 4  ;;  %v16421_v51 = vrot.slane %v13211_v29, 4  ;;  %v3898_v2 = vsel %vm16126_vm14, %v13272_v25, %v3897_v44  ;;  %v3947_v47 = vsel %vm16125_vm8, %v13282_v6, %v3946_v23 }
 0x33a   : > { %v3942_v21 = vsel %vm253_vm1, %v16420_v13, %v3935_v24  ;;  %4522 = vmatpush1.bf16.msra.mxu0 %v10186_v57  ;;  %4561 = vmatpush1.bf16.msra.mxu1 %v10192_v18  ;;  %v13511_v35 = vpop.permute.xlu0 %4119  ;;  %v13515_v41 = vpop.permute.xlu1 %4164  ;;  %v16423_v43 = vrot.slane %v16422_v16, 4  ;;  %v3844_v48 = vrot.slane %v16424_v46, 4  ;;  %v3894_v9 = vsel %vm16126_vm14, %v13241_v60, %v3892_v54  ;;  %v16429_v54 = vld [vmem:[#allocation24_spill] sm:$0xff]  ;;  %v16434_v57 = vld [vmem:[#allocation19_spill] sm:$0xff] }
 0x33b   : > { %v3845_v30 = vsel %vm253_vm1, %v16421_v51, %v3840_v50  ;;  %v16425_v25 = vmov %v16417_v62  ;;  %4523 = vmatprep.subr.bf16.mxu0 %v10183_v61  ;;  %4562 = vmatprep.subr.bf16.mxu1 %v10189_v27  ;;  %v3746_v24 = vrot.slane %v16426_v15, 4  ;;  %v3943_v6 = vsel %vm16125_vm8, %v13287_v32, %v3942_v21  ;;  %v16430_v32 = vld [vmem:[#allocation16_spill] sm:$0xff]  ;;  %v16436_v27 = vld [vmem:[#allocation22_spill] sm:$0xff] }
 0x33c   : > { %v3850_v14 = vsel %vm253_vm1, %v3842_v38, %v16423_v43  ;;  %v3899_v5 = vsel %vm253_vm1, %v16425_v25, %v3891_v10  ;;  %v10182_v63 = vcombine.low %v3941_v8, %v3945_v58  ;;  %v10188_v55 = vcombine.low %v3990_v45, %v3994_v20  ;;  %4991 = vrot.lane.b32.xlu1 %v4977_v31, %s10807_s10  ;;  %v16440_v25 = vld [vmem:[#allocation20_spill] sm:$0xff] }
 0x33d   : > { %4989 = vrot.lane.b32.xlu0 %v13194_v11, %s10807_s10  ;;  %v3841_v60 = vrot.slane %v16427_v17, 4  ;;  %v16428_v3 = vmov %v16415_v0  ;;  %v10179_v0 = vcombine.high %v3894_v9, %v3898_v2  ;;  %v10185_v34 = vcombine.high %v3943_v6, %v3947_v47 }
 0x33e   : > { %v3895_v38 = vsel %vm253_vm1, %v16428_v3, %v3888_v53  ;;  %v3748_v62 = vrot.slane %v16429_v54, 4  ;;  %v16431_v58 = vrot.slane %v16430_v32, 4  ;;  %v3851_v1 = vsel %vm16127_vm9, %v13248_v59, %v3850_v14  ;;  %4524 = vmatpush1.bf16.msra.mxu0 %v10182_v63  ;;  %4563 = vmatpush1.bf16.msra.mxu1 %v10188_v55  ;;  %v13544_v44 = vpop.permute.xlu0 %4158  ;;  %v13548_v8 = vpop.permute.xlu1 %4203 }
 0x33f   : > { %v3900_v10 = vsel %vm16126_vm14, %v13258_v22, %v3899_v5  ;;  %v16433_v23 = vrot.slane %v16432_v19, 4  ;;  %v3797_v18 = vrot.slane %v16434_v57, 4  ;;  %v3847_v53 = vsel %vm16127_vm9, %v13211_v29, %v3845_v30  ;;  %4525 = vmatprep.subr.bf16.mxu0 %v10179_v0  ;;  %4564 = vmatprep.subr.bf16.mxu1 %v10185_v34  ;;  %v4980_v30 = vld [vmem:[%s11005_s29 + $0x30] sm:$0xf] }
 0x340   : > { %v3798_v20 = vsel %vm253_vm1, %v16431_v58, %v3793_v7  ;;  %v16435_v59 = vmov %v16423_v43  ;;  %vm3799_vm8 = vcmask 187392   ;;  %v3896_v22 = vsel %vm16126_vm14, %v13263_v52, %v3895_v38  ;;  %4995 = vrot.lane.b32.xlu1 %v13204_v49, %s10807_s10  ;;  %v16437_v52 = vld [vmem:[#allocation29_spill] sm:$0xff]  ;;  %v16439_v43 = vld [vmem:[#allocation12_spill] sm:$0xff] }
 0x341   : > { %v3803_v45 = vsel %vm253_vm1, %v3795_v33, %v16433_v23  ;;  %v3852_v13 = vsel %vm253_vm1, %v16435_v59, %v3844_v48  ;;  %v10178_v21 = vcombine.low %v3894_v9, %v3898_v2  ;;  %v10184_v61 = vcombine.low %v3943_v6, %v3947_v47  ;;  %4993 = vrot.lane.b32.xlu0 %v13207_v37, %s10807_s10  ;;  %v16441_v6 = vld [vmem:[#allocation14_spill] sm:$0xff] }
 0x342   : > { %v3794_v29 = vrot.slane %v16436_v27, 4  ;;  %v3848_v31 = vsel %vm253_vm1, %v3840_v50, %v3841_v60  ;;  %v10175_v33 = vcombine.high %v3847_v53, %v3851_v1  ;;  %v10181_v51 = vcombine.high %v3896_v22, %v3900_v10  ;;  %v13578_v48 = vpop.permute.xlu0 %4162  ;;  %v13582_v9 = vpop.permute.xlu1 %4207 }
 0x343   : > { %v16438_v2 = vrot.slane %v16437_v52, 4  ;;  %v3750_v14 = vrot.slane %v16439_v43, 4  ;;  %v3804_v46 = vsel %vm3799_vm8, %v13222_v12, %v3803_v45  ;;  %4526 = vmatpush1.bf16.msra.mxu0 %v10178_v21  ;;  %4565 = vmatpush1.bf16.msra.mxu1 %v10184_v61  ;;  %v3853_v50 = vsel %vm16127_vm9, %v16422_v16, %v3852_v13 }
 0x344   : > { %v3747_v5 = vrot.slane %v16440_v25, 4  ;;  %v16442_v63 = vrot.slane %v16441_v6, 4  ;;  %v3800_v17 = vsel %vm3799_vm8, %v16430_v32, %v3798_v20  ;;  %v16443_v12 = vmov %v16433_v23  ;;  %4527 = vmatprep.subr.bf16.mxu0 %v10175_v33  ;;  %4566 = vmatprep.subr.bf16.mxu1 %v10181_v51  ;;  %v5023_v32 = vld [vmem:[%s11005_s29 + $0x14] sm:$0xf] }
 0x345   : > { %v3751_v47 = vsel %vm253_vm1, %v16438_v2, %v3746_v24  ;;  %v3805_v60 = vsel %vm253_vm1, %v16443_v12, %v3797_v18  ;;  %vm3752_vm14 = vcmask 195584   ;;  %v3849_v16 = vsel %vm16127_vm9, %v13239_v26, %v3848_v31  ;;  %5033 = vrot.lane.b32.xlu1 %v13176_v36, %s10852_s21  ;;  %4997 = vrot.lane.b32.xlu0 %v4980_v30, %s10807_s10 }
 0x346   : > { %v3756_v55 = vsel %vm253_vm1, %v3748_v62, %v16442_v63  ;;  %v10174_v3 = vcombine.low %v3847_v53, %v3851_v1  ;;  %v10180_v38 = vcombine.low %v3896_v22, %v3900_v10  ;;  %v3801_v0 = vsel %vm253_vm1, %v3793_v7, %v3794_v29  ;;  %v13607_v1 = vpop.permute.xlu0 %4166  ;;  %v13611_v23 = vpop.permute.xlu1 %4211 }
 0x347   : > { %v10171_v34 = vcombine.high %v3800_v17, %v3804_v46  ;;  %v10177_v62 = vcombine.high %v3849_v16, %v3853_v50  ;;  %v3757_v58 = vsel %vm3752_vm14, %v16429_v54, %v3756_v55  ;;  %v16444_v26 = vmov %v16442_v63  ;;  %v16447_v63 = vld [vmem:[#allocation15_spill] sm:$0xff] }
 0x348   : > { %v3758_v20 = vsel %vm253_vm1, %v16444_v26, %v3750_v14  ;;  %4528 = vmatpush1.bf16.msra.mxu0 %v10174_v3  ;;  %4567 = vmatpush1.bf16.msra.mxu1 %v10180_v38  ;;  %v3806_v10 = vsel %vm3799_vm8, %v16432_v19, %v3805_v60  ;;  %v3754_v7 = vsel %vm253_vm1, %v3746_v24, %v3747_v5  ;;  %v4172_v22 = vrot.slane %v13515_v41, 4 }
 0x349   : > { %v3753_v54 = vsel %vm3752_vm14, %v16437_v52, %v3751_v47  ;;  %4529 = vmatprep.subr.bf16.mxu0 %v10171_v34  ;;  %4568 = vmatprep.subr.bf16.mxu1 %v10177_v62  ;;  %v3802_v45 = vsel %vm3799_vm8, %v13209_v40, %v3801_v0  ;;  %v10170_v57 = vcombine.low %v3800_v17, %v3804_v46  ;;  %v4171_v21 = vrot.slane %v13578_v48, 4  ;;  %v5026_v47 = vld [vmem:[%s11005_s29 + $0x30] sm:$0xf]  ;;  %v5070_v0 = vld [vmem:[%s11005_s29 + $0x14] sm:$0xf] }
 0x34a   : > { %v10176_v18 = vcombine.low %v3849_v16, %v3853_v50  ;;  %5037 = vrot.lane.b32.xlu1 %v5023_v32, %s10852_s21  ;;  %5035 = vrot.lane.b32.xlu0 %v13194_v11, %s10852_s21  ;;  %v10167_v19 = vcombine.high %v3753_v54, %v3757_v58  ;;  %v10173_v53 = vcombine.high %v3802_v45, %v3806_v10  ;;  %v13627_v13 = vpop.permute.xlu0 %4205  ;;  %v13629_v40 = vpop.permute.xlu1 %4619  ;;  %v4215_v61 = vrot.slane %v13548_v8, 4 }
 0x34b   : > { %v3759_v24 = vsel %vm3752_vm14, %v16441_v6, %v3758_v20  ;;  %v3755_v59 = vsel %vm3752_vm14, %v16426_v15, %v3754_v7  ;;  %16445 = vst [vmem:[#allocation27_spill] sm:$0xff] %v13629_v40  ;;  %v4216_v27 = vrot.slane %v13627_v13, 4  ;;  %v10166_v29 = vcombine.low %v3753_v54, %v3757_v58  ;;  %v16449_v7 = vld [vmem:[#allocation31_spill] sm:$0xff] }
 0x34c   : > { %4530 = vmatpush1.bf16.msra.mxu0 %v10170_v57  ;;  %4569 = vmatpush1.bf16.msra.mxu1 %v10176_v18  ;;  %v4125_v15 = vrot.slane %v13423_v28, 4  ;;  %v10172_v31 = vcombine.low %v3802_v45, %v3806_v10  ;;  %v10169_v33 = vcombine.high %v3755_v59, %v3759_v24  ;;  %v4124_v51 = vrot.slane %v13475_v42, 4 }
 0x34d   : > { %4531 = vmatprep.subr.bf16.mxu0 %v10167_v19  ;;  %4570 = vmatprep.subr.bf16.mxu1 %v10173_v53  ;;  %v4168_v30 = vrot.slane %v13451_v4, 4  ;;  %v4169_v52 = vrot.slane %v13544_v44, 4  ;;  %v4219_v2 = vrot.slane %v13611_v23, 4  ;;  %vm4175_vm8 = vcmask 121856  }
 0x34e   : > { %5041 = vrot.lane.b32.xlu1 %v13204_v49, %s10852_s21  ;;  %5039 = vrot.lane.b32.xlu0 %v13207_v37, %s10852_s21  ;;  %v4173_v43 = vrot.slane %v13607_v1, 4  ;;  %vm4222_vm14 = vcmask 113664   ;;  %v4210_v14 = vpop.permute.xlu0 %4209  ;;  %v13646_v46 = vpop.permute.xlu1 %4623  ;;  %v4179_v50 = vsel %vm253_vm1, %v4171_v21, %v4172_v22  ;;  %v4217_v25 = vrot.slane %v13582_v9, 4 }
 0x34f   : > { %16446 = vst [vmem:[#allocation28_spill] sm:$0xff] %v13646_v46  ;;  %v4221_v5 = vsel %vm253_vm1, %v4215_v61, %v4216_v27  ;;  %v4218_v6 = vrot.slane %v4210_v14, 4  ;;  %v4121_v55 = vrot.slane %v16447_v63, 4  ;;  %v4122_v17 = vrot.slane %v13445_v39, 4 }
 0x350   : > { %4532 = vmatpush1.bf16.msra.mxu0 %v10166_v29  ;;  %4571 = vmatpush1.bf16.msra.mxu1 %v10172_v31  ;;  %v4170_v12 = vrot.slane %v13479_v56, 4  ;;  %v10168_v60 = vcombine.low %v3755_v59, %v3759_v24  ;;  %v4132_v9 = vsel %vm253_vm1, %v4124_v51, %v4125_v15  ;;  %v4126_v16 = vrot.slane %v13511_v35, 4  ;;  %v5073_v31 = vld [vmem:[%s11005_s29 + $0x30] sm:$0xf] }
 0x351   : > { %4572 = vmatprep.subr.bf16.mxu1 %v10169_v33  ;;  %v4174_v3 = vsel %vm253_vm1, %v4168_v30, %v4169_v52  ;;  %v4226_v38 = vsel %vm253_vm1, %v4218_v6, %v4219_v2  ;;  %v4180_v56 = vsel %vm4175_vm8, %v13578_v48, %v4179_v50  ;;  %v4181_v34 = vsel %vm253_vm1, %v4172_v22, %v4173_v43  ;;  %v16454_v43 = vld [vmem:[#allocation23_spill] sm:$0xff]  ;;  %v5486_v50 = vld [vmem:[%s11005_s29 + $0x14] sm:$0xf] }
 0x352   : > { %5080 = vrot.lane.b32.xlu1 %v13176_v36, %s10853_s23  ;;  %5043 = vrot.lane.b32.xlu0 %v5026_v47, %s10852_s21  ;;  %v4223_v62 = vsel %vm4222_vm14, %v13548_v8, %v4221_v5  ;;  %v4227_v32 = vsel %vm4222_vm14, %v4210_v14, %v4226_v38  ;;  %v4214_v58 = vpop.permute.xlu0 %4213  ;;  %v13670_v26 = vpop.permute.xlu1 %4627  ;;  %v4224_v35 = vsel %vm253_vm1, %v4216_v27, %v4217_v25  ;;  %v4123_v54 = vrot.slane %v16449_v7, 4 }
 0x353   : > { %16448 = vst [vmem:[#allocation17_spill] sm:$0xff] %v13670_v26  ;;  %v10206_v20 = vcombine.low %v4223_v62, %v4227_v32  ;;  %v4220_v1 = vrot.slane %v4214_v58, 4  ;;  %v10207_v10 = vcombine.high %v4223_v62, %v4227_v32  ;;  %vm4128_vm9 = vcmask 130048   ;;  %v13779_v32 = vld [vmem:[%s11005_s29 + $0xc] sm:$0xff] }
 0x354   : > { %4573 = vmatpush1.bf16.msra.mxu1 %v10168_v60  ;;  %v4176_v48 = vsel %vm4175_vm8, %v13451_v4, %v4174_v3  ;;  %v4127_v8 = vsel %vm253_vm1, %v4121_v55, %v4122_v17  ;;  %v4177_v45 = vsel %vm253_vm1, %v4169_v52, %v4170_v12  ;;  %v4133_v19 = vsel %vm4128_vm9, %v13475_v42, %v4132_v9  ;;  %v5532_v9 = vld [vmem:[%s11005_s29 + $0x14] sm:$0xf]  ;;  %v13789_v58 = vld [vmem:[%s11005_s29 + $0x28] sm:$0xff] }
 0x355   : > { %v4228_v57 = vsel %vm253_vm1, %v4219_v2, %v4220_v1  ;;  %4543 = vmatprep.subr.bf16.mxu0 %v10207_v10  ;;  %v10203_v18 = vcombine.high %v4176_v48, %v4180_v56  ;;  %v4225_v53 = vsel %vm4222_vm14, %v13627_v13, %v4224_v35  ;;  %v4182_v59 = vsel %vm4175_vm8, %v13515_v41, %v4181_v34  ;;  %v13792_v35 = vld [vmem:[%s11005_s29 + $0x20] sm:$0xff]  ;;  %v5581_v10 = vld [vmem:[%s11005_s29 + $0x30] sm:$0xf] }
 0x356   : > { %5084 = vrot.lane.b32.xlu1 %v5070_v0, %s10853_s23  ;;  %5082 = vrot.lane.b32.xlu0 %v13194_v11, %s10853_s23  ;;  %v13686_v4 = vpop.permute.xlu0 %4621  ;;  %v4229_v24 = vsel %vm4222_vm14, %v13611_v23, %v4228_v57  ;;  %v13692_v22 = vpop.permute.xlu1 %4665  ;;  %v4134_v21 = vsel %vm253_vm1, %v4125_v15, %v4126_v16  ;;  %v4129_v13 = vsel %vm4128_vm9, %v16447_v63, %v4127_v8  ;;  %v13732_v63 = vld [vmem:[#allocation6 + $0x28] sm:$0xff] }
 0x357   : > { %4544 = vmatpush2.bf16.msra.mxu0 %v10206_v20  ;;  %16450 = vst [vmem:[#allocation13_spill] sm:$0xff] %v13686_v4  ;;  %16451 = vst [vmem:[#allocation24_spill] sm:$0xff] %v13692_v22  ;;  %v10208_v42 = vcombine.low %v4225_v53, %v4229_v24  ;;  %v10209_v61 = vcombine.high %v4225_v53, %v4229_v24  ;;  %v4178_v27 = vsel %vm4175_vm8, %v13544_v44, %v4177_v45 }
 0x358   : > { %4545 = vmatprep.subr.bf16.mxu0 %v10203_v18  ;;  %v10202_v23 = vcombine.low %v4176_v48, %v4180_v56  ;;  %v4130_v41 = vsel %vm253_vm1, %v4122_v17, %v4123_v54  ;;  %v10199_v29 = vcombine.high %v4129_v13, %v4133_v19  ;;  %v10205_v15 = vcombine.high %v4178_v27, %v4182_v59  ;;  %v5489_v17 = vld [vmem:[%s11005_s29 + $0x30] sm:$0xf]  ;;  %v5624_v48 = vld [vmem:[%s11005_s29 + $0x14] sm:$0xf] }
 0x359   : > { %4584 = vmatprep.subr.bf16.mxu1 %v10209_v61  ;;  %v4135_v44 = vsel %vm4128_vm9, %v13423_v28, %v4134_v21  ;;  %v4131_v30 = vsel %vm4128_vm9, %v13445_v39, %v4130_v41  ;;  %v10198_v52 = vcombine.low %v4129_v13, %v4133_v19  ;;  %v10204_v2 = vcombine.low %v4178_v27, %v4182_v59  ;;  %v5535_v56 = vld [vmem:[%s11005_s29 + $0x30] sm:$0xf]  ;;  %v5670_v59 = vld [vmem:[%s11005_s29 + $0x14] sm:$0xf] }
 0x35a   : > { %5088 = vrot.lane.b32.xlu1 %v13204_v49, %s10853_s23  ;;  %5086 = vrot.lane.b32.xlu0 %v13207_v37, %s10853_s23  ;;  %v13707_v33 = vpop.permute.xlu0 %4625  ;;  %v13711_v51 = vpop.permute.xlu1 %4669  ;;  %v10201_v47 = vcombine.high %v4131_v30, %v4135_v44  ;;  %v10164_v14 = vcombine.low %v16454_v43, %v16454_v43  ;;  %v10200_v39 = vcombine.low %v4131_v30, %v4135_v44  ;;  %v5627_v19 = vld [vmem:[%s11005_s29 + $0x30] sm:$0xf]  ;;  %v16465_v30 = vld [vmem:[#allocation18_spill] sm:$0xff] }
 0x35b   : > { %4546 = vmatpush2.bf16.msra.mxu0 %v10202_v23  ;;  %4585 = vmatpush2.bf16.msra.mxu1 %v10208_v42  ;;  %16452 = vst [vmem:[#allocation16_spill] sm:$0xff] %v13707_v33  ;;  %16453 = vst [vmem:[#allocation25_spill] sm:$0xff] %v13711_v51  ;;  %v10213_v55 = vcombine.high %v13732_v63, %v13732_v63  ;;  %v5673_v27 = vld [vmem:[%s11005_s29 + $0x30] sm:$0xf] }
 0x35c   : > { %4547 = vmatprep.subr.bf16.mxu0 %v10199_v29  ;;  %4586 = vmatprep.subr.bf16.mxu1 %v10205_v15  ;;  %16458 = vst [vmem:[#allocation12_spill] sm:$0xff] %v13732_v63  ;;  %v5716_v29 = vld [vmem:[%s11005_s29 + $0x14] sm:$0xf] }
 0x35e   : > { %5496 = vrot.lane.b32.xlu1 %v13176_v36, %s10810_s20  ;;  %5090 = vrot.lane.b32.xlu0 %v5073_v31, %s10853_s23  ;;  %v13721_v28 = vpop.permute.xlu0 %4629  ;;  %v13723_v25 = vpop.permute.xlu1 %4673 }
 0x35f   : > { %4548 = vmatpush2.bf16.msra.mxu0 %v10198_v52  ;;  %4587 = vmatpush2.bf16.msra.mxu1 %v10204_v2  ;;  %16455 = vst [vmem:[#allocation19_spill] sm:$0xff] %v13721_v28  ;;  %16456 = vst [vmem:[#allocation22_spill] sm:$0xff] %v13723_v25 }
 0x360   : > { %4588 = vmatprep.subr.bf16.mxu1 %v10201_v47 }
 0x362   : > { %5500 = vrot.lane.b32.xlu1 %v5486_v50, %s10810_s20  ;;  %5498 = vrot.lane.b32.xlu0 %v13194_v11, %s10810_s20  ;;  %v13728_v5 = vpop.permute.xlu0 %4667  ;;  %v13730_v6 = vpop.permute.xlu1 %4711 }
 0x363   : > { %4550 = vmatmul.mubr.bf16.vlgmr.msra.gmra.mxu0 %v10164_v14  ;;  %4589 = vmatpush2.bf16.msra.mxu1 %v10200_v39  ;;  %16457 = vst [vmem:[#allocation29_spill] sm:$0xff] %v13730_v6 }
 0x364   : > { %10258 = vmatprep.mubr.msk.bf16.mxu0 %vm969_vm0, %v10213_v55 }
 0x366   : > { %5504 = vrot.lane.b32.xlu1 %v13204_v49, %s10810_s20  ;;  %5502 = vrot.lane.b32.xlu0 %v13207_v37, %s10810_s20  ;;  %v13741_v12 = vpop.permute.xlu0 %4671  ;;  %v13743_v60 = vpop.permute.xlu1 %4715 }
 0x367   : > { %4591 = vmatmul.mubr.bf16.vlgmr.msra.gmra.mxu1 %v10164_v14  ;;  %16459 = vst [vmem:[#allocation20_spill] sm:$0xff] %v13743_v60  ;;  %v16467_v14 = vld [vmem:[#allocation30_spill] sm:$0xff] }
 0x368   : > { %10259 = vmatprep.mubr.msk.bf16.mxu1 %vm969_vm0, %v10213_v55  ;;  %v5719_v55 = vld [vmem:[%s11005_s29 + $0x30] sm:$0xf] }
 0x36a   : > { %5542 = vrot.lane.b32.xlu1 %v13176_v36, %s10811_s17  ;;  %5506 = vrot.lane.b32.xlu0 %v5489_v17, %s10810_s20  ;;  %v13751_v16 = vpop.permute.xlu0 %4675  ;;  %v13753_v3 = vpop.permute.xlu1 %4719  ;;  %v13767_v36 = vld [vmem:[%s11005_s29 + $0x4] sm:$0xff]  ;;  %s16463_s20 = smov 96  }
 0x36b   : > { %16460 = vst [vmem:[#allocation14_spill] sm:$0xff] %v13751_v16  ;;  %16461 = vst [vmem:[#allocation15_spill] sm:$0xff] %v13753_v3 }
 0x36e   : > { %5546 = vrot.lane.b32.xlu1 %v5532_v9, %s10811_s17  ;;  %5544 = vrot.lane.b32.xlu0 %v13194_v11, %s10811_s17  ;;  %v13758_v38 = vpop.permute.xlu0 %4713  ;;  %v13760_v0 = vpop.permute.xlu1 %4757  ;;  %v5578_v11 = vld [vmem:[%s11005_s29 + $0x14] sm:$0xf] }
 0x36f   : > { %v16469_v9 = vld [vmem:[#allocation21_spill] sm:$0xff] }
 0x372   : > { %5550 = vrot.lane.b32.xlu1 %v13204_v49, %s10811_s17  ;;  %5548 = vrot.lane.b32.xlu0 %v13207_v37, %s10811_s17  ;;  %v13770_v34 = vpop.permute.xlu0 %4717  ;;  %v13772_v62 = vpop.permute.xlu1 %4761 }
 0x376   : > { %5588 = vrot.lane.b32.xlu1 %v13767_v36, %s10812_s18  ;;  %5552 = vrot.lane.b32.xlu0 %v5535_v56, %s10811_s17  ;;  %v13781_v49 = vpop.permute.xlu0 %4721  ;;  %v13783_v37 = vpop.permute.xlu1 %4765  ;;  %s16464_s17 = smov 95  }
 0x377   : > { %16462 = vst [vmem:[#allocation31_spill] sm:$0xff] %v13781_v49 }
 0x37a   : > { %5592 = vrot.lane.b32.xlu1 %v5578_v11, %s10812_s18  ;;  %5590 = vrot.lane.b32.xlu0 %v13779_v32, %s10812_s18  ;;  %v13794_v20 = vpop.permute.xlu0 %4759  ;;  %v13796_v1 = vpop.permute.xlu1 %4803 }
 0x37e   : > { %5596 = vrot.lane.b32.xlu1 %v13789_v58, %s10812_s18  ;;  %5594 = vrot.lane.b32.xlu0 %v13792_v35, %s10812_s18  ;;  %v13803_v7 = vpop.permute.xlu0 %4763  ;;  %v13805_v54 = vpop.permute.xlu1 %4807 }
 0x382   : > { %5634 = vrot.lane.b32.xlu1 %v13767_v36, %s10813_s11  ;;  %5598 = vrot.lane.b32.xlu0 %v5581_v10, %s10812_s18  ;;  %v13811_v8 = vpop.permute.xlu0 %4767  ;;  %v13813_v45 = vpop.permute.xlu1 %4811  ;;  %s16473_s18 = smov 94  }
 0x386   : > { %5638 = vrot.lane.b32.xlu1 %v5624_v48, %s10813_s11  ;;  %5636 = vrot.lane.b32.xlu0 %v13779_v32, %s10813_s11  ;;  %v13818_v57 = vpop.permute.xlu0 %4805  ;;  %v13820_v18 = vpop.permute.xlu1 %4849 }
 0x38a   : > { %5642 = vrot.lane.b32.xlu1 %v13789_v58, %s10813_s11  ;;  %5640 = vrot.lane.b32.xlu0 %v13792_v35, %s10813_s11  ;;  %v13827_v53 = vpop.permute.xlu0 %4809  ;;  %v13829_v24 = vpop.permute.xlu1 %4853 }
 0x38b   : > { %v4818_v22 = vrot.slane %v13827_v53, 4 }
 0x38e   : > { %5680 = vrot.lane.b32.xlu1 %v13767_v36, %s16463_s20  ;;  %5644 = vrot.lane.b32.xlu0 %v5627_v19, %s10813_s11  ;;  %v13835_v21 = vpop.permute.xlu0 %4813  ;;  %v13837_v42 = vpop.permute.xlu1 %4857  ;;  %s16476_s11 = smov 93  }
 0x392   : > { %5684 = vrot.lane.b32.xlu1 %v5670_v59, %s16463_s20  ;;  %5682 = vrot.lane.b32.xlu0 %v13779_v32, %s16463_s20  ;;  %v13842_v61 = vpop.permute.xlu0 %4851  ;;  %v13844_v13 = vpop.permute.xlu1 %4895  ;;  %v16471_v59 = vld [vmem:[#allocation26_spill] sm:$0xff] }
 0x393   : > { %v4862_v63 = vrot.slane %v13842_v61, 4 }
 0x396   : > { %5688 = vrot.lane.b32.xlu1 %v13789_v58, %s16463_s20  ;;  %5686 = vrot.lane.b32.xlu0 %v13792_v35, %s16463_s20  ;;  %v13851_v23 = vpop.permute.xlu0 %4855  ;;  %v13853_v41 = vpop.permute.xlu1 %4899 }
 0x39a   : > { %5726 = vrot.lane.b32.xlu1 %v13767_v36, %s16464_s17  ;;  %5690 = vrot.lane.b32.xlu0 %v5673_v27, %s16463_s20  ;;  %v13859_v15 = vpop.permute.xlu0 %4859  ;;  %v13861_v31 = vpop.permute.xlu1 %4903  ;;  %s16484_s20 = smov 92  }
 0x39d   : > { %v3665_v44 = vpop.f32.mrf.mxu0 }
 0x39e   : > { %5730 = vrot.lane.b32.xlu1 %v5716_v29, %s16464_s17  ;;  %5728 = vrot.lane.b32.xlu0 %v13779_v32, %s16464_s17  ;;  %v13867_v52 = vadd.f32 %v3665_v44, %v16465_v30  ;;  %v13869_v2 = vpop.permute.xlu0 %4897  ;;  %v13871_v47 = vpop.permute.xlu1 %4941  ;;  %v5762_v29 = vld [vmem:[%s11005_s29 + $0x14] sm:$0xf] }
 0x39f   : > { %v3667_v43 = vpop.f32.mrf.mxu0 }
 0x3a0   : > { %16466 = vst [vmem:[#allocation23_spill] sm:$0xff] %v13867_v52  ;;  %v13874_v50 = vadd.f32 %v3667_v43, %v16467_v14  ;;  %v5765_v52 = vld [vmem:[%s11005_s29 + $0x30] sm:$0xf] }
 0x3a1   : > { %v3706_v39 = vpop.f32.mrf.mxu1  ;;  %v3669_v17 = vpop.f32.mrf.mxu0 }
 0x3a2   : > { %16468 = vst [vmem:[#allocation18_spill] sm:$0xff] %v13874_v50  ;;  %5734 = vrot.lane.b32.xlu1 %v13789_v58, %s16464_s17  ;;  %5732 = vrot.lane.b32.xlu0 %v13792_v35, %s16464_s17  ;;  %v13882_v56 = vadd.f32 %v3706_v39, %v16469_v9  ;;  %v4902_v11 = vpop.permute.xlu0 %4901  ;;  %v13884_v10 = vpop.permute.xlu1 %4945  ;;  %v4953_v39 = vrot.slane %v13871_v47, 4  ;;  %v4908_v50 = vrot.slane %v13869_v2, 4 }
 0x3a3   : > { %v3708_v48 = vpop.f32.mrf.mxu1  ;;  %v3670_v19 = vpop.f32.mrf.mxu0  ;;  %v4955_v51 = vrot.slane %v13884_v10, 4  ;;  %v4866_v10 = vrot.slane %v13859_v15, 4 }
 0x3a4   : > { %16470 = vst [vmem:[#allocation30_spill] sm:$0xff] %v13882_v56  ;;  %v13887_v27 = vadd.f32 %v3708_v48, %v16471_v59  ;;  %v4865_v19 = vrot.slane %v13837_v42, 4  ;;  %v4864_v59 = vrot.slane %v13851_v23, 4  ;;  %v4907_v56 = vrot.slane %v13844_v13, 4 }
 0x3a5   : > { %v3710_v44 = vpop.f32.mrf.mxu1  ;;  %v4861_v48 = vrot.slane %v13820_v18, 4 }
 0x3a6   : > { %16472 = vst [vmem:[#allocation21_spill] sm:$0xff] %v13887_v27  ;;  %5772 = vrot.lane.b32.xlu1 %v13767_v36, %s16473_s18  ;;  %5736 = vrot.lane.b32.xlu0 %v5719_v55, %s16464_s17  ;;  %v4906_v30 = vpop.permute.xlu0 %4905  ;;  %v13893_v43 = vpop.permute.xlu1 %4949  ;;  %v4910_v27 = vrot.slane %v4902_v11, 4  ;;  %v4815_v55 = vrot.slane %v13796_v1, 4  ;;  %s10854_s17 = smov 91  }
 0x3a7   : > { %v3711_v14 = vpop.f32.mrf.mxu1  ;;  %v4957_v9 = vrot.slane %v13893_v43, 4  ;;  %v4912_v26 = vrot.slane %v4906_v30, 4  ;;  %v4913_v30 = vsel %vm253_vm1, %v4907_v56, %v4908_v50 }
 0x3a8   : > { %v4911_v14 = vrot.slane %v13861_v31, 4 }
 0x3aa   : > { %5776 = vrot.lane.b32.xlu1 %v5762_v29, %s16473_s18  ;;  %5774 = vrot.lane.b32.xlu0 %v13779_v32, %s16473_s18  ;;  %v4944_v44 = vpop.permute.xlu0 %4943  ;;  %v13905_v29 = vpop.permute.xlu1 %4987  ;;  %v4917_v40 = vsel %vm253_vm1, %v4910_v27, %v4911_v14  ;;  %v4871_v27 = vsel %vm253_vm1, %v4864_v59, %v4865_v19  ;;  %v4919_v60 = vsel %vm253_vm1, %v4911_v14, %v4912_v26  ;;  %v16479_v14 = vrot.slane %v13794_v20, 4 }
 0x3ab   : > { %16474 = vst [vmem:[#allocation26_spill] sm:$0xff] %v13905_v29  ;;  %v4954_v17 = vrot.slane %v4944_v44, 4  ;;  %v4909_v29 = vrot.slane %v13853_v41, 4  ;;  %v4918_v33 = vsel %vm584_vm11, %v4902_v11, %v4917_v40  ;;  %v16478_v40 = vrot.slane %v13813_v45, 4 }
 0x3ac   : > { %v4920_v11 = vsel %vm584_vm11, %v13861_v31, %v4919_v60  ;;  %v4817_v60 = vrot.slane %v13805_v54, 4 }
 0x3ad   : > { %v4959_v16 = vsel %vm253_vm1, %v4953_v39, %v4954_v17  ;;  %v4961_v59 = vsel %vm253_vm1, %v4954_v17, %v4955_v51  ;;  %v4825_v26 = vsel %vm253_vm1, %v4818_v22, %v16478_v40  ;;  %v4915_v51 = vsel %vm253_vm1, %v4908_v50, %v4909_v29  ;;  %v5811_v29 = vld [vmem:[%s11005_s29 + $0x30] sm:$0xf] }
 0x3ae   : > { %5780 = vrot.lane.b32.xlu1 %v13789_v58, %s16473_s18  ;;  %5778 = vrot.lane.b32.xlu0 %v13792_v35, %s16473_s18  ;;  %v4948_v46 = vpop.permute.xlu0 %4947  ;;  %v13925_v28 = vpop.permute.xlu1 %4991  ;;  %v4960_v41 = vsel %vm631_vm10, %v13871_v47, %v4959_v16  ;;  %v4863_v16 = vrot.slane %v13829_v24, 4  ;;  %v4872_v22 = vsel %vm537_vm3, %v13851_v23, %v4871_v27  ;;  %v4962_v24 = vsel %vm631_vm10, %v4944_v44, %v4961_v59 }
 0x3af   : > { %16475 = vst [vmem:[#allocation32_spill] sm:$0xff] %v13925_v28  ;;  %v4956_v25 = vrot.slane %v4948_v46, 4  ;;  %v5808_v28 = vld [vmem:[%s11005_s29 + $0x14] sm:$0xf]  ;;  %v4873_v50 = vsel %vm253_vm1, %v4865_v19, %v4866_v10  ;;  %v4826_v27 = vsel %vm16163_vm2, %v13827_v53, %v4825_v26  ;;  %v4774_v59 = vrot.slane %v13811_v8, 4 }
 0x3b1   : > { %v4963_v39 = vsel %vm253_vm1, %v4956_v25, %v4957_v9  ;;  %v16477_v25 = vrot.slane %v13818_v57, 4 }
 0x3b2   : > { %5818 = vrot.lane.b32.xlu1 %v13767_v36, %s16476_s11  ;;  %5782 = vrot.lane.b32.xlu0 %v5765_v52, %s16473_s18  ;;  %v4964_v4 = vsel %vm631_vm10, %v4948_v46, %v4963_v39  ;;  %v4952_v49 = vpop.permute.xlu0 %4951  ;;  %v13947_v52 = vpop.permute.xlu1 %4995  ;;  %v4914_v46 = vsel %vm584_vm11, %v13844_v13, %v4913_v30  ;;  %v16481_v30 = vrot.slane %v13783_v37, 4  ;;  %v16482_v39 = vrot.slane %v13803_v7, 4  ;;  %s10855_s18 = smov 90  }
 0x3b3   : > { %v10242_v15 = vcombine.low %v4960_v41, %v4964_v4  ;;  %v4958_v3 = vrot.slane %v4952_v49, 4  ;;  %v10243_v56 = vcombine.high %v4960_v41, %v4964_v4  ;;  %v4821_v6 = vsel %vm253_vm1, %v4815_v55, %v16477_v25 }
 0x3b4   : > { %v4867_v4 = vsel %vm253_vm1, %v4861_v48, %v4862_v63  ;;  %v10239_v47 = vcombine.high %v4914_v46, %v4918_v33  ;;  %v4724_v48 = vrot.slane %v13758_v38, 4  ;;  %v10238_v44 = vcombine.low %v4914_v46, %v4918_v33 }
 0x3b5   : > { %v4965_v49 = vsel %vm253_vm1, %v4957_v9, %v4958_v3  ;;  %5394 = vmatprep.subr.bf16.mxu0 %v10243_v56  ;;  %v4820_v3 = vrot.slane %v13835_v21, 4  ;;  %v4868_v55 = vsel %vm537_vm3, %v13820_v18, %v4867_v4  ;;  %v4869_v21 = vsel %vm253_vm1, %v4862_v63, %v4863_v16  ;;  %v5854_v4 = vld [vmem:[%s11005_s29 + $0x14] sm:$0xf] }
 0x3b6   : > { %5822 = vrot.lane.b32.xlu1 %v5808_v28, %s16476_s11  ;;  %5820 = vrot.lane.b32.xlu0 %v13779_v32, %s16476_s11  ;;  %v13968_v13 = vpop.permute.xlu0 %4989  ;;  %v4966_v28 = vsel %vm631_vm10, %v13893_v43, %v4965_v49  ;;  %v4916_v43 = vsel %vm584_vm11, %v13869_v2, %v4915_v51  ;;  %v10235_v31 = vcombine.high %v4868_v55, %v4872_v22  ;;  %v4726_v18 = vrot.slane %v13770_v34, 4 }
 0x3b7   : > { %5395 = vmatpush1.bf16.msra.mxu0 %v10242_v15  ;;  %v13974_v17 = vpop.permute.xlu1 %5033  ;;  %v10244_v23 = vcombine.low %v4962_v24, %v4966_v28  ;;  %v10245_v9 = vcombine.high %v4962_v24, %v4966_v28  ;;  %v10241_v19 = vcombine.high %v4916_v43, %v4920_v11  ;;  %v16480_v33 = vrot.slane %v13760_v0, 4 }
 0x3b8   : > { %5396 = vmatprep.subr.bf16.mxu0 %v10239_v47  ;;  %v4874_v63 = vsel %vm537_vm3, %v13837_v42, %v4873_v50  ;;  %v4779_v41 = vsel %vm253_vm1, %v16482_v39, %v16481_v30  ;;  %v4822_v53 = vsel %vm16163_vm2, %v13796_v1, %v4821_v6  ;;  %v16483_v15 = vmov %v16478_v40 }
 0x3b9   : > { %5435 = vmatprep.subr.bf16.mxu1 %v10245_v9  ;;  %v4775_v2 = vsel %vm253_vm1, %v16480_v33, %v16479_v14  ;;  %v4827_v56 = vsel %vm253_vm1, %v16483_v15, %v4820_v3  ;;  %v4678_v42 = vrot.slane %v13728_v5, 4  ;;  %v4870_v25 = vsel %vm537_vm3, %v13842_v61, %v4869_v21  ;;  %v16486_v61 = vld [vmem:[#allocation29_spill] sm:$0xff]  ;;  %v16498_v15 = vld [vmem:[#allocation22_spill] sm:$0xff] }
 0x3ba   : > { %5826 = vrot.lane.b32.xlu1 %v13789_v58, %s16476_s11  ;;  %5824 = vrot.lane.b32.xlu0 %v13792_v35, %s16476_s11  ;;  %v13998_v54 = vpop.permute.xlu0 %4993  ;;  %v10234_v40 = vcombine.low %v4868_v55, %v4872_v22  ;;  %v10240_v26 = vcombine.low %v4916_v43, %v4920_v11  ;;  %v4771_v6 = vrot.slane %v13772_v62, 4  ;;  %v16485_v1 = vrot.slane %v13818_v57, 4  ;;  %v16488_v11 = vld [vmem:[#allocation15_spill] sm:$0xff] }
 0x3bb   : > { %5397 = vmatpush1.bf16.msra.mxu0 %v10238_v44  ;;  %5436 = vmatpush1.bf16.msra.mxu1 %v10244_v23  ;;  %v10231_v16 = vcombine.high %v4822_v53, %v4826_v27  ;;  %v10237_v46 = vcombine.high %v4870_v25, %v4874_v63  ;;  %v4680_v51 = vrot.slane %v13741_v12, 4  ;;  %v16487_v49 = vrot.slane %v16486_v61, 4  ;;  %v16490_v23 = vld [vmem:[#allocation31_spill] sm:$0xff]  ;;  %v16492_v44 = vld [vmem:[#allocation13_spill] sm:$0xff] }
 0x3bc   : > { %v14002_v10 = vpop.permute.xlu1 %5037  ;;  %5398 = vmatprep.subr.bf16.mxu0 %v10235_v31  ;;  %5437 = vmatprep.subr.bf16.mxu1 %v10241_v19  ;;  %v4823_v8 = vsel %vm253_vm1, %v16485_v1, %v4817_v60  ;;  %v4780_v22 = vsel %vm16157_vm4, %v13803_v7, %v4779_v41  ;;  %v4828_v24 = vsel %vm16163_vm2, %v13813_v45, %v4827_v56  ;;  %v16489_v3 = vrot.slane %v16488_v11, 4  ;;  %v16493_v19 = vld [vmem:[#allocation20_spill] sm:$0xff] }
 0x3bd   : > { %v4729_v47 = vsel %vm253_vm1, %v16487_v49, %v4724_v48  ;;  %v4728_v9 = vrot.slane %v16490_v23, 4  ;;  %v4776_v55 = vsel %vm16157_vm4, %v13760_v0, %v4775_v2  ;;  %v16491_v7 = vmov %v16481_v30  ;;  %v16495_v2 = vld [vmem:[#allocation16_spill] sm:$0xff] }
 0x3be   : > { %5864 = vrot.lane.b32.xlu1 %v13767_v36, %s16484_s20  ;;  %5828 = vrot.lane.b32.xlu0 %v5811_v29, %s16476_s11  ;;  %v14034_v62 = vpop.permute.xlu0 %4997  ;;  %v4733_v50 = vsel %vm253_vm1, %v4726_v18, %v16489_v3  ;;  %v4781_v43 = vsel %vm253_vm1, %v16491_v7, %v4774_v59  ;;  %v4632_v60 = vrot.slane %v16492_v44, 4  ;;  %v4824_v45 = vsel %vm16163_vm2, %v13818_v57, %v4823_v8  ;;  %v16496_v57 = vld [vmem:[#allocation24_spill] sm:$0xff]  ;;  %s16522_s11 = smov 74  }
 0x3bf   : > { %5399 = vmatpush1.bf16.msra.mxu0 %v10234_v40  ;;  %5438 = vmatpush1.bf16.msra.mxu1 %v10240_v26  ;;  %v10230_v21 = vcombine.low %v4822_v53, %v4826_v27  ;;  %v10236_v31 = vcombine.low %v4870_v25, %v4874_v63  ;;  %v4725_v0 = vrot.slane %v16493_v19, 4  ;;  %v16494_v29 = vmov %v16479_v14  ;;  %v16500_v40 = vld [vmem:[#allocation14_spill] sm:$0xff]  ;;  %v16506_v7 = vld [vmem:[#allocation28_spill] sm:$0xff] }
 0x3c0   : > { %v14038_v28 = vpop.permute.xlu1 %5041  ;;  %5400 = vmatprep.subr.bf16.mxu0 %v10231_v16  ;;  %5439 = vmatprep.subr.bf16.mxu1 %v10237_v46  ;;  %v4777_v18 = vsel %vm253_vm1, %v16494_v29, %v4771_v6  ;;  %v10227_v14 = vcombine.high %v4776_v55, %v4780_v22  ;;  %v10233_v33 = vcombine.high %v4824_v45, %v4828_v24  ;;  %v4634_v30 = vrot.slane %v16495_v2, 4  ;;  %v16502_v46 = vld [vmem:[#allocation25_spill] sm:$0xff] }
 0x3c1   : > { %v16497_v27 = vrot.slane %v16496_v57, 4  ;;  %v4734_v39 = vsel %vm16144_vm5, %v13770_v34, %v4733_v50  ;;  %v4782_v59 = vsel %vm16157_vm4, %v13783_v37, %v4781_v43  ;;  %v16499_v56 = vrot.slane %v16498_v15, 4 }
 0x3c2   : > { %5868 = vrot.lane.b32.xlu1 %v5854_v4, %s16484_s20  ;;  %5866 = vrot.lane.b32.xlu0 %v13779_v32, %s16484_s20  ;;  %v14067_v41 = vpop.permute.xlu0 %5035  ;;  %v4682_v26 = vrot.slane %v16500_v40, 4  ;;  %v4730_v6 = vsel %vm16144_vm5, %v16486_v61, %v4729_v47  ;;  %v16501_v34 = vmov %v16489_v3  ;;  %v4778_v37 = vsel %vm16157_vm4, %v13794_v20, %v4777_v18  ;;  %v5857_v47 = vld [vmem:[%s11005_s29 + $0x30] sm:$0xf]  ;;  %v16503_v20 = vld [vmem:[#allocation27_spill] sm:$0xff] }
 0x3c3   : > { %v4683_v63 = vsel %vm253_vm1, %v16497_v27, %v4678_v42  ;;  %5401 = vmatpush1.bf16.msra.mxu0 %v10230_v21  ;;  %5440 = vmatpush1.bf16.msra.mxu1 %v10236_v31  ;;  %v4687_v25 = vsel %vm253_vm1, %v4680_v51, %v16499_v56  ;;  %v4735_v1 = vsel %vm253_vm1, %v16501_v34, %v4728_v9  ;;  %v4679_v4 = vrot.slane %v16502_v46, 4  ;;  %v16505_v3 = vld [vmem:[#allocation19_spill] sm:$0xff] }
 0x3c4   : > { %v14071_v53 = vpop.permute.xlu1 %5080  ;;  %5402 = vmatprep.subr.bf16.mxu0 %v10227_v14  ;;  %5441 = vmatprep.subr.bf16.mxu1 %v10233_v33  ;;  %v10226_v8 = vcombine.low %v4776_v55, %v4780_v22  ;;  %v10232_v16 = vcombine.low %v4824_v45, %v4828_v24  ;;  %v4731_v51 = vsel %vm253_vm1, %v4724_v48, %v4725_v0  ;;  %v16504_v22 = vrot.slane %v16503_v20, 4  ;;  %v16507_v45 = vld [vmem:[#allocation17_spill] sm:$0xff] }
 0x3c5   : > { %v10223_v61 = vcombine.high %v4730_v6, %v4734_v39  ;;  %v10229_v49 = vcombine.high %v4778_v37, %v4782_v59  ;;  %v4636_v50 = vrot.slane %v16505_v3, 4  ;;  %v4688_v23 = vsel %vm349_vm6, %v13741_v12, %v4687_v25 }
 0x3c6   : > { %5872 = vrot.lane.b32.xlu1 %v13789_v58, %s16484_s20  ;;  %5870 = vrot.lane.b32.xlu0 %v13792_v35, %s16484_s20  ;;  %v4637_v24 = vsel %vm253_vm1, %v16504_v22, %v4632_v60  ;;  %v14101_v9 = vpop.permute.xlu0 %5039  ;;  %v4736_v48 = vsel %vm16144_vm5, %v16488_v11, %v4735_v1  ;;  %v4633_v43 = vrot.slane %v16506_v7, 4  ;;  %v16508_v21 = vrot.slane %v16507_v45, 4 }
 0x3c7   : > { %5403 = vmatpush1.bf16.msra.mxu0 %v10226_v8  ;;  %5442 = vmatpush1.bf16.msra.mxu1 %v10232_v16  ;;  %v4684_v19 = vsel %vm349_vm6, %v16496_v57, %v4683_v63  ;;  %v16509_v12 = vmov %v16499_v56  ;;  %v4732_v11 = vsel %vm16144_vm5, %v13758_v38, %v4731_v51  ;;  %v10222_v29 = vcombine.low %v4730_v6, %v4734_v39  ;;  %v5900_v57 = vld [vmem:[%s11005_s29 + $0x14] sm:$0xf] }
 0x3c8   : > { %v14105_v55 = vpop.permute.xlu1 %5084  ;;  %v4641_v31 = vsel %vm253_vm1, %v4634_v30, %v16508_v21  ;;  %v4689_v0 = vsel %vm253_vm1, %v16509_v12, %v4682_v26  ;;  %5404 = vmatprep.subr.bf16.mxu0 %v10223_v61  ;;  %5443 = vmatprep.subr.bf16.mxu1 %v10229_v49  ;;  %v10228_v18 = vcombine.low %v4778_v37, %v4782_v59  ;;  %v5049_v37 = vrot.slane %v14038_v28, 4 }
 0x3c9   : > { %v4685_v14 = vsel %vm253_vm1, %v4678_v42, %v4679_v4  ;;  %v10219_v33 = vcombine.high %v4684_v19, %v4688_v23  ;;  %v10225_v30 = vcombine.high %v4732_v11, %v4736_v48  ;;  %v4642_v27 = vsel %vm302_vm7, %v16495_v2, %v4641_v31 }
 0x3ca   : > { %5910 = vrot.lane.b32.xlu1 %v13767_v36, %s10854_s17  ;;  %5874 = vrot.lane.b32.xlu0 %v5857_v47, %s16484_s20  ;;  %v16510_v38 = vmov %v16508_v21  ;;  %v14130_v39 = vpop.permute.xlu0 %5043  ;;  %v4690_v59 = vsel %vm349_vm6, %v16498_v15, %v4689_v0  ;;  %v4639_v42 = vsel %vm253_vm1, %v4632_v60, %v4633_v43  ;;  %v4638_v2 = vsel %vm302_vm7, %v16503_v20, %v4637_v24  ;;  %v5903_v24 = vld [vmem:[%s11005_s29 + $0x30] sm:$0xf]  ;;  %v16513_v21 = vld [vmem:[#allocation26_spill] sm:$0xff]  ;;  %s16529_s20 = smov 73  }
 0x3cb   : > { %v4643_v63 = vsel %vm253_vm1, %v16510_v38, %v4636_v50  ;;  %5405 = vmatpush1.bf16.msra.mxu0 %v10222_v29  ;;  %5444 = vmatpush1.bf16.msra.mxu1 %v10228_v18  ;;  %v4686_v25 = vsel %vm349_vm6, %v13728_v5, %v4685_v14  ;;  %v10218_v40 = vcombine.low %v4684_v19, %v4688_v23  ;;  %v5048_v8 = vrot.slane %v14101_v9, 4  ;;  %v5947_v14 = vld [vmem:[%s11005_s29 + $0x14] sm:$0xf] }
 0x3cc   : > { %v14134_v56 = vpop.permute.xlu1 %5088  ;;  %5406 = vmatprep.subr.bf16.mxu0 %v10219_v33  ;;  %5445 = vmatprep.subr.bf16.mxu1 %v10225_v30  ;;  %v10224_v26 = vcombine.low %v4732_v11, %v4736_v48  ;;  %v10215_v15 = vcombine.high %v4638_v2, %v4642_v27  ;;  %v10221_v6 = vcombine.high %v4686_v25, %v4690_v59  ;;  %v5092_v16 = vrot.slane %v14071_v53, 4 }
 0x3cd   : > { %v4644_v60 = vsel %vm302_vm7, %v16507_v45, %v4643_v63  ;;  %v4640_v34 = vsel %vm302_vm7, %v16492_v44, %v4639_v42  ;;  %v10214_v4 = vcombine.low %v4638_v2, %v4642_v27  ;;  %v5003_v44 = vrot.slane %v13947_v52, 4  ;;  %v16515_v42 = vld [vmem:[#allocation32_spill] sm:$0xff] }
 0x3ce   : > { %5914 = vrot.lane.b32.xlu1 %v5900_v57, %s10854_s17  ;;  %5912 = vrot.lane.b32.xlu0 %v13779_v32, %s10854_s17  ;;  %v14150_v1 = vpop.permute.xlu0 %5082  ;;  %v10220_v51 = vcombine.low %v4686_v25, %v4690_v59  ;;  %v10217_v61 = vcombine.high %v4640_v34, %v4644_v60  ;;  %v5002_v49 = vrot.slane %v13998_v54, 4  ;;  %v5045_v47 = vrot.slane %v13974_v17, 4 }
 0x3cf   : > { %5407 = vmatpush1.bf16.msra.mxu0 %v10218_v40  ;;  %5446 = vmatpush1.bf16.msra.mxu1 %v10224_v26  ;;  %v5093_v46 = vrot.slane %v14150_v1, 4  ;;  %v5046_v20 = vrot.slane %v14067_v41, 4  ;;  %v5096_v22 = vrot.slane %v14134_v56, 4  ;;  %vm5052_vm6 = vcmask 957440  }
 0x3d0   : > { %v14152_v5 = vpop.permute.xlu1 %5496  ;;  %5408 = vmatprep.subr.bf16.mxu0 %v10215_v15  ;;  %5447 = vmatprep.subr.bf16.mxu1 %v10221_v6  ;;  %v5050_v3 = vrot.slane %v14130_v39, 4  ;;  %vm16145_vm7 = vcmask 949248   ;;  %v5056_v48 = vsel %vm253_vm1, %v5048_v8, %v5049_v37  ;;  %v5094_v7 = vrot.slane %v14105_v55, 4 }
 0x3d1   : > { %16511 = vst [vmem:[#allocation29_spill] sm:$0xff] %v14152_v5  ;;  %v5098_v43 = vsel %vm253_vm1, %v5092_v16, %v5093_v46  ;;  %v4999_v31 = vrot.slane %v16513_v21, 4  ;;  %v5000_v19 = vrot.slane %v13968_v13, 4  ;;  %v5047_v12 = vrot.slane %v14002_v10, 4 }
 0x3d2   : > { %5918 = vrot.lane.b32.xlu1 %v13789_v58, %s10854_s17  ;;  %5916 = vrot.lane.b32.xlu0 %v13792_v35, %s10854_s17  ;;  %v5087_v50 = vpop.permute.xlu0 %5086  ;;  %v10216_v0 = vcombine.low %v4640_v34, %v4644_v60  ;;  %v5009_v11 = vsel %vm253_vm1, %v5002_v49, %v5003_v44  ;;  %v5004_v55 = vrot.slane %v14034_v62, 4  ;;  %v5051_v29 = vsel %vm253_vm1, %v5045_v47, %v5046_v20 }
 0x3d3   : > { %5409 = vmatpush1.bf16.msra.mxu0 %v10214_v4  ;;  %5448 = vmatpush1.bf16.msra.mxu1 %v10220_v51  ;;  %v5095_v45 = vrot.slane %v5087_v50, 4  ;;  %v5057_v33 = vsel %vm5052_vm6, %v14101_v9, %v5056_v48  ;;  %v5058_v10 = vsel %vm253_vm1, %v5049_v37, %v5050_v3  ;;  %v5100_v30 = vsel %vm16145_vm7, %v14071_v53, %v5098_v43  ;;  %v5950_v51 = vld [vmem:[%s11005_s29 + $0x30] sm:$0xf]  ;;  %v6363_v48 = vld [vmem:[%s11005_s29 + $0x14] sm:$0xf] }
 0x3d4   : > { %v14169_v23 = vpop.permute.xlu1 %5500  ;;  %5449 = vmatprep.subr.bf16.mxu1 %v10217_v61  ;;  %v5101_v62 = vsel %vm253_vm1, %v5093_v46, %v5094_v7  ;;  %v5001_v2 = vrot.slane %v16515_v42, 4  ;;  %v5053_v9 = vsel %vm5052_vm6, %v13974_v17, %v5051_v29  ;;  %v5005_v53 = vsel %vm253_vm1, %v4999_v31, %v5000_v19  ;;  %v16523_v3 = vld [vmem:[#allocation12_spill] sm:$0xff] }
 0x3d5   : > { %16512 = vst [vmem:[#allocation15_spill] sm:$0xff] %v14169_v23  ;;  %v5103_v18 = vsel %vm253_vm1, %v5095_v45, %v5096_v22  ;;  %v5054_v25 = vsel %vm253_vm1, %v5046_v20, %v5047_v12  ;;  %v10251_v26 = vcombine.high %v5053_v9, %v5057_v33  ;;  %vm16516_vm5 = vcmask 965632  }
 0x3d6   : > { %5957 = vrot.lane.b32.xlu1 %v13767_v36, %s10855_s18  ;;  %5920 = vrot.lane.b32.xlu0 %v5903_v24, %s10854_s17  ;;  %v5104_v57 = vsel %vm16145_vm7, %v5087_v50, %v5103_v18  ;;  %v5091_v27 = vpop.permute.xlu0 %5090  ;;  %v5010_v15 = vsel %vm16516_vm5, %v13998_v54, %v5009_v11  ;;  %v5102_v6 = vsel %vm16145_vm7, %v14150_v1, %v5101_v62  ;;  %v6409_v11 = vld [vmem:[%s11005_s29 + $0x14] sm:$0xf]  ;;  %s16532_s17 = smov 72   ;;  %vm16557_vm2 = vcmask 769024  }
 0x3d7   : > { %5450 = vmatpush1.bf16.msra.mxu1 %v10216_v0  ;;  %v10254_v63 = vcombine.low %v5100_v30, %v5104_v57  ;;  %v5097_v39 = vrot.slane %v5091_v27, 4  ;;  %v10255_v59 = vcombine.high %v5100_v30, %v5104_v57  ;;  %v5059_v34 = vsel %vm5052_vm6, %v14038_v28, %v5058_v10  ;;  %v6455_v57 = vld [vmem:[%s11005_s29 + $0x14] sm:$0xf] }
 0x3d8   : > { %v14191_v38 = vpop.permute.xlu1 %5504  ;;  %v5011_v8 = vsel %vm253_vm1, %v5003_v44, %v5004_v55  ;;  %v5006_v1 = vsel %vm16516_vm5, %v16513_v21, %v5005_v53  ;;  %v5055_v46 = vsel %vm5052_vm6, %v14067_v41, %v5054_v25  ;;  %v10250_v4 = vcombine.low %v5053_v9, %v5057_v33  ;;  %v14251_v21 = vld [vmem:[#allocation6 + $0x30] sm:$0xff]  ;;  %v6412_v33 = vld [vmem:[%s11005_s29 + $0x30] sm:$0xf]  ;;  %v6501_v9 = vld [vmem:[%s11005_s29 + $0x14] sm:$0xf] }
 0x3d9   : > { %16514 = vst [vmem:[#allocation31_spill] sm:$0xff] %v14191_v38  ;;  %v5105_v40 = vsel %vm253_vm1, %v5096_v22, %v5097_v39  ;;  %5420 = vmatprep.subr.bf16.mxu0 %v10255_v59  ;;  %v5007_v28 = vsel %vm253_vm1, %v5000_v19, %v5001_v2  ;;  %v10253_v44 = vcombine.high %v5055_v46, %v5059_v34  ;;  %16527 = vst [vmem:[#allocation27_spill] sm:$0xff] %v14251_v21  ;;  %v6366_v19 = vld [vmem:[%s11005_s29 + $0x30] sm:$0xf] }
 0x3da   : > { %5961 = vrot.lane.b32.xlu1 %v5947_v14, %s10855_s18  ;;  %5959 = vrot.lane.b32.xlu0 %v13779_v32, %s10855_s18  ;;  %v14207_v17 = vpop.permute.xlu0 %5498  ;;  %v5106_v60 = vsel %vm16145_vm7, %v14134_v56, %v5105_v40  ;;  %v10247_v56 = vcombine.high %v5006_v1, %v5010_v15  ;;  %v5012_v41 = vsel %vm16516_vm5, %v13947_v52, %v5011_v8  ;;  %vm16521_vm7 = vmmov %vm16516_vm5  ;;  %v6458_v59 = vld [vmem:[%s11005_s29 + $0x30] sm:$0xf]  ;;  %v14356_v8 = vld [vmem:[%s11005_s29 + $0x28] sm:$0xff]  ;;  %vm16550_vm5 = vcmask 760832  }
 0x3db   : > { %5421 = vmatpush2.bf16.msra.mxu0 %v10254_v63  ;;  %16517 = vst [vmem:[#allocation13_spill] sm:$0xff] %v14207_v17  ;;  %v10256_v16 = vcombine.low %v5102_v6, %v5106_v60  ;;  %v10257_v54 = vcombine.high %v5102_v6, %v5106_v60  ;;  %v5008_v47 = vsel %vm16521_vm7, %v13968_v13, %v5007_v28  ;;  %vm16549_vm7 = vcmask 769024   ;;  %vm16551_vm4 = vmmov %vm16550_vm5 }
 0x3dc   : > { %v14213_v37 = vpop.permute.xlu1 %5542  ;;  %5422 = vmatprep.subr.bf16.mxu0 %v10251_v26  ;;  %v10246_v20 = vcombine.low %v5006_v1, %v5010_v15  ;;  %v10252_v22 = vcombine.low %v5055_v46, %v5059_v34  ;;  %v10249_v24 = vcombine.high %v5008_v47, %v5012_v41  ;;  %v10212_v50 = vcombine.low %v16523_v3, %v16523_v3  ;;  %v6504_v15 = vld [vmem:[%s11005_s29 + $0x30] sm:$0xf] }
 0x3dd   : > { %16518 = vst [vmem:[#allocation20_spill] sm:$0xff] %v14213_v37  ;;  %5461 = vmatprep.subr.bf16.mxu1 %v10257_v54  ;;  %v10248_v13 = vcombine.low %v5008_v47, %v5012_v41  ;;  %v10261_v31 = vcombine.high %v14251_v21, %v14251_v21  ;;  %v14346_v34 = vld [vmem:[%s11005_s29 + $0xc] sm:$0xff] }
 0x3de   : > { %5965 = vrot.lane.b32.xlu1 %v13789_v58, %s10855_s18  ;;  %5963 = vrot.lane.b32.xlu0 %v13792_v35, %s10855_s18  ;;  %v14226_v61 = vpop.permute.xlu0 %5502  ;;  %v6550_v46 = vld [vmem:[%s11005_s29 + $0x30] sm:$0xf]  ;;  %v16537_v47 = vld [vmem:[#allocation23_spill] sm:$0xff] }
 0x3df   : > { %5423 = vmatpush2.bf16.msra.mxu0 %v10250_v4  ;;  %5462 = vmatpush2.bf16.msra.mxu1 %v10256_v16  ;;  %16519 = vst [vmem:[#allocation16_spill] sm:$0xff] %v14226_v61  ;;  %v14359_v16 = vld [vmem:[%s11005_s29 + $0x20] sm:$0xff] }
 0x3e0   : > { %v14230_v49 = vpop.permute.xlu1 %5546  ;;  %5424 = vmatprep.subr.bf16.mxu0 %v10247_v56  ;;  %5463 = vmatprep.subr.bf16.mxu1 %v10253_v44  ;;  %v6593_v56 = vld [vmem:[%s11005_s29 + $0x14] sm:$0xf] }
 0x3e1   : > { %16520 = vst [vmem:[#allocation24_spill] sm:$0xff] %v14230_v49 }
 0x3e2   : > { %6373 = vrot.lane.b32.xlu1 %v13767_v36, %s16522_s11  ;;  %5967 = vrot.lane.b32.xlu0 %v5950_v51, %s10855_s18  ;;  %v14240_v52 = vpop.permute.xlu0 %5506  ;;  %s16534_s18 = smov 71  }
 0x3e3   : > { %5425 = vmatpush2.bf16.msra.mxu0 %v10246_v20  ;;  %5464 = vmatpush2.bf16.msra.mxu1 %v10252_v22  ;;  %16524 = vst [vmem:[#allocation22_spill] sm:$0xff] %v14240_v52 }
 0x3e4   : > { %v14242_v7 = vpop.permute.xlu1 %5550  ;;  %5465 = vmatprep.subr.bf16.mxu1 %v10249_v24 }
 0x3e5   : > { %16525 = vst [vmem:[#allocation14_spill] sm:$0xff] %v14242_v7 }
 0x3e6   : > { %6377 = vrot.lane.b32.xlu1 %v6363_v48, %s16522_s11  ;;  %6375 = vrot.lane.b32.xlu0 %v13779_v32, %s16522_s11  ;;  %v14247_v43 = vpop.permute.xlu0 %5544 }
 0x3e7   : > { %5427 = vmatmul.mubr.bf16.vlgmr.msra.gmra.mxu0 %v10212_v50  ;;  %5466 = vmatpush2.bf16.msra.mxu1 %v10248_v13 }
 0x3e8   : > { %v14249_v45 = vpop.permute.xlu1 %5588  ;;  %10306 = vmatprep.mubr.msk.bf16.mxu0 %vm969_vm0, %v10261_v31 }
 0x3e9   : > { %16526 = vst [vmem:[#allocation25_spill] sm:$0xff] %v14249_v45 }
 0x3ea   : > { %6381 = vrot.lane.b32.xlu1 %v13789_v58, %s16522_s11  ;;  %6379 = vrot.lane.b32.xlu0 %v13792_v35, %s16522_s11  ;;  %v14260_v12 = vpop.permute.xlu0 %5548 }
 0x3eb   : > { %5468 = vmatmul.mubr.bf16.vlgmr.msra.gmra.mxu1 %v10212_v50  ;;  %v16539_v50 = vld [vmem:[#allocation18_spill] sm:$0xff] }
 0x3ec   : > { %v14262_v0 = vpop.permute.xlu1 %5592  ;;  %10307 = vmatprep.mubr.msk.bf16.mxu1 %vm969_vm0, %v10261_v31  ;;  %v6596_v31 = vld [vmem:[%s11005_s29 + $0x30] sm:$0xf] }
 0x3ed   : > { %16528 = vst [vmem:[#allocation19_spill] sm:$0xff] %v14262_v0 }
 0x3ee   : > { %6419 = vrot.lane.b32.xlu1 %v13767_v36, %s16529_s20  ;;  %6383 = vrot.lane.b32.xlu0 %v6366_v19, %s16522_s11  ;;  %v14270_v55 = vpop.permute.xlu0 %5552  ;;  %s16535_s11 = smov 70  }
 0x3ef   : > { %16530 = vst [vmem:[#allocation28_spill] sm:$0xff] %v14270_v55 }
 0x3f0   : > { %v14272_v29 = vpop.permute.xlu1 %5596 }
 0x3f1   : > { %16531 = vst [vmem:[#allocation17_spill] sm:$0xff] %v14272_v29 }
 0x3f2   : > { %6423 = vrot.lane.b32.xlu1 %v6409_v11, %s16529_s20  ;;  %6421 = vrot.lane.b32.xlu0 %v13779_v32, %s16529_s20  ;;  %v14277_v18 = vpop.permute.xlu0 %5590  ;;  %v16541_v11 = vld [vmem:[#allocation30_spill] sm:$0xff] }
 0x3f4   : > { %v14279_v14 = vpop.permute.xlu1 %5634 }
 0x3f6   : > { %6427 = vrot.lane.b32.xlu1 %v13789_v58, %s16529_s20  ;;  %6425 = vrot.lane.b32.xlu0 %v13792_v35, %s16529_s20  ;;  %v14286_v10 = vpop.permute.xlu0 %5594 }
 0x3f8   : > { %v14288_v30 = vpop.permute.xlu1 %5638 }
 0x3fa   : > { %6465 = vrot.lane.b32.xlu1 %v13767_v36, %s16532_s17  ;;  %6429 = vrot.lane.b32.xlu0 %v6412_v33, %s16529_s20  ;;  %v14294_v27 = vpop.permute.xlu0 %5598  ;;  %s16536_s20 = smov 69  }
 0x3fb   : > { %16533 = vst [vmem:[#allocation26_spill] sm:$0xff] %v14294_v27 }
 0x3fc   : > { %v14296_v62 = vpop.permute.xlu1 %5642 }
 0x3fe   : > { %6469 = vrot.lane.b32.xlu1 %v6455_v57, %s16532_s17  ;;  %6467 = vrot.lane.b32.xlu0 %v13779_v32, %s16532_s17  ;;  %v14301_v63 = vpop.permute.xlu0 %5636 }
 0x400   : > { %v14303_v39 = vpop.permute.xlu1 %5680 }
 0x402   : > { %6473 = vrot.lane.b32.xlu1 %v13789_v58, %s16532_s17  ;;  %6471 = vrot.lane.b32.xlu0 %v13792_v35, %s16532_s17  ;;  %v14310_v42 = vpop.permute.xlu0 %5640 }
 0x404   : > { %v14312_v2 = vpop.permute.xlu1 %5684 }
 0x406   : > { %6511 = vrot.lane.b32.xlu1 %v13767_v36, %s16534_s18  ;;  %6475 = vrot.lane.b32.xlu0 %v6458_v59, %s16532_s17  ;;  %v14318_v53 = vpop.permute.xlu0 %5644  ;;  %v14334_v36 = vld [vmem:[%s11005_s29 + $0x4] sm:$0xff]  ;;  %s16545_s17 = smov 68  }
 0x408   : > { %v14320_v25 = vpop.permute.xlu1 %5688 }
 0x40a   : > { %6515 = vrot.lane.b32.xlu1 %v6501_v9, %s16534_s18  ;;  %6513 = vrot.lane.b32.xlu0 %v13779_v32, %s16534_s18  ;;  %v14325_v40 = vpop.permute.xlu0 %5682  ;;  %v6547_v32 = vld [vmem:[%s11005_s29 + $0x14] sm:$0xf] }
 0x40c   : > { %v14327_v26 = vpop.permute.xlu1 %5726 }
 0x40e   : > { %6519 = vrot.lane.b32.xlu1 %v13789_v58, %s16534_s18  ;;  %6517 = vrot.lane.b32.xlu0 %v13792_v35, %s16534_s18  ;;  %v14337_v6 = vpop.permute.xlu0 %5686 }
 0x40f   : > { %v5695_v37 = vrot.slane %v14337_v6, 4 }
 0x410   : > { %v14339_v60 = vpop.permute.xlu1 %5730 }
 0x412   : > { %6557 = vrot.lane.b32.xlu1 %v14334_v36, %s16535_s11  ;;  %6521 = vrot.lane.b32.xlu0 %v6504_v15, %s16534_s18  ;;  %v14348_v58 = vpop.permute.xlu0 %5690  ;;  %s16548_s18 = smov 67  }
 0x414   : > { %v14350_v35 = vpop.permute.xlu1 %5734 }
 0x416   : > { %6561 = vrot.lane.b32.xlu1 %v6547_v32, %s16535_s11  ;;  %6559 = vrot.lane.b32.xlu0 %v14346_v34, %s16535_s11  ;;  %v14361_v54 = vpop.permute.xlu0 %5728  ;;  %v16543_v32 = vld [vmem:[#allocation21_spill] sm:$0xff] }
 0x417   : > { %v5739_v21 = vrot.slane %v14361_v54, 4 }
 0x418   : > { %v14363_v1 = vpop.permute.xlu1 %5772 }
 0x41a   : > { %6565 = vrot.lane.b32.xlu1 %v14356_v8, %s16535_s11  ;;  %6563 = vrot.lane.b32.xlu0 %v14359_v16, %s16535_s11  ;;  %v14370_v4 = vpop.permute.xlu0 %5732 }
 0x41c   : > { %v14372_v28 = vpop.permute.xlu1 %5776 }
 0x41e   : > { %6603 = vrot.lane.b32.xlu1 %v14334_v36, %s16536_s20  ;;  %6567 = vrot.lane.b32.xlu0 %v6550_v46, %s16535_s11  ;;  %v14378_v44 = vpop.permute.xlu0 %5736  ;;  %s16568_s11 = smov 66  }
 0x420   : > { %v14380_v51 = vpop.permute.xlu1 %5780 }
 0x422   : > { %6607 = vrot.lane.b32.xlu1 %v6593_v56, %s16536_s20  ;;  %6605 = vrot.lane.b32.xlu0 %v14346_v34, %s16536_s20  ;;  %v14388_v22 = vpop.permute.xlu0 %5774  ;;  %v6639_v56 = vld [vmem:[%s11005_s29 + $0x14] sm:$0xf] }
 0x423   : > { %v4551_v41 = vpop.f32.mrf.mxu0 }
 0x424   : > { %v14386_v20 = vadd.f32 %v4551_v41, %v16537_v47  ;;  %v14390_v24 = vpop.permute.xlu1 %5818 }
 0x425   : > { %v4553_v3 = vpop.f32.mrf.mxu0 }
 0x426   : > { %16538 = vst [vmem:[#allocation32_spill] sm:$0xff] %v14386_v20  ;;  %v14393_v48 = vadd.f32 %v4553_v3, %v16539_v50  ;;  %6611 = vrot.lane.b32.xlu1 %v14356_v8, %s16536_s20  ;;  %6609 = vrot.lane.b32.xlu0 %v14359_v16, %s16536_s20  ;;  %v5779_v57 = vpop.permute.xlu0 %5778  ;;  %v6642_v20 = vld [vmem:[%s11005_s29 + $0x30] sm:$0xf] }
 0x427   : > { %v4592_v13 = vpop.f32.mrf.mxu1  ;;  %v4555_v19 = vpop.f32.mrf.mxu0 }
 0x428   : > { %16540 = vst [vmem:[#allocation12_spill] sm:$0xff] %v14393_v48  ;;  %v14401_v33 = vadd.f32 %v4592_v13, %v16541_v11  ;;  %v14403_v59 = vpop.permute.xlu1 %5822  ;;  %v5830_v13 = vrot.slane %v14390_v24, 4  ;;  %v5785_v48 = vrot.slane %v14388_v22, 4 }
 0x429   : > { %v4594_v9 = vpop.f32.mrf.mxu1  ;;  %v4556_v15 = vpop.f32.mrf.mxu0  ;;  %v5832_v49 = vrot.slane %v14403_v59, 4  ;;  %v5743_v59 = vrot.slane %v14378_v44, 4 }
 0x42a   : > { %16542 = vst [vmem:[#allocation23_spill] sm:$0xff] %v14401_v33  ;;  %v14406_v46 = vadd.f32 %v4594_v9, %v16543_v32  ;;  %6649 = vrot.lane.b32.xlu1 %v14334_v36, %s16545_s17  ;;  %6613 = vrot.lane.b32.xlu0 %v6596_v31, %s16536_s20  ;;  %v5783_v47 = vpop.permute.xlu0 %5782  ;;  %v5692_v31 = vrot.slane %v14303_v39, 4  ;;  %v5742_v15 = vrot.slane %v14350_v35, 4  ;;  %v5741_v32 = vrot.slane %v14370_v4, 4  ;;  %s10856_s20 = smov 65  }
 0x42b   : > { %v4596_v41 = vpop.f32.mrf.mxu1  ;;  %v5784_v33 = vrot.slane %v14363_v1, 4  ;;  %v5789_v38 = vrot.slane %v5783_v47, 4  ;;  %v5738_v9 = vrot.slane %v14327_v26, 4 }
 0x42c   : > { %16544 = vst [vmem:[#allocation18_spill] sm:$0xff] %v14406_v46  ;;  %v14412_v3 = vpop.permute.xlu1 %5826  ;;  %v5787_v46 = vrot.slane %v5779_v57, 4 }
 0x42d   : > { %v4597_v50 = vpop.f32.mrf.mxu1  ;;  %v5834_v11 = vrot.slane %v14412_v3, 4  ;;  %v5790_v47 = vsel %vm253_vm1, %v5784_v33, %v5785_v48 }
 0x42e   : > { %6653 = vrot.lane.b32.xlu1 %v6639_v56, %s16545_s17  ;;  %6651 = vrot.lane.b32.xlu0 %v14346_v34, %s16545_s17  ;;  %v5821_v41 = vpop.permute.xlu0 %5820  ;;  %v5788_v50 = vrot.slane %v14380_v51, 4 }
 0x42f   : > { %v5831_v19 = vrot.slane %v5821_v41, 4 }
 0x430   : > { %v14424_v56 = vpop.permute.xlu1 %5864  ;;  %v5794_v5 = vsel %vm253_vm1, %v5787_v46, %v5788_v50  ;;  %v5748_v46 = vsel %vm253_vm1, %v5741_v32, %v5742_v15  ;;  %v5796_v0 = vsel %vm253_vm1, %v5788_v50, %v5789_v38  ;;  %v16559_v50 = vrot.slane %v14301_v63, 4 }
 0x431   : > { %16546 = vst [vmem:[#allocation30_spill] sm:$0xff] %v14424_v56  ;;  %v5836_v55 = vsel %vm253_vm1, %v5830_v13, %v5831_v19  ;;  %v5786_v56 = vrot.slane %v14372_v28, 4  ;;  %v5795_v61 = vsel %vm16549_vm7, %v5779_v57, %v5794_v5  ;;  %v5838_v32 = vsel %vm253_vm1, %v5831_v19, %v5832_v49 }
 0x432   : > { %6657 = vrot.lane.b32.xlu1 %v14356_v8, %s16545_s17  ;;  %6655 = vrot.lane.b32.xlu0 %v14359_v16, %s16545_s17  ;;  %v5825_v23 = vpop.permute.xlu0 %5824  ;;  %v5837_v28 = vsel %vm16550_vm5, %v14390_v24, %v5836_v55  ;;  %v16553_v5 = vrot.slane %v14320_v25, 4  ;;  %v5740_v55 = vrot.slane %v14339_v60, 4  ;;  %v5839_v60 = vsel %vm16550_vm5, %v5821_v41, %v5838_v32 }
 0x433   : > { %v5833_v7 = vrot.slane %v5825_v23, 4  ;;  %v5792_v49 = vsel %vm253_vm1, %v5785_v48, %v5786_v56  ;;  %v5797_v57 = vsel %vm16557_vm2, %v14380_v51, %v5796_v0  ;;  %v5750_v48 = vsel %vm253_vm1, %v5742_v15, %v5743_v59  ;;  %v6688_v56 = vld [vmem:[%s11005_s29 + $0x30] sm:$0xf] }
 0x434   : > { %v14444_v52 = vpop.permute.xlu1 %5868  ;;  %v5702_v38 = vsel %vm253_vm1, %v5695_v37, %v16553_v5  ;;  %v5694_v0 = vrot.slane %v14312_v2, 4  ;;  %v5651_v32 = vrot.slane %v14318_v53, 4 }
 0x435   : > { %16547 = vst [vmem:[#allocation21_spill] sm:$0xff] %v14444_v52  ;;  %v5840_v13 = vsel %vm253_vm1, %v5833_v7, %v5834_v11  ;;  %v6685_v52 = vld [vmem:[%s11005_s29 + $0x14] sm:$0xf]  ;;  %v16552_v7 = vrot.slane %v14325_v40, 4 }
 0x436   : > { %6695 = vrot.lane.b32.xlu1 %v14334_v36, %s16548_s18  ;;  %6659 = vrot.lane.b32.xlu0 %v6642_v20, %s16545_s17  ;;  %v5841_v17 = vsel %vm16551_vm4, %v5825_v23, %v5840_v13  ;;  %v5829_v27 = vpop.permute.xlu0 %5828  ;;  %vm16554_vm4 = vmmov %vm16549_vm7  ;;  %vm16555_vm7 = vcmask 777216   ;;  %v16564_v13 = vrot.slane %v14310_v42, 4  ;;  %s10857_s17 = smov 64  }
 0x437   : > { %v10290_v44 = vcombine.low %v5837_v28, %v5841_v17  ;;  %v5835_v29 = vrot.slane %v5829_v27, 4  ;;  %v10291_v33 = vcombine.high %v5837_v28, %v5841_v17  ;;  %v5698_v45 = vsel %vm253_vm1, %v5692_v31, %v16552_v7 }
 0x438   : > { %v14466_v20 = vpop.permute.xlu1 %5872  ;;  %v5791_v23 = vsel %vm16554_vm4, %v14363_v1, %v5790_v47  ;;  %v5744_v17 = vsel %vm253_vm1, %v5738_v9, %v5739_v21  ;;  %v5749_v37 = vsel %vm16555_vm7, %v14370_v4, %v5748_v46  ;;  %vm16556_vm4 = vmmov %vm16550_vm5  ;;  %v5601_v9 = vrot.slane %v14277_v18, 4 }
 0x439   : > { %v5842_v27 = vsel %vm253_vm1, %v5834_v11, %v5835_v29  ;;  %6271 = vmatprep.subr.bf16.mxu0 %v10291_v33  ;;  %v10287_v24 = vcombine.high %v5791_v23, %v5795_v61  ;;  %v5697_v29 = vrot.slane %v14348_v58, 4  ;;  %v5745_v31 = vsel %vm16555_vm7, %v14327_v26, %v5744_v17  ;;  %vm16558_vm5 = vmmov %vm16557_vm2  ;;  %v6731_v17 = vld [vmem:[%s11005_s29 + $0x14] sm:$0xf] }
 0x43a   : > { %6699 = vrot.lane.b32.xlu1 %v6685_v52, %s16548_s18  ;;  %6697 = vrot.lane.b32.xlu0 %v14346_v34, %s16548_s18  ;;  %v14487_v1 = vpop.permute.xlu0 %5866  ;;  %v5843_v52 = vsel %vm16556_vm4, %v14412_v3, %v5842_v27  ;;  %v5793_v3 = vsel %vm16558_vm5, %v14388_v22, %v5792_v49  ;;  %v10286_v41 = vcombine.low %v5791_v23, %v5795_v61  ;;  %v5603_v26 = vrot.slane %v14286_v10, 4  ;;  %vm16562_vm4 = vmmov %vm16555_vm7 }
 0x43b   : > { %6272 = vmatpush1.bf16.msra.mxu0 %v10290_v44  ;;  %v10292_v4 = vcombine.low %v5839_v60, %v5843_v52  ;;  %v10293_v11 = vcombine.high %v5839_v60, %v5843_v52  ;;  %v5746_v58 = vsel %vm253_vm1, %v5739_v21, %v5740_v55  ;;  %v10283_v51 = vcombine.high %v5745_v31, %v5749_v37  ;;  %vm16567_vm5 = vmmov %vm16562_vm4 }
 0x43c   : > { %v14493_v19 = vpop.permute.xlu1 %5910  ;;  %6273 = vmatprep.subr.bf16.mxu0 %v10287_v24  ;;  %v10289_v15 = vcombine.high %v5793_v3, %v5797_v57  ;;  %v16560_v61 = vrot.slane %v14279_v14, 4  ;;  %vm16561_vm2 = vcmask 785408   ;;  %v5751_v21 = vsel %vm16562_vm4, %v14350_v35, %v5750_v48 }
 0x43d   : > { %6312 = vmatprep.subr.bf16.mxu1 %v10293_v11  ;;  %v5703_v46 = vsel %vm16561_vm2, %v14337_v6, %v5702_v38  ;;  %v16563_v47 = vrot.slane %v14296_v62, 4  ;;  %vm16565_vm7 = vmmov %vm16561_vm2  ;;  %v16566_v44 = vmov %v16553_v5  ;;  %v5555_v35 = vrot.slane %v14247_v43, 4 }
 0x43e   : > { %6703 = vrot.lane.b32.xlu1 %v14356_v8, %s16548_s18  ;;  %6701 = vrot.lane.b32.xlu0 %v14359_v16, %s16548_s18  ;;  %v5652_v22 = vsel %vm253_vm1, %v16560_v61, %v16559_v50  ;;  %v14517_v2 = vpop.permute.xlu0 %5870  ;;  %v5699_v6 = vsel %vm16565_vm7, %v14303_v39, %v5698_v45  ;;  %v5704_v33 = vsel %vm253_vm1, %v16566_v44, %v5697_v29  ;;  %v5648_v45 = vrot.slane %v14288_v30, 4  ;;  %vm16573_vm4 = vmmov %vm16565_vm7  ;;  %v16588_v44 = vld [vmem:[#allocation14_spill] sm:$0xff] }
 0x43f   : > { %6274 = vmatpush1.bf16.msra.mxu0 %v10286_v41  ;;  %6313 = vmatpush1.bf16.msra.mxu1 %v10292_v4  ;;  %v5656_v28 = vsel %vm253_vm1, %v16564_v13, %v16563_v47  ;;  %v5747_v7 = vsel %vm16567_vm5, %v14361_v54, %v5746_v58  ;;  %v10282_v5 = vcombine.low %v5745_v31, %v5749_v37  ;;  %v16569_v39 = vrot.slane %v14325_v40, 4  ;;  %v16570_v54 = vld [vmem:[#allocation25_spill] sm:$0xff]  ;;  %v16576_v4 = vld [vmem:[#allocation26_spill] sm:$0xff]  ;;  %vm16580_vm5 = vmmov %vm16573_vm4 }
 0x440   : > { %v14521_v59 = vpop.permute.xlu1 %5914  ;;  %6275 = vmatprep.subr.bf16.mxu0 %v10283_v51  ;;  %6314 = vmatprep.subr.bf16.mxu1 %v10289_v15  ;;  %v10288_v38 = vcombine.low %v5793_v3, %v5797_v57  ;;  %v10279_v55 = vcombine.high %v5699_v6, %v5703_v46  ;;  %v10285_v23 = vcombine.high %v5747_v7, %v5751_v21  ;;  %v5557_v49 = vrot.slane %v14260_v12, 4  ;;  %v16574_v57 = vld [vmem:[#allocation17_spill] sm:$0xff]  ;;  %v16581_v15 = vld [vmem:[#allocation19_spill] sm:$0xff] }
 0x441   : > { %v5700_v53 = vsel %vm253_vm1, %v16569_v39, %v5694_v0  ;;  %v16571_v27 = vrot.slane %v16570_v54, 4  ;;  %vm16572_vm2 = vcmask 793600   ;;  %v5705_v60 = vsel %vm16573_vm4, %v14320_v25, %v5704_v33  ;;  %v16579_v41 = vld [vmem:[#allocation13_spill] sm:$0xff] }
 0x442   : > { %6741 = vrot.lane.b32.xlu1 %v14334_v36, %s16568_s11  ;;  %6705 = vrot.lane.b32.xlu0 %v6688_v56, %s16548_s18  ;;  %v5657_v37 = vsel %vm16572_vm2, %v14310_v42, %v5656_v28  ;;  %v14553_v30 = vpop.permute.xlu0 %5874  ;;  %v16575_v29 = vrot.slane %v16574_v57, 4  ;;  %v5605_v11 = vrot.slane %v16576_v4, 4  ;;  %vm16577_vm7 = vmmov %vm16572_vm2  ;;  %v16578_v42 = vmov %v16563_v47  ;;  %s16625_s18 = smov 48  }
 0x443   : > { %v5606_v24 = vsel %vm253_vm1, %v16571_v27, %v5601_v9  ;;  %6276 = vmatpush1.bf16.msra.mxu0 %v10282_v5  ;;  %6315 = vmatpush1.bf16.msra.mxu1 %v10288_v38  ;;  %v5653_v31 = vsel %vm16577_vm7, %v14279_v14, %v5652_v22  ;;  %v5658_v3 = vsel %vm253_vm1, %v16578_v42, %v5651_v32  ;;  %v5509_v0 = vrot.slane %v16579_v41, 4  ;;  %v16583_v22 = vld [vmem:[#allocation16_spill] sm:$0xff]  ;;  %vm16587_vm4 = vmmov %vm16577_vm7  ;;  %v16600_v42 = vld [vmem:[#allocation15_spill] sm:$0xff] }
 0x444   : > { %v14557_v52 = vpop.permute.xlu1 %5918  ;;  %v5610_v48 = vsel %vm253_vm1, %v5603_v26, %v16575_v29  ;;  %6277 = vmatprep.subr.bf16.mxu0 %v10279_v55  ;;  %6316 = vmatprep.subr.bf16.mxu1 %v10285_v23  ;;  %v5701_v25 = vsel %vm16580_vm5, %v14325_v40, %v5700_v53  ;;  %v10278_v58 = vcombine.low %v5699_v6, %v5703_v46  ;;  %v5602_v14 = vrot.slane %v16581_v15, 4  ;;  %v16584_v40 = vld [vmem:[#allocation20_spill] sm:$0xff]  ;;  %vm16593_vm5 = vmmov %vm16587_vm4 }
 0x445   : > { %v10284_v51 = vcombine.low %v5747_v7, %v5751_v21  ;;  %v16582_v56 = vmov %v16559_v50  ;;  %v10275_v50 = vcombine.high %v5653_v31, %v5657_v37  ;;  %v10281_v61 = vcombine.high %v5701_v25, %v5705_v60  ;;  %v16590_v5 = vld [vmem:[#allocation28_spill] sm:$0xff] }
 0x446   : > { %6745 = vrot.lane.b32.xlu1 %v6731_v17, %s16568_s11  ;;  %6743 = vrot.lane.b32.xlu0 %v14346_v34, %s16568_s11  ;;  %v5654_v26 = vsel %vm253_vm1, %v16582_v56, %v5648_v45  ;;  %v5511_v47 = vrot.slane %v16583_v22, 4  ;;  %v16585_v46 = vrot.slane %v16584_v40, 4  ;;  %vm16586_vm2 = vcmask 801792   ;;  %v14586_v28 = vpop.permute.xlu0 %5912  ;;  %v16594_v23 = vld [vmem:[#allocation24_spill] sm:$0xff] }
 0x447   : > { %v5611_v13 = vsel %vm16586_vm2, %v14286_v10, %v5610_v48  ;;  %6278 = vmatpush1.bf16.msra.mxu0 %v10278_v58  ;;  %6317 = vmatpush1.bf16.msra.mxu1 %v10284_v51  ;;  %v5659_v32 = vsel %vm16587_vm4, %v14296_v62, %v5658_v3  ;;  %v16589_v33 = vrot.slane %v16588_v44, 4  ;;  %v5559_v38 = vrot.slane %v16590_v5, 4  ;;  %vm16591_vm7 = vmmov %vm16586_vm2 }
 0x448   : > { %v5560_v21 = vsel %vm253_vm1, %v16585_v46, %v5555_v35  ;;  %v14590_v6 = vpop.permute.xlu1 %5957  ;;  %v5607_v45 = vsel %vm16591_vm7, %v16570_v54, %v5606_v24  ;;  %v16592_v10 = vmov %v16575_v29  ;;  %6279 = vmatprep.subr.bf16.mxu0 %v10275_v50  ;;  %6318 = vmatprep.subr.bf16.mxu1 %v10281_v61  ;;  %v5655_v62 = vsel %vm16593_vm5, %v14301_v63, %v5654_v26  ;;  %v6734_v24 = vld [vmem:[%s11005_s29 + $0x30] sm:$0xf]  ;;  %v16597_v29 = vld [vmem:[#allocation22_spill] sm:$0xff]  ;;  %vm16599_vm4 = vmmov %vm16591_vm7 }
 0x449   : > { %v5564_v7 = vsel %vm253_vm1, %v5557_v49, %v16589_v33  ;;  %v5612_v39 = vsel %vm253_vm1, %v16592_v10, %v5605_v11  ;;  %v10274_v53 = vcombine.low %v5653_v31, %v5657_v37  ;;  %v10280_v55 = vcombine.low %v5701_v25, %v5705_v60  ;;  %v16595_v63 = vld [vmem:[#allocation29_spill] sm:$0xff]  ;;  %v16601_v25 = vld [vmem:[#allocation31_spill] sm:$0xff]  ;;  %vm16605_vm5 = vmmov %vm16599_vm4 }
 0x44a   : > { %6749 = vrot.lane.b32.xlu1 %v14356_v8, %s16568_s11  ;;  %6747 = vrot.lane.b32.xlu0 %v14359_v16, %s16568_s11  ;;  %v5556_v17 = vrot.slane %v16594_v23, 4  ;;  %v5608_v49 = vsel %vm253_vm1, %v5601_v9, %v5602_v14  ;;  %v10271_v54 = vcombine.high %v5607_v45, %v5611_v13  ;;  %v10277_v27 = vcombine.high %v5655_v62, %v5659_v32  ;;  %v14620_v11 = vpop.permute.xlu0 %5916 }
 0x44b   : > { %v16596_v37 = vrot.slane %v16595_v63, 4  ;;  %v5513_v48 = vrot.slane %v16597_v29, 4  ;;  %vm16598_vm2 = vcmask 809984   ;;  %6280 = vmatpush1.bf16.msra.mxu0 %v10274_v53  ;;  %6319 = vmatpush1.bf16.msra.mxu1 %v10280_v55  ;;  %v5613_v9 = vsel %vm16599_vm4, %v16574_v57, %v5612_v39 }
 0x44c   : > { %v5565_v4 = vsel %vm16598_vm2, %v14260_v12, %v5564_v7  ;;  %v14624_v31 = vpop.permute.xlu1 %5961  ;;  %v5510_v3 = vrot.slane %v16600_v42, 4  ;;  %v16602_v58 = vrot.slane %v16601_v25, 4  ;;  %vm16603_vm7 = vmmov %vm16598_vm2  ;;  %v16604_v12 = vmov %v16589_v33  ;;  %6281 = vmatprep.subr.bf16.mxu0 %v10271_v54  ;;  %6320 = vmatprep.subr.bf16.mxu1 %v10277_v27 }
 0x44d   : > { %v5514_v60 = vsel %vm253_vm1, %v16596_v37, %v5509_v0  ;;  %v5561_v15 = vsel %vm16603_vm7, %v16584_v40, %v5560_v21  ;;  %v5566_v14 = vsel %vm253_vm1, %v16604_v12, %v5559_v38  ;;  %v5609_v57 = vsel %vm16605_vm5, %v14277_v18, %v5608_v49  ;;  %v6777_v40 = vld [vmem:[%s11005_s29 + $0x14] sm:$0xf]  ;;  %vm16608_vm4 = vmmov %vm16603_vm7 }
 0x44e   : > { %v5518_v51 = vsel %vm253_vm1, %v5511_v47, %v16602_v58  ;;  %v10270_v56 = vcombine.low %v5607_v45, %v5611_v13  ;;  %v10276_v26 = vcombine.low %v5655_v62, %v5659_v32  ;;  %6787 = vrot.lane.b32.xlu1 %v14334_v36, %s10856_s20  ;;  %6751 = vrot.lane.b32.xlu0 %v6734_v24, %s16568_s11  ;;  %vm16606_vm2 = vcmask 818176   ;;  %v14649_v13 = vpop.permute.xlu0 %5920  ;;  %vm16610_vm5 = vmmov %vm16608_vm4  ;;  %s16629_s11 = smov 41  }
 0x44f   : > { %v5562_v50 = vsel %vm253_vm1, %v5555_v35, %v5556_v17  ;;  %v10267_v61 = vcombine.high %v5561_v15, %v5565_v4  ;;  %v10273_v47 = vcombine.high %v5609_v57, %v5613_v9  ;;  %v5519_v46 = vsel %vm16606_vm2, %v16583_v22, %v5518_v51  ;;  %vm16609_vm7 = vmmov %vm16606_vm2 }
 0x450   : > { %v16607_v18 = vmov %v16602_v58  ;;  %6282 = vmatpush1.bf16.msra.mxu0 %v10270_v56  ;;  %6321 = vmatpush1.bf16.msra.mxu1 %v10276_v26  ;;  %v5567_v32 = vsel %vm16608_vm4, %v16588_v44, %v5566_v14  ;;  %v14653_v33 = vpop.permute.xlu1 %5965  ;;  %v5516_v35 = vsel %vm253_vm1, %v5509_v0, %v5510_v3  ;;  %v5515_v22 = vsel %vm16609_vm7, %v16595_v63, %v5514_v60  ;;  %vm16611_vm4 = vmmov %vm16606_vm2  ;;  %v6780_v60 = vld [vmem:[%s11005_s29 + $0x30] sm:$0xf]  ;;  %v16614_v58 = vld [vmem:[#allocation30_spill] sm:$0xff] }
 0x451   : > { %v5520_v21 = vsel %vm253_vm1, %v16607_v18, %v5513_v48  ;;  %6283 = vmatprep.subr.bf16.mxu0 %v10267_v61  ;;  %6322 = vmatprep.subr.bf16.mxu1 %v10273_v47  ;;  %v5563_v7 = vsel %vm16610_vm5, %v14247_v43, %v5562_v50  ;;  %v10266_v5 = vcombine.low %v5561_v15, %v5565_v4  ;;  %v5926_v62 = vrot.slane %v14557_v52, 4  ;;  %v6824_v50 = vld [vmem:[%s11005_s29 + $0x14] sm:$0xf] }
 0x452   : > { %v10272_v38 = vcombine.low %v5609_v57, %v5613_v9  ;;  %6791 = vrot.lane.b32.xlu1 %v6777_v40, %s10856_s20  ;;  %6789 = vrot.lane.b32.xlu0 %v14346_v34, %s10856_s20  ;;  %v10263_v44 = vcombine.high %v5515_v22, %v5519_v46  ;;  %v10269_v45 = vcombine.high %v5563_v7, %v5567_v32  ;;  %v14669_v39 = vpop.permute.xlu0 %5959  ;;  %v5925_v53 = vrot.slane %v14620_v11, 4 }
 0x453   : > { %v5521_v0 = vsel %vm16606_vm2, %v16601_v25, %v5520_v21  ;;  %v5517_v10 = vsel %vm16611_vm4, %v16579_v41, %v5516_v35  ;;  %v5969_v55 = vrot.slane %v14590_v6, 4  ;;  %v5970_v23 = vrot.slane %v14669_v39, 4  ;;  %v16616_v35 = vld [vmem:[#allocation21_spill] sm:$0xff] }
 0x454   : > { %6284 = vmatpush1.bf16.msra.mxu0 %v10266_v5  ;;  %6323 = vmatpush1.bf16.msra.mxu1 %v10272_v38  ;;  %v14671_v43 = vpop.permute.xlu1 %6373  ;;  %v10262_v17 = vcombine.low %v5515_v22, %v5519_v46  ;;  %v5880_v41 = vrot.slane %v14466_v20, 4  ;;  %v10268_v49 = vcombine.low %v5563_v7, %v5567_v32  ;;  %v10265_v54 = vcombine.high %v5517_v10, %v5521_v0 }
 0x455   : > { %16612 = vst [vmem:[#allocation25_spill] sm:$0xff] %v14671_v43  ;;  %6285 = vmatprep.subr.bf16.mxu0 %v10263_v44  ;;  %6324 = vmatprep.subr.bf16.mxu1 %v10269_v45  ;;  %v5879_v27 = vrot.slane %v14517_v2, 4  ;;  %v5922_v24 = vrot.slane %v14493_v19, 4  ;;  %v5923_v63 = vrot.slane %v14586_v28, 4  ;;  %v5973_v37 = vrot.slane %v14653_v33, 4 }
 0x456   : > { %6795 = vrot.lane.b32.xlu1 %v14356_v8, %s10856_s20  ;;  %6793 = vrot.lane.b32.xlu0 %v14359_v16, %s10856_s20  ;;  %vm5929_vm7 = vcmask 744448   ;;  %v5927_v29 = vrot.slane %v14649_v13, 4  ;;  %vm5976_vm5 = vcmask 736256   ;;  %v5964_v48 = vpop.permute.xlu0 %5963  ;;  %v5933_v9 = vsel %vm253_vm1, %v5925_v53, %v5926_v62 }
 0x457   : > { %v5971_v42 = vrot.slane %v14624_v31, 4  ;;  %v5975_v3 = vsel %vm253_vm1, %v5969_v55, %v5970_v23  ;;  %v5972_v25 = vrot.slane %v5964_v48, 4  ;;  %v5876_v51 = vrot.slane %v16614_v58, 4 }
 0x458   : > { %6286 = vmatpush1.bf16.msra.mxu0 %v10262_v17  ;;  %6325 = vmatpush1.bf16.msra.mxu1 %v10268_v49  ;;  %v14688_v4 = vpop.permute.xlu1 %6377  ;;  %v5877_v15 = vrot.slane %v14487_v1, 4  ;;  %v5924_v12 = vrot.slane %v14521_v59, 4  ;;  %v10264_v14 = vcombine.low %v5517_v10, %v5521_v0  ;;  %v5886_v57 = vsel %vm253_vm1, %v5879_v27, %v5880_v41  ;;  %v6827_v49 = vld [vmem:[%s11005_s29 + $0x30] sm:$0xf] }
 0x459   : > { %16613 = vst [vmem:[#allocation17_spill] sm:$0xff] %v14688_v4  ;;  %6326 = vmatprep.subr.bf16.mxu1 %v10265_v54  ;;  %v5881_v31 = vrot.slane %v14553_v30, 4  ;;  %v5928_v56 = vsel %vm253_vm1, %v5922_v24, %v5923_v63  ;;  %v5980_v26 = vsel %vm253_vm1, %v5972_v25, %v5973_v37  ;;  %v5934_v61 = vsel %vm5929_vm7, %v14620_v11, %v5933_v9 }
 0x45a   : > { %6834 = vrot.lane.b32.xlu1 %v14334_v36, %s10857_s17  ;;  %6797 = vrot.lane.b32.xlu0 %v6780_v60, %s10856_s20  ;;  %v5935_v59 = vsel %vm253_vm1, %v5926_v62, %v5927_v29  ;;  %v5977_v47 = vsel %vm5976_vm5, %v14590_v6, %v5975_v3  ;;  %v5981_v40 = vsel %vm5976_vm5, %v5964_v48, %v5980_v26  ;;  %v5968_v46 = vpop.permute.xlu0 %5967  ;;  %v5878_v22 = vrot.slane %v16616_v35, 4  ;;  %v16626_v29 = vld [vmem:[#allocation27_spill] sm:$0xff]  ;;  %s16635_s20 = smov 42  }
 0x45b   : > { %v5978_v30 = vsel %vm253_vm1, %v5970_v23, %v5971_v42  ;;  %v10302_v21 = vcombine.low %v5977_v47, %v5981_v40  ;;  %v5974_v13 = vrot.slane %v5968_v46, 4  ;;  %v10303_v32 = vcombine.high %v5977_v47, %v5981_v40  ;;  %v7562_v42 = vld [vmem:[%s11005_s29 + $0x14] sm:$0xf] }
 0x45c   : > { %6327 = vmatpush1.bf16.msra.mxu1 %v10264_v14  ;;  %v14710_v18 = vpop.permute.xlu1 %6381  ;;  %v5930_v11 = vsel %vm5929_vm7, %v14493_v19, %v5928_v56  ;;  %v5882_v6 = vsel %vm253_vm1, %v5876_v51, %v5877_v15  ;;  %v5931_v7 = vsel %vm253_vm1, %v5923_v63, %v5924_v12  ;;  %vm16617_vm2 = vcmask 752640   ;;  %v7516_v56 = vld [vmem:[%s11005_s29 + $0x14] sm:$0xf] }
 0x45d   : > { %16615 = vst [vmem:[#allocation26_spill] sm:$0xff] %v14710_v18  ;;  %v5982_v5 = vsel %vm253_vm1, %v5973_v37, %v5974_v13  ;;  %6297 = vmatprep.subr.bf16.mxu0 %v10303_v32  ;;  %v10299_v38 = vcombine.high %v5930_v11, %v5934_v61  ;;  %v5887_v44 = vsel %vm16617_vm2, %v14517_v2, %v5886_v57  ;;  %vm16620_vm4 = vmmov %vm16617_vm2  ;;  %v7473_v32 = vld [vmem:[%s11005_s29 + $0x30] sm:$0xf] }
 0x45e   : > { %6838 = vrot.lane.b32.xlu1 %v6824_v50, %s10857_s17  ;;  %6836 = vrot.lane.b32.xlu0 %v14346_v34, %s10857_s17  ;;  %v5979_v45 = vsel %vm5976_vm5, %v14669_v39, %v5978_v30  ;;  %v14726_v19 = vpop.permute.xlu0 %6375  ;;  %v5983_v0 = vsel %vm5976_vm5, %v14653_v33, %v5982_v5  ;;  %v5936_v10 = vsel %vm5929_vm7, %v14557_v52, %v5935_v59  ;;  %vm16622_vm5 = vmmov %vm16617_vm2  ;;  %v7470_v30 = vld [vmem:[%s11005_s29 + $0x14] sm:$0xf] }
 0x45f   : > { %6298 = vmatpush2.bf16.msra.mxu0 %v10302_v21  ;;  %16618 = vst [vmem:[#allocation13_spill] sm:$0xff] %v14726_v19  ;;  %v5888_v53 = vsel %vm253_vm1, %v5880_v41, %v5881_v31  ;;  %v10304_v55 = vcombine.low %v5979_v45, %v5983_v0  ;;  %v10305_v2 = vcombine.high %v5979_v45, %v5983_v0 }
 0x460   : > { %v14732_v62 = vpop.permute.xlu1 %6419  ;;  %6299 = vmatprep.subr.bf16.mxu0 %v10299_v38  ;;  %v5883_v39 = vsel %vm16620_vm4, %v16614_v58, %v5882_v6  ;;  %v5932_v23 = vsel %vm5929_vm7, %v14586_v28, %v5931_v7  ;;  %v10298_v17 = vcombine.low %v5930_v11, %v5934_v61  ;;  %v5884_v52 = vsel %vm253_vm1, %v5877_v15, %v5878_v22  ;;  %vm16624_vm7 = vmmov %vm16617_vm2  ;;  %v14771_v58 = vld [vmem:[#allocation6 + $0x38] sm:$0xff] }
 0x461   : > { %16619 = vst [vmem:[#allocation19_spill] sm:$0xff] %v14732_v62  ;;  %6338 = vmatprep.subr.bf16.mxu1 %v10305_v2  ;;  %v10295_v33 = vcombine.high %v5883_v39, %v5887_v44  ;;  %v10301_v41 = vcombine.high %v5932_v23, %v5936_v10  ;;  %v5889_v28 = vsel %vm16622_vm5, %v14466_v20, %v5888_v53  ;;  %16631 = vst [vmem:[#allocation29_spill] sm:$0xff] %v14771_v58  ;;  %v7565_v15 = vld [vmem:[%s11005_s29 + $0x30] sm:$0xf]  ;;  %v7424_v7 = vld [vmem:[%s11005_s29 + $0x14] sm:$0xf] }
 0x462   : > { %6842 = vrot.lane.b32.xlu1 %v14356_v8, %s10857_s17  ;;  %6840 = vrot.lane.b32.xlu0 %v14359_v16, %s10857_s17  ;;  %v14745_v54 = vpop.permute.xlu0 %6379  ;;  %v5885_v24 = vsel %vm16624_vm7, %v14487_v1, %v5884_v52  ;;  %v10294_v63 = vcombine.low %v5883_v39, %v5887_v44  ;;  %v10300_v37 = vcombine.low %v5932_v23, %v5936_v10  ;;  %v7519_v61 = vld [vmem:[%s11005_s29 + $0x30] sm:$0xf]  ;;  %vm16652_vm2 = vcmask 556032  }
 0x463   : > { %6300 = vmatpush2.bf16.msra.mxu0 %v10298_v17  ;;  %6339 = vmatpush2.bf16.msra.mxu1 %v10304_v55  ;;  %16621 = vst [vmem:[#allocation16_spill] sm:$0xff] %v14745_v54  ;;  %v10297_v60 = vcombine.high %v5885_v24, %v5889_v28  ;;  %v10260_v48 = vcombine.low %v16626_v29, %v16626_v29  ;;  %v7427_v44 = vld [vmem:[%s11005_s29 + $0x30] sm:$0xf]  ;;  %v7378_v55 = vld [vmem:[%s11005_s29 + $0x14] sm:$0xf]  ;;  %vm16653_vm4 = vcmask 547840   ;;  %vm16657_vm7 = vmmov %vm16652_vm2 }
 0x464   : > { %v14749_v27 = vpop.permute.xlu1 %6423  ;;  %6301 = vmatprep.subr.bf16.mxu0 %v10295_v33  ;;  %6340 = vmatprep.subr.bf16.mxu1 %v10301_v41  ;;  %v10296_v1 = vcombine.low %v5885_v24, %v5889_v28  ;;  %v10309_v51 = vcombine.high %v14771_v58, %v14771_v58  ;;  %v7381_v23 = vld [vmem:[%s11005_s29 + $0x30] sm:$0xf]  ;;  %vm16654_vm5 = vmmov %vm16653_vm4 }
 0x465   : > { %16623 = vst [vmem:[#allocation20_spill] sm:$0xff] %v14749_v27  ;;  %v16641_v28 = vld [vmem:[#allocation32_spill] sm:$0xff] }
 0x466   : > { %7250 = vrot.lane.b32.xlu1 %v14334_v36, %s16625_s18  ;;  %6844 = vrot.lane.b32.xlu0 %v6827_v49, %s10857_s17  ;;  %v14758_v20 = vpop.permute.xlu0 %6383  ;;  %s16637_s17 = smov 43   ;;  %v14899_v49 = vld [vmem:[%s11005_s29 + $0x20] sm:$0xff]  ;;  %v16643_v29 = vld [vmem:[#allocation12_spill] sm:$0xff] }
 0x467   : > { %6302 = vmatpush2.bf16.msra.mxu0 %v10294_v63  ;;  %6341 = vmatpush2.bf16.msra.mxu1 %v10300_v37  ;;  %16627 = vst [vmem:[#allocation14_spill] sm:$0xff] %v14758_v20 }
 0x468   : > { %v14760_v9 = vpop.permute.xlu1 %6427  ;;  %6342 = vmatprep.subr.bf16.mxu1 %v10297_v60 }
 0x469   : > { %16628 = vst [vmem:[#allocation28_spill] sm:$0xff] %v14760_v9 }
 0x46a   : > { %7574 = vrot.lane.b32.xlu1 %v14346_v34, %s16629_s11  ;;  %7572 = vrot.lane.b32.xlu0 %v14334_v36, %s16629_s11  ;;  %v14767_v3 = vpop.permute.xlu0 %6421 }
 0x46b   : > { %6304 = vmatmul.mubr.bf16.vlgmr.msra.gmra.mxu0 %v10260_v48  ;;  %6343 = vmatpush2.bf16.msra.mxu1 %v10296_v1 }
 0x46c   : > { %v14769_v25 = vpop.permute.xlu1 %6465  ;;  %10354 = vmatprep.mubr.msk.bf16.mxu0 %vm969_vm0, %v10309_v51 }
 0x46d   : > { %16630 = vst [vmem:[#allocation24_spill] sm:$0xff] %v14769_v25 }
 0x46e   : > { %7578 = vrot.lane.b32.xlu1 %v14359_v16, %s16629_s11  ;;  %7576 = vrot.lane.b32.xlu0 %v7562_v42, %s16629_s11  ;;  %v14779_v12 = vpop.permute.xlu0 %6425  ;;  %v7335_v42 = vld [vmem:[%s11005_s29 + $0x30] sm:$0xf] }
 0x46f   : > { %6345 = vmatmul.mubr.bf16.vlgmr.msra.gmra.mxu1 %v10260_v48 }
 0x470   : > { %v14781_v14 = vpop.permute.xlu1 %6469  ;;  %10355 = vmatprep.mubr.msk.bf16.mxu1 %vm969_vm0, %v10309_v51  ;;  %v14917_v51 = vld [vmem:[%s11005_s29 + $0x28] sm:$0xff] }
 0x471   : > { %16632 = vst [vmem:[#allocation22_spill] sm:$0xff] %v14781_v14 }
 0x472   : > { %7582 = vrot.lane.b32.xlu1 %v7565_v15, %s16629_s11  ;;  %7580 = vrot.lane.b32.xlu0 %v14356_v8, %s16629_s11  ;;  %v14788_v57 = vpop.permute.xlu0 %6429  ;;  %s16638_s11 = smov 44  }
 0x473   : > { %16633 = vst [vmem:[#allocation15_spill] sm:$0xff] %v14788_v57 }
 0x474   : > { %v14790_v31 = vpop.permute.xlu1 %6473 }
 0x475   : > { %16634 = vst [vmem:[#allocation31_spill] sm:$0xff] %v14790_v31 }
 0x476   : > { %7528 = vrot.lane.b32.xlu1 %v14346_v34, %s16635_s20  ;;  %7526 = vrot.lane.b32.xlu0 %v14334_v36, %s16635_s20  ;;  %v14797_v26 = vpop.permute.xlu0 %6467 }
 0x478   : > { %v14799_v50 = vpop.permute.xlu1 %6511 }
 0x47a   : > { %7532 = vrot.lane.b32.xlu1 %v14359_v16, %s16635_s20  ;;  %7530 = vrot.lane.b32.xlu0 %v7516_v56, %s16635_s20  ;;  %v14805_v59 = vpop.permute.xlu0 %6471  ;;  %v16645_v56 = vld [vmem:[#allocation23_spill] sm:$0xff] }
 0x47c   : > { %v14807_v47 = vpop.permute.xlu1 %6515 }
 0x47e   : > { %7536 = vrot.lane.b32.xlu1 %v7519_v61, %s16635_s20  ;;  %7534 = vrot.lane.b32.xlu0 %v14356_v8, %s16635_s20  ;;  %v14812_v40 = vpop.permute.xlu0 %6475  ;;  %s16639_s20 = smov 45  }
 0x47f   : > { %16636 = vst [vmem:[#allocation30_spill] sm:$0xff] %v14812_v40 }
 0x480   : > { %v14814_v46 = vpop.permute.xlu1 %6519 }
 0x482   : > { %7482 = vrot.lane.b32.xlu1 %v14346_v34, %s16637_s17  ;;  %7480 = vrot.lane.b32.xlu0 %v14334_v36, %s16637_s17  ;;  %v14821_v21 = vpop.permute.xlu0 %6513 }
 0x484   : > { %v14823_v13 = vpop.permute.xlu1 %6557 }
 0x486   : > { %7486 = vrot.lane.b32.xlu1 %v14359_v16, %s16637_s17  ;;  %7484 = vrot.lane.b32.xlu0 %v7470_v30, %s16637_s17  ;;  %v14829_v35 = vpop.permute.xlu0 %6517 }
 0x488   : > { %v14831_v22 = vpop.permute.xlu1 %6561 }
 0x48a   : > { %7490 = vrot.lane.b32.xlu1 %v7473_v32, %s16637_s17  ;;  %7488 = vrot.lane.b32.xlu0 %v14356_v8, %s16637_s17  ;;  %v14836_v11 = vpop.permute.xlu0 %6521  ;;  %s16640_s17 = smov 46  }
 0x48c   : > { %v14838_v6 = vpop.permute.xlu1 %6565 }
 0x48e   : > { %7436 = vrot.lane.b32.xlu1 %v14346_v34, %s16638_s11  ;;  %7434 = vrot.lane.b32.xlu0 %v14334_v36, %s16638_s11  ;;  %v14845_v5 = vpop.permute.xlu0 %6559 }
 0x490   : > { %v14847_v38 = vpop.permute.xlu1 %6603 }
 0x492   : > { %7440 = vrot.lane.b32.xlu1 %v14359_v16, %s16638_s11  ;;  %7438 = vrot.lane.b32.xlu0 %v7424_v7, %s16638_s11  ;;  %v14853_v45 = vpop.permute.xlu0 %6563 }
 0x493   : > { %v6572_v62 = vrot.slane %v14853_v45, 4 }
 0x494   : > { %v14855_v0 = vpop.permute.xlu1 %6607 }
 0x496   : > { %7444 = vrot.lane.b32.xlu1 %v7427_v44, %s16638_s11  ;;  %7442 = vrot.lane.b32.xlu0 %v14356_v8, %s16638_s11  ;;  %v14860_v10 = vpop.permute.xlu0 %6567  ;;  %s16649_s11 = smov 47  }
 0x498   : > { %v14862_v53 = vpop.permute.xlu1 %6611 }
 0x49a   : > { %7390 = vrot.lane.b32.xlu1 %v14346_v34, %s16639_s20  ;;  %7388 = vrot.lane.b32.xlu0 %v14334_v36, %s16639_s20  ;;  %v14869_v2 = vpop.permute.xlu0 %6605  ;;  %v14885_v36 = vld [vmem:[%s11005_s29 + $0xc] sm:$0xff]  ;;  %v14888_v34 = vld [vmem:[%s11005_s29 + $0x4] sm:$0xff] }
 0x49c   : > { %v14871_v39 = vpop.permute.xlu1 %6649 }
 0x49e   : > { %7394 = vrot.lane.b32.xlu1 %v14359_v16, %s16639_s20  ;;  %7392 = vrot.lane.b32.xlu0 %v7378_v55, %s16639_s20  ;;  %v14877_v17 = vpop.permute.xlu0 %6609  ;;  %v16647_v55 = vld [vmem:[#allocation18_spill] sm:$0xff] }
 0x4a0   : > { %v14879_v52 = vpop.permute.xlu1 %6653 }
 0x4a1   : > { %v6663_v18 = vrot.slane %v14879_v52, 4 }
 0x4a2   : > { %7398 = vrot.lane.b32.xlu1 %v7381_v23, %s16639_s20  ;;  %7396 = vrot.lane.b32.xlu0 %v14356_v8, %s16639_s20  ;;  %v14890_v33 = vpop.permute.xlu0 %6613  ;;  %v7332_v8 = vld [vmem:[%s11005_s29 + $0x14] sm:$0xf]  ;;  %s10858_s20 = smov 38  }
 0x4a4   : > { %v14892_v16 = vpop.permute.xlu1 %6657 }
 0x4a6   : > { %7344 = vrot.lane.b32.xlu1 %v14885_v36, %s16640_s17  ;;  %7342 = vrot.lane.b32.xlu0 %v14888_v34, %s16640_s17  ;;  %v14905_v63 = vpop.permute.xlu0 %6651 }
 0x4a7   : > { %v5428_v41 = vpop.f32.mrf.mxu0 }
 0x4a8   : > { %v14903_v24 = vadd.f32 %v5428_v41, %v16641_v28  ;;  %v14907_v37 = vpop.permute.xlu1 %6695 }
 0x4a9   : > { %v5430_v60 = vpop.f32.mrf.mxu0 }
 0x4aa   : > { %16642 = vst [vmem:[#allocation21_spill] sm:$0xff] %v14903_v24  ;;  %v14910_v48 = vadd.f32 %v5430_v60, %v16643_v29  ;;  %7348 = vrot.lane.b32.xlu1 %v14899_v49, %s16640_s17  ;;  %7346 = vrot.lane.b32.xlu0 %v7332_v8, %s16640_s17  ;;  %v6656_v30 = vpop.permute.xlu0 %6655  ;;  %v6662_v24 = vrot.slane %v14905_v63, 4 }
 0x4ab   : > { %v5469_v1 = vpop.f32.mrf.mxu1  ;;  %v5432_v15 = vpop.f32.mrf.mxu0  ;;  %v6664_v29 = vrot.slane %v6656_v30, 4 }
 0x4ac   : > { %16644 = vst [vmem:[#allocation27_spill] sm:$0xff] %v14910_v48  ;;  %v14920_v61 = vadd.f32 %v5469_v1, %v16645_v56  ;;  %v14922_v32 = vpop.permute.xlu1 %6699  ;;  %v7286_v15 = vld [vmem:[%s11005_s29 + $0x14] sm:$0xf]  ;;  %v6707_v1 = vrot.slane %v14907_v37, 4  ;;  %v6661_v48 = vrot.slane %v14871_v39, 4  ;;  %v6615_v56 = vrot.slane %v14847_v38, 4 }
 0x4ad   : > { %v5471_v7 = vpop.f32.mrf.mxu1  ;;  %v5433_v44 = vpop.f32.mrf.mxu0  ;;  %v6709_v27 = vrot.slane %v14922_v32, 4  ;;  %v6620_v32 = vrot.slane %v14890_v33, 4 }
 0x4ae   : > { %16646 = vst [vmem:[#allocation32_spill] sm:$0xff] %v14920_v61  ;;  %v14925_v23 = vadd.f32 %v5471_v7, %v16647_v55  ;;  %7352 = vrot.lane.b32.xlu1 %v7335_v42, %s16640_s17  ;;  %7350 = vrot.lane.b32.xlu0 %v14917_v51, %s16640_s17  ;;  %v6660_v8 = vpop.permute.xlu0 %6659  ;;  %v6569_v7 = vrot.slane %v14823_v13, 4  ;;  %v6619_v44 = vrot.slane %v14862_v53, 4  ;;  %v6618_v55 = vrot.slane %v14877_v17, 4  ;;  %v7289_v42 = vld [vmem:[%s11005_s29 + $0x30] sm:$0xf] }
 0x4af   : > { %v5473_v41 = vpop.f32.mrf.mxu1  ;;  %v6666_v4 = vrot.slane %v6660_v8, 4  ;;  %s16715_s17 = smov 40  }
 0x4b0   : > { %16648 = vst [vmem:[#allocation12_spill] sm:$0xff] %v14925_v23  ;;  %v14930_v28 = vpop.permute.xlu1 %6703  ;;  %v6665_v23 = vrot.slane %v14892_v16, 4  ;;  %v6625_v8 = vsel %vm253_vm1, %v6618_v55, %v6619_v44 }
 0x4b1   : > { %v5474_v60 = vpop.f32.mrf.mxu1  ;;  %v6711_v58 = vrot.slane %v14930_v28, 4 }
 0x4b2   : > { %7298 = vrot.lane.b32.xlu1 %v14885_v36, %s16649_s11  ;;  %7296 = vrot.lane.b32.xlu0 %v14888_v34, %s16649_s11  ;;  %v6698_v41 = vpop.permute.xlu0 %6697  ;;  %v6673_v14 = vsel %vm253_vm1, %v6665_v23, %v6666_v4 }
 0x4b3   : > { %v6708_v61 = vrot.slane %v6698_v41, 4 }
 0x4b4   : > { %v14944_v60 = vpop.permute.xlu1 %6741 }
 0x4b5   : > { %16650 = vst [vmem:[#allocation23_spill] sm:$0xff] %v14944_v60  ;;  %v6713_v57 = vsel %vm253_vm1, %v6707_v1, %v6708_v61  ;;  %v6616_v60 = vrot.slane %v14869_v2, 4  ;;  %v6715_v55 = vsel %vm253_vm1, %v6708_v61, %v6709_v27  ;;  %v6669_v27 = vsel %vm253_vm1, %v6662_v24, %v6663_v18 }
 0x4b6   : > { %7302 = vrot.lane.b32.xlu1 %v14899_v49, %s16649_s11  ;;  %7300 = vrot.lane.b32.xlu0 %v7286_v15, %s16649_s11  ;;  %v6702_v20 = vpop.permute.xlu0 %6701  ;;  %v6671_v15 = vsel %vm253_vm1, %v6664_v29, %v6665_v23  ;;  %v6667_v29 = vsel %vm253_vm1, %v6661_v48, %v6662_v24  ;;  %v6714_v52 = vsel %vm16653_vm4, %v14907_v37, %v6713_v57  ;;  %v6617_v57 = vrot.slane %v14855_v0, 4 }
 0x4b7   : > { %v6710_v9 = vrot.slane %v6702_v20, 4  ;;  %v6672_v54 = vsel %vm16652_vm2, %v6656_v30, %v6671_v15  ;;  %v16656_v30 = vrot.slane %v14838_v6, 4  ;;  %vm16658_vm2 = vcmask 564224   ;;  %v7243_v15 = vld [vmem:[%s11005_s29 + $0x30] sm:$0xf] }
 0x4b8   : > { %v14963_v43 = vpop.permute.xlu1 %6745  ;;  %v6716_v0 = vsel %vm16653_vm4, %v6698_v41, %v6715_v55  ;;  %v6674_v23 = vsel %vm16657_vm7, %v14892_v16, %v6673_v14  ;;  %v6574_v18 = vrot.slane %v14860_v10, 4  ;;  %v6478_v24 = vrot.slane %v14797_v26, 4 }
 0x4b9   : > { %16651 = vst [vmem:[#allocation18_spill] sm:$0xff] %v14963_v43  ;;  %v6717_v1 = vsel %vm253_vm1, %v6710_v9, %v6711_v58  ;;  %v7240_v43 = vld [vmem:[%s11005_s29 + $0x14] sm:$0xf]  ;;  %v16655_v9 = vrot.slane %v14845_v5, 4  ;;  %v6579_v4 = vsel %vm253_vm1, %v6572_v62, %v16656_v30  ;;  %v6626_v62 = vsel %vm16658_vm2, %v14877_v17, %v6625_v8 }
 0x4ba   : > { %7306 = vrot.lane.b32.xlu1 %v7289_v42, %s16649_s11  ;;  %7304 = vrot.lane.b32.xlu0 %v14917_v51, %s16649_s11  ;;  %v6718_v42 = vsel %vm16654_vm5, %v6702_v20, %v6717_v1  ;;  %v6706_v19 = vpop.permute.xlu0 %6705  ;;  %v6668_v20 = vsel %vm16657_vm7, %v14871_v39, %v6667_v29  ;;  %vm16659_vm5 = vmmov %vm16653_vm4  ;;  %v6571_v14 = vrot.slane %v14831_v22, 4  ;;  %v6623_v10 = vsel %vm253_vm1, %v6616_v60, %v6617_v57  ;;  %s16726_s11 = smov 16  }
 0x4bb   : > { %v10338_v33 = vcombine.low %v6714_v52, %v6718_v42  ;;  %v6712_v31 = vrot.slane %v6706_v19, 4  ;;  %v10339_v48 = vcombine.high %v6714_v52, %v6718_v42  ;;  %v6575_v25 = vsel %vm253_vm1, %v6569_v7, %v16655_v9  ;;  %vm16660_vm4 = vmmov %vm16657_vm7 }
 0x4bc   : > { %v14985_v40 = vpop.permute.xlu1 %6749  ;;  %v6621_v19 = vsel %vm253_vm1, %v6615_v56, %v6616_v60  ;;  %v10335_v61 = vcombine.high %v6668_v20, %v6672_v54  ;;  %v10334_v41 = vcombine.low %v6668_v20, %v6672_v54  ;;  %v16661_v8 = vrot.slane %v14821_v21, 4  ;;  %vm16664_vm7 = vmmov %vm16658_vm2 }
 0x4bd   : > { %v6719_v37 = vsel %vm253_vm1, %v6711_v58, %v6712_v31  ;;  %7148 = vmatprep.subr.bf16.mxu0 %v10339_v48  ;;  %v6627_v58 = vsel %vm253_vm1, %v6619_v44, %v6620_v32  ;;  %v6622_v7 = vsel %vm16658_vm2, %v14847_v38, %v6621_v19  ;;  %v6480_v38 = vrot.slane %v14805_v59, 4  ;;  %v7701_v19 = vld [vmem:[%s11005_s29 + $0x14] sm:$0xf] }
 0x4be   : > { %7254 = vrot.lane.b32.xlu1 %v7240_v43, %s16625_s18  ;;  %7252 = vrot.lane.b32.xlu0 %v14885_v36, %s16625_s18  ;;  %v15006_v39 = vpop.permute.xlu0 %6743  ;;  %v6720_v43 = vsel %vm16659_vm5, %v14930_v28, %v6719_v37  ;;  %v6670_v28 = vsel %vm16660_vm4, %v14905_v63, %v6669_v27  ;;  %v10331_v16 = vcombine.high %v6622_v7, %v6626_v62  ;;  %v16662_v54 = vrot.slane %v14799_v50, 4  ;;  %vm16669_vm4 = vmmov %vm16664_vm7 }
 0x4bf   : > { %7149 = vmatpush1.bf16.msra.mxu0 %v10338_v33  ;;  %v10340_v31 = vcombine.low %v6716_v0, %v6720_v43  ;;  %v10341_v17 = vcombine.high %v6716_v0, %v6720_v43  ;;  %v10337_v44 = vcombine.high %v6670_v28, %v6674_v23  ;;  %vm16663_vm5 = vcmask 572416  }
 0x4c0   : > { %v15012_v56 = vpop.permute.xlu1 %6787  ;;  %7150 = vmatprep.subr.bf16.mxu0 %v10335_v61  ;;  %v6529_v63 = vsel %vm253_vm1, %v16662_v54, %v16661_v8  ;;  %v6580_v32 = vsel %vm16663_vm5, %v14853_v45, %v6579_v4  ;;  %v6628_v60 = vsel %vm16664_vm7, %v14862_v53, %v6627_v58  ;;  %v16665_v1 = vrot.slane %v14814_v46, 4  ;;  %vm16667_vm2 = vmmov %vm16663_vm5 }
 0x4c1   : > { %7189 = vmatprep.subr.bf16.mxu1 %v10341_v17  ;;  %v16666_v52 = vrot.slane %v14829_v35, 4  ;;  %v6528_v55 = vrot.slane %v14836_v11, 4  ;;  %v6576_v45 = vsel %vm16667_vm2, %v14823_v13, %v6575_v25  ;;  %v16668_v33 = vmov %v16656_v30  ;;  %vm16674_vm7 = vmmov %vm16667_vm2 }
 0x4c2   : > { %7258 = vrot.lane.b32.xlu1 %v14917_v51, %s16625_s18  ;;  %7256 = vrot.lane.b32.xlu0 %v14899_v49, %s16625_s18  ;;  %v15036_v22 = vpop.permute.xlu0 %6747  ;;  %v6581_v48 = vsel %vm253_vm1, %v16668_v33, %v6574_v18  ;;  %v6432_v53 = vrot.slane %v14767_v3, 4  ;;  %v6624_v9 = vsel %vm16669_vm4, %v14869_v2, %v6623_v10  ;;  %v10330_v30 = vcombine.low %v6622_v7, %v6626_v62  ;;  %v16671_v2 = vld [vmem:[#allocation24_spill] sm:$0xff]  ;;  %vm16681_vm4 = vmmov %vm16674_vm7 }
 0x4c3   : > { %7151 = vmatpush1.bf16.msra.mxu0 %v10334_v41  ;;  %7190 = vmatpush1.bf16.msra.mxu1 %v10340_v31  ;;  %v6533_v42 = vsel %vm253_vm1, %v16666_v52, %v16665_v1  ;;  %v10336_v4 = vcombine.low %v6670_v28, %v6674_v23  ;;  %v6525_v25 = vrot.slane %v14807_v47, 4  ;;  %v16670_v13 = vrot.slane %v14845_v5, 4  ;;  %v16675_v23 = vld [vmem:[#allocation31_spill] sm:$0xff]  ;;  %v16677_v31 = vld [vmem:[#allocation30_spill] sm:$0xff]  ;;  %v16680_v41 = vld [vmem:[#allocation13_spill] sm:$0xff] }
 0x4c4   : > { %v15040_v29 = vpop.permute.xlu1 %6791  ;;  %7152 = vmatprep.subr.bf16.mxu0 %v10331_v16  ;;  %7191 = vmatprep.subr.bf16.mxu1 %v10337_v44  ;;  %v10327_v57 = vcombine.high %v6576_v45, %v6580_v32  ;;  %v10333_v20 = vcombine.high %v6624_v9, %v6628_v60  ;;  %v6434_v27 = vrot.slane %v14779_v12, 4  ;;  %v16672_v37 = vrot.slane %v16671_v2, 4  ;;  %v16682_v44 = vld [vmem:[#allocation22_spill] sm:$0xff]  ;;  %v16689_v33 = vld [vmem:[#allocation28_spill] sm:$0xff] }
 0x4c5   : > { %v6577_v11 = vsel %vm253_vm1, %v16670_v13, %v6571_v14  ;;  %vm16673_vm5 = vcmask 580608   ;;  %v6582_v0 = vsel %vm16674_vm7, %v14838_v6, %v6581_v48  ;;  %v16676_v18 = vrot.slane %v16675_v23, 4 }
 0x4c6   : > { %7711 = vrot.lane.b32.xlu1 %v14888_v34, %s10858_s20  ;;  %7260 = vrot.lane.b32.xlu0 %v7243_v15, %s16625_s18  ;;  %v6483_v61 = vsel %vm253_vm1, %v16672_v37, %v6478_v24  ;;  %v6534_v62 = vsel %vm16673_vm5, %v14829_v35, %v6533_v42  ;;  %v15072_v47 = vpop.permute.xlu0 %6751  ;;  %v6482_v17 = vrot.slane %v16677_v31, 4  ;;  %vm16678_vm2 = vmmov %vm16673_vm5  ;;  %v16679_v35 = vmov %v16665_v1  ;;  %s10859_s18 = smov 39  }
 0x4c7   : > { %7153 = vmatpush1.bf16.msra.mxu0 %v10330_v30  ;;  %7192 = vmatpush1.bf16.msra.mxu1 %v10336_v4  ;;  %v6487_v58 = vsel %vm253_vm1, %v6480_v38, %v16676_v18  ;;  %v6530_v7 = vsel %vm16678_vm2, %v14799_v50, %v6529_v63  ;;  %v6535_v28 = vsel %vm253_vm1, %v16679_v35, %v6528_v55  ;;  %v6386_v14 = vrot.slane %v16680_v41, 4  ;;  %v16684_v63 = vld [vmem:[#allocation16_spill] sm:$0xff]  ;;  %vm16688_vm7 = vmmov %vm16678_vm2  ;;  %v16691_v30 = vld [vmem:[#allocation15_spill] sm:$0xff] }
 0x4c8   : > { %v15076_v43 = vpop.permute.xlu1 %6795  ;;  %7154 = vmatprep.subr.bf16.mxu0 %v10327_v57  ;;  %7193 = vmatprep.subr.bf16.mxu1 %v10333_v20  ;;  %v6578_v6 = vsel %vm16681_vm4, %v14845_v5, %v6577_v11  ;;  %v10326_v10 = vcombine.low %v6576_v45, %v6580_v32  ;;  %v10332_v16 = vcombine.low %v6624_v9, %v6628_v60  ;;  %v6479_v50 = vrot.slane %v16682_v44, 4  ;;  %v16685_v5 = vld [vmem:[#allocation19_spill] sm:$0xff]  ;;  %vm16694_vm4 = vmmov %vm16688_vm7  ;;  %v16695_v20 = vld [vmem:[#allocation20_spill] sm:$0xff] }
 0x4c9   : > { %v16683_v15 = vmov %v16661_v8  ;;  %v10323_v8 = vcombine.high %v6530_v7, %v6534_v62  ;;  %v10329_v54 = vcombine.high %v6578_v6, %v6582_v0  ;;  %v6388_v1 = vrot.slane %v16684_v63, 4  ;;  %v16701_v35 = vld [vmem:[#allocation17_spill] sm:$0xff] }
 0x4ca   : > { %7715 = vrot.lane.b32.xlu1 %v7701_v19, %s10858_s20  ;;  %7713 = vrot.lane.b32.xlu0 %v14885_v36, %s10858_s20  ;;  %v6531_v38 = vsel %vm253_vm1, %v16683_v15, %v6525_v25  ;;  %v16686_v32 = vrot.slane %v16685_v5, 4  ;;  %vm16687_vm5 = vcmask 588800   ;;  %v15105_v42 = vpop.permute.xlu0 %6789  ;;  %v6536_v55 = vsel %vm16688_vm7, %v14814_v46, %v6535_v28 }
 0x4cb   : > { %v6488_v52 = vsel %vm16687_vm5, %v14805_v59, %v6487_v58  ;;  %7155 = vmatpush1.bf16.msra.mxu0 %v10326_v10  ;;  %7194 = vmatpush1.bf16.msra.mxu1 %v10332_v16  ;;  %v16690_v48 = vrot.slane %v16689_v33, 4  ;;  %v6436_v4 = vrot.slane %v16691_v30, 4  ;;  %vm16692_vm2 = vmmov %vm16687_vm5  ;;  %v16693_v59 = vmov %v16676_v18  ;;  %v16698_v18 = vld [vmem:[#allocation14_spill] sm:$0xff] }
 0x4cc   : > { %v6437_v60 = vsel %vm253_vm1, %v16686_v32, %v6432_v53  ;;  %v15109_v45 = vpop.permute.xlu1 %6834  ;;  %v6484_v25 = vsel %vm16692_vm2, %v16671_v2, %v6483_v61  ;;  %v6489_v13 = vsel %vm253_vm1, %v16693_v59, %v6482_v17  ;;  %7156 = vmatprep.subr.bf16.mxu0 %v10323_v8  ;;  %7195 = vmatprep.subr.bf16.mxu1 %v10329_v54  ;;  %v6433_v19 = vrot.slane %v16695_v20, 4  ;;  %v7704_v61 = vld [vmem:[%s11005_s29 + $0x30] sm:$0xf]  ;;  %vm16700_vm7 = vmmov %vm16692_vm2 }
 0x4cd   : > { %v6441_v9 = vsel %vm253_vm1, %v6434_v27, %v16690_v48  ;;  %v6532_v46 = vsel %vm16694_vm4, %v14821_v21, %v6531_v38  ;;  %v10322_v11 = vcombine.low %v6530_v7, %v6534_v62  ;;  %v10328_v57 = vcombine.low %v6578_v6, %v6582_v0  ;;  %v16696_v21 = vld [vmem:[#allocation25_spill] sm:$0xff]  ;;  %v16702_v6 = vld [vmem:[#allocation26_spill] sm:$0xff]  ;;  %vm16706_vm4 = vmmov %vm16700_vm7 }
 0x4ce   : > { %7719 = vrot.lane.b32.xlu1 %v14917_v51, %s10858_s20  ;;  %7717 = vrot.lane.b32.xlu0 %v14899_v49, %s10858_s20  ;;  %v6485_v27 = vsel %vm253_vm1, %v6478_v24, %v6479_v50  ;;  %v10319_v2 = vcombine.high %v6484_v25, %v6488_v52  ;;  %v10325_v37 = vcombine.high %v6532_v46, %v6536_v55  ;;  %v16697_v62 = vrot.slane %v16696_v21, 4  ;;  %v15139_v17 = vpop.permute.xlu0 %6793 }
 0x4cf   : > { %v6390_v58 = vrot.slane %v16698_v18, 4  ;;  %vm16699_vm5 = vcmask 596992   ;;  %7157 = vmatpush1.bf16.msra.mxu0 %v10322_v11  ;;  %7196 = vmatpush1.bf16.msra.mxu1 %v10328_v57  ;;  %v6490_v24 = vsel %vm16700_vm7, %v16675_v23, %v6489_v13  ;;  %v6387_v28 = vrot.slane %v16701_v35, 4 }
 0x4d0   : > { %v6391_v0 = vsel %vm253_vm1, %v16697_v62, %v6386_v14  ;;  %v6442_v31 = vsel %vm16699_vm5, %v14779_v12, %v6441_v9  ;;  %v15143_v7 = vpop.permute.xlu1 %6838  ;;  %v16703_v10 = vrot.slane %v16702_v6, 4  ;;  %vm16704_vm2 = vmmov %vm16699_vm5  ;;  %v16705_v12 = vmov %v16690_v48  ;;  %7158 = vmatprep.subr.bf16.mxu0 %v10319_v2  ;;  %7197 = vmatprep.subr.bf16.mxu1 %v10325_v37 }
 0x4d1   : > { %v6438_v44 = vsel %vm16704_vm2, %v16685_v5, %v6437_v60  ;;  %v6443_v50 = vsel %vm253_vm1, %v16705_v12, %v6436_v4  ;;  %v6486_v23 = vsel %vm16706_vm4, %v14797_v26, %v6485_v27  ;;  %v10318_v15 = vcombine.low %v6484_v25, %v6488_v52  ;;  %v7654_v5 = vld [vmem:[%s11005_s29 + $0x14] sm:$0xf]  ;;  %vm16709_vm7 = vmmov %vm16704_vm2 }
 0x4d2   : > { %v6395_v16 = vsel %vm253_vm1, %v6388_v1, %v16703_v10  ;;  %v10324_v38 = vcombine.low %v6532_v46, %v6536_v55  ;;  %7664 = vrot.lane.b32.xlu1 %v14888_v34, %s10859_s18  ;;  %7721 = vrot.lane.b32.xlu0 %v7704_v61, %s10858_s20  ;;  %v6439_v8 = vsel %vm253_vm1, %v6432_v53, %v6433_v19  ;;  %vm16707_vm5 = vcmask 605184   ;;  %v15168_v52 = vpop.permute.xlu0 %6797  ;;  %vm16711_vm4 = vmmov %vm16709_vm7  ;;  %s16736_s20 = smov 18  }
 0x4d3   : > { %v10315_v54 = vcombine.high %v6438_v44, %v6442_v31  ;;  %v10321_v1 = vcombine.high %v6486_v23, %v6490_v24  ;;  %v6396_v32 = vsel %vm16707_vm5, %v16684_v63, %v6395_v16  ;;  %v16708_v26 = vmov %v16703_v10  ;;  %7159 = vmatpush1.bf16.msra.mxu0 %v10318_v15  ;;  %vm16710_vm2 = vmmov %vm16707_vm5  ;;  %v16714_v10 = vld [vmem:[#allocation23_spill] sm:$0xff] }
 0x4d4   : > { %v6397_v60 = vsel %vm253_vm1, %v16708_v26, %v6390_v58  ;;  %7198 = vmatpush1.bf16.msra.mxu1 %v10324_v38  ;;  %v6444_v55 = vsel %vm16709_vm7, %v16689_v33, %v6443_v50  ;;  %v15172_v48 = vpop.permute.xlu1 %6842  ;;  %v6393_v53 = vsel %vm253_vm1, %v6386_v14, %v6387_v28  ;;  %v6392_v63 = vsel %vm16710_vm2, %v16696_v21, %v6391_v0  ;;  %vm16712_vm5 = vmmov %vm16710_vm2  ;;  %v7657_v0 = vld [vmem:[%s11005_s29 + $0x30] sm:$0xf] }
 0x4d5   : > { %7160 = vmatprep.subr.bf16.mxu0 %v10315_v54  ;;  %7199 = vmatprep.subr.bf16.mxu1 %v10321_v1  ;;  %v6440_v9 = vsel %vm16711_vm4, %v14767_v3, %v6439_v8  ;;  %v10314_v30 = vcombine.low %v6438_v44, %v6442_v31  ;;  %v10320_v4 = vcombine.low %v6486_v23, %v6490_v24  ;;  %vm16713_vm7 = vmmov %vm16710_vm2  ;;  %v6803_v46 = vrot.slane %v15076_v43, 4  ;;  %v7608_v8 = vld [vmem:[%s11005_s29 + $0x14] sm:$0xf] }
 0x4d6   : > { %7668 = vrot.lane.b32.xlu1 %v7654_v5, %s10859_s18  ;;  %7666 = vrot.lane.b32.xlu0 %v14885_v36, %s10859_s18  ;;  %v10311_v33 = vcombine.high %v6392_v63, %v6396_v32  ;;  %v10317_v25 = vcombine.high %v6440_v9, %v6444_v55  ;;  %v6398_v14 = vsel %vm16712_vm5, %v16702_v6, %v6397_v60  ;;  %v15188_v13 = vpop.permute.xlu0 %6836  ;;  %v6802_v11 = vrot.slane %v15139_v17, 4 }
 0x4d7   : > { %v6394_v59 = vsel %vm16713_vm7, %v16680_v41, %v6393_v53  ;;  %7161 = vmatpush1.bf16.msra.mxu0 %v10314_v30  ;;  %v6846_v57 = vrot.slane %v15109_v45, 4  ;;  %v6847_v20 = vrot.slane %v15188_v13, 4  ;;  %v10310_v19 = vcombine.low %v6392_v63, %v6396_v32  ;;  %v16716_v53 = vld [vmem:[#allocation18_spill] sm:$0xff] }
 0x4d8   : > { %7200 = vmatpush1.bf16.msra.mxu1 %v10320_v4  ;;  %v15190_v3 = vpop.permute.xlu1 %7250  ;;  %7162 = vmatprep.subr.bf16.mxu0 %v10311_v33  ;;  %v6757_v41 = vrot.slane %v14985_v40, 4  ;;  %v10316_v27 = vcombine.low %v6440_v9, %v6444_v55  ;;  %v10313_v2 = vcombine.high %v6394_v59, %v6398_v14  ;;  %v6756_v37 = vrot.slane %v15036_v22, 4 }
 0x4d9   : > { %7201 = vmatprep.subr.bf16.mxu1 %v10317_v25  ;;  %v6799_v61 = vrot.slane %v15012_v56, 4  ;;  %v6800_v21 = vrot.slane %v15105_v42, 4  ;;  %v6850_v62 = vrot.slane %v15172_v48, 4  ;;  %vm6806_vm2 = vcmask 531456  }
 0x4da   : > { %7672 = vrot.lane.b32.xlu1 %v14917_v51, %s10859_s18  ;;  %7670 = vrot.lane.b32.xlu0 %v14899_v49, %s10859_s18  ;;  %v6804_v18 = vrot.slane %v15168_v52, 4  ;;  %vm6853_vm4 = vcmask 523264   ;;  %v6841_v58 = vpop.permute.xlu0 %6840  ;;  %v6810_v24 = vsel %vm253_vm1, %v6802_v11, %v6803_v46  ;;  %v6848_v35 = vrot.slane %v15143_v7, 4 }
 0x4db   : > { %7163 = vmatpush1.bf16.msra.mxu0 %v10310_v19  ;;  %v6852_v28 = vsel %vm253_vm1, %v6846_v57, %v6847_v20  ;;  %v6849_v6 = vrot.slane %v6841_v58, 4  ;;  %v6753_v16 = vrot.slane %v16714_v10, 4  ;;  %v6754_v44 = vrot.slane %v15006_v39, 4 }
 0x4dc   : > { %7202 = vmatpush1.bf16.msra.mxu1 %v10316_v27  ;;  %v15207_v31 = vpop.permute.xlu1 %7574  ;;  %v6801_v12 = vrot.slane %v15040_v29, 4  ;;  %v10312_v50 = vcombine.low %v6394_v59, %v6398_v14  ;;  %v6763_v23 = vsel %vm253_vm1, %v6756_v37, %v6757_v41  ;;  %v6758_v7 = vrot.slane %v15072_v47, 4  ;;  %v7611_v27 = vld [vmem:[%s11005_s29 + $0x30] sm:$0xf] }
 0x4dd   : > { %7203 = vmatprep.subr.bf16.mxu1 %v10313_v2  ;;  %v6805_v15 = vsel %vm253_vm1, %v6799_v61, %v6800_v21  ;;  %v6857_v38 = vsel %vm253_vm1, %v6849_v6, %v6850_v62  ;;  %v6811_v54 = vsel %vm6806_vm2, %v15139_v17, %v6810_v24  ;;  %v6812_v29 = vsel %vm253_vm1, %v6803_v46, %v6804_v18  ;;  %v16721_v6 = vld [vmem:[#allocation29_spill] sm:$0xff] }
 0x4de   : > { %7618 = vrot.lane.b32.xlu1 %v14888_v34, %s16715_s17  ;;  %7674 = vrot.lane.b32.xlu0 %v7657_v0, %s10859_s18  ;;  %v6854_v1 = vsel %vm6853_vm4, %v15109_v45, %v6852_v28  ;;  %v6858_v5 = vsel %vm6853_vm4, %v6841_v58, %v6857_v38  ;;  %v6845_v32 = vpop.permute.xlu0 %6844  ;;  %v6855_v47 = vsel %vm253_vm1, %v6847_v20, %v6848_v35  ;;  %v6755_v63 = vrot.slane %v16716_v53, 4  ;;  %v15265_v0 = vld [vmem:[#allocation6 + $0x40] sm:$0xff]  ;;  %s16741_s18 = smov 19  }
 0x4df   : > { %v10350_v60 = vcombine.low %v6854_v1, %v6858_v5  ;;  %v6851_v52 = vrot.slane %v6845_v32, 4  ;;  %v10351_v55 = vcombine.high %v6854_v1, %v6858_v5  ;;  %v6807_v17 = vsel %vm6806_vm2, %v15012_v56, %v6805_v15 }
 0x4e0   : > { %7204 = vmatpush1.bf16.msra.mxu1 %v10312_v50  ;;  %v15229_v26 = vpop.permute.xlu1 %7578  ;;  %v6759_v45 = vsel %vm253_vm1, %v6753_v16, %v6754_v44  ;;  %v6808_v9 = vsel %vm253_vm1, %v6800_v21, %v6801_v12  ;;  %v10347_v4 = vcombine.high %v6807_v17, %v6811_v54  ;;  %vm16717_vm5 = vcmask 539648   ;;  %v8439_v16 = vld [vmem:[%s11005_s29 + $0x14] sm:$0xf] }
 0x4e1   : > { %v6859_v30 = vsel %vm253_vm1, %v6850_v62, %v6851_v52  ;;  %7174 = vmatprep.subr.bf16.mxu0 %v10351_v55  ;;  %v6764_v33 = vsel %vm16717_vm5, %v15036_v22, %v6763_v23  ;;  %v6856_v25 = vsel %vm6853_vm4, %v15188_v13, %v6855_v47  ;;  %v6813_v59 = vsel %vm6806_vm2, %v15076_v43, %v6812_v29  ;;  %vm16718_vm7 = vmmov %vm16717_vm5 }
 0x4e2   : > { %7622 = vrot.lane.b32.xlu1 %v7608_v8, %s16715_s17  ;;  %7620 = vrot.lane.b32.xlu0 %v14885_v36, %s16715_s17  ;;  %v7573_v56 = vpop.permute.xlu0 %7572  ;;  %v6860_v14 = vsel %vm6853_vm4, %v15172_v48, %v6859_v30  ;;  %v6765_v11 = vsel %vm253_vm1, %v6757_v41, %v6758_v7  ;;  %v6760_v22 = vsel %vm16718_vm7, %v16714_v10, %v6759_v45  ;;  %v7585_v2 = vrot.slane %v15207_v31, 4 }
 0x4e3   : > { %7175 = vmatpush2.bf16.msra.mxu0 %v10350_v60  ;;  %v10352_v57 = vcombine.low %v6856_v25, %v6860_v14  ;;  %v10353_v20 = vcombine.high %v6856_v25, %v6860_v14  ;;  %v6809_v13 = vsel %vm6806_vm2, %v15105_v42, %v6808_v9  ;;  %v10346_v19 = vcombine.low %v6807_v17, %v6811_v54  ;;  %vm16719_vm2 = vmmov %vm16717_vm5 }
 0x4e4   : > { %v7583_v46 = vpop.permute.xlu1 %7582  ;;  %7176 = vmatprep.subr.bf16.mxu0 %v10347_v4  ;;  %v6761_v43 = vsel %vm253_vm1, %v6754_v44, %v6755_v63  ;;  %v10343_v48 = vcombine.high %v6760_v22, %v6764_v33  ;;  %v10349_v41 = vcombine.high %v6809_v13, %v6813_v59  ;;  %v7584_v37 = vrot.slane %v7573_v56, 4  ;;  %vm16720_vm4 = vmmov %vm16719_vm2 }
 0x4e5   : > { %7215 = vmatprep.subr.bf16.mxu1 %v10353_v20  ;;  %v6766_v42 = vsel %vm16719_vm2, %v14985_v40, %v6765_v11  ;;  %v6762_v18 = vsel %vm16720_vm4, %v15006_v39, %v6761_v43  ;;  %v10342_v58 = vcombine.low %v6760_v22, %v6764_v33  ;;  %v10348_v24 = vcombine.low %v6809_v13, %v6813_v59  ;;  %v8393_v33 = vld [vmem:[%s11005_s29 + $0x14] sm:$0xf] }
 0x4e6   : > { %7626 = vrot.lane.b32.xlu1 %v14917_v51, %s16715_s17  ;;  %7624 = vrot.lane.b32.xlu0 %v14899_v49, %s16715_s17  ;;  %v7577_v61 = vpop.permute.xlu0 %7576  ;;  %v7587_v35 = vrot.slane %v15229_v26, 4  ;;  %v7589_v40 = vrot.slane %v7583_v46, 4  ;;  %v10345_v28 = vcombine.high %v6762_v18, %v6766_v42  ;;  %v10308_v10 = vcombine.low %v16721_v6, %v16721_v6 }
 0x4e7   : > { %7177 = vmatpush2.bf16.msra.mxu0 %v10346_v19  ;;  %7216 = vmatpush2.bf16.msra.mxu1 %v10352_v57  ;;  %v7586_v62 = vrot.slane %v7577_v61, 4  ;;  %v7590_v44 = vsel %vm253_vm1, %v7584_v37, %v7585_v2  ;;  %v10357_v50 = vcombine.high %v15265_v0, %v15265_v0  ;;  %v10344_v15 = vcombine.low %v6762_v18, %v6766_v42  ;;  %v8396_v61 = vld [vmem:[%s11005_s29 + $0x30] sm:$0xf] }
 0x4e8   : > { %v15263_v21 = vpop.permute.xlu1 %7528  ;;  %7178 = vmatprep.subr.bf16.mxu0 %v10343_v48  ;;  %7217 = vmatprep.subr.bf16.mxu1 %v10349_v41  ;;  %vm16722_vm5 = vcmask 334848  }
 0x4e9   : > { %v7592_v23 = vsel %vm253_vm1, %v7585_v2, %v7586_v62  ;;  %v7591_v38 = vsel %vm16722_vm5, %v7573_v56, %v7590_v44  ;;  %vm16723_vm7 = vmmov %vm16722_vm5  ;;  %v7539_v17 = vrot.slane %v15263_v21, 4 }
 0x4ea   : > { %8449 = vrot.lane.b32.xlu1 %v14888_v34, %s10850_s22  ;;  %7628 = vrot.lane.b32.xlu0 %v7611_v27, %s16715_s17  ;;  %v7581_v39 = vpop.permute.xlu0 %7580  ;;  %v7593_v29 = vsel %vm16723_vm7, %v15207_v31, %v7592_v23  ;;  %vm16724_vm2 = vmmov %vm16722_vm5  ;;  %v8442_v31 = vld [vmem:[%s11005_s29 + $0x30] sm:$0xf]  ;;  %vm16727_vm5 = vcmask 343040   ;;  %s16746_s17 = smov 20  }
 0x4eb   : > { %7179 = vmatpush2.bf16.msra.mxu0 %v10342_v58  ;;  %7218 = vmatpush2.bf16.msra.mxu1 %v10348_v24  ;;  %v7588_v7 = vrot.slane %v7581_v39, 4  ;;  %vm16725_vm4 = vmmov %vm16724_vm2 }
 0x4ec   : > { %v7533_v12 = vpop.permute.xlu1 %7532  ;;  %7219 = vmatprep.subr.bf16.mxu1 %v10345_v28  ;;  %vm16728_vm7 = vmmov %vm16727_vm5 }
 0x4ed   : > { %v7596_v8 = vsel %vm253_vm1, %v7588_v7, %v7589_v40  ;;  %v7594_v54 = vsel %vm253_vm1, %v7587_v35, %v7588_v7  ;;  %v7541_v30 = vrot.slane %v7533_v12, 4  ;;  %v8347_v40 = vld [vmem:[%s11005_s29 + $0x14] sm:$0xf] }
 0x4ee   : > { %8453 = vrot.lane.b32.xlu1 %v8439_v16, %s10850_s22  ;;  %8451 = vrot.lane.b32.xlu0 %v14885_v36, %s10850_s22  ;;  %v7597_v1 = vsel %vm16724_vm2, %v7581_v39, %v7596_v8  ;;  %v7527_v5 = vpop.permute.xlu0 %7526  ;;  %v7595_v32 = vsel %vm16725_vm4, %v15229_v26, %v7594_v54  ;;  %vm16729_vm2 = vmmov %vm16727_vm5 }
 0x4ef   : > { %7181 = vmatmul.mubr.bf16.vlgmr.msra.gmra.mxu0 %v10308_v10  ;;  %7220 = vmatpush2.bf16.msra.mxu1 %v10344_v15  ;;  %v10388_v60 = vcombine.low %v7593_v29, %v7597_v1  ;;  %v10386_v52 = vcombine.low %v7591_v38, %v7595_v32  ;;  %v10387_v55 = vcombine.high %v7591_v38, %v7595_v32  ;;  %v7538_v45 = vrot.slane %v7527_v5, 4  ;;  %vm16730_vm4 = vmmov %vm16729_vm2  ;;  %v8350_v32 = vld [vmem:[%s11005_s29 + $0x30] sm:$0xf] }
 0x4f0   : > { %v7537_v47 = vpop.permute.xlu1 %7536  ;;  %10402 = vmatprep.mubr.msk.bf16.mxu0 %vm969_vm0, %v10357_v50  ;;  %v10389_v53 = vcombine.high %v7593_v29, %v7597_v1 }
 0x4f1   : > { %8025 = vmatprep.subr.bf16.mxu0 %v10387_v55  ;;  %v7543_v4 = vrot.slane %v7537_v47, 4  ;;  %v7544_v14 = vsel %vm253_vm1, %v7538_v45, %v7539_v17 }
 0x4f2   : > { %8457 = vrot.lane.b32.xlu1 %v14917_v51, %s10850_s22  ;;  %8455 = vrot.lane.b32.xlu0 %v14899_v49, %s10850_s22  ;;  %v7531_v26 = vpop.permute.xlu0 %7530  ;;  %v7545_v20 = vsel %vm16727_vm5, %v7527_v5, %v7544_v14  ;;  %vm16732_vm5 = vcmask 351232  }
 0x4f3   : > { %7222 = vmatmul.mubr.bf16.vlgmr.msra.gmra.mxu1 %v10308_v10  ;;  %8066 = vmatprep.subr.bf16.mxu1 %v10389_v53  ;;  %v7540_v9 = vrot.slane %v7531_v26, 4 }
 0x4f4   : > { %8026 = vmatpush1.bf16.msra.mxu0 %v10386_v52  ;;  %v7483_v63 = vpop.permute.xlu1 %7482  ;;  %8067 = vmatpush1.bf16.msra.mxu1 %v10388_v60 }
 0x4f5   : > { %10403 = vmatprep.mubr.msk.bf16.mxu1 %vm969_vm0, %v10357_v50  ;;  %v7546_v59 = vsel %vm253_vm1, %v7539_v17, %v7540_v9  ;;  %v7493_v62 = vrot.slane %v7483_v63, 4 }
 0x4f6   : > { %8403 = vrot.lane.b32.xlu1 %v14888_v34, %s16726_s11  ;;  %8459 = vrot.lane.b32.xlu0 %v8442_v31, %s10850_s22  ;;  %v7535_v25 = vpop.permute.xlu0 %7534  ;;  %v7547_v22 = vsel %vm16728_vm7, %v15263_v21, %v7546_v59  ;;  %s16731_s22 = smov 17   ;;  %vm16733_vm7 = vmmov %vm16732_vm5 }
 0x4f7   : > { %v7542_v46 = vrot.slane %v7535_v25, 4 }
 0x4f8   : > { %v7487_v56 = vpop.permute.xlu1 %7486 }
 0x4f9   : > { %v7550_v11 = vsel %vm253_vm1, %v7542_v46, %v7543_v4  ;;  %v7548_v57 = vsel %vm253_vm1, %v7541_v30, %v7542_v46  ;;  %v7495_v24 = vrot.slane %v7487_v56, 4 }
 0x4fa   : > { %8407 = vrot.lane.b32.xlu1 %v8393_v33, %s16726_s11  ;;  %8405 = vrot.lane.b32.xlu0 %v14885_v36, %s16726_s11  ;;  %v7551_v13 = vsel %vm16729_vm2, %v7535_v25, %v7550_v11  ;;  %v7481_v19 = vpop.permute.xlu0 %7480  ;;  %v7549_v43 = vsel %vm16730_vm4, %v7533_v12, %v7548_v57  ;;  %vm16734_vm2 = vmmov %vm16732_vm5 }
 0x4fb   : > { %v10384_v41 = vcombine.low %v7547_v22, %v7551_v13  ;;  %v10382_v27 = vcombine.low %v7545_v20, %v7549_v43  ;;  %v10383_v2 = vcombine.high %v7545_v20, %v7549_v43  ;;  %v10385_v37 = vcombine.high %v7547_v22, %v7551_v13  ;;  %vm16735_vm4 = vmmov %vm16734_vm2  ;;  %v8304_v43 = vld [vmem:[%s11005_s29 + $0x30] sm:$0xf] }
 0x4fc   : > { %v7491_v48 = vpop.permute.xlu1 %7490  ;;  %v7492_v18 = vrot.slane %v7481_v19, 4 }
 0x4fd   : > { %8027 = vmatprep.subr.bf16.mxu0 %v10383_v2  ;;  %8068 = vmatprep.subr.bf16.mxu1 %v10385_v37  ;;  %v7497_v35 = vrot.slane %v7491_v48, 4 }
 0x4fe   : > { %8411 = vrot.lane.b32.xlu1 %v14917_v51, %s16726_s11  ;;  %8409 = vrot.lane.b32.xlu0 %v14899_v49, %s16726_s11  ;;  %v7485_v42 = vpop.permute.xlu0 %7484  ;;  %v7498_v10 = vsel %vm253_vm1, %v7492_v18, %v7493_v62 }
 0x4ff   : > { %8028 = vmatpush1.bf16.msra.mxu0 %v10382_v27  ;;  %8069 = vmatpush1.bf16.msra.mxu1 %v10384_v41  ;;  %v7494_v58 = vrot.slane %v7485_v42, 4  ;;  %v7499_v50 = vsel %vm16732_vm5, %v7481_v19, %v7498_v10  ;;  %vm16737_vm5 = vcmask 359424  }
 0x500   : > { %v7437_v21 = vpop.permute.xlu1 %7436 }
 0x501   : > { %v7500_v16 = vsel %vm253_vm1, %v7493_v62, %v7494_v58  ;;  %v7447_v52 = vrot.slane %v7437_v21, 4 }
 0x502   : > { %8357 = vrot.lane.b32.xlu1 %v14888_v34, %s16731_s22  ;;  %8413 = vrot.lane.b32.xlu0 %v8396_v61, %s16726_s11  ;;  %v7489_v28 = vpop.permute.xlu0 %7488  ;;  %v7501_v23 = vsel %vm16733_vm7, %v7483_v63, %v7500_v16  ;;  %v8301_v63 = vld [vmem:[%s11005_s29 + $0x14] sm:$0xf]  ;;  %vm16738_vm7 = vmmov %vm16737_vm5  ;;  %s16755_s11 = smov 21  }
 0x503   : > { %v7496_v44 = vrot.slane %v7489_v28, 4 }
 0x504   : > { %v7441_v6 = vpop.permute.xlu1 %7440 }
 0x505   : > { %v7504_v39 = vsel %vm253_vm1, %v7496_v44, %v7497_v35  ;;  %v7502_v12 = vsel %vm253_vm1, %v7495_v24, %v7496_v44  ;;  %v7449_v31 = vrot.slane %v7441_v6, 4 }
 0x506   : > { %8361 = vrot.lane.b32.xlu1 %v8347_v40, %s16731_s22  ;;  %8359 = vrot.lane.b32.xlu0 %v14885_v36, %s16731_s22  ;;  %v7505_v7 = vsel %vm16734_vm2, %v7489_v28, %v7504_v39  ;;  %v7435_v15 = vpop.permute.xlu0 %7434  ;;  %v7503_v38 = vsel %vm16735_vm4, %v7487_v56, %v7502_v12  ;;  %vm16739_vm2 = vmmov %vm16737_vm5 }
 0x507   : > { %v10380_v54 = vcombine.low %v7501_v23, %v7505_v7  ;;  %v10378_v29 = vcombine.low %v7499_v50, %v7503_v38  ;;  %v10379_v1 = vcombine.high %v7499_v50, %v7503_v38  ;;  %v10381_v5 = vcombine.high %v7501_v23, %v7505_v7  ;;  %vm16740_vm4 = vmmov %vm16739_vm2  ;;  %v10664_v23 = vld [vmem:[%s11005_s29 + $0x20] sm:$0xff]  ;;  %v8258_v7 = vld [vmem:[%s11005_s29 + $0x30] sm:$0xf] }
 0x508   : > { %v7445_v8 = vpop.permute.xlu1 %7444  ;;  %v7446_v55 = vrot.slane %v7435_v15, 4 }
 0x509   : > { %8029 = vmatprep.subr.bf16.mxu0 %v10379_v1  ;;  %8070 = vmatprep.subr.bf16.mxu1 %v10381_v5  ;;  %v7451_v26 = vrot.slane %v7445_v8, 4  ;;  %v10665_v1 = vld [vmem:[%s11005_s29 + $0x4] sm:$0xff] }
 0x50a   : > { %8365 = vrot.lane.b32.xlu1 %v14917_v51, %s16731_s22  ;;  %8363 = vrot.lane.b32.xlu0 %v14899_v49, %s16731_s22  ;;  %v7439_v47 = vpop.permute.xlu0 %7438  ;;  %v7452_v9 = vsel %vm253_vm1, %v7446_v55, %v7447_v52 }
 0x50b   : > { %8030 = vmatpush1.bf16.msra.mxu0 %v10378_v29  ;;  %8071 = vmatpush1.bf16.msra.mxu1 %v10380_v54  ;;  %v7448_v53 = vrot.slane %v7439_v47, 4  ;;  %v7453_v56 = vsel %vm16737_vm5, %v7435_v15, %v7452_v9  ;;  %vm16742_vm5 = vcmask 367616   ;;  %v15387_v47 = vld [vmem:[%s11005_s29 + $0xc] sm:$0xff]  ;;  %v15400_v9 = vld [vmem:[%s11005_s29 + $0x20] sm:$0xff] }
 0x50c   : > { %v7391_v60 = vpop.permute.xlu1 %7390 }
 0x50d   : > { %v7454_v30 = vsel %vm253_vm1, %v7447_v52, %v7448_v53  ;;  %v7401_v27 = vrot.slane %v7391_v60, 4 }
 0x50e   : > { %8311 = vrot.lane.b32.xlu1 %v14888_v34, %s16736_s20  ;;  %8367 = vrot.lane.b32.xlu0 %v8350_v32, %s16731_s22  ;;  %v7443_v17 = vpop.permute.xlu0 %7442  ;;  %v7455_v14 = vsel %vm16738_vm7, %v7437_v21, %v7454_v30  ;;  %v8255_v21 = vld [vmem:[%s11005_s29 + $0x14] sm:$0xf]  ;;  %vm16743_vm7 = vmmov %vm16742_vm5  ;;  %s16760_s22 = smov 22  }
 0x50f   : > { %v7450_v4 = vrot.slane %v7443_v17, 4  ;;  %v8209_v32 = vld [vmem:[%s11005_s29 + $0x14] sm:$0xf] }
 0x510   : > { %v7395_v45 = vpop.permute.xlu1 %7394 }
 0x511   : > { %v7458_v33 = vsel %vm253_vm1, %v7450_v4, %v7451_v26  ;;  %v7456_v25 = vsel %vm253_vm1, %v7449_v31, %v7450_v4  ;;  %v7403_v61 = vrot.slane %v7395_v45, 4 }
 0x512   : > { %8315 = vrot.lane.b32.xlu1 %v8301_v63, %s16736_s20  ;;  %8313 = vrot.lane.b32.xlu0 %v14885_v36, %s16736_s20  ;;  %v7459_v59 = vsel %vm16739_vm2, %v7443_v17, %v7458_v33  ;;  %v7389_v46 = vpop.permute.xlu0 %7388  ;;  %v7457_v11 = vsel %vm16740_vm4, %v7441_v6, %v7456_v25  ;;  %vm16744_vm2 = vmmov %vm16742_vm5  ;;  %v16750_v33 = vld [vmem:[#allocation21_spill] sm:$0xff] }
 0x513   : > { %v10376_v20 = vcombine.low %v7455_v14, %v7459_v59  ;;  %v10374_v22 = vcombine.low %v7453_v56, %v7457_v11  ;;  %v10375_v13 = vcombine.high %v7453_v56, %v7457_v11  ;;  %v10377_v19 = vcombine.high %v7455_v14, %v7459_v59  ;;  %vm16745_vm4 = vmmov %vm16744_vm2 }
 0x514   : > { %v7399_v57 = vpop.permute.xlu1 %7398  ;;  %v7400_v2 = vrot.slane %v7389_v46, 4 }
 0x515   : > { %8031 = vmatprep.subr.bf16.mxu0 %v10375_v13  ;;  %8072 = vmatprep.subr.bf16.mxu1 %v10377_v19  ;;  %v7405_v42 = vrot.slane %v7399_v57, 4 }
 0x516   : > { %8319 = vrot.lane.b32.xlu1 %v14917_v51, %s16736_s20  ;;  %8317 = vrot.lane.b32.xlu0 %v14899_v49, %s16736_s20  ;;  %v7393_v48 = vpop.permute.xlu0 %7392  ;;  %v7406_v18 = vsel %vm253_vm1, %v7400_v2, %v7401_v27 }
 0x517   : > { %8032 = vmatpush1.bf16.msra.mxu0 %v10374_v22  ;;  %8073 = vmatpush1.bf16.msra.mxu1 %v10376_v20  ;;  %v7402_v37 = vrot.slane %v7393_v48, 4  ;;  %v7407_v40 = vsel %vm16742_vm5, %v7389_v46, %v7406_v18  ;;  %vm16747_vm5 = vcmask 375808   ;;  %v16752_v22 = vld [vmem:[#allocation27_spill] sm:$0xff] }
 0x518   : > { %v7345_v41 = vpop.permute.xlu1 %7344 }
 0x519   : > { %v7408_v58 = vsel %vm253_vm1, %v7401_v27, %v7402_v37  ;;  %v7355_v15 = vrot.slane %v7345_v41, 4  ;;  %v8212_v27 = vld [vmem:[%s11005_s29 + $0x30] sm:$0xf] }
 0x51a   : > { %8265 = vrot.lane.b32.xlu1 %v14888_v34, %s16741_s18  ;;  %8321 = vrot.lane.b32.xlu0 %v8304_v43, %s16736_s20  ;;  %v7397_v62 = vpop.permute.xlu0 %7396  ;;  %v7409_v28 = vsel %vm16743_vm7, %v7391_v60, %v7408_v58  ;;  %vm16748_vm7 = vmmov %vm16747_vm5  ;;  %v10666_v43 = vld [vmem:[%s11005_s29 + $0x28] sm:$0xff]  ;;  %s10860_s20 = smov 12  }
 0x51b   : > { %v7404_v24 = vrot.slane %v7397_v62, 4  ;;  %v16753_v37 = vld [vmem:[#allocation32_spill] sm:$0xff] }
 0x51c   : > { %v7349_v49 = vpop.permute.xlu1 %7348 }
 0x51d   : > { %v7412_v34 = vsel %vm253_vm1, %v7404_v24, %v7405_v42  ;;  %v7410_v35 = vsel %vm253_vm1, %v7403_v61, %v7404_v24 }
 0x51e   : > { %8269 = vrot.lane.b32.xlu1 %v8255_v21, %s16741_s18  ;;  %8267 = vrot.lane.b32.xlu0 %v14885_v36, %s16741_s18  ;;  %v7413_v6 = vsel %vm16744_vm2, %v7397_v62, %v7412_v34  ;;  %v7343_v10 = vpop.permute.xlu0 %7342  ;;  %v7411_v16 = vsel %vm16745_vm4, %v7395_v45, %v7410_v35  ;;  %vm16749_vm2 = vmmov %vm16747_vm5  ;;  %v16754_v34 = vld [vmem:[#allocation12_spill] sm:$0xff] }
 0x51f   : > { %v10372_v39 = vcombine.low %v7409_v28, %v7413_v6  ;;  %v10370_v12 = vcombine.low %v7407_v40, %v7411_v16  ;;  %v10371_v50 = vcombine.high %v7407_v40, %v7411_v16  ;;  %v10373_v36 = vcombine.high %v7409_v28, %v7413_v6  ;;  %vm16751_vm4 = vmmov %vm16749_vm2  ;;  %v8163_v6 = vld [vmem:[%s11005_s29 + $0x14] sm:$0xf] }
 0x520   : > { %v7353_v44 = vpop.permute.xlu1 %7352  ;;  %v7354_v38 = vrot.slane %v7343_v10, 4 }
 0x521   : > { %8033 = vmatprep.subr.bf16.mxu0 %v10371_v50  ;;  %8074 = vmatprep.subr.bf16.mxu1 %v10373_v36  ;;  %v7359_v5 = vrot.slane %v7353_v44, 4 }
 0x522   : > { %8273 = vrot.lane.b32.xlu1 %v14917_v51, %s16741_s18  ;;  %8271 = vrot.lane.b32.xlu0 %v10664_v23, %s16741_s18  ;;  %v7347_v8 = vpop.permute.xlu0 %7346  ;;  %v7357_v51 = vrot.slane %v7349_v49, 4  ;;  %v7360_v60 = vsel %vm253_vm1, %v7354_v38, %v7355_v15 }
 0x523   : > { %8034 = vmatpush1.bf16.msra.mxu0 %v10370_v12  ;;  %8075 = vmatpush1.bf16.msra.mxu1 %v10372_v39  ;;  %v7356_v29 = vrot.slane %v7347_v8, 4  ;;  %v7361_v26 = vsel %vm16747_vm5, %v7343_v10, %v7360_v60  ;;  %vm16756_vm5 = vcmask 384000  }
 0x524   : > { %v15380_v54 = vpop.permute.xlu1 %7298 }
 0x525   : > { %v7362_v53 = vsel %vm253_vm1, %v7355_v15, %v7356_v29  ;;  %v7309_v62 = vrot.slane %v15380_v54, 4  ;;  %v15439_v15 = vld [vmem:[%s11005_s29 + $0x28] sm:$0xff] }
 0x526   : > { %8219 = vrot.lane.b32.xlu1 %v10665_v1, %s16746_s17  ;;  %8275 = vrot.lane.b32.xlu0 %v8258_v7, %s16741_s18  ;;  %v7351_v52 = vpop.permute.xlu0 %7350  ;;  %v7363_v30 = vsel %vm16748_vm7, %v7345_v41, %v7362_v53  ;;  %v15416_v41 = vld [vmem:[%s11005_s29 + $0x4] sm:$0xff]  ;;  %vm16757_vm7 = vmmov %vm16756_vm5  ;;  %s10861_s18 = smov 13  }
 0x527   : > { %v7358_v31 = vrot.slane %v7351_v52, 4 }
 0x528   : > { %v15390_v55 = vpop.permute.xlu1 %7302 }
 0x529   : > { %v7366_v63 = vsel %vm253_vm1, %v7358_v31, %v7359_v5  ;;  %v7364_v45 = vsel %vm253_vm1, %v7357_v51, %v7358_v31  ;;  %v7311_v40 = vrot.slane %v15390_v55, 4 }
 0x52a   : > { %8223 = vrot.lane.b32.xlu1 %v8209_v32, %s16746_s17  ;;  %8221 = vrot.lane.b32.xlu0 %v15387_v47, %s16746_s17  ;;  %v7367_v4 = vsel %vm16749_vm2, %v7351_v52, %v7366_v63  ;;  %v7297_v56 = vpop.permute.xlu0 %7296  ;;  %v7365_v14 = vsel %vm16751_vm4, %v7349_v49, %v7364_v45  ;;  %vm16758_vm2 = vmmov %vm16756_vm5  ;;  %v8166_v63 = vld [vmem:[%s11005_s29 + $0x30] sm:$0xf] }
 0x52b   : > { %v6305_v17 = vpop.f32.mrf.mxu0  ;;  %v10368_v46 = vcombine.low %v7363_v30, %v7367_v4  ;;  %v10366_v57 = vcombine.low %v7361_v26, %v7365_v14  ;;  %v10367_v20 = vcombine.high %v7361_v26, %v7365_v14  ;;  %v10369_v19 = vcombine.high %v7363_v30, %v7367_v4  ;;  %vm16759_vm4 = vmmov %vm16758_vm2 }
 0x52c   : > { %v15405_v25 = vadd.f32 %v6305_v17, %v16750_v33  ;;  %v7307_v59 = vpop.permute.xlu1 %7306  ;;  %v7308_v49 = vrot.slane %v7297_v56, 4 }
 0x52d   : > { %v6307_v11 = vpop.f32.mrf.mxu0  ;;  %8035 = vmatprep.subr.bf16.mxu0 %v10367_v20  ;;  %8076 = vmatprep.subr.bf16.mxu1 %v10369_v19  ;;  %v7313_v28 = vrot.slane %v7307_v59, 4 }
 0x52e   : > { %v15409_v13 = vadd.f32 %v6307_v11, %v16752_v22  ;;  %8227 = vrot.lane.b32.xlu1 %v10666_v43, %s16746_s17  ;;  %8225 = vrot.lane.b32.xlu0 %v15400_v9, %s16746_s17  ;;  %v7301_v42 = vpop.permute.xlu0 %7300  ;;  %v7314_v39 = vsel %vm253_vm1, %v7308_v49, %v7309_v62 }
 0x52f   : > { %v6346_v48 = vpop.f32.mrf.mxu1  ;;  %v6309_v2 = vpop.f32.mrf.mxu0  ;;  %8036 = vmatpush1.bf16.msra.mxu0 %v10366_v57  ;;  %8077 = vmatpush1.bf16.msra.mxu1 %v10368_v46  ;;  %v7310_v18 = vrot.slane %v7301_v42, 4  ;;  %v7315_v38 = vsel %vm16756_vm5, %v7297_v56, %v7314_v39  ;;  %v8117_v56 = vld [vmem:[%s11005_s29 + $0x14] sm:$0xf]  ;;  %vm7730_vm5 = vcmask 310272  }
 0x530   : > { %v15420_v61 = vadd.f32 %v6346_v48, %v16753_v37  ;;  %v7255_v21 = vpop.permute.xlu1 %7254 }
 0x531   : > { %v6348_v58 = vpop.f32.mrf.mxu1  ;;  %v6310_v24 = vpop.f32.mrf.mxu0  ;;  %v7316_v12 = vsel %vm253_vm1, %v7309_v62, %v7310_v18  ;;  %v7264_v45 = vrot.slane %v7255_v21, 4  ;;  %v8120_v18 = vld [vmem:[%s11005_s29 + $0x30] sm:$0xf] }
 0x532   : > { %v15424_v35 = vadd.f32 %v6348_v58, %v16754_v34  ;;  %8173 = vrot.lane.b32.xlu1 %v15416_v41, %s16755_s11  ;;  %8229 = vrot.lane.b32.xlu0 %v8212_v27, %s16746_s17  ;;  %v7305_v16 = vpop.permute.xlu0 %7304  ;;  %v7317_v8 = vsel %vm16757_vm7, %v15380_v54, %v7316_v12  ;;  %v7262_v54 = vrot.slane %v15190_v3, 4  ;;  %vm7683_vm7 = vcmask 318464  }
 0x533   : > { %v6350_v10 = vpop.f32.mrf.mxu1  ;;  %v7312_v50 = vrot.slane %v7305_v16, 4 }
 0x534   : > { %v7259_v44 = vpop.permute.xlu1 %7258  ;;  %v8578_v10 = vld [vmem:[%s11005_s29 + $0x14] sm:$0xf] }
 0x535   : > { %v6351_v36 = vpop.f32.mrf.mxu1  ;;  %v7320_v23 = vsel %vm253_vm1, %v7312_v50, %v7313_v28  ;;  %v7318_v7 = vsel %vm253_vm1, %v7311_v40, %v7312_v50  ;;  %v7266_v26 = vrot.slane %v7259_v44, 4 }
 0x536   : > { %8177 = vrot.lane.b32.xlu1 %v8163_v6, %s16755_s11  ;;  %8175 = vrot.lane.b32.xlu0 %v15387_v47, %s16755_s11  ;;  %v7321_v29 = vsel %vm16758_vm2, %v7305_v16, %v7320_v23  ;;  %v7253_v1 = vpop.permute.xlu0 %7252  ;;  %v7319_v51 = vsel %vm16759_vm4, %v15390_v55, %v7318_v7  ;;  %vm16761_vm2 = vcmask 326656  }
 0x537   : > { %v10364_v32 = vcombine.low %v7317_v8, %v7321_v29  ;;  %v7263_v60 = vrot.slane %v7253_v1, 4  ;;  %v10362_v52 = vcombine.low %v7315_v38, %v7319_v51  ;;  %v10363_v53 = vcombine.high %v7315_v38, %v7319_v51  ;;  %vm16762_vm4 = vmmov %vm16761_vm2 }
 0x538   : > { %v15447_v5 = vpop.permute.xlu1 %7711  ;;  %v10365_v31 = vcombine.high %v7317_v8, %v7321_v29 }
 0x539   : > { %8037 = vmatprep.subr.bf16.mxu0 %v10363_v53  ;;  %v7268_v30 = vsel %vm253_vm1, %v7262_v54, %v7263_v60  ;;  %v7270_v57 = vsel %vm253_vm1, %v7263_v60, %v7264_v45  ;;  %v7723_v37 = vrot.slane %v15447_v5, 4 }
 0x53a   : > { %8181 = vrot.lane.b32.xlu1 %v15439_v15, %s16755_s11  ;;  %8179 = vrot.lane.b32.xlu0 %v15400_v9, %s16755_s11  ;;  %v7257_v55 = vpop.permute.xlu0 %7256  ;;  %v7269_v14 = vsel %vm969_vm0, %v15190_v3, %v7268_v30  ;;  %v7271_v3 = vsel %vm969_vm0, %v7253_v1, %v7270_v57  ;;  %v8531_v30 = vld [vmem:[%s11005_s29 + $0x14] sm:$0xf] }
 0x53b   : > { %8078 = vmatprep.subr.bf16.mxu1 %v10365_v31  ;;  %8038 = vmatpush1.bf16.msra.mxu0 %v10362_v52  ;;  %v7265_v4 = vrot.slane %v7257_v55, 4  ;;  %v8581_v31 = vld [vmem:[%s11005_s29 + $0x30] sm:$0xf] }
 0x53c   : > { %v7716_v17 = vpop.permute.xlu1 %7715  ;;  %8079 = vmatpush1.bf16.msra.mxu1 %v10364_v32 }
 0x53d   : > { %v7272_v33 = vsel %vm253_vm1, %v7265_v4, %v7266_v26  ;;  %v7725_v34 = vrot.slane %v7716_v17, 4 }
 0x53e   : > { %8127 = vrot.lane.b32.xlu1 %v15416_v41, %s16760_s22  ;;  %8183 = vrot.lane.b32.xlu0 %v8166_v63, %s16755_s11  ;;  %v7273_v59 = vsel %vm969_vm0, %v7257_v55, %v7272_v33  ;;  %v7261_v46 = vpop.permute.xlu0 %7260 }
 0x53f   : > { %v10358_v20 = vcombine.low %v7269_v14, %v7273_v59  ;;  %v7267_v22 = vrot.slane %v7261_v46, 4  ;;  %v10359_v19 = vcombine.high %v7269_v14, %v7273_v59 }
 0x540   : > { %v7720_v11 = vpop.permute.xlu1 %7719 }
 0x541   : > { %v7274_v43 = vsel %vm253_vm1, %v7266_v26, %v7267_v22  ;;  %8039 = vmatprep.subr.bf16.mxu0 %v10359_v19  ;;  %v7727_v49 = vrot.slane %v7720_v11, 4 }
 0x542   : > { %8131 = vrot.lane.b32.xlu1 %v8117_v56, %s16760_s22  ;;  %8129 = vrot.lane.b32.xlu0 %v15387_v47, %s16760_s22  ;;  %v7714_v48 = vpop.permute.xlu0 %7713  ;;  %v7275_v27 = vsel %vm969_vm0, %v7259_v44, %v7274_v43 }
 0x543   : > { %8040 = vmatpush1.bf16.msra.mxu0 %v10358_v20  ;;  %v7724_v42 = vrot.slane %v7714_v48, 4  ;;  %v10360_v21 = vcombine.low %v7271_v3, %v7275_v27  ;;  %v10361_v62 = vcombine.high %v7271_v3, %v7275_v27 }
 0x544   : > { %v7665_v2 = vpop.permute.xlu1 %7664 }
 0x545   : > { %8080 = vmatprep.subr.bf16.mxu1 %v10361_v62  ;;  %v7729_v40 = vsel %vm253_vm1, %v7723_v37, %v7724_v42  ;;  %v7732_v50 = vsel %vm253_vm1, %v7724_v42, %v7725_v34 }
 0x546   : > { %8135 = vrot.lane.b32.xlu1 %v15439_v15, %s16760_s22  ;;  %8133 = vrot.lane.b32.xlu0 %v15400_v9, %s16760_s22  ;;  %v7718_v58 = vpop.permute.xlu0 %7717  ;;  %v7731_v16 = vsel %vm7730_vm5, %v15447_v5, %v7729_v40  ;;  %v7733_v8 = vsel %vm7730_vm5, %v7714_v48, %v7732_v50  ;;  %v7676_v5 = vrot.slane %v7665_v2, 4  ;;  %v8485_v40 = vld [vmem:[%s11005_s29 + $0x14] sm:$0xf] }
 0x547   : > { %8081 = vmatpush1.bf16.msra.mxu1 %v10360_v21  ;;  %v7726_v28 = vrot.slane %v7718_v58, 4  ;;  %v8534_v21 = vld [vmem:[%s11005_s29 + $0x30] sm:$0xf] }
 0x548   : > { %v7669_v24 = vpop.permute.xlu1 %7668 }
 0x549   : > { %v7734_v6 = vsel %vm253_vm1, %v7726_v28, %v7727_v49  ;;  %v7678_v63 = vrot.slane %v7669_v24, 4 }
 0x54a   : > { %8588 = vrot.lane.b32.xlu1 %v15416_v41, %s10860_s20  ;;  %8137 = vrot.lane.b32.xlu0 %v8120_v18, %s16760_s22  ;;  %v7735_v44 = vsel %vm7730_vm5, %v7718_v58, %v7734_v6  ;;  %v7722_v39 = vpop.permute.xlu0 %7721 }
 0x54b   : > { %v10398_v36 = vcombine.low %v7731_v16, %v7735_v44  ;;  %v7728_v23 = vrot.slane %v7722_v39, 4  ;;  %v10399_v7 = vcombine.high %v7731_v16, %v7735_v44 }
 0x54c   : > { %v7673_v12 = vpop.permute.xlu1 %7672 }
 0x54d   : > { %v7736_v38 = vsel %vm253_vm1, %v7727_v49, %v7728_v23  ;;  %8051 = vmatprep.subr.bf16.mxu0 %v10399_v7  ;;  %v7680_v53 = vrot.slane %v7673_v12, 4 }
 0x54e   : > { %8592 = vrot.lane.b32.xlu1 %v8578_v10, %s10860_s20  ;;  %8590 = vrot.lane.b32.xlu0 %v15387_v47, %s10860_s20  ;;  %v7667_v29 = vpop.permute.xlu0 %7666  ;;  %v7737_v1 = vsel %vm7730_vm5, %v7720_v11, %v7736_v38  ;;  %vm16763_vm5 = vmmov %vm16761_vm2 }
 0x54f   : > { %8052 = vmatpush2.bf16.msra.mxu0 %v10398_v36  ;;  %v7677_v32 = vrot.slane %v7667_v29, 4  ;;  %v10400_v60 = vcombine.low %v7733_v8, %v7737_v1  ;;  %v10401_v52 = vcombine.high %v7733_v8, %v7737_v1  ;;  %v10356_v36 = vcombine.low %v15265_v0, %v15265_v0 }
 0x550   : > { %v7619_v51 = vpop.permute.xlu1 %7618 }
 0x551   : > { %8092 = vmatprep.subr.bf16.mxu1 %v10401_v52  ;;  %v7682_v55 = vsel %vm253_vm1, %v7676_v5, %v7677_v32  ;;  %v7685_v59 = vsel %vm253_vm1, %v7677_v32, %v7678_v63  ;;  %v7630_v48 = vrot.slane %v7619_v51, 4  ;;  %v15545_v5 = vld [vmem:[%s11005_s29 + $0x8] sm:$0xff]  ;;  %v8488_v32 = vld [vmem:[%s11005_s29 + $0x30] sm:$0xf]  ;;  %v9316_v63 = vld [vmem:[%s11005_s29 + $0x18] sm:$0xf] }
 0x552   : > { %8596 = vrot.lane.b32.xlu1 %v15439_v15, %s10860_s20  ;;  %8594 = vrot.lane.b32.xlu0 %v15400_v9, %s10860_s20  ;;  %v7671_v54 = vpop.permute.xlu0 %7670  ;;  %v7684_v4 = vsel %vm7683_vm7, %v7665_v2, %v7682_v55  ;;  %v7686_v22 = vsel %vm7683_vm7, %v7667_v29, %v7685_v59  ;;  %v15559_v55 = vld [vmem:[%s11005_s29 + $0x10] sm:$0xff] }
 0x553   : > { %8093 = vmatpush2.bf16.msra.mxu1 %v10400_v60  ;;  %v7679_v17 = vrot.slane %v7671_v54, 4 }
 0x554   : > { %v7623_v26 = vpop.permute.xlu1 %7622 }
 0x555   : > { %v7687_v45 = vsel %vm253_vm1, %v7679_v17, %v7680_v53  ;;  %v7632_v18 = vrot.slane %v7623_v26, 4 }
 0x556   : > { %8541 = vrot.lane.b32.xlu1 %v15416_v41, %s10861_s18  ;;  %8598 = vrot.lane.b32.xlu0 %v8581_v31, %s10860_s20  ;;  %v7688_v33 = vsel %vm7683_vm7, %v7671_v54, %v7687_v45  ;;  %v7675_v56 = vpop.permute.xlu0 %7674 }
 0x557   : > { %v10394_v46 = vcombine.low %v7684_v4, %v7688_v33  ;;  %v7681_v11 = vrot.slane %v7675_v56, 4  ;;  %v10395_v57 = vcombine.high %v7684_v4, %v7688_v33 }
 0x558   : > { %v7627_v14 = vpop.permute.xlu1 %7626 }
 0x559   : > { %v7689_v20 = vsel %vm253_vm1, %v7680_v53, %v7681_v11  ;;  %8053 = vmatprep.subr.bf16.mxu0 %v10395_v57  ;;  %v7634_v42 = vrot.slane %v7627_v14, 4  ;;  %v15548_v53 = vld [vmem:[#allocation6 + $0x48] sm:$0xff]  ;;  %v15572_v11 = vld [vmem:[%s11005_s29 + $0x2c] sm:$0xff] }
 0x55a   : > { %8545 = vrot.lane.b32.xlu1 %v8531_v30, %s10861_s18  ;;  %8543 = vrot.lane.b32.xlu0 %v15387_v47, %s10861_s18  ;;  %v7621_v19 = vpop.permute.xlu0 %7620  ;;  %v7690_v43 = vsel %vm7683_vm7, %v7673_v12, %v7689_v20  ;;  %vm16764_vm7 = vmmov %vm16761_vm2  ;;  %v15575_v57 = vld [vmem:[%s11005_s29 + $0x24] sm:$0xff] }
 0x55b   : > { %8054 = vmatpush2.bf16.msra.mxu0 %v10394_v46  ;;  %v7631_v27 = vrot.slane %v7621_v19, 4  ;;  %v10396_v2 = vcombine.low %v7686_v22, %v7690_v43  ;;  %v10397_v37 = vcombine.high %v7686_v22, %v7690_v43 }
 0x55c   : > { %v15513_v3 = vpop.permute.xlu1 %8449 }
 0x55d   : > { %8094 = vmatprep.subr.bf16.mxu1 %v10397_v37  ;;  %v7636_v58 = vsel %vm253_vm1, %v7630_v48, %v7631_v27  ;;  %v7638_v44 = vsel %vm253_vm1, %v7631_v27, %v7632_v18  ;;  %v8461_v29 = vrot.slane %v15513_v3, 4 }
 0x55e   : > { %8549 = vrot.lane.b32.xlu1 %v15439_v15, %s10861_s18  ;;  %8547 = vrot.lane.b32.xlu0 %v15400_v9, %s10861_s18  ;;  %v7625_v62 = vpop.permute.xlu0 %7624  ;;  %v7637_v28 = vsel %vm16761_vm2, %v7619_v51, %v7636_v58  ;;  %v7639_v23 = vsel %vm16763_vm5, %v7621_v19, %v7638_v44 }
 0x55f   : > { %8095 = vmatpush2.bf16.msra.mxu1 %v10396_v2  ;;  %v7633_v24 = vrot.slane %v7625_v62, 4 }
 0x560   : > { %v8454_v49 = vpop.permute.xlu1 %8453 }
 0x561   : > { %v7640_v34 = vsel %vm253_vm1, %v7633_v24, %v7634_v42  ;;  %v8463_v31 = vrot.slane %v8454_v49, 4 }
 0x562   : > { %8495 = vrot.lane.b32.xlu1 %v15416_v41, %s10851_s28  ;;  %8551 = vrot.lane.b32.xlu0 %v8534_v21, %s10861_s18  ;;  %v7641_v6 = vsel %vm16762_vm4, %v7625_v62, %v7640_v34  ;;  %v7629_v10 = vpop.permute.xlu0 %7628  ;;  %v9270_v34 = vld [vmem:[%s11005_s29 + $0x18] sm:$0xf] }
 0x563   : > { %v10390_v39 = vcombine.low %v7637_v28, %v7641_v6  ;;  %v7635_v12 = vrot.slane %v7629_v10, 4  ;;  %v10391_v50 = vcombine.high %v7637_v28, %v7641_v6 }
 0x564   : > { %v8458_v16 = vpop.permute.xlu1 %8457 }
 0x565   : > { %v7642_v41 = vsel %vm253_vm1, %v7634_v42, %v7635_v12  ;;  %8055 = vmatprep.subr.bf16.mxu0 %v10391_v50  ;;  %v8465_v0 = vrot.slane %v8458_v16, 4  ;;  %v9319_v42 = vld [vmem:[%s11005_s29 + $0x34] sm:$0xf] }
 0x566   : > { %8499 = vrot.lane.b32.xlu1 %v8485_v40, %s10851_s28  ;;  %8497 = vrot.lane.b32.xlu0 %v15387_v47, %s10851_s28  ;;  %v8452_v7 = vpop.permute.xlu0 %8451  ;;  %v7643_v38 = vsel %vm16764_vm7, %v7627_v14, %v7642_v41  ;;  %vm16773_vm7 = vcmask 179200  }
 0x567   : > { %8056 = vmatpush2.bf16.msra.mxu0 %v10390_v39  ;;  %v8462_v1 = vrot.slane %v8452_v7, 4  ;;  %v10392_v47 = vcombine.low %v7639_v23, %v7643_v38  ;;  %v10393_v51 = vcombine.high %v7639_v23, %v7643_v38 }
 0x568   : > { %v15537_v8 = vpop.permute.xlu1 %8403 }
 0x569   : > { %8096 = vmatprep.subr.bf16.mxu1 %v10393_v51  ;;  %v8467_v54 = vsel %vm253_vm1, %v8461_v29, %v8462_v1  ;;  %v8469_v33 = vsel %vm253_vm1, %v8462_v1, %v8463_v31  ;;  %v9273_v51 = vld [vmem:[%s11005_s29 + $0x34] sm:$0xf] }
 0x56a   : > { %8503 = vrot.lane.b32.xlu1 %v15439_v15, %s10851_s28  ;;  %8501 = vrot.lane.b32.xlu0 %v15400_v9, %s10851_s28  ;;  %v8456_v60 = vpop.permute.xlu0 %8455  ;;  %v10405_v9 = vcombine.high %v15548_v53, %v15548_v53  ;;  %v8468_v17 = vsel %vm4175_vm8, %v15513_v3, %v8467_v54  ;;  %v8470_v20 = vsel %vm4175_vm8, %v8452_v7, %v8469_v33  ;;  %v8415_v3 = vrot.slane %v15537_v8, 4 }
 0x56b   : > { %8058 = vmatmul.mubr.bf16.vlgmr.msra.gmra.mxu0 %v10356_v36  ;;  %8097 = vmatpush2.bf16.msra.mxu1 %v10392_v47  ;;  %v8464_v15 = vrot.slane %v8456_v60, 4 }
 0x56c   : > { %v8408_v52 = vpop.permute.xlu1 %8407  ;;  %10450 = vmatprep.mubr.msk.bf16.mxu0 %vm969_vm0, %v10405_v9 }
 0x56d   : > { %v8471_v26 = vsel %vm253_vm1, %v8464_v15, %v8465_v0  ;;  %v8417_v49 = vrot.slane %v8408_v52, 4  ;;  %v9224_v15 = vld [vmem:[%s11005_s29 + $0x18] sm:$0xf] }
 0x56e   : > { %9326 = vrot.lane.b32.xlu1 %v15545_v5, %s10852_s21  ;;  %8505 = vrot.lane.b32.xlu0 %v8488_v32, %s10851_s28  ;;  %v8472_v45 = vsel %vm4175_vm8, %v8456_v60, %v8471_v26  ;;  %v8460_v30 = vpop.permute.xlu0 %8459  ;;  %s10864_s28 = smov [#allocation8]  }
 0x56f   : > { %8099 = vmatmul.mubr.bf16.vlgmr.msra.gmra.mxu1 %v10356_v36  ;;  %v10434_v56 = vcombine.low %v8468_v17, %v8472_v45  ;;  %v8466_v14 = vrot.slane %v8460_v30, 4  ;;  %v10435_v59 = vcombine.high %v8468_v17, %v8472_v45 }
 0x570   : > { %v8412_v4 = vpop.permute.xlu1 %8411  ;;  %10451 = vmatprep.mubr.msk.bf16.mxu1 %vm969_vm0, %v10405_v9 }
 0x571   : > { %v8473_v46 = vsel %vm253_vm1, %v8465_v0, %v8466_v14  ;;  %8902 = vmatprep.subr.bf16.mxu0 %v10435_v59  ;;  %v8419_v37 = vrot.slane %v8412_v4, 4 }
 0x572   : > { %9330 = vrot.lane.b32.xlu1 %v9316_v63, %s10852_s21  ;;  %9328 = vrot.lane.b32.xlu0 %v15559_v55, %s10852_s21  ;;  %v8406_v22 = vpop.permute.xlu0 %8405  ;;  %v8474_v19 = vsel %vm4175_vm8, %v8458_v16, %v8473_v46  ;;  %vm16769_vm8 = vcmask 171008  }
 0x573   : > { %8903 = vmatpush1.bf16.msra.mxu0 %v10434_v56  ;;  %v8416_v48 = vrot.slane %v8406_v22, 4  ;;  %v10436_v27 = vcombine.low %v8470_v20, %v8474_v19  ;;  %v10437_v2 = vcombine.high %v8470_v20, %v8474_v19  ;;  %vm16770_vm2 = vmmov %vm16769_vm8 }
 0x574   : > { %v8358_v43 = vpop.permute.xlu1 %8357  ;;  %vm16771_vm4 = vmmov %vm16770_vm2 }
 0x575   : > { %8943 = vmatprep.subr.bf16.mxu1 %v10437_v2  ;;  %v8421_v18 = vsel %vm253_vm1, %v8415_v3, %v8416_v48  ;;  %v8423_v16 = vsel %vm253_vm1, %v8416_v48, %v8417_v49  ;;  %v8369_v38 = vrot.slane %v8358_v43, 4  ;;  %vm16772_vm5 = vmmov %vm16770_vm2 }
 0x576   : > { %9334 = vrot.lane.b32.xlu1 %v15572_v11, %s10852_s21  ;;  %9332 = vrot.lane.b32.xlu0 %v15575_v57, %s10852_s21  ;;  %v8410_v21 = vpop.permute.xlu0 %8409  ;;  %v8422_v40 = vsel %vm4128_vm9, %v15537_v8, %v8421_v18  ;;  %v8424_v41 = vsel %vm4128_vm9, %v8406_v22, %v8423_v16  ;;  %v9178_v18 = vld [vmem:[%s11005_s29 + $0x18] sm:$0xf] }
 0x577   : > { %8944 = vmatpush1.bf16.msra.mxu1 %v10436_v27  ;;  %v8418_v58 = vrot.slane %v8410_v21, 4  ;;  %v9227_v27 = vld [vmem:[%s11005_s29 + $0x34] sm:$0xf] }
 0x578   : > { %v8362_v62 = vpop.permute.xlu1 %8361 }
 0x579   : > { %v8425_v24 = vsel %vm253_vm1, %v8418_v58, %v8419_v37  ;;  %v8371_v60 = vrot.slane %v8362_v62, 4 }
 0x57a   : > { %9280 = vrot.lane.b32.xlu1 %v15545_v5, %s10807_s10  ;;  %9336 = vrot.lane.b32.xlu0 %v9319_v42, %s10852_s21  ;;  %v8426_v28 = vsel %vm4128_vm9, %v8410_v21, %v8425_v24  ;;  %v8414_v6 = vpop.permute.xlu0 %8413  ;;  %s10725_s21 = sshll.u32 %s10864_s28, 4  ;;  %s10726_s21 = int_to_ptr.vmem [resolvable:$false] %s10725_s21 }
 0x57b   : > { %v10430_v44 = vcombine.low %v8422_v40, %v8426_v28  ;;  %v8420_v39 = vrot.slane %v8414_v6, 4  ;;  %v10431_v12 = vcombine.high %v8422_v40, %v8426_v28 }
 0x57c   : > { %v8366_v10 = vpop.permute.xlu1 %8365 }
 0x57d   : > { %v8427_v50 = vsel %vm253_vm1, %v8419_v37, %v8420_v39  ;;  %8904 = vmatprep.subr.bf16.mxu0 %v10431_v12  ;;  %v8373_v47 = vrot.slane %v8366_v10, 4 }
 0x57e   : > { %9284 = vrot.lane.b32.xlu1 %v9270_v34, %s10807_s10  ;;  %9282 = vrot.lane.b32.xlu0 %v15559_v55, %s10807_s10  ;;  %v8360_v36 = vpop.permute.xlu0 %8359  ;;  %v8428_v23 = vsel %vm4128_vm9, %v8412_v4, %v8427_v50  ;;  %vm16765_vm9 = vcmask 162816  }
 0x57f   : > { %8905 = vmatpush1.bf16.msra.mxu0 %v10430_v44  ;;  %v8370_v8 = vrot.slane %v8360_v36, 4  ;;  %v10432_v29 = vcombine.low %v8424_v41, %v8428_v23  ;;  %v10433_v1 = vcombine.high %v8424_v41, %v8428_v23 }
 0x580   : > { %v8312_v7 = vpop.permute.xlu1 %8311 }
 0x581   : > { %8945 = vmatprep.subr.bf16.mxu1 %v10433_v1  ;;  %v8375_v52 = vsel %vm253_vm1, %v8369_v38, %v8370_v8  ;;  %v8377_v45 = vsel %vm253_vm1, %v8370_v8, %v8371_v60  ;;  %v8323_v22 = vrot.slane %v8312_v7, 4 }
 0x582   : > { %9288 = vrot.lane.b32.xlu1 %v15572_v11, %s10807_s10  ;;  %9286 = vrot.lane.b32.xlu0 %v15575_v57, %s10807_s10  ;;  %v8364_v0 = vpop.permute.xlu0 %8363  ;;  %v8376_v9 = vsel %vm4081_vm15, %v8358_v43, %v8375_v52  ;;  %v8378_v14 = vsel %vm4081_vm15, %v8360_v36, %v8377_v45  ;;  %v9132_v52 = vld [vmem:[%s11005_s29 + $0x18] sm:$0xf] }
 0x583   : > { %8946 = vmatpush1.bf16.msra.mxu1 %v10432_v29  ;;  %v8372_v31 = vrot.slane %v8364_v0, 4  ;;  %v9181_v29 = vld [vmem:[%s11005_s29 + $0x34] sm:$0xf] }
 0x584   : > { %v8316_v32 = vpop.permute.xlu1 %8315 }
 0x585   : > { %v8379_v54 = vsel %vm253_vm1, %v8372_v31, %v8373_v47  ;;  %v8325_v42 = vrot.slane %v8316_v32, 4 }
 0x586   : > { %9234 = vrot.lane.b32.xlu1 %v15545_v5, %s10806_s9  ;;  %9290 = vrot.lane.b32.xlu0 %v9273_v51, %s10807_s10  ;;  %v8380_v26 = vsel %vm4081_vm15, %v8364_v0, %v8379_v54  ;;  %v8368_v63 = vpop.permute.xlu0 %8367 }
 0x587   : > { %v10426_v30 = vcombine.low %v8376_v9, %v8380_v26  ;;  %v8374_v4 = vrot.slane %v8368_v63, 4  ;;  %v10427_v33 = vcombine.high %v8376_v9, %v8380_v26 }
 0x588   : > { %v8320_v17 = vpop.permute.xlu1 %8319 }
 0x589   : > { %v8381_v56 = vsel %vm253_vm1, %v8373_v47, %v8374_v4  ;;  %8906 = vmatprep.subr.bf16.mxu0 %v10427_v33  ;;  %v8327_v48 = vrot.slane %v8320_v17, 4 }
 0x58a   : > { %9238 = vrot.lane.b32.xlu1 %v9224_v15, %s10806_s9  ;;  %9236 = vrot.lane.b32.xlu0 %v15559_v55, %s10806_s9  ;;  %v8314_v59 = vpop.permute.xlu0 %8313  ;;  %v8382_v46 = vsel %vm4081_vm15, %v8366_v10, %v8381_v56  ;;  %vm16767_vm15 = vmmov %vm16765_vm9 }
 0x58b   : > { %8907 = vmatpush1.bf16.msra.mxu0 %v10426_v30  ;;  %v8324_v19 = vrot.slane %v8314_v59, 4  ;;  %v10428_v43 = vcombine.low %v8378_v14, %v8382_v46  ;;  %v10429_v3 = vcombine.high %v8378_v14, %v8382_v46 }
 0x58c   : > { %v8266_v20 = vpop.permute.xlu1 %8265 }
 0x58d   : > { %8947 = vmatprep.subr.bf16.mxu1 %v10429_v3  ;;  %v8329_v21 = vsel %vm253_vm1, %v8323_v22, %v8324_v19  ;;  %v8331_v28 = vsel %vm253_vm1, %v8324_v19, %v8325_v42  ;;  %v8277_v36 = vrot.slane %v8266_v20, 4 }
 0x58e   : > { %9242 = vrot.lane.b32.xlu1 %v15572_v11, %s10806_s9  ;;  %9240 = vrot.lane.b32.xlu0 %v15575_v57, %s10806_s9  ;;  %v8318_v2 = vpop.permute.xlu0 %8317  ;;  %v8330_v58 = vsel %vm4034_vm13, %v8312_v7, %v8329_v21  ;;  %v8332_v39 = vsel %vm4034_vm13, %v8314_v59, %v8331_v28  ;;  %v9086_v21 = vld [vmem:[%s11005_s29 + $0x18] sm:$0xf] }
 0x58f   : > { %8948 = vmatpush1.bf16.msra.mxu1 %v10428_v43  ;;  %v8326_v62 = vrot.slane %v8318_v2, 4  ;;  %v9135_v43 = vld [vmem:[%s11005_s29 + $0x34] sm:$0xf] }
 0x590   : > { %v8270_v37 = vpop.permute.xlu1 %8269 }
 0x591   : > { %v8333_v49 = vsel %vm253_vm1, %v8326_v62, %v8327_v48  ;;  %v8279_v51 = vrot.slane %v8270_v37, 4 }
 0x592   : > { %9188 = vrot.lane.b32.xlu1 %v15545_v5, %s10805_s8  ;;  %9244 = vrot.lane.b32.xlu0 %v9227_v27, %s10806_s9  ;;  %v8334_v24 = vsel %vm4034_vm13, %v8318_v2, %v8333_v49  ;;  %v8322_v34 = vpop.permute.xlu0 %8321 }
 0x593   : > { %v10422_v6 = vcombine.low %v8330_v58, %v8334_v24  ;;  %v8328_v10 = vrot.slane %v8322_v34, 4  ;;  %v10423_v16 = vcombine.high %v8330_v58, %v8334_v24 }
 0x594   : > { %v8274_v40 = vpop.permute.xlu1 %8273 }
 0x595   : > { %v8335_v44 = vsel %vm253_vm1, %v8327_v48, %v8328_v10  ;;  %8908 = vmatprep.subr.bf16.mxu0 %v10423_v16  ;;  %v8281_v8 = vrot.slane %v8274_v40, 4 }
 0x596   : > { %9192 = vrot.lane.b32.xlu1 %v9178_v18, %s10805_s8  ;;  %9190 = vrot.lane.b32.xlu0 %v15559_v55, %s10805_s8  ;;  %v8268_v12 = vpop.permute.xlu0 %8267  ;;  %v8336_v50 = vsel %vm4034_vm13, %v8320_v17, %v8335_v44  ;;  %vm16768_vm13 = vmmov %vm16765_vm9 }
 0x597   : > { %8909 = vmatpush1.bf16.msra.mxu0 %v10422_v6  ;;  %v8278_v23 = vrot.slane %v8268_v12, 4  ;;  %v10424_v7 = vcombine.low %v8332_v39, %v8336_v50  ;;  %v10425_v38 = vcombine.high %v8332_v39, %v8336_v50 }
 0x598   : > { %v8220_v41 = vpop.permute.xlu1 %8219 }
 0x599   : > { %8949 = vmatprep.subr.bf16.mxu1 %v10425_v38  ;;  %v8283_v0 = vsel %vm253_vm1, %v8277_v36, %v8278_v23  ;;  %v8285_v26 = vsel %vm253_vm1, %v8278_v23, %v8279_v51  ;;  %v8231_v59 = vrot.slane %v8220_v41, 4 }
 0x59a   : > { %9196 = vrot.lane.b32.xlu1 %v15572_v11, %s10805_s8  ;;  %9194 = vrot.lane.b32.xlu0 %v15575_v57, %s10805_s8  ;;  %v8272_v1 = vpop.permute.xlu0 %8271  ;;  %v8284_v31 = vsel %vm3987_vm12, %v8266_v20, %v8283_v0  ;;  %v8286_v4 = vsel %vm3987_vm12, %v8268_v12, %v8285_v26 }
 0x59b   : > { %8950 = vmatpush1.bf16.msra.mxu1 %v10424_v7  ;;  %v8280_v32 = vrot.slane %v8272_v1, 4 }
 0x59c   : > { %v8224_v47 = vpop.permute.xlu1 %8223 }
 0x59d   : > { %v8287_v60 = vsel %vm253_vm1, %v8280_v32, %v8281_v8  ;;  %v8233_v27 = vrot.slane %v8224_v47, 4 }
 0x59e   : > { %9142 = vrot.lane.b32.xlu1 %v15545_v5, %s10804_s7  ;;  %9198 = vrot.lane.b32.xlu0 %v9181_v29, %s10805_s8  ;;  %v8288_v54 = vsel %vm3987_vm12, %v8272_v1, %v8287_v60  ;;  %v8276_v15 = vpop.permute.xlu0 %8275  ;;  %v9089_v1 = vld [vmem:[%s11005_s29 + $0x34] sm:$0xf] }
 0x59f   : > { %v10418_v63 = vcombine.low %v8284_v31, %v8288_v54  ;;  %v8282_v17 = vrot.slane %v8276_v15, 4  ;;  %v10419_v45 = vcombine.high %v8284_v31, %v8288_v54 }
 0x5a0   : > { %v8228_v9 = vpop.permute.xlu1 %8227 }
 0x5a1   : > { %v8289_v30 = vsel %vm253_vm1, %v8281_v8, %v8282_v17  ;;  %8910 = vmatprep.subr.bf16.mxu0 %v10419_v45  ;;  %v8235_v19 = vrot.slane %v8228_v9, 4 }
 0x5a2   : > { %9146 = vrot.lane.b32.xlu1 %v9132_v52, %s10804_s7  ;;  %9144 = vrot.lane.b32.xlu0 %v15559_v55, %s10804_s7  ;;  %v8222_v33 = vpop.permute.xlu0 %8221  ;;  %v8290_v56 = vsel %vm3987_vm12, %v8274_v40, %v8289_v30  ;;  %vm16766_vm12 = vmmov %vm16765_vm9 }
 0x5a3   : > { %8911 = vmatpush1.bf16.msra.mxu0 %v10418_v63  ;;  %v8232_v46 = vrot.slane %v8222_v33, 4  ;;  %v10420_v20 = vcombine.low %v8286_v4, %v8290_v56  ;;  %v10421_v22 = vcombine.high %v8286_v4, %v8290_v56 }
 0x5a4   : > { %v15661_v14 = vpop.permute.xlu1 %8173 }
 0x5a5   : > { %8951 = vmatprep.subr.bf16.mxu1 %v10421_v22  ;;  %v8237_v2 = vsel %vm253_vm1, %v8231_v59, %v8232_v46  ;;  %v8239_v24 = vsel %vm253_vm1, %v8232_v46, %v8233_v27 }
 0x5a6   : > { %9150 = vrot.lane.b32.xlu1 %v15572_v11, %s10804_s7  ;;  %9148 = vrot.lane.b32.xlu0 %v15575_v57, %s10804_s7  ;;  %v8226_v3 = vpop.permute.xlu0 %8225  ;;  %v8238_v62 = vsel %vm16765_vm9, %v8220_v41, %v8237_v2  ;;  %v8240_v16 = vsel %vm16767_vm15, %v8222_v33, %v8239_v24  ;;  %v8185_v41 = vrot.slane %v15661_v14, 4  ;;  %v8994_v24 = vld [vmem:[%s11005_s29 + $0x18] sm:$0xf]  ;;  %vm16774_vm9 = vmmov %vm16773_vm7 }
 0x5a7   : > { %8952 = vmatpush1.bf16.msra.mxu1 %v10420_v20  ;;  %v8234_v37 = vrot.slane %v8226_v3, 4  ;;  %vm16776_vm15 = vmmov %vm16773_vm7 }
 0x5a8   : > { %v8178_v48 = vpop.permute.xlu1 %8177 }
 0x5a9   : > { %v8241_v42 = vsel %vm253_vm1, %v8234_v37, %v8235_v19  ;;  %v9043_v37 = vld [vmem:[%s11005_s29 + $0x34] sm:$0xf] }
 0x5aa   : > { %9096 = vrot.lane.b32.xlu1 %v15545_v5, %s10803_s4  ;;  %9152 = vrot.lane.b32.xlu0 %v9135_v43, %s10804_s7  ;;  %v8242_v49 = vsel %vm16766_vm12, %v8226_v3, %v8241_v42  ;;  %v8230_v18 = vpop.permute.xlu0 %8229  ;;  %vm16775_vm12 = vmmov %vm16773_vm7 }
 0x5ab   : > { %v10414_v34 = vcombine.low %v8238_v62, %v8242_v49  ;;  %v8236_v40 = vrot.slane %v8230_v18, 4  ;;  %v10415_v28 = vcombine.high %v8238_v62, %v8242_v49 }
 0x5ac   : > { %v8182_v58 = vpop.permute.xlu1 %8181 }
 0x5ad   : > { %v8243_v6 = vsel %vm253_vm1, %v8235_v19, %v8236_v40  ;;  %8912 = vmatprep.subr.bf16.mxu0 %v10415_v28  ;;  %v8189_v29 = vrot.slane %v8182_v58, 4 }
 0x5ae   : > { %9100 = vrot.lane.b32.xlu1 %v9086_v21, %s10803_s4  ;;  %9098 = vrot.lane.b32.xlu0 %v15559_v55, %s10803_s4  ;;  %v8176_v39 = vpop.permute.xlu0 %8175  ;;  %v8244_v12 = vsel %vm16768_vm13, %v8228_v9, %v8243_v6  ;;  %v9040_v9 = vld [vmem:[%s11005_s29 + $0x18] sm:$0xf]  ;;  %vm8607_vm13 = vcmask 97280  }
 0x5af   : > { %v7182_v10 = vpop.f32.mrf.mxu0  ;;  %8913 = vmatpush1.bf16.msra.mxu0 %v10414_v34  ;;  %v8186_v36 = vrot.slane %v8176_v39, 4  ;;  %v10416_v7 = vcombine.low %v8240_v16, %v8244_v12  ;;  %v10417_v38 = vcombine.high %v8240_v16, %v8244_v12 }
 0x5b0   : > { %v15683_v44 = vadd.f32 %v7182_v10, %v15405_v25  ;;  %v15686_v50 = vpop.permute.xlu1 %8127 }
 0x5b1   : > { %v7184_v23 = vpop.f32.mrf.mxu0  ;;  %8953 = vmatprep.subr.bf16.mxu1 %v10417_v38  ;;  %v8191_v60 = vsel %vm253_vm1, %v8185_v41, %v8186_v36  ;;  %v8139_v43 = vrot.slane %v15686_v50, 4 }
 0x5b2   : > { %v15690_v8 = vadd.f32 %v7184_v23, %v15409_v13  ;;  %9104 = vrot.lane.b32.xlu1 %v15572_v11, %s10803_s4  ;;  %9102 = vrot.lane.b32.xlu0 %v15575_v57, %s10803_s4  ;;  %v8180_v0 = vpop.permute.xlu0 %8179  ;;  %v8187_v13 = vrot.slane %v8178_v48, 4  ;;  %v8192_v63 = vsel %vm16769_vm8, %v15661_v14, %v8191_v60  ;;  %vm8560_vm8 = vcmask 105472  }
 0x5b3   : > { %v7223_v25 = vpop.f32.mrf.mxu1  ;;  %v7186_v47 = vpop.f32.mrf.mxu0  ;;  %8954 = vmatpush1.bf16.msra.mxu1 %v10416_v7  ;;  %v8188_v52 = vrot.slane %v8180_v0, 4 }
 0x5b4   : > { %v15698_v51 = vadd.f32 %v7223_v25, %v15420_v61  ;;  %v8132_v32 = vpop.permute.xlu1 %8131  ;;  %v8193_v4 = vsel %vm253_vm1, %v8186_v36, %v8187_v13 }
 0x5b5   : > { %v7225_v31 = vpop.f32.mrf.mxu1  ;;  %v7187_v54 = vpop.f32.mrf.mxu0  ;;  %v8195_v61 = vsel %vm253_vm1, %v8188_v52, %v8189_v29  ;;  %v8194_v14 = vsel %vm16771_vm4, %v8176_v39, %v8193_v4  ;;  %v8141_v62 = vrot.slane %v8132_v32, 4 }
 0x5b6   : > { %v15702_v15 = vadd.f32 %v7225_v31, %v15424_v35  ;;  %9050 = vrot.lane.b32.xlu1 %v15545_v5, %s10802_s30  ;;  %9106 = vrot.lane.b32.xlu0 %v9089_v1, %s10803_s4  ;;  %v8196_v17 = vsel %vm16770_vm2, %v8180_v0, %v8195_v61  ;;  %v8184_v45 = vpop.permute.xlu0 %8183  ;;  %v8997_v0 = vld [vmem:[%s11005_s29 + $0x34] sm:$0xf]  ;;  %v9455_v61 = vld [vmem:[%s11005_s29 + $0x18] sm:$0xf]  ;;  %s9884_s4 = sshll.u32 %s11153_s27, 4  ;;  %s15931_s4 = int_to_ptr.vmem [resolvable:$true] %s9884_s4 }
 0x5b7   : > { %v7227_v26 = vpop.f32.mrf.mxu1  ;;  %v10410_v35 = vcombine.low %v8192_v63, %v8196_v17  ;;  %v10411_v33 = vcombine.high %v8192_v63, %v8196_v17  ;;  %v8190_v56 = vrot.slane %v8184_v45, 4  ;;  %s10721_s10 = scalar_lea.vmem %s15931_s4, 512  ;;  %p10728_p10 = scmp.lt.s32.totalorder %s15931_s4, %s10726_s21 }
 0x5b8   : > { %v8136_v30 = vpop.permute.xlu1 %8135  ;;  %p10722_p3 = scmp.ne.s32.totalorder %s15931_s4, %s10721_s10 }
 0x5b9   : > { %v7228_v59 = vpop.f32.mrf.mxu1  ;;  %v8197_v46 = vsel %vm253_vm1, %v8189_v29, %v8190_v56  ;;  %8914 = vmatprep.subr.bf16.mxu0 %v10411_v33  ;;  %v8143_v2 = vrot.slane %v8136_v30, 4 }
 0x5ba   : > { %9054 = vrot.lane.b32.xlu1 %v9040_v9, %s10802_s30  ;;  %9052 = vrot.lane.b32.xlu0 %v15559_v55, %s10802_s30  ;;  %v8130_v20 = vpop.permute.xlu0 %8129  ;;  %v8198_v22 = vsel %vm16772_vm5, %v8182_v58, %v8197_v46  ;;  %vm16785_vm5 = vcmask 1006592   ;;  %p10723_p7 = pnand %p10722_p3, %p16797_p11 }
 0x5bb   : > { %8915 = vmatpush1.bf16.msra.mxu0 %v10410_v35  ;;  %v8140_v3 = vrot.slane %v8130_v20, 4  ;;  %v10412_v48 = vcombine.low %v8194_v14, %v8198_v22  ;;  %v10413_v27 = vcombine.high %v8194_v14, %v8198_v22 }
 0x5bc   : > { %v8589_v19 = vpop.permute.xlu1 %8588  ;;  %p10724_p12 = pneg %p10723_p7 }
 0x5bd   : > { %8955 = vmatprep.subr.bf16.mxu1 %v10413_v27  ;;  %v8145_v49 = vsel %vm253_vm1, %v8139_v43, %v8140_v3  ;;  %v8147_v10 = vsel %vm253_vm1, %v8140_v3, %v8141_v62  ;;  %v8600_v38 = vrot.slane %v8589_v19, 4 }
 0x5be   : > { %9058 = vrot.lane.b32.xlu1 %v15572_v11, %s10802_s30  ;;  %9056 = vrot.lane.b32.xlu0 %v15575_v57, %s10802_s30  ;;  %v8134_v42 = vpop.permute.xlu0 %8133  ;;  %v8146_v34 = vsel %vm16773_vm7, %v15686_v50, %v8145_v49  ;;  %v8148_v50 = vsel %vm16775_vm12, %v8130_v20, %v8147_v10  ;;  %v9408_v49 = vld [vmem:[%s11005_s29 + $0x18] sm:$0xf]  ;;  %vm16786_vm7 = vmmov %vm16785_vm5 }
 0x5bf   : > { %8956 = vmatpush1.bf16.msra.mxu1 %v10412_v48  ;;  %v8142_v18 = vrot.slane %v8134_v42, 4  ;;  %v9458_v48 = vld [vmem:[%s11005_s29 + $0x34] sm:$0xf]  ;;  %vm16788_vm12 = vmmov %vm16785_vm5 }
 0x5c0   : > { %v8593_v21 = vpop.permute.xlu1 %8592 }
 0x5c1   : > { %v8149_v58 = vsel %vm253_vm1, %v8142_v18, %v8143_v2  ;;  %v8602_v60 = vrot.slane %v8593_v21, 4 }
 0x5c2   : > { %9004 = vrot.lane.b32.xlu1 %v15545_v5, %s10801_s25  ;;  %9060 = vrot.lane.b32.xlu0 %v9043_v37, %s10802_s30  ;;  %v8150_v40 = vsel %vm16774_vm9, %v8134_v42, %v8149_v58  ;;  %v8138_v28 = vpop.permute.xlu0 %8137  ;;  %s10862_s30 = smov 114   ;;  %vm16787_vm9 = vmmov %vm16785_vm5 }
 0x5c3   : > { %v10406_v16 = vcombine.low %v8146_v34, %v8150_v40  ;;  %v10407_v39 = vcombine.high %v8146_v34, %v8150_v40  ;;  %v8144_v12 = vrot.slane %v8138_v28, 4 }
 0x5c4   : > { %v8597_v6 = vpop.permute.xlu1 %8596 }
 0x5c5   : > { %v8151_v41 = vsel %vm253_vm1, %v8143_v2, %v8144_v12  ;;  %8916 = vmatprep.subr.bf16.mxu0 %v10407_v39  ;;  %v8604_v47 = vrot.slane %v8597_v6, 4 }
 0x5c6   : > { %9008 = vrot.lane.b32.xlu1 %v8994_v24, %s10801_s25  ;;  %9006 = vrot.lane.b32.xlu0 %v15559_v55, %s10801_s25  ;;  %v8591_v36 = vpop.permute.xlu0 %8590  ;;  %v8152_v23 = vsel %vm16776_vm15, %v8136_v30, %v8151_v41  ;;  %vm16789_vm15 = vcmask 1014784  }
 0x5c7   : > { %8917 = vmatpush1.bf16.msra.mxu0 %v10406_v16  ;;  %v8601_v25 = vrot.slane %v8591_v36, 4  ;;  %v10408_v29 = vcombine.low %v8148_v50, %v8152_v23  ;;  %v10409_v1 = vcombine.high %v8148_v50, %v8152_v23 }
 0x5c8   : > { %v8542_v7 = vpop.permute.xlu1 %8541 }
 0x5c9   : > { %8957 = vmatprep.subr.bf16.mxu1 %v10409_v1  ;;  %v8606_v52 = vsel %vm253_vm1, %v8600_v38, %v8601_v25  ;;  %v8609_v45 = vsel %vm253_vm1, %v8601_v25, %v8602_v60  ;;  %v8553_v20 = vrot.slane %v8542_v7, 4 }
 0x5ca   : > { %9012 = vrot.lane.b32.xlu1 %v15572_v11, %s10801_s25  ;;  %9010 = vrot.lane.b32.xlu0 %v15575_v57, %s10801_s25  ;;  %v8595_v32 = vpop.permute.xlu0 %8594  ;;  %v8608_v9 = vsel %vm8607_vm13, %v8589_v19, %v8606_v52  ;;  %v8610_v56 = vsel %vm8607_vm13, %v8591_v36, %v8609_v45  ;;  %v9362_v52 = vld [vmem:[%s11005_s29 + $0x18] sm:$0xf] }
 0x5cb   : > { %8958 = vmatpush1.bf16.msra.mxu1 %v10408_v29  ;;  %v8603_v31 = vrot.slane %v8595_v32, 4  ;;  %v9411_v29 = vld [vmem:[%s11005_s29 + $0x34] sm:$0xf] }
 0x5cc   : > { %v8546_v13 = vpop.permute.xlu1 %8545 }
 0x5cd   : > { %v8611_v54 = vsel %vm253_vm1, %v8603_v31, %v8604_v47  ;;  %v8555_v37 = vrot.slane %v8546_v13, 4 }
 0x5ce   : > { %9465 = vrot.lane.b32.xlu1 %v15545_v5, %s10862_s30  ;;  %9014 = vrot.lane.b32.xlu0 %v8997_v0, %s10801_s25  ;;  %v8612_v26 = vsel %vm8607_vm13, %v8595_v32, %v8611_v54  ;;  %v8599_v63 = vpop.permute.xlu0 %8598  ;;  %s10863_s25 = smov 115  }
 0x5cf   : > { %v10446_v30 = vcombine.low %v8608_v9, %v8612_v26  ;;  %v10447_v4 = vcombine.high %v8608_v9, %v8612_v26  ;;  %v8605_v35 = vrot.slane %v8599_v63, 4 }
 0x5d0   : > { %v8550_v17 = vpop.permute.xlu1 %8549 }
 0x5d1   : > { %v8613_v33 = vsel %vm253_vm1, %v8604_v47, %v8605_v35  ;;  %8928 = vmatprep.subr.bf16.mxu0 %v10447_v4  ;;  %v8557_v3 = vrot.slane %v8550_v17, 4 }
 0x5d2   : > { %9469 = vrot.lane.b32.xlu1 %v9455_v61, %s10862_s30  ;;  %9467 = vrot.lane.b32.xlu0 %v15559_v55, %s10862_s30  ;;  %v8544_v59 = vpop.permute.xlu0 %8543  ;;  %v8614_v46 = vsel %vm8607_vm13, %v8597_v6, %v8613_v33  ;;  %vm16790_vm13 = vmmov %vm16789_vm15 }
 0x5d3   : > { %8929 = vmatpush2.bf16.msra.mxu0 %v10446_v30  ;;  %v8554_v22 = vrot.slane %v8544_v59, 4  ;;  %v10448_v19 = vcombine.low %v8610_v56, %v8614_v46  ;;  %v10449_v43 = vcombine.high %v8610_v56, %v8614_v46  ;;  %v10404_v30 = vcombine.low %v15548_v53, %v15548_v53 }
 0x5d4   : > { %v8496_v14 = vpop.permute.xlu1 %8495 }
 0x5d5   : > { %8969 = vmatprep.subr.bf16.mxu1 %v10449_v43  ;;  %v8559_v42 = vsel %vm253_vm1, %v8553_v20, %v8554_v22  ;;  %v8562_v40 = vsel %vm253_vm1, %v8554_v22, %v8555_v37  ;;  %v8507_v36 = vrot.slane %v8496_v14, 4  ;;  %v15808_v43 = vld [vmem:[#allocation6 + $0x50] sm:$0xff] }
 0x5d6   : > { %9473 = vrot.lane.b32.xlu1 %v15572_v11, %s10862_s30  ;;  %9471 = vrot.lane.b32.xlu0 %v15575_v57, %s10862_s30  ;;  %v8548_v27 = vpop.permute.xlu0 %8547  ;;  %v8561_v18 = vsel %vm8560_vm8, %v8542_v7, %v8559_v42  ;;  %v8563_v39 = vsel %vm8560_vm8, %v8544_v59, %v8562_v40 }
 0x5d7   : > { %8970 = vmatpush2.bf16.msra.mxu1 %v10448_v19  ;;  %v8556_v21 = vrot.slane %v8548_v27, 4 }
 0x5d8   : > { %v8500_v2 = vpop.permute.xlu1 %8499 }
 0x5d9   : > { %v8564_v62 = vsel %vm253_vm1, %v8556_v21, %v8557_v3  ;;  %v8509_v0 = vrot.slane %v8500_v2, 4  ;;  %v10453_v2 = vcombine.high %v15808_v43, %v15808_v43 }
 0x5da   : > { %9418 = vrot.lane.b32.xlu1 %v15545_v5, %s10863_s25  ;;  %9475 = vrot.lane.b32.xlu0 %v9458_v48, %s10862_s30  ;;  %v8565_v58 = vsel %vm8560_vm8, %v8548_v27, %v8564_v62  ;;  %v8552_v24 = vpop.permute.xlu0 %8551 }
 0x5db   : > { %v10442_v28 = vcombine.low %v8561_v18, %v8565_v58  ;;  %v10443_v6 = vcombine.high %v8561_v18, %v8565_v58  ;;  %v8558_v10 = vrot.slane %v8552_v24, 4 }
 0x5dc   : > { %v8504_v34 = vpop.permute.xlu1 %8503 }
 0x5dd   : > { %v8566_v16 = vsel %vm253_vm1, %v8557_v3, %v8558_v10  ;;  %8930 = vmatprep.subr.bf16.mxu0 %v10443_v6  ;;  %v8511_v25 = vrot.slane %v8504_v34, 4 }
 0x5de   : > { %9422 = vrot.lane.b32.xlu1 %v9408_v49, %s10863_s25  ;;  %9420 = vrot.lane.b32.xlu0 %v15559_v55, %s10863_s25  ;;  %v8498_v12 = vpop.permute.xlu0 %8497  ;;  %v8567_v41 = vsel %vm8560_vm8, %v8550_v17, %v8566_v16  ;;  %vm16791_vm8 = vmmov %vm16790_vm13 }
 0x5df   : > { %8931 = vmatpush2.bf16.msra.mxu0 %v10442_v28  ;;  %v8508_v23 = vrot.slane %v8498_v12, 4  ;;  %v10444_v7 = vcombine.low %v8563_v39, %v8567_v41  ;;  %v10445_v38 = vcombine.high %v8563_v39, %v8567_v41 }
 0x5e0   : > { %v9327_v50 = vpop.permute.xlu1 %9326 }
 0x5e1   : > { %8971 = vmatprep.subr.bf16.mxu1 %v10445_v38  ;;  %v8513_v32 = vsel %vm253_vm1, %v8507_v36, %v8508_v23  ;;  %v8515_v26 = vsel %vm253_vm1, %v8508_v23, %v8509_v0  ;;  %v9338_v59 = vrot.slane %v9327_v50, 4 }
 0x5e2   : > { %9426 = vrot.lane.b32.xlu1 %v15572_v11, %s10863_s25  ;;  %9424 = vrot.lane.b32.xlu0 %v15575_v57, %s10863_s25  ;;  %v8502_v1 = vpop.permute.xlu0 %8501  ;;  %v8514_v31 = vsel %vm4222_vm14, %v8496_v14, %v8513_v32  ;;  %v8516_v4 = vsel %vm4222_vm14, %v8498_v12, %v8515_v26 }
 0x5e3   : > { %8972 = vmatpush2.bf16.msra.mxu1 %v10444_v7  ;;  %v8510_v13 = vrot.slane %v8502_v1, 4 }
 0x5e4   : > { %v9331_v47 = vpop.permute.xlu1 %9330 }
 0x5e5   : > { %v8517_v60 = vsel %vm253_vm1, %v8510_v13, %v8511_v25  ;;  %v9340_v3 = vrot.slane %v9331_v47, 4 }
 0x5e6   : > { %9372 = vrot.lane.b32.xlu1 %v15545_v5, %s10853_s23  ;;  %9428 = vrot.lane.b32.xlu0 %v9411_v29, %s10863_s25  ;;  %v8518_v54 = vsel %vm4222_vm14, %v8502_v1, %v8517_v60  ;;  %v8506_v61 = vpop.permute.xlu0 %8505 }
 0x5e7   : > { %v10438_v63 = vcombine.low %v8514_v31, %v8518_v54  ;;  %v10439_v17 = vcombine.high %v8514_v31, %v8518_v54  ;;  %v8512_v45 = vrot.slane %v8506_v61, 4 }
 0x5e8   : > { %v9335_v9 = vpop.permute.xlu1 %9334 }
 0x5e9   : > { %v8519_v5 = vsel %vm253_vm1, %v8511_v25, %v8512_v45  ;;  %8932 = vmatprep.subr.bf16.mxu0 %v10439_v17  ;;  %v9342_v53 = vrot.slane %v9335_v9, 4 }
 0x5ea   : > { %9376 = vrot.lane.b32.xlu1 %v9362_v52, %s10853_s23  ;;  %9374 = vrot.lane.b32.xlu0 %v15559_v55, %s10853_s23  ;;  %v9329_v35 = vpop.permute.xlu0 %9328  ;;  %v8520_v33 = vsel %vm4222_vm14, %v8504_v34, %v8519_v5  ;;  %v9365_v55 = vld [vmem:[%s11005_s29 + $0x34] sm:$0xf]  ;;  %s10505_s29 = sshll.u32 %s10906_s16, 9  ;;  %s9870_s16 = scalar_lea.sflag [#allocation5], %s11001_s26 }
 0x5eb   : > { %8933 = vmatpush2.bf16.msra.mxu0 %v10438_v63  ;;  %v9339_v46 = vrot.slane %v9329_v35, 4  ;;  %v10440_v14 = vcombine.low %v8516_v4, %v8520_v33  ;;  %v10441_v20 = vcombine.high %v8516_v4, %v8520_v33  ;;  %s15929_s9 = scalar_lea.hbm %s15976_s3, %s10505_s29 }
 0x5ec   : > { %v9281_v56 = vpop.permute.xlu1 %9280 }
 0x5ed   : > { %8973 = vmatprep.subr.bf16.mxu1 %v10441_v20  ;;  %v9344_v48 = vsel %vm253_vm1, %v9338_v59, %v9339_v46  ;;  %v9346_v62 = vsel %vm253_vm1, %v9339_v46, %v9340_v3  ;;  %v9292_v10 = vrot.slane %v9281_v56, 4 }
 0x5ee   : > { %9380 = vrot.lane.b32.xlu1 %v15572_v11, %s10853_s23  ;;  %9378 = vrot.lane.b32.xlu0 %v15575_v57, %s10853_s23  ;;  %v9333_v22 = vpop.permute.xlu0 %9332  ;;  %v9345_v57 = vsel %vm5052_vm6, %v9327_v50, %v9344_v48  ;;  %v9347_v34 = vsel %vm5052_vm6, %v9329_v35, %v9346_v62 }
 0x5ef   : > { %8935 = vmatmul.mubr.bf16.vlgmr.msra.gmra.mxu0 %v10404_v30  ;;  %8974 = vmatpush2.bf16.msra.mxu1 %v10440_v14  ;;  %v9341_v27 = vrot.slane %v9333_v22, 4 }
 0x5f0   : > { %v9285_v19 = vpop.permute.xlu1 %9284  ;;  %10498 = vmatprep.mubr.msk.bf16.mxu0 %vm969_vm0, %v10453_v2 }
 0x5f1   : > { %v9348_v11 = vsel %vm253_vm1, %v9341_v27, %v9342_v53  ;;  %v9294_v23 = vrot.slane %v9285_v19, 4 }
 0x5f2   : > { %9382 = vrot.lane.b32.xlu0 %v9365_v55, %s10853_s23  ;;  %8976 = vmatmul.mubr.bf16.vlgmr.msra.gmra.mxu1 %v10404_v30  ;;  %v9349_v37 = vsel %vm5052_vm6, %v9333_v22, %v9348_v11  ;;  %v9337_v42 = vpop.permute.xlu0 %9336  ;;  %s10727_s23 = scalar_lea.vmem %s10726_s21, 1024 }
 0x5f3   : > { %10499 = vmatprep.mubr.msk.bf16.mxu1 %vm969_vm0, %v10453_v2  ;;  %v10482_v49 = vcombine.low %v9345_v57, %v9349_v37  ;;  %v10483_v18 = vcombine.high %v9345_v57, %v9349_v37  ;;  %v9343_v58 = vrot.slane %v9337_v42, 4  ;;  %vm16777_vm0 = vcmask 965632   ;;  %p10729_p2 = scmp.lt.s32.totalorder %s10727_s23, %s10721_s10 }
 0x5f4   : > { %v9289_v21 = vpop.permute.xlu1 %9288  ;;  %vm16778_vm14 = vmmov %vm16777_vm0 }
 0x5f5   : > { %v9350_v24 = vsel %vm253_vm1, %v9342_v53, %v9343_v58  ;;  %9779 = vmatprep.subr.bf16.mxu0 %v10483_v18  ;;  %v9296_v41 = vrot.slane %v9289_v21, 4  ;;  %vm16780_vm2 = vmmov %vm16777_vm0  ;;  %p10730_p13 = por %p10729_p2, %p10728_p10 }
 0x5f6   : > { %9780 = vmatpush1.bf16.msra.mxu0 %v10482_v49  ;;  %v9283_v40 = vpop.permute.xlu0 %9282  ;;  %v9351_v28 = vsel %vm5052_vm6, %v9335_v9, %v9350_v24  ;;  %vm16779_vm6 = vmmov %vm16777_vm0 }
 0x5f7   : > { %v9293_v16 = vrot.slane %v9283_v40, 4  ;;  %v10484_v39 = vcombine.low %v9347_v34, %v9351_v28  ;;  %v10485_v12 = vcombine.high %v9347_v34, %v9351_v28  ;;  %p10731_p0 = pnand %p10730_p13, %p10724_p12 }
 0x5f8   : > { %v9235_v6 = vpop.permute.xlu1 %9234 }
 0x5f9   : > { %9820 = vmatprep.subr.bf16.mxu1 %v10485_v12  ;;  %v9298_v7 = vsel %vm253_vm1, %v9292_v10, %v9293_v16  ;;  %v9300_v32 = vsel %vm253_vm1, %v9293_v16, %v9294_v23  ;;  %v9246_v63 = vrot.slane %v9235_v6, 4 }
 0x5fa   : > { %9821 = vmatpush1.bf16.msra.mxu1 %v10484_v39  ;;  %v9287_v50 = vpop.permute.xlu0 %9286  ;;  %v9299_v29 = vsel %vm16777_vm0, %v9281_v56, %v9298_v7  ;;  %v9301_v54 = vsel %vm16779_vm6, %v9283_v40, %v9300_v32  ;;  %vm16792_vm0 = vmmov %vm16791_vm8  ;;  %vm9437_vm6 = vcmask 941056  }
 0x5fb   : > { %v9295_v38 = vrot.slane %v9287_v50, 4 }
 0x5fc   : > { %v9239_v36 = vpop.permute.xlu1 %9238 }
 0x5fd   : > { %v9302_v25 = vsel %vm253_vm1, %v9295_v38, %v9296_v41  ;;  %v9248_v33 = vrot.slane %v9239_v36, 4 }
 0x5fe   : > { %v9303_v1 = vsel %vm16778_vm14, %v9287_v50, %v9302_v25  ;;  %v9291_v47 = vpop.permute.xlu0 %9290  ;;  %vm9484_vm14 = vcmask 932864  }
 0x5ff   : > { %v10478_v13 = vcombine.low %v9299_v29, %v9303_v1  ;;  %v10479_v60 = vcombine.high %v9299_v29, %v9303_v1  ;;  %v9297_v52 = vrot.slane %v9291_v47, 4 }
 0x600   : > { %v9243_v0 = vpop.permute.xlu1 %9242 }
 0x601   : > { %v9304_v31 = vsel %vm253_vm1, %v9296_v41, %v9297_v52  ;;  %9781 = vmatprep.subr.bf16.mxu0 %v10479_v60  ;;  %v9250_v30 = vrot.slane %v9243_v0, 4 }
 0x602   : > { %9782 = vmatpush1.bf16.msra.mxu0 %v10478_v13  ;;  %v9237_v61 = vpop.permute.xlu0 %9236  ;;  %v9305_v9 = vsel %vm16780_vm2, %v9289_v21, %v9304_v31  ;;  %vm16793_vm2 = vcmask 949248  }
 0x603   : > { %v9247_v17 = vrot.slane %v9237_v61, 4  ;;  %v10480_v45 = vcombine.low %v9301_v54, %v9305_v9  ;;  %v10481_v5 = vcombine.high %v9301_v54, %v9305_v9 }
 0x604   : > { %v9189_v26 = vpop.permute.xlu1 %9188 }
 0x605   : > { %9822 = vmatprep.subr.bf16.mxu1 %v10481_v5  ;;  %v9252_v56 = vsel %vm253_vm1, %v9246_v63, %v9247_v17  ;;  %v9254_v22 = vsel %vm253_vm1, %v9247_v17, %v9248_v33  ;;  %v9200_v42 = vrot.slane %v9189_v26, 4 }
 0x606   : > { %9823 = vmatpush1.bf16.msra.mxu1 %v10480_v45  ;;  %v9241_v4 = vpop.permute.xlu0 %9240  ;;  %v9253_v14 = vsel %vm631_vm10, %v9235_v6, %v9252_v56  ;;  %v9255_v2 = vsel %vm631_vm10, %v9237_v61, %v9254_v22 }
 0x607   : > { %v9249_v59 = vrot.slane %v9241_v4, 4 }
 0x608   : > { %v9193_v35 = vpop.permute.xlu1 %9192 }
 0x609   : > { %v9256_v46 = vsel %vm253_vm1, %v9249_v59, %v9250_v30  ;;  %v9202_v34 = vrot.slane %v9193_v35, 4 }
 0x60a   : > { %v9257_v20 = vsel %vm631_vm10, %v9241_v4, %v9256_v46  ;;  %v9245_v53 = vpop.permute.xlu0 %9244 }
 0x60b   : > { %v10474_v19 = vcombine.low %v9253_v14, %v9257_v20  ;;  %v10475_v3 = vcombine.high %v9253_v14, %v9257_v20  ;;  %v9251_v48 = vrot.slane %v9245_v53, 4 }
 0x60c   : > { %v9197_v55 = vpop.permute.xlu1 %9196 }
 0x60d   : > { %v9258_v27 = vsel %vm253_vm1, %v9250_v30, %v9251_v48  ;;  %9783 = vmatprep.subr.bf16.mxu0 %v10475_v3  ;;  %v9204_v18 = vrot.slane %v9197_v55, 4 }
 0x60e   : > { %9784 = vmatpush1.bf16.msra.mxu0 %v10474_v19  ;;  %v9191_v11 = vpop.permute.xlu0 %9190  ;;  %v9259_v57 = vsel %vm631_vm10, %v9243_v0, %v9258_v27 }
 0x60f   : > { %v9201_v21 = vrot.slane %v9191_v11, 4  ;;  %v10476_v62 = vcombine.low %v9255_v2, %v9259_v57  ;;  %v10477_v49 = vcombine.high %v9255_v2, %v9259_v57 }
 0x610   : > { %v9143_v37 = vpop.permute.xlu1 %9142 }
 0x611   : > { %9824 = vmatprep.subr.bf16.mxu1 %v10477_v49  ;;  %v9206_v40 = vsel %vm253_vm1, %v9200_v42, %v9201_v21  ;;  %v9208_v41 = vsel %vm253_vm1, %v9201_v21, %v9202_v34  ;;  %v9154_v47 = vrot.slane %v9143_v37, 4 }
 0x612   : > { %9825 = vmatpush1.bf16.msra.mxu1 %v10476_v62  ;;  %v9195_v58 = vpop.permute.xlu0 %9194  ;;  %v9207_v10 = vsel %vm584_vm11, %v9189_v26, %v9206_v40  ;;  %v9209_v38 = vsel %vm584_vm11, %v9191_v11, %v9208_v41 }
 0x613   : > { %v9203_v28 = vrot.slane %v9195_v58, 4 }
 0x614   : > { %v9147_v24 = vpop.permute.xlu1 %9146 }
 0x615   : > { %v9210_v6 = vsel %vm253_vm1, %v9203_v28, %v9204_v18  ;;  %v9156_v54 = vrot.slane %v9147_v24, 4 }
 0x616   : > { %v9211_v16 = vsel %vm584_vm11, %v9195_v58, %v9210_v6  ;;  %v9199_v39 = vpop.permute.xlu0 %9198 }
 0x617   : > { %v10470_v50 = vcombine.low %v9207_v10, %v9211_v16  ;;  %v10471_v36 = vcombine.high %v9207_v10, %v9211_v16  ;;  %v9205_v23 = vrot.slane %v9199_v39, 4 }
 0x618   : > { %v9151_v12 = vpop.permute.xlu1 %9150 }
 0x619   : > { %v9212_v7 = vsel %vm253_vm1, %v9204_v18, %v9205_v23  ;;  %9785 = vmatprep.subr.bf16.mxu0 %v10471_v36  ;;  %v9158_v60 = vrot.slane %v9151_v12, 4 }
 0x61a   : > { %9786 = vmatpush1.bf16.msra.mxu0 %v10470_v50  ;;  %v9145_v25 = vpop.permute.xlu0 %9144  ;;  %v9213_v29 = vsel %vm584_vm11, %v9197_v55, %v9212_v7 }
 0x61b   : > { %v9155_v0 = vrot.slane %v9145_v25, 4  ;;  %v10472_v32 = vcombine.low %v9209_v38, %v9213_v29  ;;  %v10473_v13 = vcombine.high %v9209_v38, %v9213_v29 }
 0x61c   : > { %v9097_v1 = vpop.permute.xlu1 %9096 }
 0x61d   : > { %9826 = vmatprep.subr.bf16.mxu1 %v10473_v13  ;;  %v9160_v61 = vsel %vm253_vm1, %v9154_v47, %v9155_v0  ;;  %v9162_v30 = vsel %vm253_vm1, %v9155_v0, %v9156_v54  ;;  %v9108_v53 = vrot.slane %v9097_v1, 4 }
 0x61e   : > { %9827 = vmatpush1.bf16.msra.mxu1 %v10472_v32  ;;  %v9149_v52 = vpop.permute.xlu0 %9148  ;;  %v9161_v63 = vsel %vm537_vm3, %v9143_v37, %v9160_v61  ;;  %v9163_v59 = vsel %vm537_vm3, %v9145_v25, %v9162_v30 }
 0x61f   : > { %v9157_v9 = vrot.slane %v9149_v52, 4 }
 0x620   : > { %v9101_v31 = vpop.permute.xlu1 %9100 }
 0x621   : > { %v9164_v26 = vsel %vm253_vm1, %v9157_v9, %v9158_v60  ;;  %v9110_v57 = vrot.slane %v9101_v31, 4 }
 0x622   : > { %v9165_v17 = vsel %vm537_vm3, %v9149_v52, %v9164_v26  ;;  %v9153_v45 = vpop.permute.xlu0 %9152 }
 0x623   : > { %v10466_v4 = vcombine.low %v9161_v63, %v9165_v17  ;;  %v10467_v35 = vcombine.high %v9161_v63, %v9165_v17  ;;  %v9159_v33 = vrot.slane %v9153_v45, 4 }
 0x624   : > { %v9105_v5 = vpop.permute.xlu1 %9104 }
 0x625   : > { %v9166_v56 = vsel %vm253_vm1, %v9158_v60, %v9159_v33  ;;  %9787 = vmatprep.subr.bf16.mxu0 %v10467_v35  ;;  %v9112_v48 = vrot.slane %v9105_v5, 4 }
 0x626   : > { %9788 = vmatpush1.bf16.msra.mxu0 %v10466_v4  ;;  %v9099_v46 = vpop.permute.xlu0 %9098  ;;  %v9167_v14 = vsel %vm537_vm3, %v9151_v12, %v9166_v56  ;;  %vm16781_vm3 = vcmask 998400  }
 0x627   : > { %v9109_v55 = vrot.slane %v9099_v46, 4  ;;  %v10468_v22 = vcombine.low %v9163_v59, %v9167_v14  ;;  %v10469_v19 = vcombine.high %v9163_v59, %v9167_v14  ;;  %vm16782_vm10 = vmmov %vm16781_vm3 }
 0x628   : > { %v9051_v20 = vpop.permute.xlu1 %9050  ;;  %vm16783_vm11 = vmmov %vm16781_vm3 }
 0x629   : > { %9828 = vmatprep.subr.bf16.mxu1 %v10469_v19  ;;  %v9114_v37 = vsel %vm253_vm1, %v9108_v53, %v9109_v55  ;;  %v9116_v6 = vsel %vm253_vm1, %v9109_v55, %v9110_v57  ;;  %vm16784_vm4 = vmmov %vm16781_vm3  ;;  %v9062_v25 = vrot.slane %v9051_v20, 4 }
 0x62a   : > { %9829 = vmatpush1.bf16.msra.mxu1 %v10468_v22  ;;  %v9103_v2 = vpop.permute.xlu0 %9102  ;;  %v9115_v24 = vsel %vm16781_vm3, %v9097_v1, %v9114_v37  ;;  %v9117_v23 = vsel %vm16783_vm11, %v9099_v46, %v9116_v6  ;;  %vm16794_vm3 = vmmov %vm16793_vm2 }
 0x62b   : > { %v8059_v3 = vpop.f32.mrf.mxu0  ;;  %v9111_v42 = vrot.slane %v9103_v2, 4  ;;  %vm16796_vm11 = vmmov %vm16793_vm2 }
 0x62c   : > { %v15856_v27 = vadd.f32 %v8059_v3, %v15683_v44  ;;  %v9055_v11 = vpop.permute.xlu1 %9054 }
 0x62d   : > { %v8061_v21 = vpop.f32.mrf.mxu0  ;;  %v9118_v49 = vsel %vm253_vm1, %v9111_v42, %v9112_v48  ;;  %v9064_v60 = vrot.slane %v9055_v11, 4 }
 0x62e   : > { %v15860_v62 = vadd.f32 %v8061_v21, %v15690_v8  ;;  %v9119_v44 = vsel %vm16782_vm10, %v9103_v2, %v9118_v49  ;;  %v9107_v40 = vpop.permute.xlu0 %9106  ;;  %vm16795_vm10 = vmmov %vm16793_vm2 }
 0x62f   : > { %v8100_v18 = vpop.f32.mrf.mxu1  ;;  %v8063_v58 = vpop.f32.mrf.mxu0  ;;  %v10462_v10 = vcombine.low %v9115_v24, %v9119_v44  ;;  %v10463_v16 = vcombine.high %v9115_v24, %v9119_v44  ;;  %v9113_v39 = vrot.slane %v9107_v40, 4 }
 0x630   : > { %v15866_v34 = vadd.f32 %v8100_v18, %v15698_v51  ;;  %v9059_v28 = vpop.permute.xlu1 %9058 }
 0x631   : > { %v8102_v8 = vpop.f32.mrf.mxu1  ;;  %v8064_v12 = vpop.f32.mrf.mxu0  ;;  %v9120_v50 = vsel %vm253_vm1, %v9112_v48, %v9113_v39  ;;  %9789 = vmatprep.subr.bf16.mxu0 %v10463_v16  ;;  %v9066_v32 = vrot.slane %v9059_v28, 4 }
 0x632   : > { %v15870_v41 = vadd.f32 %v8102_v8, %v15702_v15  ;;  %9790 = vmatpush1.bf16.msra.mxu0 %v10462_v10  ;;  %v9053_v51 = vpop.permute.xlu0 %9052  ;;  %v9121_v7 = vsel %vm16784_vm4, %v9105_v5, %v9120_v50 }
 0x633   : > { %v8104_v36 = vpop.f32.mrf.mxu1  ;;  %v9063_v29 = vrot.slane %v9053_v51, 4  ;;  %v10464_v1 = vcombine.low %v9117_v23, %v9121_v7  ;;  %v10465_v47 = vcombine.high %v9117_v23, %v9121_v7 }
 0x634   : > { %v9005_v38 = vpop.permute.xlu1 %9004 }
 0x635   : > { %v8105_v0 = vpop.f32.mrf.mxu1  ;;  %9830 = vmatprep.subr.bf16.mxu1 %v10465_v47  ;;  %v9068_v52 = vsel %vm253_vm1, %v9062_v25, %v9063_v29  ;;  %v9070_v17 = vsel %vm253_vm1, %v9063_v29, %v9064_v60  ;;  %v9016_v46 = vrot.slane %v9005_v38, 4 }
 0x636   : > { %9831 = vmatpush1.bf16.msra.mxu1 %v10464_v1  ;;  %v9057_v15 = vpop.permute.xlu0 %9056  ;;  %v9069_v61 = vsel %vm16785_vm5, %v9051_v20, %v9068_v52  ;;  %v9071_v35 = vsel %vm16787_vm9, %v9053_v51, %v9070_v17 }
 0x637   : > { %v9065_v31 = vrot.slane %v9057_v15, 4 }
 0x638   : > { %v9009_v13 = vpop.permute.xlu1 %9008 }
 0x639   : > { %v9072_v54 = vsel %vm253_vm1, %v9065_v31, %v9066_v32  ;;  %v9018_v3 = vrot.slane %v9009_v13, 4 }
 0x63a   : > { %v9073_v9 = vsel %vm16786_vm7, %v9057_v15, %v9072_v54  ;;  %v9061_v26 = vpop.permute.xlu0 %9060 }
 0x63b   : > { %v10458_v45 = vcombine.low %v9069_v61, %v9073_v9  ;;  %v10459_v5 = vcombine.high %v9069_v61, %v9073_v9  ;;  %v9067_v30 = vrot.slane %v9061_v26, 4 }
 0x63c   : > { %v9013_v63 = vpop.permute.xlu1 %9012 }
 0x63d   : > { %v9074_v4 = vsel %vm253_vm1, %v9066_v32, %v9067_v30  ;;  %9791 = vmatprep.subr.bf16.mxu0 %v10459_v5  ;;  %v9020_v55 = vrot.slane %v9013_v63, 4 }
 0x63e   : > { %9792 = vmatpush1.bf16.msra.mxu0 %v10458_v45  ;;  %v9007_v33 = vpop.permute.xlu0 %9006  ;;  %v9075_v56 = vsel %vm16788_vm12, %v9059_v28, %v9074_v4 }
 0x63f   : > { %v9017_v14 = vrot.slane %v9007_v33, 4  ;;  %v10460_v20 = vcombine.low %v9071_v35, %v9075_v56  ;;  %v10461_v53 = vcombine.high %v9071_v35, %v9075_v56 }
 0x640   : > { %v9466_v59 = vpop.permute.xlu1 %9465 }
 0x641   : > { %9832 = vmatprep.subr.bf16.mxu1 %v10461_v53  ;;  %v9022_v48 = vsel %vm253_vm1, %v9016_v46, %v9017_v14  ;;  %v9024_v49 = vsel %vm253_vm1, %v9017_v14, %v9018_v3  ;;  %v9477_v16 = vrot.slane %v9466_v59, 4 }
 0x642   : > { %9833 = vmatpush1.bf16.msra.mxu1 %v10460_v20  ;;  %v9011_v22 = vpop.permute.xlu0 %9010  ;;  %v9023_v57 = vsel %vm16789_vm15, %v9005_v38, %v9022_v48  ;;  %v9025_v40 = vsel %vm16791_vm8, %v9007_v33, %v9024_v49 }
 0x643   : > { %v9019_v2 = vrot.slane %v9011_v22, 4 }
 0x644   : > { %v9470_v19 = vpop.permute.xlu1 %9469 }
 0x645   : > { %v9026_v11 = vsel %vm253_vm1, %v9019_v2, %v9020_v55  ;;  %v9479_v51 = vrot.slane %v9470_v19, 4 }
 0x646   : > { %v9027_v37 = vsel %vm16790_vm13, %v9011_v22, %v9026_v11  ;;  %v9015_v42 = vpop.permute.xlu0 %9014 }
 0x647   : > { %v10454_v18 = vcombine.low %v9023_v57, %v9027_v37  ;;  %v10455_v58 = vcombine.high %v9023_v57, %v9027_v37  ;;  %v9021_v24 = vrot.slane %v9015_v42, 4 }
 0x648   : > { %v9474_v21 = vpop.permute.xlu1 %9473 }
 0x649   : > { %v9028_v44 = vsel %vm253_vm1, %v9020_v55, %v9021_v24  ;;  %9793 = vmatprep.subr.bf16.mxu0 %v10455_v58  ;;  %v9481_v50 = vrot.slane %v9474_v21, 4 }
 0x64a   : > { %9794 = vmatpush1.bf16.msra.mxu0 %v10454_v18  ;;  %v9468_v28 = vpop.permute.xlu0 %9467  ;;  %v9029_v6 = vsel %vm16792_vm0, %v9013_v63, %v9028_v44 }
 0x64b   : > { %v9478_v39 = vrot.slane %v9468_v28, 4  ;;  %v10456_v8 = vcombine.low %v9025_v40, %v9029_v6  ;;  %v10457_v12 = vcombine.high %v9025_v40, %v9029_v6 }
 0x64c   : > { %v9419_v10 = vpop.permute.xlu1 %9418 }
 0x64d   : > { %9834 = vmatprep.subr.bf16.mxu1 %v10457_v12  ;;  %v9483_v7 = vsel %vm253_vm1, %v9477_v16, %v9478_v39  ;;  %v9486_v32 = vsel %vm253_vm1, %v9478_v39, %v9479_v51  ;;  %v9430_v26 = vrot.slane %v9419_v10, 4 }
 0x64e   : > { %9835 = vmatpush1.bf16.msra.mxu1 %v10456_v8  ;;  %v9472_v36 = vpop.permute.xlu0 %9471  ;;  %v9485_v29 = vsel %vm9484_vm14, %v9466_v59, %v9483_v7  ;;  %v9487_v31 = vsel %vm9484_vm14, %v9468_v28, %v9486_v32 }
 0x64f   : > { %v9480_v38 = vrot.slane %v9472_v36, 4 }
 0x650   : > { %v9423_v23 = vpop.permute.xlu1 %9422 }
 0x651   : > { %v9488_v25 = vsel %vm253_vm1, %v9480_v38, %v9481_v50  ;;  %v9432_v4 = vrot.slane %v9423_v23, 4  ;;  %v10452_v23 = vcombine.low %v15808_v43, %v15808_v43 }
 0x652   : > { %v9489_v1 = vsel %vm9484_vm14, %v9472_v36, %v9488_v25  ;;  %v9476_v47 = vpop.permute.xlu0 %9475 }
 0x653   : > { %v10494_v15 = vcombine.low %v9485_v29, %v9489_v1  ;;  %v10495_v13 = vcombine.high %v9485_v29, %v9489_v1  ;;  %v9482_v60 = vrot.slane %v9476_v47, 4 }
 0x654   : > { %v9427_v0 = vpop.permute.xlu1 %9426 }
 0x655   : > { %v9490_v52 = vsel %vm253_vm1, %v9481_v50, %v9482_v60  ;;  %9805 = vmatprep.subr.bf16.mxu0 %v10495_v13  ;;  %v9434_v5 = vrot.slane %v9427_v0, 4 }
 0x656   : > { %9806 = vmatpush2.bf16.msra.mxu0 %v10494_v15  ;;  %v9421_v54 = vpop.permute.xlu0 %9420  ;;  %v9491_v61 = vsel %vm9484_vm14, %v9474_v21, %v9490_v52 }
 0x657   : > { %v9431_v63 = vrot.slane %v9421_v54, 4  ;;  %v10496_v17 = vcombine.low %v9487_v31, %v9491_v61  ;;  %v10497_v45 = vcombine.high %v9487_v31, %v9491_v61 }
 0x658   : > { %v9373_v9 = vpop.permute.xlu1 %9372 }
 0x659   : > { %9846 = vmatprep.subr.bf16.mxu1 %v10497_v45  ;;  %v9436_v35 = vsel %vm253_vm1, %v9430_v26, %v9431_v63  ;;  %v9439_v53 = vsel %vm253_vm1, %v9431_v63, %v9432_v4  ;;  %v9384_v37 = vrot.slane %v9373_v9, 4 }
 0x65a   : > { %9847 = vmatpush2.bf16.msra.mxu1 %v10496_v17  ;;  %v9425_v30 = vpop.permute.xlu0 %9424  ;;  %v9438_v46 = vsel %vm9437_vm6, %v9419_v10, %v9436_v35  ;;  %v9440_v48 = vsel %vm9437_vm6, %v9421_v54, %v9439_v53 }
 0x65b   : > { %v9433_v33 = vrot.slane %v9425_v30, 4 }
 0x65c   : > { %v9377_v56 = vpop.permute.xlu1 %9376 }
 0x65d   : > { %v9441_v59 = vsel %vm253_vm1, %v9433_v33, %v9434_v5  ;;  %v9386_v24 = vrot.slane %v9377_v56, 4 }
 0x65e   : > { %v9442_v14 = vsel %vm9437_vm6, %v9425_v30, %v9441_v59  ;;  %v9429_v20 = vpop.permute.xlu0 %9428 }
 0x65f   : > { %v10490_v55 = vcombine.low %v9438_v46, %v9442_v14  ;;  %v10491_v22 = vcombine.high %v9438_v46, %v9442_v14  ;;  %v9435_v19 = vrot.slane %v9429_v20, 4 }
 0x660   : > { %v9381_v57 = vpop.permute.xlu1 %9380 }
 0x661   : > { %v9443_v3 = vsel %vm253_vm1, %v9434_v5, %v9435_v19  ;;  %9807 = vmatprep.subr.bf16.mxu0 %v10491_v22  ;;  %v9388_v18 = vrot.slane %v9381_v57, 4 }
 0x662   : > { %9808 = vmatpush2.bf16.msra.mxu0 %v10490_v55  ;;  %v9375_v2 = vpop.permute.xlu0 %9374  ;;  %v9444_v11 = vsel %vm9437_vm6, %v9427_v0, %v9443_v3 }
 0x663   : > { %v9385_v42 = vrot.slane %v9375_v2, 4  ;;  %v10492_v21 = vcombine.low %v9440_v48, %v9444_v11  ;;  %v10493_v49 = vcombine.high %v9440_v48, %v9444_v11 }
 0x665   : > { %9848 = vmatprep.subr.bf16.mxu1 %v10493_v49  ;;  %v9390_v44 = vsel %vm253_vm1, %v9384_v37, %v9385_v42  ;;  %v9392_v39 = vsel %vm253_vm1, %v9385_v42, %v9386_v24 }
 0x666   : > { %9849 = vmatpush2.bf16.msra.mxu1 %v10492_v21  ;;  %v9379_v58 = vpop.permute.xlu0 %9378  ;;  %v9391_v6 = vsel %vm16793_vm2, %v9373_v9, %v9390_v44  ;;  %v9393_v51 = vsel %vm16795_vm10, %v9375_v2, %v9392_v39 }
 0x667   : > { %v9387_v40 = vrot.slane %v9379_v58, 4 }
 0x669   : > { %v9394_v28 = vsel %vm253_vm1, %v9387_v40, %v9388_v18 }
 0x66a   : > { %v9395_v10 = vsel %vm16794_vm3, %v9379_v58, %v9394_v28  ;;  %v9383_v16 = vpop.permute.xlu0 %9382 }
 0x66b   : > { %v10486_v8 = vcombine.low %v9391_v6, %v9395_v10  ;;  %v10487_v12 = vcombine.high %v9391_v6, %v9395_v10  ;;  %v9389_v50 = vrot.slane %v9383_v16, 4 }
 0x66d   : > { %v9396_v36 = vsel %vm253_vm1, %v9388_v18, %v9389_v50  ;;  %9809 = vmatprep.subr.bf16.mxu0 %v10487_v12 }
 0x66e   : > { %9810 = vmatpush2.bf16.msra.mxu0 %v10486_v8  ;;  %v9397_v7 = vsel %vm16796_vm11, %v9381_v57, %v9396_v36 }
 0x66f   : > { %v10488_v38 = vcombine.low %v9393_v51, %v9397_v7  ;;  %v10489_v25 = vcombine.high %v9393_v51, %v9397_v7 }
 0x671   : > { %9812 = vmatmul.mubr.bf16.vlgmr.msra.gmra.mxu0 %v10452_v23  ;;  %9850 = vmatprep.subr.bf16.mxu1 %v10489_v25 }
 0x672   : > { %9851 = vmatpush2.bf16.msra.mxu1 %v10488_v38 }
 0x675   : > { %9853 = vmatmul.mubr.bf16.vlgmr.msra.gmra.mxu1 %v10452_v23 }
 0x6af   : > { %v8936_v29 = vpop.f32.mrf.mxu0 }
 0x6b0   : > { %v8984_v1 = vadd.f32 %v8936_v29, %v15856_v27 }
 0x6b1   : > { %v8938_v47 = vpop.f32.mrf.mxu0 }
 0x6b2   : > { %v8985_v0 = vadd.f32 %v8938_v47, %v15860_v62  ;;  %v8977_v43 = vpop.f32.mrf.mxu1 }
 0x6b3   : > { %v8940_v32 = vpop.f32.mrf.mxu0  ;;  %v8986_v15 = vadd.f32 %v8977_v43, %v15866_v34 }
 0x6b4   : > { %v8979_v13 = vpop.f32.mrf.mxu1 }
 0x6b5   : > { %v8941_v60 = vpop.f32.mrf.mxu0  ;;  %v8987_v52 = vadd.f32 %v8979_v13, %v15870_v41 }
 0x6b6   : > { %v8981_v31 = vpop.f32.mrf.mxu1 }
 0x6b8   : > { %v8982_v54 = vpop.f32.mrf.mxu1 }
 0x731   : > { %v9813_v61 = vpop.f32.mrf.mxu0 }
 0x732   : > { %v9861_v9 = vadd.f32 %v9813_v61, %v8984_v1 }
 0x733   : > { %v9815_v27 = vpop.f32.mrf.mxu0 }
 0x734   : > { %9865 = vst [vmem:[%s11153_s27] sm:$0xff] %v9861_v9  ;;  %v9862_v62 = vadd.f32 %v9815_v27, %v8985_v0 }
 0x735   : > { %v9817_v26 = vpop.f32.mrf.mxu0  ;;  %v9854_v63 = vpop.f32.mrf.mxu1 }
 0x736   : > { %9866 = vst [vmem:[%s11153_s27 + $0x8] sm:$0xff] %v9862_v62  ;;  %v9863_v34 = vadd.f32 %v9854_v63, %v8986_v15 }
 0x737   : > { %v9818_v17 = vpop.f32.mrf.mxu0  ;;  %v9856_v45 = vpop.f32.mrf.mxu1 }
 0x738   : > { %9867 = vst [vmem:[%s11153_s27 + $0x10] sm:$0xff] %v9863_v34  ;;  %v9864_v41 = vadd.f32 %v9856_v45, %v8987_v52 }
 0x739   : > { %v9858_v5 = vpop.f32.mrf.mxu1 }
 0x73a   : > { %9868 = vst [vmem:[%s11153_s27 + $0x18] sm:$0xff] %v9864_v41 }
 0x73b   : > { %v9859_v30 = vpop.f32.mrf.mxu1 }
 0x73c   : > { %10734 = shalt.err (!%p10731_p0)
}
 0x73d   : > { %s10735_s27 = scalar_lea.hbm %s15929_s9, 512  ;;  %s10739_s11 = scalar_lea.hbm %s15976_s3, 1024 }
 0x73e   : > { %p10736_p5 = scmp.ne.s32.totalorder %s15929_s9, %s10735_s27  ;;  %p10740_p4 = scmp.lt.s32.totalorder %s15929_s9, %s15976_s3 }
 0x73f   : > { %p10741_p6 = scmp.lt.s32.totalorder %s10739_s11, %s10735_s27 }
 0x740   : > { %p10737_p9 = pnand %p10736_p5, %p16797_p11 }
 0x741   : > { %p10742_p8 = por %p10741_p6, %p10740_p4 }
 0x742   : > { %p10738_p1 = pneg %p10737_p9 }
 0x744   : > { %p10743_p3 = pnand %p10742_p8, %p10738_p1 }
 0x746   : > { %10746 = shalt.err (!%p10743_p3)
}
 0x747   : > { %10515 = dma.vmem_to_hbm [thread:$0]  (%p16797_p11), %s15931_s4, 512, %s15929_s9, %s9870_s16  }
 0x748 PF: > { %s9896_s18 = sand.u32 1, %s10777_s12   ;;  %p16798_p7 = scmp.ne.s32.totalorder %s16181_s19, 0 }
 0x749   : > { %p16799_p12 = scmp.ge.s32.totalorder %s10789_s15, 2  ;;  %s9897_s30 = scalar_lea.sflag [#allocation5], %s9896_s18 }
 0x74b   : > { %p10526_p10 = pnand %p16799_p12, %p16798_p7 }
 0x74d   : > { %p10527_p2 = pneg %p10526_p10 }
 0x74f   : > { %10772 = dma.done.wait (%p10527_p2), %s9897_s30, 512  }
 0x750   : > { %10774 = vsyncadd (%p10527_p2), %s9897_s30, 4294966784  ;;  %p17_p13 = scmp.ge.s32.totalorder %s10939_s24, 4   ;;  %s16800_s12 = smov %s10781_s13 }
 0x751   : > { %s16801_s13 = smov %s10785_s14  ;;  %s16802_s14 = smov %s10956_s5 }
 0x752   : > { %s16803_s15 = smov %s10939_s24  ;;  %19 = sbr.rel (!%p17_p13) target bundleno = 6 (0x6), region = 91 }
 0x757   :  { %9902 = vsyncpa [#allocation4], 1 }
 0x758   :  { %9904 = vsyncpa [#allocation4 + $0x1], 1 }
 0x759   :  { %9905 = vsyncpa [#allocation7], 1 }
 0x75a   :  { %9906 = vsyncpa [#allocation5], 1 }
 0x75b   :  { %9908 = vsyncpa [#allocation5 + $0x1], 1 }

</bundles_post_ra>
